<compile_context>
chip_gen: v7x
topology: tpu7x:2x2x1
jax: 0.10.0
libtpu: 0.0.40
codegen_flags: <defaults>
</compile_context>

<pallas_src>
import math
import functools

import jax
import jax.numpy as jnp
from jax.experimental import pallas as pl
from jax.experimental.pallas import tpu as pltpu


# ---------------------------------------------------------------------------
# In-kernel helpers
# ---------------------------------------------------------------------------
def _layer_norm(x, gamma, beta, eps=1e-5):
    mean = jnp.mean(x, axis=-1, keepdims=True)
    cen = x - mean
    var = jnp.mean(cen * cen, axis=-1, keepdims=True)
    return cen * jax.lax.rsqrt(var + eps) * gamma + beta


# ---------------------------------------------------------------------------
# Fused kernel: input projection + all encoder layers, B_BLOCK rows per step
# ---------------------------------------------------------------------------
def _encoder_kernel(inp_ref, emb_ref, w_inp_ref,
                    w_in_ref, b_in_ref, w_out_ref,
                    wf1_ref, bf1_ref, wf2_ref, vec_ref,
                    out_ref, *, n_head, n_layers):
    Bb, T, C = inp_ref.shape
    D = emb_ref.shape[-1]
    H = n_head
    Dh = D // H
    N = Bb * T

    # ----- fused input projection: one tiny MXU matmul (K = 2 + feature_dim)
    inp = inp_ref[...].reshape(N, C)                            # (N, Ci+F) f32
    x = (jnp.dot(inp, w_inp_ref[...], preferred_element_type=jnp.float32)
         + emb_ref[...].reshape(N, D))                          # (N, D) f32

    # ----- n_layers post-norm encoder layers, unrolled ----------------------
    for l in range(n_layers):
        xb = x.astype(jnp.bfloat16)
        attn = vec_ref[l, 0]                                    # (1, D) = bo
        for h in range(H):
            # per-head projections on whole arrays (no lane slicing);
            # 1/sqrt(Dh) is folded into the Q weights/bias at pack time.
            q = (jnp.dot(xb, w_in_ref[l, h],
                         preferred_element_type=jnp.float32) + b_in_ref[l, h])
            k = (jnp.dot(xb, w_in_ref[l, H + h],
                         preferred_element_type=jnp.float32) + b_in_ref[l, H + h])
            v = (jnp.dot(xb, w_in_ref[l, 2 * H + h],
                         preferred_element_type=jnp.float32) + b_in_ref[l, 2 * H + h])
            q3 = q.reshape(Bb, T, Dh).astype(jnp.bfloat16)
            k3 = k.reshape(Bb, T, Dh).astype(jnp.bfloat16)
            v3 = v.reshape(Bb, T, Dh).astype(jnp.bfloat16)

            s = jnp.einsum("bqe,bke->bqk", q3, k3,
                           preferred_element_type=jnp.float32)  # (Bb, T, T)
            s = s - jnp.max(s, axis=-1, keepdims=True)
            p = jnp.exp(s)
            p = p / jnp.sum(p, axis=-1, keepdims=True)          # exact recip
            ctx = jnp.einsum("bqk,bke->bqe", p.astype(jnp.bfloat16), v3,
                             preferred_element_type=jnp.float32)  # (Bb, T, Dh)

            # contract head directly against its W_out rows (no head concat)
            attn = attn + jnp.dot(ctx.reshape(N, Dh).astype(jnp.bfloat16),
                                  w_out_ref[l, h],
                                  preferred_element_type=jnp.float32)

        y = _layer_norm(x + attn, vec_ref[l, 1], vec_ref[l, 2])

        ff = (jnp.dot(y.astype(jnp.bfloat16), wf1_ref[l],
                      preferred_element_type=jnp.float32) + bf1_ref[l])
        ff = jnp.maximum(ff, 0.0)
        ff = (jnp.dot(ff.astype(jnp.bfloat16), wf2_ref[l],
                      preferred_element_type=jnp.float32) + vec_ref[l, 3])
        x = _layer_norm(y + ff, vec_ref[l, 4], vec_ref[l, 5])

    out_ref[...] = x.reshape(Bb, T, D)


def _fused_encoder(kp, n_head, inp, emb, *, b_block):
    B, T, C = inp.shape
    D = emb.shape[-1]
    L = kp["wf1"].shape[0]
    FF = kp["wf1"].shape[2]
    H = n_head
    Dh = D // H
    assert B % b_block == 0
    nblk = B // b_block

    kernel = functools.partial(_encoder_kernel, n_head=n_head, n_layers=L)

    def const(shape):
        return pl.BlockSpec(shape, lambda b, _n=len(shape): (0,) * _n)

    def batched(shape):
        return pl.BlockSpec(shape, lambda b: (b, 0, 0))

    return pl.pallas_call(
        kernel,
        out_shape=jax.ShapeDtypeStruct((B, T, D), jnp.float32),
        grid=(nblk,),
        in_specs=[
            batched((b_block, T, C)),        # raw [img | obj] features
            batched((b_block, T, D)),        # class + idx embeddings + input bias
            const((C, D)),                   # stacked input-projection weight
            const((L, 3 * H, D, Dh)),        # per-head Wq|Wk|Wv   (bf16, scale folded)
            const((L, 3 * H, 1, Dh)),        # per-head bq|bk|bv   (f32, scale folded)
            const((L, H, Dh, D)),            # per-head Wo         (bf16)
            const((L, D, FF)),               # FFN W1              (bf16)
            const((L, 1, FF)),               # FFN b1
            const((L, FF, D)),               # FFN W2              (bf16)
            const((L, 6, 1, D)),             # [bo, g1, be1, bf2, g2, be2]
        ],
        out_specs=batched((b_block, T, D)),
        compiler_params=pltpu.CompilerParams(
            dimension_semantics=("parallel",)),
    )(inp, emb, kp["w_inp"], kp["w_in"], kp["b_in"], kp["w_out"],
      kp["wf1"], kp["bf1"], kp["wf2"], kp["vec"])


# ---------------------------------------------------------------------------
# Full forward (mirrors MCCFormers_S.forward)
# ---------------------------------------------------------------------------
def mccformers_s_forward(kp, n_head, img_feat1, img_feat2,
                         obj_fea_bef, obj_fea_aft, class_bef, class_aft,
                         *, num_blocks=2):
    """num_blocks=2 keeps both v7x TensorCores busy; use 1 on v5e/v6e."""
    B, S, _ = img_feat1.shape
    D = kp["emb_idx"].shape[1]

    # XLA glue: concat before/after, embedding gather, constant-bias fold.
    inp = jnp.concatenate(
        [jnp.concatenate([img_feat1.astype(jnp.float32), obj_fea_bef], axis=-1),
         jnp.concatenate([img_feat2.astype(jnp.float32), obj_fea_aft], axis=-1)],
        axis=1)                                                    # (B, 2S, 2+F)
    cls_cat = kp["emb_cls"][jnp.concatenate([class_bef, class_aft], axis=1)]
    idx_full = jnp.concatenate(
        [jnp.broadcast_to(kp["emb_idx"][0:1], (S, D)),
         jnp.broadcast_to(kp["emb_idx"][1:2], (S, D))], axis=0)    # (2S, D)
    emb = cls_cat + idx_full[None] + kp["b_inp"][None, None]       # (B, 2S, D)

    # batch packing: <= num_blocks grid steps, pad batch if needed
    nblk = max(1, min(num_blocks, B))
    b_block = -(-B // nblk)
    b_pad = nblk * b_block
    if b_pad != B:
        pad = ((0, b_pad - B), (0, 0), (0, 0))
        inp = jnp.pad(inp, pad)
        emb = jnp.pad(emb, pad)

    out = _fused_encoder(kp, n_head, inp, emb, b_block=b_block)    # (B_pad, 2S, D)
    # back to PyTorch sequence-first layout (S_total, B, D)
    return jnp.transpose(out[:B], (1, 0, 2))


# ---------------------------------------------------------------------------
# Parameter construction: "logical" (PyTorch-like) params + kernel packing
# ---------------------------------------------------------------------------
def init_logical_params(key, feature_dim, d_model, n_head, n_layers,
                        dim_feedforward):
    def nrm(k, shape, scale=0.1):
        return scale * jax.random.normal(k, shape, jnp.float32)

    L = n_layers
    ks = iter(jax.random.split(key, 40))
    p = {
        "w_img": nrm(next(ks), (2, d_model)),                 # linear_layer2
        "b_img": nrm(next(ks), (d_model,)),
        "w_obj": nrm(next(ks), (feature_dim, d_model)),       # linear_layer
        "b_obj": nrm(next(ks), (d_model,)),
        "emb_cls": nrm(next(ks), (49, d_model)),              # embedding_layer
        "emb_idx": nrm(next(ks), (2, d_model)),               # idx_embedding
        "wq": nrm(next(ks), (L, d_model, d_model)),
        "bq": nrm(next(ks), (L, d_model)),
        "wk": nrm(next(ks), (L, d_model, d_model)),
        "bk": nrm(next(ks), (L, d_model)),
        "wv": nrm(next(ks), (L, d_model, d_model)),
        "bv": nrm(next(ks), (L, d_model)),
        "wo": nrm(next(ks), (L, d_model, d_model)),
        "bo": nrm(next(ks), (L, d_model)),
        "g1": jnp.ones((L, d_model), jnp.float32),
        "be1": jnp.zeros((L, d_model), jnp.float32),
        "wf1": nrm(next(ks), (L, d_model, dim_feedforward)),
        "bf1": nrm(next(ks), (L, dim_feedforward)),
        "wf2": nrm(next(ks), (L, dim_feedforward, d_model)),
        "bf2": nrm(next(ks), (L, d_model)),
        "g2": jnp.ones((L, d_model), jnp.float32),
        "be2": jnp.zeros((L, d_model), jnp.float32),
    }
    # TODO(synk): input_proj (Conv2d), w_embedding, h_embedding exist in
    # __init__ but are unused by MCCFormers_S.forward(); not instantiated.
    return p


def pack_kernel_params(lp, n_head):
    """Pack per-layer weights into a few pre-split, scale-folded slabs."""
    L, D, _ = lp["wq"].shape
    H = n_head
    Dh = D // H
    FF = lp["wf1"].shape[2]
    scale = 1.0 / math.sqrt(Dh)

    def split_w(w, s=1.0):        # (L, D, D) -> (L, H, D, Dh)
        return (w * s).reshape(L, D, H, Dh).transpose(0, 2, 1, 3)

    def split_b(b, s=1.0):        # (L, D) -> (L, H, 1, Dh)
        return (b * s).reshape(L, H, 1, Dh)

    w_in = jnp.stack([split_w(lp["wq"], scale), split_w(lp["wk"]),
                      split_w(lp["wv"])], axis=1).reshape(L, 3 * H, D, Dh)
    b_in = jnp.stack([split_b(lp["bq"], scale), split_b(lp["bk"]),
                      split_b(lp["bv"])], axis=1).reshape(L, 3 * H, 1, Dh)
    w_out = lp["wo"].reshape(L, H, Dh, D)
    vec = jnp.stack([lp["bo"], lp["g1"], lp["be1"],
                     lp["bf2"], lp["g2"], lp["be2"]],
                    axis=1).reshape(L, 6, 1, D)
    return {
        "w_inp": jnp.concatenate([lp["w_img"], lp["w_obj"]], axis=0),  # (2+F, D)
        "b_inp": lp["b_img"] + lp["b_obj"],                            # (D,)
        "emb_cls": lp["emb_cls"],
        "emb_idx": lp["emb_idx"],
        "w_in": w_in.astype(jnp.bfloat16),
        "b_in": b_in,
        "w_out": w_out.astype(jnp.bfloat16),
        "wf1": lp["wf1"].astype(jnp.bfloat16),
        "bf1": lp["bf1"].reshape(L, 1, FF),
        "wf2": lp["wf2"].astype(jnp.bfloat16),
        "vec": vec,
    }


# ---------------------------------------------------------------------------
# Pure-JAX f32 reference (true module math) for a sanity check
# ---------------------------------------------------------------------------
def _ref_forward(lp, n_head, img1, img2, objb, obja, clsb, clsa):
    D = lp["emb_idx"].shape[1]
    H = n_head
    Dh = D // H

    def proj(img, obj, cls, idx_row):
        return (img.astype(jnp.float32) @ lp["w_img"] + lp["b_img"]
                + obj @ lp["w_obj"] + lp["b_obj"]
                + lp["emb_cls"][cls] + idx_row)

    x = jnp.concatenate([proj(img1, objb, clsb, lp["emb_idx"][0]),
                         proj(img2, obja, clsa, lp["emb_idx"][1])], axis=1)

    def ln(v, g, b):
        m = v.mean(-1, keepdims=True)
        var = ((v - m) ** 2).mean(-1, keepdims=True)
        return (v - m) / jnp.sqrt(var + 1e-5) * g + b

    L = lp["wq"].shape[0]
    B, T, _ = x.shape
    for l in range(L):
        q = x @ lp["wq"][l] + lp["bq"][l]
        k = x @ lp["wk"][l] + lp["bk"][l]
        v = x @ lp["wv"][l] + lp["bv"][l]
        qh = q.reshape(B, T, H, Dh).transpose(0, 2, 1, 3)
        kh = k.reshape(B, T, H, Dh).transpose(0, 2, 1, 3)
        vh = v.reshape(B, T, H, Dh).transpose(0, 2, 1, 3)
        s = jnp.einsum("bhqd,bhkd->bhqk", qh, kh) / math.sqrt(Dh)
        p = jax.nn.softmax(s, axis=-1)
        ctx = jnp.einsum("bhqk,bhkd->bhqd", p, vh)
        ctx = ctx.transpose(0, 2, 1, 3).reshape(B, T, D)
        attn = ctx @ lp["wo"][l] + lp["bo"][l]
        y = ln(x + attn, lp["g1"][l], lp["be1"][l])
        ff = jnp.maximum(y @ lp["wf1"][l] + lp["bf1"][l], 0.0)
        ff = ff @ lp["wf2"][l] + lp["bf2"][l]
        x = ln(y + ff, lp["g2"][l], lp["be2"][l])
    return jnp.transpose(x, (1, 0, 2))


if __name__ == "__main__":
    B = 4                 # packed 2 rows / grid step -> 2 steps (both v7x TCs)
    feature_dim = 4
    d_model = 32
    n_head = 4
    n_layers = 2
    dim_feedforward = 64
    S = 20   # MCCFormers_S.forward hard-codes 20 object tokens per image

    key = jax.random.PRNGKey(0)
    kroot, k1, k2, k3, k4, k5, k6 = jax.random.split(key, 7)

    logical = init_logical_params(kroot, feature_dim, d_model, n_head,
                                  n_layers, dim_feedforward)
    kparams = pack_kernel_params(logical, n_head)

    img_feat1 = jax.random.normal(k1, (B, S, 2), jnp.float32)
    img_feat2 = jax.random.normal(k2, (B, S, 2), jnp.float32)
    obj_fea_bef = jax.random.normal(k3, (B, S, feature_dim), jnp.float32)
    obj_fea_aft = jax.random.normal(k4, (B, S, feature_dim), jnp.float32)
    class_bef = jax.random.randint(k5, (B, S), 0, 49, jnp.int32)
    class_aft = jax.random.randint(k6, (B, S), 0, 49, jnp.int32)

    fwd = jax.jit(mccformers_s_forward, static_argnums=(1,))
    out = fwd(kparams, n_head, img_feat1, img_feat2,
              obj_fea_bef, obj_fea_aft, class_bef, class_aft)
    out = jax.block_until_ready(out)

    assert out.shape == (2 * S, B, d_model), out.shape
    assert bool(jnp.all(jnp.isfinite(out)))

    # parity vs. pure-f32 reference; tolerance accounts for bf16 MXU operands
    # (review-sanctioned) across 2 encoder layers.
    ref = _ref_forward(logical, n_head, img_feat1, img_feat2,
                       obj_fea_bef, obj_fea_aft, class_bef, class_aft)
    max_err = float(jnp.max(jnp.abs(out - ref)))
    assert max_err < 7.5e-2, f"mismatch vs reference: {max_err}"

    print("KERNEL_OK")
</pallas_src>

<mosaic_0001>
module attributes {stable_mosaic.version = 11 : i64} {
  func.func @_encoder_kernel(%arg0: i32, %arg1: memref<2x40x6xf32, #tpu.memory_space<vmem>>, %arg2: memref<2x40x32xf32, #tpu.memory_space<vmem>>, %arg3: memref<6x32xf32, #tpu.memory_space<vmem>>, %arg4: memref<2x12x32x8xbf16, #tpu.memory_space<vmem>>, %arg5: memref<2x12x1x8xf32, #tpu.memory_space<vmem>>, %arg6: memref<2x4x8x32xbf16, #tpu.memory_space<vmem>>, %arg7: memref<2x32x64xbf16, #tpu.memory_space<vmem>>, %arg8: memref<2x1x64xf32, #tpu.memory_space<vmem>>, %arg9: memref<2x64x32xbf16, #tpu.memory_space<vmem>>, %arg10: memref<2x6x1x32xf32, #tpu.memory_space<vmem>>, %arg11: memref<2x40x32xf32, #tpu.memory_space<vmem>>) attributes {dimension_semantics = [#tpu.dimension_semantics<parallel>], iteration_bounds = array<i64: 2>, scalar_prefetch = 0 : i64, scratch_operands = 0 : i64, tpu.core_type = #tpu.core_type<tc>, window_params = [{transform_indices = @transform_0, window_bounds = array<i64: 2, 40, 6>}, {transform_indices = @transform_1, window_bounds = array<i64: 2, 40, 32>}, {pipeline_mode = #tpu.pipeline_mode<synchronous>, transform_indices = @transform_2, window_bounds = array<i64: 6, 32>}, {pipeline_mode = #tpu.pipeline_mode<synchronous>, transform_indices = @transform_3, window_bounds = array<i64: 2, 12, 32, 8>}, {pipeline_mode = #tpu.pipeline_mode<synchronous>, transform_indices = @transform_4, window_bounds = array<i64: 2, 12, 1, 8>}, {pipeline_mode = #tpu.pipeline_mode<synchronous>, transform_indices = @transform_5, window_bounds = array<i64: 2, 4, 8, 32>}, {pipeline_mode = #tpu.pipeline_mode<synchronous>, transform_indices = @transform_6, window_bounds = array<i64: 2, 32, 64>}, {pipeline_mode = #tpu.pipeline_mode<synchronous>, transform_indices = @transform_7, window_bounds = array<i64: 2, 1, 64>}, {pipeline_mode = #tpu.pipeline_mode<synchronous>, transform_indices = @transform_8, window_bounds = array<i64: 2, 64, 32>}, {pipeline_mode = #tpu.pipeline_mode<synchronous>, transform_indices = @transform_9, window_bounds = array<i64: 2, 6, 1, 32>}, {transform_indices = @transform_10, window_bounds = array<i64: 2, 40, 32>}]} {
    %c0 = arith.constant 0 : index
    %c0_0 = arith.constant 0 : index
    %c0_1 = arith.constant 0 : index
    %0 = vector.load %arg1[%c0, %c0_0, %c0_1] : memref<2x40x6xf32, #tpu.memory_space<vmem>>, vector<2x40x6xf32>
    %1 = vector.shape_cast %0 : vector<2x40x6xf32> to vector<80x6xf32>
    %c0_2 = arith.constant 0 : index
    %c0_3 = arith.constant 0 : index
    %2 = vector.load %arg3[%c0_2, %c0_3] : memref<6x32xf32, #tpu.memory_space<vmem>>, vector<6x32xf32>
    %cst = arith.constant dense<0.000000e+00> : vector<80x32xf32>
    %3 = tpu.matmul %1, %2, %cst {dimension_numbers = #tpu.dot_dimension_numbers<[1], [0], [0], [1], [0, 0, 1, 1], [], []>} : vector<80x6xf32>, vector<6x32xf32>, vector<80x32xf32> -> vector<80x32xf32>
    %c0_4 = arith.constant 0 : index
    %c0_5 = arith.constant 0 : index
    %c0_6 = arith.constant 0 : index
    %4 = vector.load %arg2[%c0_4, %c0_5, %c0_6] : memref<2x40x32xf32, #tpu.memory_space<vmem>>, vector<2x40x32xf32>
    %5 = vector.shape_cast %4 : vector<2x40x32xf32> to vector<80x32xf32>
    %6 = arith.addf %3, %5 : vector<80x32xf32>
    %7 = arith.truncf %6 : vector<80x32xf32> to vector<80x32xbf16>
    %c0_7 = arith.constant 0 : index
    %c0_8 = arith.constant 0 : index
    %c0_9 = arith.constant 0 : index
    %c0_10 = arith.constant 0 : index
    %8 = vector.load %arg10[%c0_7, %c0_8, %c0_9, %c0_10] : memref<2x6x1x32xf32, #tpu.memory_space<vmem>>, vector<1x1x1x32xf32>
    %9 = vector.shape_cast %8 : vector<1x1x1x32xf32> to vector<1x32xf32>
    %c0_11 = arith.constant 0 : index
    %c0_12 = arith.constant 0 : index
    %c0_13 = arith.constant 0 : index
    %c0_14 = arith.constant 0 : index
    %10 = vector.load %arg4[%c0_11, %c0_12, %c0_13, %c0_14] : memref<2x12x32x8xbf16, #tpu.memory_space<vmem>>, vector<1x1x32x8xbf16>
    %11 = vector.shape_cast %10 : vector<1x1x32x8xbf16> to vector<32x8xbf16>
    %cst_15 = arith.constant dense<0.000000e+00> : vector<80x8xf32>
    %12 = tpu.matmul %7, %11, %cst_15 {dimension_numbers = #tpu.dot_dimension_numbers<[1], [0], [0], [1], [0, 0, 1, 1], [], []>} : vector<80x32xbf16>, vector<32x8xbf16>, vector<80x8xf32> -> vector<80x8xf32>
    %c0_16 = arith.constant 0 : index
    %c0_17 = arith.constant 0 : index
    %c0_18 = arith.constant 0 : index
    %c0_19 = arith.constant 0 : index
    %13 = vector.load %arg5[%c0_16, %c0_17, %c0_18, %c0_19] : memref<2x12x1x8xf32, #tpu.memory_space<vmem>>, vector<1x1x1x8xf32>
    %14 = vector.shape_cast %13 : vector<1x1x1x8xf32> to vector<1x8xf32>
    %15 = vector.broadcast %14 : vector<1x8xf32> to vector<80x8xf32>
    %16 = arith.addf %12, %15 : vector<80x8xf32>
    %c0_20 = arith.constant 0 : index
    %c4 = arith.constant 4 : index
    %c0_21 = arith.constant 0 : index
    %c0_22 = arith.constant 0 : index
    %17 = vector.load %arg4[%c0_20, %c4, %c0_21, %c0_22] : memref<2x12x32x8xbf16, #tpu.memory_space<vmem>>, vector<1x1x32x8xbf16>
    %18 = vector.shape_cast %17 : vector<1x1x32x8xbf16> to vector<32x8xbf16>
    %cst_23 = arith.constant dense<0.000000e+00> : vector<80x8xf32>
    %19 = tpu.matmul %7, %18, %cst_23 {dimension_numbers = #tpu.dot_dimension_numbers<[1], [0], [0], [1], [0, 0, 1, 1], [], []>} : vector<80x32xbf16>, vector<32x8xbf16>, vector<80x8xf32> -> vector<80x8xf32>
    %c0_24 = arith.constant 0 : index
    %c4_25 = arith.constant 4 : index
    %c0_26 = arith.constant 0 : index
    %c0_27 = arith.constant 0 : index
    %20 = vector.load %arg5[%c0_24, %c4_25, %c0_26, %c0_27] : memref<2x12x1x8xf32, #tpu.memory_space<vmem>>, vector<1x1x1x8xf32>
    %21 = vector.shape_cast %20 : vector<1x1x1x8xf32> to vector<1x8xf32>
    %22 = vector.broadcast %21 : vector<1x8xf32> to vector<80x8xf32>
    %23 = arith.addf %19, %22 : vector<80x8xf32>
    %c0_28 = arith.constant 0 : index
    %c8 = arith.constant 8 : index
    %c0_29 = arith.constant 0 : index
    %c0_30 = arith.constant 0 : index
    %24 = vector.load %arg4[%c0_28, %c8, %c0_29, %c0_30] : memref<2x12x32x8xbf16, #tpu.memory_space<vmem>>, vector<1x1x32x8xbf16>
    %25 = vector.shape_cast %24 : vector<1x1x32x8xbf16> to vector<32x8xbf16>
    %cst_31 = arith.constant dense<0.000000e+00> : vector<80x8xf32>
    %26 = tpu.matmul %7, %25, %cst_31 {dimension_numbers = #tpu.dot_dimension_numbers<[1], [0], [0], [1], [0, 0, 1, 1], [], []>} : vector<80x32xbf16>, vector<32x8xbf16>, vector<80x8xf32> -> vector<80x8xf32>
    %c0_32 = arith.constant 0 : index
    %c8_33 = arith.constant 8 : index
    %c0_34 = arith.constant 0 : index
    %c0_35 = arith.constant 0 : index
    %27 = vector.load %arg5[%c0_32, %c8_33, %c0_34, %c0_35] : memref<2x12x1x8xf32, #tpu.memory_space<vmem>>, vector<1x1x1x8xf32>
    %28 = vector.shape_cast %27 : vector<1x1x1x8xf32> to vector<1x8xf32>
    %29 = vector.broadcast %28 : vector<1x8xf32> to vector<80x8xf32>
    %30 = arith.addf %26, %29 : vector<80x8xf32>
    %31 = vector.shape_cast %16 : vector<80x8xf32> to vector<2x40x8xf32>
    %32 = arith.truncf %31 : vector<2x40x8xf32> to vector<2x40x8xbf16>
    %33 = vector.shape_cast %23 : vector<80x8xf32> to vector<2x40x8xf32>
    %34 = arith.truncf %33 : vector<2x40x8xf32> to vector<2x40x8xbf16>
    %35 = vector.shape_cast %30 : vector<80x8xf32> to vector<2x40x8xf32>
    %36 = arith.truncf %35 : vector<2x40x8xf32> to vector<2x40x8xbf16>
    "tpu.trace_start"() <{level = 10 : i32, message = "bqe,bke->bqk"}> : () -> ()
    %cst_36 = arith.constant dense<0.000000e+00> : vector<2x40x40xf32>
    %37 = tpu.matmul %32, %34, %cst_36 {dimension_numbers = #tpu.dot_dimension_numbers<[2], [2], [1], [1], [0, 0, 0, 1, 1, 1], [0], [0]>} : vector<2x40x8xbf16>, vector<2x40x8xbf16>, vector<2x40x40xf32> -> vector<2x40x40xf32>
    "tpu.trace_stop"() : () -> ()
    %cst_37 = arith.constant dense<0xFF800000> : vector<2x40xf32>
    %38 = vector.multi_reduction <maximumf>, %37, %cst_37 [2] : vector<2x40x40xf32> to vector<2x40xf32>
    %39 = vector.shape_cast %38 : vector<2x40xf32> to vector<2x40x1xf32>
    %40 = vector.broadcast %39 : vector<2x40x1xf32> to vector<2x40x40xf32>
    %41 = arith.subf %37, %40 : vector<2x40x40xf32>
    %42 = math.exp %41 : vector<2x40x40xf32>
    %cst_38 = arith.constant dense<0.000000e+00> : vector<2x40xf32>
    %43 = vector.multi_reduction <add>, %42, %cst_38 [2] : vector<2x40x40xf32> to vector<2x40xf32>
    %44 = vector.shape_cast %43 : vector<2x40xf32> to vector<2x40x1xf32>
    %45 = vector.broadcast %44 : vector<2x40x1xf32> to vector<2x40x40xf32>
    %46 = arith.divf %42, %45 : vector<2x40x40xf32>
    %47 = arith.truncf %46 : vector<2x40x40xf32> to vector<2x40x40xbf16>
    "tpu.trace_start"() <{level = 10 : i32, message = "bqk,bke->bqe"}> : () -> ()
    %cst_39 = arith.constant dense<0.000000e+00> : vector<2x40x8xf32>
    %48 = tpu.matmul %47, %36, %cst_39 {dimension_numbers = #tpu.dot_dimension_numbers<[2], [1], [1], [2], [0, 0, 0, 1, 1, 2], [0], [0]>} : vector<2x40x40xbf16>, vector<2x40x8xbf16>, vector<2x40x8xf32> -> vector<2x40x8xf32>
    "tpu.trace_stop"() : () -> ()
    %49 = vector.shape_cast %48 : vector<2x40x8xf32> to vector<80x8xf32>
    %50 = arith.truncf %49 : vector<80x8xf32> to vector<80x8xbf16>
    %c0_40 = arith.constant 0 : index
    %c0_41 = arith.constant 0 : index
    %c0_42 = arith.constant 0 : index
    %c0_43 = arith.constant 0 : index
    %51 = vector.load %arg6[%c0_40, %c0_41, %c0_42, %c0_43] : memref<2x4x8x32xbf16, #tpu.memory_space<vmem>>, vector<1x1x8x32xbf16>
    %52 = vector.shape_cast %51 : vector<1x1x8x32xbf16> to vector<8x32xbf16>
    %cst_44 = arith.constant dense<0.000000e+00> : vector<80x32xf32>
    %53 = tpu.matmul %50, %52, %cst_44 {dimension_numbers = #tpu.dot_dimension_numbers<[1], [0], [0], [1], [0, 0, 1, 1], [], []>} : vector<80x8xbf16>, vector<8x32xbf16>, vector<80x32xf32> -> vector<80x32xf32>
    %54 = vector.broadcast %9 : vector<1x32xf32> to vector<80x32xf32>
    %55 = arith.addf %54, %53 : vector<80x32xf32>
    %c0_45 = arith.constant 0 : index
    %c1 = arith.constant 1 : index
    %c0_46 = arith.constant 0 : index
    %c0_47 = arith.constant 0 : index
    %56 = vector.load %arg4[%c0_45, %c1, %c0_46, %c0_47] : memref<2x12x32x8xbf16, #tpu.memory_space<vmem>>, vector<1x1x32x8xbf16>
    %57 = vector.shape_cast %56 : vector<1x1x32x8xbf16> to vector<32x8xbf16>
    %cst_48 = arith.constant dense<0.000000e+00> : vector<80x8xf32>
    %58 = tpu.matmul %7, %57, %cst_48 {dimension_numbers = #tpu.dot_dimension_numbers<[1], [0], [0], [1], [0, 0, 1, 1], [], []>} : vector<80x32xbf16>, vector<32x8xbf16>, vector<80x8xf32> -> vector<80x8xf32>
    %c0_49 = arith.constant 0 : index
    %c1_50 = arith.constant 1 : index
    %c0_51 = arith.constant 0 : index
    %c0_52 = arith.constant 0 : index
    %59 = vector.load %arg5[%c0_49, %c1_50, %c0_51, %c0_52] : memref<2x12x1x8xf32, #tpu.memory_space<vmem>>, vector<1x1x1x8xf32>
    %60 = vector.shape_cast %59 : vector<1x1x1x8xf32> to vector<1x8xf32>
    %61 = vector.broadcast %60 : vector<1x8xf32> to vector<80x8xf32>
    %62 = arith.addf %58, %61 : vector<80x8xf32>
    %c0_53 = arith.constant 0 : index
    %c5 = arith.constant 5 : index
    %c0_54 = arith.constant 0 : index
    %c0_55 = arith.constant 0 : index
    %63 = vector.load %arg4[%c0_53, %c5, %c0_54, %c0_55] : memref<2x12x32x8xbf16, #tpu.memory_space<vmem>>, vector<1x1x32x8xbf16>
    %64 = vector.shape_cast %63 : vector<1x1x32x8xbf16> to vector<32x8xbf16>
    %cst_56 = arith.constant dense<0.000000e+00> : vector<80x8xf32>
    %65 = tpu.matmul %7, %64, %cst_56 {dimension_numbers = #tpu.dot_dimension_numbers<[1], [0], [0], [1], [0, 0, 1, 1], [], []>} : vector<80x32xbf16>, vector<32x8xbf16>, vector<80x8xf32> -> vector<80x8xf32>
    %c0_57 = arith.constant 0 : index
    %c5_58 = arith.constant 5 : index
    %c0_59 = arith.constant 0 : index
    %c0_60 = arith.constant 0 : index
    %66 = vector.load %arg5[%c0_57, %c5_58, %c0_59, %c0_60] : memref<2x12x1x8xf32, #tpu.memory_space<vmem>>, vector<1x1x1x8xf32>
    %67 = vector.shape_cast %66 : vector<1x1x1x8xf32> to vector<1x8xf32>
    %68 = vector.broadcast %67 : vector<1x8xf32> to vector<80x8xf32>
    %69 = arith.addf %65, %68 : vector<80x8xf32>
    %c0_61 = arith.constant 0 : index
    %c9 = arith.constant 9 : index
    %c0_62 = arith.constant 0 : index
    %c0_63 = arith.constant 0 : index
    %70 = vector.load %arg4[%c0_61, %c9, %c0_62, %c0_63] : memref<2x12x32x8xbf16, #tpu.memory_space<vmem>>, vector<1x1x32x8xbf16>
    %71 = vector.shape_cast %70 : vector<1x1x32x8xbf16> to vector<32x8xbf16>
    %cst_64 = arith.constant dense<0.000000e+00> : vector<80x8xf32>
    %72 = tpu.matmul %7, %71, %cst_64 {dimension_numbers = #tpu.dot_dimension_numbers<[1], [0], [0], [1], [0, 0, 1, 1], [], []>} : vector<80x32xbf16>, vector<32x8xbf16>, vector<80x8xf32> -> vector<80x8xf32>
    %c0_65 = arith.constant 0 : index
    %c9_66 = arith.constant 9 : index
    %c0_67 = arith.constant 0 : index
    %c0_68 = arith.constant 0 : index
    %73 = vector.load %arg5[%c0_65, %c9_66, %c0_67, %c0_68] : memref<2x12x1x8xf32, #tpu.memory_space<vmem>>, vector<1x1x1x8xf32>
    %74 = vector.shape_cast %73 : vector<1x1x1x8xf32> to vector<1x8xf32>
    %75 = vector.broadcast %74 : vector<1x8xf32> to vector<80x8xf32>
    %76 = arith.addf %72, %75 : vector<80x8xf32>
    %77 = vector.shape_cast %62 : vector<80x8xf32> to vector<2x40x8xf32>
    %78 = arith.truncf %77 : vector<2x40x8xf32> to vector<2x40x8xbf16>
    %79 = vector.shape_cast %69 : vector<80x8xf32> to vector<2x40x8xf32>
    %80 = arith.truncf %79 : vector<2x40x8xf32> to vector<2x40x8xbf16>
    %81 = vector.shape_cast %76 : vector<80x8xf32> to vector<2x40x8xf32>
    %82 = arith.truncf %81 : vector<2x40x8xf32> to vector<2x40x8xbf16>
    "tpu.trace_start"() <{level = 10 : i32, message = "bqe,bke->bqk"}> : () -> ()
    %cst_69 = arith.constant dense<0.000000e+00> : vector<2x40x40xf32>
    %83 = tpu.matmul %78, %80, %cst_69 {dimension_numbers = #tpu.dot_dimension_numbers<[2], [2], [1], [1], [0, 0, 0, 1, 1, 1], [0], [0]>} : vector<2x40x8xbf16>, vector<2x40x8xbf16>, vector<2x40x40xf32> -> vector<2x40x40xf32>
    "tpu.trace_stop"() : () -> ()
    %cst_70 = arith.constant dense<0xFF800000> : vector<2x40xf32>
    %84 = vector.multi_reduction <maximumf>, %83, %cst_70 [2] : vector<2x40x40xf32> to vector<2x40xf32>
    %85 = vector.shape_cast %84 : vector<2x40xf32> to vector<2x40x1xf32>
    %86 = vector.broadcast %85 : vector<2x40x1xf32> to vector<2x40x40xf32>
    %87 = arith.subf %83, %86 : vector<2x40x40xf32>
    %88 = math.exp %87 : vector<2x40x40xf32>
    %cst_71 = arith.constant dense<0.000000e+00> : vector<2x40xf32>
    %89 = vector.multi_reduction <add>, %88, %cst_71 [2] : vector<2x40x40xf32> to vector<2x40xf32>
    %90 = vector.shape_cast %89 : vector<2x40xf32> to vector<2x40x1xf32>
    %91 = vector.broadcast %90 : vector<2x40x1xf32> to vector<2x40x40xf32>
    %92 = arith.divf %88, %91 : vector<2x40x40xf32>
    %93 = arith.truncf %92 : vector<2x40x40xf32> to vector<2x40x40xbf16>
    "tpu.trace_start"() <{level = 10 : i32, message = "bqk,bke->bqe"}> : () -> ()
    %cst_72 = arith.constant dense<0.000000e+00> : vector<2x40x8xf32>
    %94 = tpu.matmul %93, %82, %cst_72 {dimension_numbers = #tpu.dot_dimension_numbers<[2], [1], [1], [2], [0, 0, 0, 1, 1, 2], [0], [0]>} : vector<2x40x40xbf16>, vector<2x40x8xbf16>, vector<2x40x8xf32> -> vector<2x40x8xf32>
    "tpu.trace_stop"() : () -> ()
    %95 = vector.shape_cast %94 : vector<2x40x8xf32> to vector<80x8xf32>
    %96 = arith.truncf %95 : vector<80x8xf32> to vector<80x8xbf16>
    %c0_73 = arith.constant 0 : index
    %c1_74 = arith.constant 1 : index
    %c0_75 = arith.constant 0 : index
    %c0_76 = arith.constant 0 : index
    %97 = vector.load %arg6[%c0_73, %c1_74, %c0_75, %c0_76] : memref<2x4x8x32xbf16, #tpu.memory_space<vmem>>, vector<1x1x8x32xbf16>
    %98 = vector.shape_cast %97 : vector<1x1x8x32xbf16> to vector<8x32xbf16>
    %cst_77 = arith.constant dense<0.000000e+00> : vector<80x32xf32>
    %99 = tpu.matmul %96, %98, %cst_77 {dimension_numbers = #tpu.dot_dimension_numbers<[1], [0], [0], [1], [0, 0, 1, 1], [], []>} : vector<80x8xbf16>, vector<8x32xbf16>, vector<80x32xf32> -> vector<80x32xf32>
    %100 = arith.addf %55, %99 : vector<80x32xf32>
    %c0_78 = arith.constant 0 : index
    %c2 = arith.constant 2 : index
    %c0_79 = arith.constant 0 : index
    %c0_80 = arith.constant 0 : index
    %101 = vector.load %arg4[%c0_78, %c2, %c0_79, %c0_80] : memref<2x12x32x8xbf16, #tpu.memory_space<vmem>>, vector<1x1x32x8xbf16>
    %102 = vector.shape_cast %101 : vector<1x1x32x8xbf16> to vector<32x8xbf16>
    %cst_81 = arith.constant dense<0.000000e+00> : vector<80x8xf32>
    %103 = tpu.matmul %7, %102, %cst_81 {dimension_numbers = #tpu.dot_dimension_numbers<[1], [0], [0], [1], [0, 0, 1, 1], [], []>} : vector<80x32xbf16>, vector<32x8xbf16>, vector<80x8xf32> -> vector<80x8xf32>
    %c0_82 = arith.constant 0 : index
    %c2_83 = arith.constant 2 : index
    %c0_84 = arith.constant 0 : index
    %c0_85 = arith.constant 0 : index
    %104 = vector.load %arg5[%c0_82, %c2_83, %c0_84, %c0_85] : memref<2x12x1x8xf32, #tpu.memory_space<vmem>>, vector<1x1x1x8xf32>
    %105 = vector.shape_cast %104 : vector<1x1x1x8xf32> to vector<1x8xf32>
    %106 = vector.broadcast %105 : vector<1x8xf32> to vector<80x8xf32>
    %107 = arith.addf %103, %106 : vector<80x8xf32>
    %c0_86 = arith.constant 0 : index
    %c6 = arith.constant 6 : index
    %c0_87 = arith.constant 0 : index
    %c0_88 = arith.constant 0 : index
    %108 = vector.load %arg4[%c0_86, %c6, %c0_87, %c0_88] : memref<2x12x32x8xbf16, #tpu.memory_space<vmem>>, vector<1x1x32x8xbf16>
    %109 = vector.shape_cast %108 : vector<1x1x32x8xbf16> to vector<32x8xbf16>
    %cst_89 = arith.constant dense<0.000000e+00> : vector<80x8xf32>
    %110 = tpu.matmul %7, %109, %cst_89 {dimension_numbers = #tpu.dot_dimension_numbers<[1], [0], [0], [1], [0, 0, 1, 1], [], []>} : vector<80x32xbf16>, vector<32x8xbf16>, vector<80x8xf32> -> vector<80x8xf32>
    %c0_90 = arith.constant 0 : index
    %c6_91 = arith.constant 6 : index
    %c0_92 = arith.constant 0 : index
    %c0_93 = arith.constant 0 : index
    %111 = vector.load %arg5[%c0_90, %c6_91, %c0_92, %c0_93] : memref<2x12x1x8xf32, #tpu.memory_space<vmem>>, vector<1x1x1x8xf32>
    %112 = vector.shape_cast %111 : vector<1x1x1x8xf32> to vector<1x8xf32>
    %113 = vector.broadcast %112 : vector<1x8xf32> to vector<80x8xf32>
    %114 = arith.addf %110, %113 : vector<80x8xf32>
    %c0_94 = arith.constant 0 : index
    %c10 = arith.constant 10 : index
    %c0_95 = arith.constant 0 : index
    %c0_96 = arith.constant 0 : index
    %115 = vector.load %arg4[%c0_94, %c10, %c0_95, %c0_96] : memref<2x12x32x8xbf16, #tpu.memory_space<vmem>>, vector<1x1x32x8xbf16>
    %116 = vector.shape_cast %115 : vector<1x1x32x8xbf16> to vector<32x8xbf16>
    %cst_97 = arith.constant dense<0.000000e+00> : vector<80x8xf32>
    %117 = tpu.matmul %7, %116, %cst_97 {dimension_numbers = #tpu.dot_dimension_numbers<[1], [0], [0], [1], [0, 0, 1, 1], [], []>} : vector<80x32xbf16>, vector<32x8xbf16>, vector<80x8xf32> -> vector<80x8xf32>
    %c0_98 = arith.constant 0 : index
    %c10_99 = arith.constant 10 : index
    %c0_100 = arith.constant 0 : index
    %c0_101 = arith.constant 0 : index
    %118 = vector.load %arg5[%c0_98, %c10_99, %c0_100, %c0_101] : memref<2x12x1x8xf32, #tpu.memory_space<vmem>>, vector<1x1x1x8xf32>
    %119 = vector.shape_cast %118 : vector<1x1x1x8xf32> to vector<1x8xf32>
    %120 = vector.broadcast %119 : vector<1x8xf32> to vector<80x8xf32>
    %121 = arith.addf %117, %120 : vector<80x8xf32>
    %122 = vector.shape_cast %107 : vector<80x8xf32> to vector<2x40x8xf32>
    %123 = arith.truncf %122 : vector<2x40x8xf32> to vector<2x40x8xbf16>
    %124 = vector.shape_cast %114 : vector<80x8xf32> to vector<2x40x8xf32>
    %125 = arith.truncf %124 : vector<2x40x8xf32> to vector<2x40x8xbf16>
    %126 = vector.shape_cast %121 : vector<80x8xf32> to vector<2x40x8xf32>
    %127 = arith.truncf %126 : vector<2x40x8xf32> to vector<2x40x8xbf16>
    "tpu.trace_start"() <{level = 10 : i32, message = "bqe,bke->bqk"}> : () -> ()
    %cst_102 = arith.constant dense<0.000000e+00> : vector<2x40x40xf32>
    %128 = tpu.matmul %123, %125, %cst_102 {dimension_numbers = #tpu.dot_dimension_numbers<[2], [2], [1], [1], [0, 0, 0, 1, 1, 1], [0], [0]>} : vector<2x40x8xbf16>, vector<2x40x8xbf16>, vector<2x40x40xf32> -> vector<2x40x40xf32>
    "tpu.trace_stop"() : () -> ()
    %cst_103 = arith.constant dense<0xFF800000> : vector<2x40xf32>
    %129 = vector.multi_reduction <maximumf>, %128, %cst_103 [2] : vector<2x40x40xf32> to vector<2x40xf32>
    %130 = vector.shape_cast %129 : vector<2x40xf32> to vector<2x40x1xf32>
    %131 = vector.broadcast %130 : vector<2x40x1xf32> to vector<2x40x40xf32>
    %132 = arith.subf %128, %131 : vector<2x40x40xf32>
    %133 = math.exp %132 : vector<2x40x40xf32>
    %cst_104 = arith.constant dense<0.000000e+00> : vector<2x40xf32>
    %134 = vector.multi_reduction <add>, %133, %cst_104 [2] : vector<2x40x40xf32> to vector<2x40xf32>
    %135 = vector.shape_cast %134 : vector<2x40xf32> to vector<2x40x1xf32>
    %136 = vector.broadcast %135 : vector<2x40x1xf32> to vector<2x40x40xf32>
    %137 = arith.divf %133, %136 : vector<2x40x40xf32>
    %138 = arith.truncf %137 : vector<2x40x40xf32> to vector<2x40x40xbf16>
    "tpu.trace_start"() <{level = 10 : i32, message = "bqk,bke->bqe"}> : () -> ()
    %cst_105 = arith.constant dense<0.000000e+00> : vector<2x40x8xf32>
    %139 = tpu.matmul %138, %127, %cst_105 {dimension_numbers = #tpu.dot_dimension_numbers<[2], [1], [1], [2], [0, 0, 0, 1, 1, 2], [0], [0]>} : vector<2x40x40xbf16>, vector<2x40x8xbf16>, vector<2x40x8xf32> -> vector<2x40x8xf32>
    "tpu.trace_stop"() : () -> ()
    %140 = vector.shape_cast %139 : vector<2x40x8xf32> to vector<80x8xf32>
    %141 = arith.truncf %140 : vector<80x8xf32> to vector<80x8xbf16>
    %c0_106 = arith.constant 0 : index
    %c2_107 = arith.constant 2 : index
    %c0_108 = arith.constant 0 : index
    %c0_109 = arith.constant 0 : index
    %142 = vector.load %arg6[%c0_106, %c2_107, %c0_108, %c0_109] : memref<2x4x8x32xbf16, #tpu.memory_space<vmem>>, vector<1x1x8x32xbf16>
    %143 = vector.shape_cast %142 : vector<1x1x8x32xbf16> to vector<8x32xbf16>
    %cst_110 = arith.constant dense<0.000000e+00> : vector<80x32xf32>
    %144 = tpu.matmul %141, %143, %cst_110 {dimension_numbers = #tpu.dot_dimension_numbers<[1], [0], [0], [1], [0, 0, 1, 1], [], []>} : vector<80x8xbf16>, vector<8x32xbf16>, vector<80x32xf32> -> vector<80x32xf32>
    %145 = arith.addf %100, %144 : vector<80x32xf32>
    %c0_111 = arith.constant 0 : index
    %c3 = arith.constant 3 : index
    %c0_112 = arith.constant 0 : index
    %c0_113 = arith.constant 0 : index
    %146 = vector.load %arg4[%c0_111, %c3, %c0_112, %c0_113] : memref<2x12x32x8xbf16, #tpu.memory_space<vmem>>, vector<1x1x32x8xbf16>
    %147 = vector.shape_cast %146 : vector<1x1x32x8xbf16> to vector<32x8xbf16>
    %cst_114 = arith.constant dense<0.000000e+00> : vector<80x8xf32>
    %148 = tpu.matmul %7, %147, %cst_114 {dimension_numbers = #tpu.dot_dimension_numbers<[1], [0], [0], [1], [0, 0, 1, 1], [], []>} : vector<80x32xbf16>, vector<32x8xbf16>, vector<80x8xf32> -> vector<80x8xf32>
    %c0_115 = arith.constant 0 : index
    %c3_116 = arith.constant 3 : index
    %c0_117 = arith.constant 0 : index
    %c0_118 = arith.constant 0 : index
    %149 = vector.load %arg5[%c0_115, %c3_116, %c0_117, %c0_118] : memref<2x12x1x8xf32, #tpu.memory_space<vmem>>, vector<1x1x1x8xf32>
    %150 = vector.shape_cast %149 : vector<1x1x1x8xf32> to vector<1x8xf32>
    %151 = vector.broadcast %150 : vector<1x8xf32> to vector<80x8xf32>
    %152 = arith.addf %148, %151 : vector<80x8xf32>
    %c0_119 = arith.constant 0 : index
    %c7 = arith.constant 7 : index
    %c0_120 = arith.constant 0 : index
    %c0_121 = arith.constant 0 : index
    %153 = vector.load %arg4[%c0_119, %c7, %c0_120, %c0_121] : memref<2x12x32x8xbf16, #tpu.memory_space<vmem>>, vector<1x1x32x8xbf16>
    %154 = vector.shape_cast %153 : vector<1x1x32x8xbf16> to vector<32x8xbf16>
    %cst_122 = arith.constant dense<0.000000e+00> : vector<80x8xf32>
    %155 = tpu.matmul %7, %154, %cst_122 {dimension_numbers = #tpu.dot_dimension_numbers<[1], [0], [0], [1], [0, 0, 1, 1], [], []>} : vector<80x32xbf16>, vector<32x8xbf16>, vector<80x8xf32> -> vector<80x8xf32>
    %c0_123 = arith.constant 0 : index
    %c7_124 = arith.constant 7 : index
    %c0_125 = arith.constant 0 : index
    %c0_126 = arith.constant 0 : index
    %156 = vector.load %arg5[%c0_123, %c7_124, %c0_125, %c0_126] : memref<2x12x1x8xf32, #tpu.memory_space<vmem>>, vector<1x1x1x8xf32>
    %157 = vector.shape_cast %156 : vector<1x1x1x8xf32> to vector<1x8xf32>
    %158 = vector.broadcast %157 : vector<1x8xf32> to vector<80x8xf32>
    %159 = arith.addf %155, %158 : vector<80x8xf32>
    %c0_127 = arith.constant 0 : index
    %c11 = arith.constant 11 : index
    %c0_128 = arith.constant 0 : index
    %c0_129 = arith.constant 0 : index
    %160 = vector.load %arg4[%c0_127, %c11, %c0_128, %c0_129] : memref<2x12x32x8xbf16, #tpu.memory_space<vmem>>, vector<1x1x32x8xbf16>
    %161 = vector.shape_cast %160 : vector<1x1x32x8xbf16> to vector<32x8xbf16>
    %cst_130 = arith.constant dense<0.000000e+00> : vector<80x8xf32>
    %162 = tpu.matmul %7, %161, %cst_130 {dimension_numbers = #tpu.dot_dimension_numbers<[1], [0], [0], [1], [0, 0, 1, 1], [], []>} : vector<80x32xbf16>, vector<32x8xbf16>, vector<80x8xf32> -> vector<80x8xf32>
    %c0_131 = arith.constant 0 : index
    %c11_132 = arith.constant 11 : index
    %c0_133 = arith.constant 0 : index
    %c0_134 = arith.constant 0 : index
    %163 = vector.load %arg5[%c0_131, %c11_132, %c0_133, %c0_134] : memref<2x12x1x8xf32, #tpu.memory_space<vmem>>, vector<1x1x1x8xf32>
    %164 = vector.shape_cast %163 : vector<1x1x1x8xf32> to vector<1x8xf32>
    %165 = vector.broadcast %164 : vector<1x8xf32> to vector<80x8xf32>
    %166 = arith.addf %162, %165 : vector<80x8xf32>
    %167 = vector.shape_cast %152 : vector<80x8xf32> to vector<2x40x8xf32>
    %168 = arith.truncf %167 : vector<2x40x8xf32> to vector<2x40x8xbf16>
    %169 = vector.shape_cast %159 : vector<80x8xf32> to vector<2x40x8xf32>
    %170 = arith.truncf %169 : vector<2x40x8xf32> to vector<2x40x8xbf16>
    %171 = vector.shape_cast %166 : vector<80x8xf32> to vector<2x40x8xf32>
    %172 = arith.truncf %171 : vector<2x40x8xf32> to vector<2x40x8xbf16>
    "tpu.trace_start"() <{level = 10 : i32, message = "bqe,bke->bqk"}> : () -> ()
    %cst_135 = arith.constant dense<0.000000e+00> : vector<2x40x40xf32>
    %173 = tpu.matmul %168, %170, %cst_135 {dimension_numbers = #tpu.dot_dimension_numbers<[2], [2], [1], [1], [0, 0, 0, 1, 1, 1], [0], [0]>} : vector<2x40x8xbf16>, vector<2x40x8xbf16>, vector<2x40x40xf32> -> vector<2x40x40xf32>
    "tpu.trace_stop"() : () -> ()
    %cst_136 = arith.constant dense<0xFF800000> : vector<2x40xf32>
    %174 = vector.multi_reduction <maximumf>, %173, %cst_136 [2] : vector<2x40x40xf32> to vector<2x40xf32>
    %175 = vector.shape_cast %174 : vector<2x40xf32> to vector<2x40x1xf32>
    %176 = vector.broadcast %175 : vector<2x40x1xf32> to vector<2x40x40xf32>
    %177 = arith.subf %173, %176 : vector<2x40x40xf32>
    %178 = math.exp %177 : vector<2x40x40xf32>
    %cst_137 = arith.constant dense<0.000000e+00> : vector<2x40xf32>
    %179 = vector.multi_reduction <add>, %178, %cst_137 [2] : vector<2x40x40xf32> to vector<2x40xf32>
    %180 = vector.shape_cast %179 : vector<2x40xf32> to vector<2x40x1xf32>
    %181 = vector.broadcast %180 : vector<2x40x1xf32> to vector<2x40x40xf32>
    %182 = arith.divf %178, %181 : vector<2x40x40xf32>
    %183 = arith.truncf %182 : vector<2x40x40xf32> to vector<2x40x40xbf16>
    "tpu.trace_start"() <{level = 10 : i32, message = "bqk,bke->bqe"}> : () -> ()
    %cst_138 = arith.constant dense<0.000000e+00> : vector<2x40x8xf32>
    %184 = tpu.matmul %183, %172, %cst_138 {dimension_numbers = #tpu.dot_dimension_numbers<[2], [1], [1], [2], [0, 0, 0, 1, 1, 2], [0], [0]>} : vector<2x40x40xbf16>, vector<2x40x8xbf16>, vector<2x40x8xf32> -> vector<2x40x8xf32>
    "tpu.trace_stop"() : () -> ()
    %185 = vector.shape_cast %184 : vector<2x40x8xf32> to vector<80x8xf32>
    %186 = arith.truncf %185 : vector<80x8xf32> to vector<80x8xbf16>
    %c0_139 = arith.constant 0 : index
    %c3_140 = arith.constant 3 : index
    %c0_141 = arith.constant 0 : index
    %c0_142 = arith.constant 0 : index
    %187 = vector.load %arg6[%c0_139, %c3_140, %c0_141, %c0_142] : memref<2x4x8x32xbf16, #tpu.memory_space<vmem>>, vector<1x1x8x32xbf16>
    %188 = vector.shape_cast %187 : vector<1x1x8x32xbf16> to vector<8x32xbf16>
    %cst_143 = arith.constant dense<0.000000e+00> : vector<80x32xf32>
    %189 = tpu.matmul %186, %188, %cst_143 {dimension_numbers = #tpu.dot_dimension_numbers<[1], [0], [0], [1], [0, 0, 1, 1], [], []>} : vector<80x8xbf16>, vector<8x32xbf16>, vector<80x32xf32> -> vector<80x32xf32>
    %190 = arith.addf %145, %189 : vector<80x32xf32>
    %191 = arith.addf %6, %190 : vector<80x32xf32>
    %c0_144 = arith.constant 0 : index
    %c1_145 = arith.constant 1 : index
    %c0_146 = arith.constant 0 : index
    %c0_147 = arith.constant 0 : index
    %192 = vector.load %arg10[%c0_144, %c1_145, %c0_146, %c0_147] : memref<2x6x1x32xf32, #tpu.memory_space<vmem>>, vector<1x1x1x32xf32>
    %193 = vector.shape_cast %192 : vector<1x1x1x32xf32> to vector<1x32xf32>
    %c0_148 = arith.constant 0 : index
    %c2_149 = arith.constant 2 : index
    %c0_150 = arith.constant 0 : index
    %c0_151 = arith.constant 0 : index
    %194 = vector.load %arg10[%c0_148, %c2_149, %c0_150, %c0_151] : memref<2x6x1x32xf32, #tpu.memory_space<vmem>>, vector<1x1x1x32xf32>
    %195 = vector.shape_cast %194 : vector<1x1x1x32xf32> to vector<1x32xf32>
    %cst_152 = arith.constant dense<0.000000e+00> : vector<80xf32>
    %196 = vector.multi_reduction <add>, %191, %cst_152 [1] : vector<80x32xf32> to vector<80xf32>
    %197 = vector.shape_cast %196 : vector<80xf32> to vector<80x1xf32>
    %cst_153 = arith.constant 3.200000e+01 : f32
    %198 = vector.broadcast %cst_153 : f32 to vector<80x1xf32>
    %199 = arith.divf %197, %198 : vector<80x1xf32>
    %200 = vector.broadcast %199 : vector<80x1xf32> to vector<80x32xf32>
    %201 = arith.subf %191, %200 : vector<80x32xf32>
    %202 = arith.mulf %201, %201 : vector<80x32xf32>
    %cst_154 = arith.constant dense<0.000000e+00> : vector<80xf32>
    %203 = vector.multi_reduction <add>, %202, %cst_154 [1] : vector<80x32xf32> to vector<80xf32>
    %204 = vector.shape_cast %203 : vector<80xf32> to vector<80x1xf32>
    %cst_155 = arith.constant 3.200000e+01 : f32
    %205 = vector.broadcast %cst_155 : f32 to vector<80x1xf32>
    %206 = arith.divf %204, %205 : vector<80x1xf32>
    %cst_156 = arith.constant 9.99999974E-6 : f32
    %207 = vector.broadcast %cst_156 : f32 to vector<80x1xf32>
    %208 = arith.addf %206, %207 : vector<80x1xf32>
    %209 = math.rsqrt %208 : vector<80x1xf32>
    %210 = vector.broadcast %209 : vector<80x1xf32> to vector<80x32xf32>
    %211 = arith.mulf %201, %210 : vector<80x32xf32>
    %212 = vector.broadcast %193 : vector<1x32xf32> to vector<80x32xf32>
    %213 = arith.mulf %211, %212 : vector<80x32xf32>
    %214 = vector.broadcast %195 : vector<1x32xf32> to vector<80x32xf32>
    %215 = arith.addf %213, %214 : vector<80x32xf32>
    %216 = arith.truncf %215 : vector<80x32xf32> to vector<80x32xbf16>
    %c0_157 = arith.constant 0 : index
    %c0_158 = arith.constant 0 : index
    %c0_159 = arith.constant 0 : index
    %217 = vector.load %arg7[%c0_157, %c0_158, %c0_159] : memref<2x32x64xbf16, #tpu.memory_space<vmem>>, vector<1x32x64xbf16>
    %218 = vector.shape_cast %217 : vector<1x32x64xbf16> to vector<32x64xbf16>
    %cst_160 = arith.constant dense<0.000000e+00> : vector<80x64xf32>
    %219 = tpu.matmul %216, %218, %cst_160 {dimension_numbers = #tpu.dot_dimension_numbers<[1], [0], [0], [1], [0, 0, 1, 1], [], []>} : vector<80x32xbf16>, vector<32x64xbf16>, vector<80x64xf32> -> vector<80x64xf32>
    %c0_161 = arith.constant 0 : index
    %c0_162 = arith.constant 0 : index
    %c0_163 = arith.constant 0 : index
    %220 = vector.load %arg8[%c0_161, %c0_162, %c0_163] : memref<2x1x64xf32, #tpu.memory_space<vmem>>, vector<1x1x64xf32>
    %221 = vector.shape_cast %220 : vector<1x1x64xf32> to vector<1x64xf32>
    %222 = vector.broadcast %221 : vector<1x64xf32> to vector<80x64xf32>
    %223 = arith.addf %219, %222 : vector<80x64xf32>
    %cst_164 = arith.constant 0.000000e+00 : f32
    %224 = vector.broadcast %cst_164 : f32 to vector<80x64xf32>
    %225 = arith.maximumf %223, %224 : vector<80x64xf32>
    %226 = arith.truncf %225 : vector<80x64xf32> to vector<80x64xbf16>
    %c0_165 = arith.constant 0 : index
    %c0_166 = arith.constant 0 : index
    %c0_167 = arith.constant 0 : index
    %227 = vector.load %arg9[%c0_165, %c0_166, %c0_167] : memref<2x64x32xbf16, #tpu.memory_space<vmem>>, vector<1x64x32xbf16>
    %228 = vector.shape_cast %227 : vector<1x64x32xbf16> to vector<64x32xbf16>
    %cst_168 = arith.constant dense<0.000000e+00> : vector<80x32xf32>
    %229 = tpu.matmul %226, %228, %cst_168 {dimension_numbers = #tpu.dot_dimension_numbers<[1], [0], [0], [1], [0, 0, 1, 1], [], []>} : vector<80x64xbf16>, vector<64x32xbf16>, vector<80x32xf32> -> vector<80x32xf32>
    %c0_169 = arith.constant 0 : index
    %c3_170 = arith.constant 3 : index
    %c0_171 = arith.constant 0 : index
    %c0_172 = arith.constant 0 : index
    %230 = vector.load %arg10[%c0_169, %c3_170, %c0_171, %c0_172] : memref<2x6x1x32xf32, #tpu.memory_space<vmem>>, vector<1x1x1x32xf32>
    %231 = vector.shape_cast %230 : vector<1x1x1x32xf32> to vector<1x32xf32>
    %232 = vector.broadcast %231 : vector<1x32xf32> to vector<80x32xf32>
    %233 = arith.addf %229, %232 : vector<80x32xf32>
    %234 = arith.addf %215, %233 : vector<80x32xf32>
    %c0_173 = arith.constant 0 : index
    %c4_174 = arith.constant 4 : index
    %c0_175 = arith.constant 0 : index
    %c0_176 = arith.constant 0 : index
    %235 = vector.load %arg10[%c0_173, %c4_174, %c0_175, %c0_176] : memref<2x6x1x32xf32, #tpu.memory_space<vmem>>, vector<1x1x1x32xf32>
    %236 = vector.shape_cast %235 : vector<1x1x1x32xf32> to vector<1x32xf32>
    %c0_177 = arith.constant 0 : index
    %c5_178 = arith.constant 5 : index
    %c0_179 = arith.constant 0 : index
    %c0_180 = arith.constant 0 : index
    %237 = vector.load %arg10[%c0_177, %c5_178, %c0_179, %c0_180] : memref<2x6x1x32xf32, #tpu.memory_space<vmem>>, vector<1x1x1x32xf32>
    %238 = vector.shape_cast %237 : vector<1x1x1x32xf32> to vector<1x32xf32>
    %cst_181 = arith.constant dense<0.000000e+00> : vector<80xf32>
    %239 = vector.multi_reduction <add>, %234, %cst_181 [1] : vector<80x32xf32> to vector<80xf32>
    %240 = vector.shape_cast %239 : vector<80xf32> to vector<80x1xf32>
    %cst_182 = arith.constant 3.200000e+01 : f32
    %241 = vector.broadcast %cst_182 : f32 to vector<80x1xf32>
    %242 = arith.divf %240, %241 : vector<80x1xf32>
    %243 = vector.broadcast %242 : vector<80x1xf32> to vector<80x32xf32>
    %244 = arith.subf %234, %243 : vector<80x32xf32>
    %245 = arith.mulf %244, %244 : vector<80x32xf32>
    %cst_183 = arith.constant dense<0.000000e+00> : vector<80xf32>
    %246 = vector.multi_reduction <add>, %245, %cst_183 [1] : vector<80x32xf32> to vector<80xf32>
    %247 = vector.shape_cast %246 : vector<80xf32> to vector<80x1xf32>
    %cst_184 = arith.constant 3.200000e+01 : f32
    %248 = vector.broadcast %cst_184 : f32 to vector<80x1xf32>
    %249 = arith.divf %247, %248 : vector<80x1xf32>
    %cst_185 = arith.constant 9.99999974E-6 : f32
    %250 = vector.broadcast %cst_185 : f32 to vector<80x1xf32>
    %251 = arith.addf %249, %250 : vector<80x1xf32>
    %252 = math.rsqrt %251 : vector<80x1xf32>
    %253 = vector.broadcast %252 : vector<80x1xf32> to vector<80x32xf32>
    %254 = arith.mulf %244, %253 : vector<80x32xf32>
    %255 = vector.broadcast %236 : vector<1x32xf32> to vector<80x32xf32>
    %256 = arith.mulf %254, %255 : vector<80x32xf32>
    %257 = vector.broadcast %238 : vector<1x32xf32> to vector<80x32xf32>
    %258 = arith.addf %256, %257 : vector<80x32xf32>
    %259 = arith.truncf %258 : vector<80x32xf32> to vector<80x32xbf16>
    %c1_186 = arith.constant 1 : index
    %c0_187 = arith.constant 0 : index
    %c0_188 = arith.constant 0 : index
    %c0_189 = arith.constant 0 : index
    %260 = vector.load %arg10[%c1_186, %c0_187, %c0_188, %c0_189] : memref<2x6x1x32xf32, #tpu.memory_space<vmem>>, vector<1x1x1x32xf32>
    %261 = vector.shape_cast %260 : vector<1x1x1x32xf32> to vector<1x32xf32>
    %c1_190 = arith.constant 1 : index
    %c0_191 = arith.constant 0 : index
    %c0_192 = arith.constant 0 : index
    %c0_193 = arith.constant 0 : index
    %262 = vector.load %arg4[%c1_190, %c0_191, %c0_192, %c0_193] : memref<2x12x32x8xbf16, #tpu.memory_space<vmem>>, vector<1x1x32x8xbf16>
    %263 = vector.shape_cast %262 : vector<1x1x32x8xbf16> to vector<32x8xbf16>
    %cst_194 = arith.constant dense<0.000000e+00> : vector<80x8xf32>
    %264 = tpu.matmul %259, %263, %cst_194 {dimension_numbers = #tpu.dot_dimension_numbers<[1], [0], [0], [1], [0, 0, 1, 1], [], []>} : vector<80x32xbf16>, vector<32x8xbf16>, vector<80x8xf32> -> vector<80x8xf32>
    %c1_195 = arith.constant 1 : index
    %c0_196 = arith.constant 0 : index
    %c0_197 = arith.constant 0 : index
    %c0_198 = arith.constant 0 : index
    %265 = vector.load %arg5[%c1_195, %c0_196, %c0_197, %c0_198] : memref<2x12x1x8xf32, #tpu.memory_space<vmem>>, vector<1x1x1x8xf32>
    %266 = vector.shape_cast %265 : vector<1x1x1x8xf32> to vector<1x8xf32>
    %267 = vector.broadcast %266 : vector<1x8xf32> to vector<80x8xf32>
    %268 = arith.addf %264, %267 : vector<80x8xf32>
    %c1_199 = arith.constant 1 : index
    %c4_200 = arith.constant 4 : index
    %c0_201 = arith.constant 0 : index
    %c0_202 = arith.constant 0 : index
    %269 = vector.load %arg4[%c1_199, %c4_200, %c0_201, %c0_202] : memref<2x12x32x8xbf16, #tpu.memory_space<vmem>>, vector<1x1x32x8xbf16>
    %270 = vector.shape_cast %269 : vector<1x1x32x8xbf16> to vector<32x8xbf16>
    %cst_203 = arith.constant dense<0.000000e+00> : vector<80x8xf32>
    %271 = tpu.matmul %259, %270, %cst_203 {dimension_numbers = #tpu.dot_dimension_numbers<[1], [0], [0], [1], [0, 0, 1, 1], [], []>} : vector<80x32xbf16>, vector<32x8xbf16>, vector<80x8xf32> -> vector<80x8xf32>
    %c1_204 = arith.constant 1 : index
    %c4_205 = arith.constant 4 : index
    %c0_206 = arith.constant 0 : index
    %c0_207 = arith.constant 0 : index
    %272 = vector.load %arg5[%c1_204, %c4_205, %c0_206, %c0_207] : memref<2x12x1x8xf32, #tpu.memory_space<vmem>>, vector<1x1x1x8xf32>
    %273 = vector.shape_cast %272 : vector<1x1x1x8xf32> to vector<1x8xf32>
    %274 = vector.broadcast %273 : vector<1x8xf32> to vector<80x8xf32>
    %275 = arith.addf %271, %274 : vector<80x8xf32>
    %c1_208 = arith.constant 1 : index
    %c8_209 = arith.constant 8 : index
    %c0_210 = arith.constant 0 : index
    %c0_211 = arith.constant 0 : index
    %276 = vector.load %arg4[%c1_208, %c8_209, %c0_210, %c0_211] : memref<2x12x32x8xbf16, #tpu.memory_space<vmem>>, vector<1x1x32x8xbf16>
    %277 = vector.shape_cast %276 : vector<1x1x32x8xbf16> to vector<32x8xbf16>
    %cst_212 = arith.constant dense<0.000000e+00> : vector<80x8xf32>
    %278 = tpu.matmul %259, %277, %cst_212 {dimension_numbers = #tpu.dot_dimension_numbers<[1], [0], [0], [1], [0, 0, 1, 1], [], []>} : vector<80x32xbf16>, vector<32x8xbf16>, vector<80x8xf32> -> vector<80x8xf32>
    %c1_213 = arith.constant 1 : index
    %c8_214 = arith.constant 8 : index
    %c0_215 = arith.constant 0 : index
    %c0_216 = arith.constant 0 : index
    %279 = vector.load %arg5[%c1_213, %c8_214, %c0_215, %c0_216] : memref<2x12x1x8xf32, #tpu.memory_space<vmem>>, vector<1x1x1x8xf32>
    %280 = vector.shape_cast %279 : vector<1x1x1x8xf32> to vector<1x8xf32>
    %281 = vector.broadcast %280 : vector<1x8xf32> to vector<80x8xf32>
    %282 = arith.addf %278, %281 : vector<80x8xf32>
    %283 = vector.shape_cast %268 : vector<80x8xf32> to vector<2x40x8xf32>
    %284 = arith.truncf %283 : vector<2x40x8xf32> to vector<2x40x8xbf16>
    %285 = vector.shape_cast %275 : vector<80x8xf32> to vector<2x40x8xf32>
    %286 = arith.truncf %285 : vector<2x40x8xf32> to vector<2x40x8xbf16>
    %287 = vector.shape_cast %282 : vector<80x8xf32> to vector<2x40x8xf32>
    %288 = arith.truncf %287 : vector<2x40x8xf32> to vector<2x40x8xbf16>
    "tpu.trace_start"() <{level = 10 : i32, message = "bqe,bke->bqk"}> : () -> ()
    %cst_217 = arith.constant dense<0.000000e+00> : vector<2x40x40xf32>
    %289 = tpu.matmul %284, %286, %cst_217 {dimension_numbers = #tpu.dot_dimension_numbers<[2], [2], [1], [1], [0, 0, 0, 1, 1, 1], [0], [0]>} : vector<2x40x8xbf16>, vector<2x40x8xbf16>, vector<2x40x40xf32> -> vector<2x40x40xf32>
    "tpu.trace_stop"() : () -> ()
    %cst_218 = arith.constant dense<0xFF800000> : vector<2x40xf32>
    %290 = vector.multi_reduction <maximumf>, %289, %cst_218 [2] : vector<2x40x40xf32> to vector<2x40xf32>
    %291 = vector.shape_cast %290 : vector<2x40xf32> to vector<2x40x1xf32>
    %292 = vector.broadcast %291 : vector<2x40x1xf32> to vector<2x40x40xf32>
    %293 = arith.subf %289, %292 : vector<2x40x40xf32>
    %294 = math.exp %293 : vector<2x40x40xf32>
    %cst_219 = arith.constant dense<0.000000e+00> : vector<2x40xf32>
    %295 = vector.multi_reduction <add>, %294, %cst_219 [2] : vector<2x40x40xf32> to vector<2x40xf32>
    %296 = vector.shape_cast %295 : vector<2x40xf32> to vector<2x40x1xf32>
    %297 = vector.broadcast %296 : vector<2x40x1xf32> to vector<2x40x40xf32>
    %298 = arith.divf %294, %297 : vector<2x40x40xf32>
    %299 = arith.truncf %298 : vector<2x40x40xf32> to vector<2x40x40xbf16>
    "tpu.trace_start"() <{level = 10 : i32, message = "bqk,bke->bqe"}> : () -> ()
    %cst_220 = arith.constant dense<0.000000e+00> : vector<2x40x8xf32>
    %300 = tpu.matmul %299, %288, %cst_220 {dimension_numbers = #tpu.dot_dimension_numbers<[2], [1], [1], [2], [0, 0, 0, 1, 1, 2], [0], [0]>} : vector<2x40x40xbf16>, vector<2x40x8xbf16>, vector<2x40x8xf32> -> vector<2x40x8xf32>
    "tpu.trace_stop"() : () -> ()
    %301 = vector.shape_cast %300 : vector<2x40x8xf32> to vector<80x8xf32>
    %302 = arith.truncf %301 : vector<80x8xf32> to vector<80x8xbf16>
    %c1_221 = arith.constant 1 : index
    %c0_222 = arith.constant 0 : index
    %c0_223 = arith.constant 0 : index
    %c0_224 = arith.constant 0 : index
    %303 = vector.load %arg6[%c1_221, %c0_222, %c0_223, %c0_224] : memref<2x4x8x32xbf16, #tpu.memory_space<vmem>>, vector<1x1x8x32xbf16>
    %304 = vector.shape_cast %303 : vector<1x1x8x32xbf16> to vector<8x32xbf16>
    %cst_225 = arith.constant dense<0.000000e+00> : vector<80x32xf32>
    %305 = tpu.matmul %302, %304, %cst_225 {dimension_numbers = #tpu.dot_dimension_numbers<[1], [0], [0], [1], [0, 0, 1, 1], [], []>} : vector<80x8xbf16>, vector<8x32xbf16>, vector<80x32xf32> -> vector<80x32xf32>
    %306 = vector.broadcast %261 : vector<1x32xf32> to vector<80x32xf32>
    %307 = arith.addf %306, %305 : vector<80x32xf32>
    %c1_226 = arith.constant 1 : index
    %c1_227 = arith.constant 1 : index
    %c0_228 = arith.constant 0 : index
    %c0_229 = arith.constant 0 : index
    %308 = vector.load %arg4[%c1_226, %c1_227, %c0_228, %c0_229] : memref<2x12x32x8xbf16, #tpu.memory_space<vmem>>, vector<1x1x32x8xbf16>
    %309 = vector.shape_cast %308 : vector<1x1x32x8xbf16> to vector<32x8xbf16>
    %cst_230 = arith.constant dense<0.000000e+00> : vector<80x8xf32>
    %310 = tpu.matmul %259, %309, %cst_230 {dimension_numbers = #tpu.dot_dimension_numbers<[1], [0], [0], [1], [0, 0, 1, 1], [], []>} : vector<80x32xbf16>, vector<32x8xbf16>, vector<80x8xf32> -> vector<80x8xf32>
    %c1_231 = arith.constant 1 : index
    %c1_232 = arith.constant 1 : index
    %c0_233 = arith.constant 0 : index
    %c0_234 = arith.constant 0 : index
    %311 = vector.load %arg5[%c1_231, %c1_232, %c0_233, %c0_234] : memref<2x12x1x8xf32, #tpu.memory_space<vmem>>, vector<1x1x1x8xf32>
    %312 = vector.shape_cast %311 : vector<1x1x1x8xf32> to vector<1x8xf32>
    %313 = vector.broadcast %312 : vector<1x8xf32> to vector<80x8xf32>
    %314 = arith.addf %310, %313 : vector<80x8xf32>
    %c1_235 = arith.constant 1 : index
    %c5_236 = arith.constant 5 : index
    %c0_237 = arith.constant 0 : index
    %c0_238 = arith.constant 0 : index
    %315 = vector.load %arg4[%c1_235, %c5_236, %c0_237, %c0_238] : memref<2x12x32x8xbf16, #tpu.memory_space<vmem>>, vector<1x1x32x8xbf16>
    %316 = vector.shape_cast %315 : vector<1x1x32x8xbf16> to vector<32x8xbf16>
    %cst_239 = arith.constant dense<0.000000e+00> : vector<80x8xf32>
    %317 = tpu.matmul %259, %316, %cst_239 {dimension_numbers = #tpu.dot_dimension_numbers<[1], [0], [0], [1], [0, 0, 1, 1], [], []>} : vector<80x32xbf16>, vector<32x8xbf16>, vector<80x8xf32> -> vector<80x8xf32>
    %c1_240 = arith.constant 1 : index
    %c5_241 = arith.constant 5 : index
    %c0_242 = arith.constant 0 : index
    %c0_243 = arith.constant 0 : index
    %318 = vector.load %arg5[%c1_240, %c5_241, %c0_242, %c0_243] : memref<2x12x1x8xf32, #tpu.memory_space<vmem>>, vector<1x1x1x8xf32>
    %319 = vector.shape_cast %318 : vector<1x1x1x8xf32> to vector<1x8xf32>
    %320 = vector.broadcast %319 : vector<1x8xf32> to vector<80x8xf32>
    %321 = arith.addf %317, %320 : vector<80x8xf32>
    %c1_244 = arith.constant 1 : index
    %c9_245 = arith.constant 9 : index
    %c0_246 = arith.constant 0 : index
    %c0_247 = arith.constant 0 : index
    %322 = vector.load %arg4[%c1_244, %c9_245, %c0_246, %c0_247] : memref<2x12x32x8xbf16, #tpu.memory_space<vmem>>, vector<1x1x32x8xbf16>
    %323 = vector.shape_cast %322 : vector<1x1x32x8xbf16> to vector<32x8xbf16>
    %cst_248 = arith.constant dense<0.000000e+00> : vector<80x8xf32>
    %324 = tpu.matmul %259, %323, %cst_248 {dimension_numbers = #tpu.dot_dimension_numbers<[1], [0], [0], [1], [0, 0, 1, 1], [], []>} : vector<80x32xbf16>, vector<32x8xbf16>, vector<80x8xf32> -> vector<80x8xf32>
    %c1_249 = arith.constant 1 : index
    %c9_250 = arith.constant 9 : index
    %c0_251 = arith.constant 0 : index
    %c0_252 = arith.constant 0 : index
    %325 = vector.load %arg5[%c1_249, %c9_250, %c0_251, %c0_252] : memref<2x12x1x8xf32, #tpu.memory_space<vmem>>, vector<1x1x1x8xf32>
    %326 = vector.shape_cast %325 : vector<1x1x1x8xf32> to vector<1x8xf32>
    %327 = vector.broadcast %326 : vector<1x8xf32> to vector<80x8xf32>
    %328 = arith.addf %324, %327 : vector<80x8xf32>
    %329 = vector.shape_cast %314 : vector<80x8xf32> to vector<2x40x8xf32>
    %330 = arith.truncf %329 : vector<2x40x8xf32> to vector<2x40x8xbf16>
    %331 = vector.shape_cast %321 : vector<80x8xf32> to vector<2x40x8xf32>
    %332 = arith.truncf %331 : vector<2x40x8xf32> to vector<2x40x8xbf16>
    %333 = vector.shape_cast %328 : vector<80x8xf32> to vector<2x40x8xf32>
    %334 = arith.truncf %333 : vector<2x40x8xf32> to vector<2x40x8xbf16>
    "tpu.trace_start"() <{level = 10 : i32, message = "bqe,bke->bqk"}> : () -> ()
    %cst_253 = arith.constant dense<0.000000e+00> : vector<2x40x40xf32>
    %335 = tpu.matmul %330, %332, %cst_253 {dimension_numbers = #tpu.dot_dimension_numbers<[2], [2], [1], [1], [0, 0, 0, 1, 1, 1], [0], [0]>} : vector<2x40x8xbf16>, vector<2x40x8xbf16>, vector<2x40x40xf32> -> vector<2x40x40xf32>
    "tpu.trace_stop"() : () -> ()
    %cst_254 = arith.constant dense<0xFF800000> : vector<2x40xf32>
    %336 = vector.multi_reduction <maximumf>, %335, %cst_254 [2] : vector<2x40x40xf32> to vector<2x40xf32>
    %337 = vector.shape_cast %336 : vector<2x40xf32> to vector<2x40x1xf32>
    %338 = vector.broadcast %337 : vector<2x40x1xf32> to vector<2x40x40xf32>
    %339 = arith.subf %335, %338 : vector<2x40x40xf32>
    %340 = math.exp %339 : vector<2x40x40xf32>
    %cst_255 = arith.constant dense<0.000000e+00> : vector<2x40xf32>
    %341 = vector.multi_reduction <add>, %340, %cst_255 [2] : vector<2x40x40xf32> to vector<2x40xf32>
    %342 = vector.shape_cast %341 : vector<2x40xf32> to vector<2x40x1xf32>
    %343 = vector.broadcast %342 : vector<2x40x1xf32> to vector<2x40x40xf32>
    %344 = arith.divf %340, %343 : vector<2x40x40xf32>
    %345 = arith.truncf %344 : vector<2x40x40xf32> to vector<2x40x40xbf16>
    "tpu.trace_start"() <{level = 10 : i32, message = "bqk,bke->bqe"}> : () -> ()
    %cst_256 = arith.constant dense<0.000000e+00> : vector<2x40x8xf32>
    %346 = tpu.matmul %345, %334, %cst_256 {dimension_numbers = #tpu.dot_dimension_numbers<[2], [1], [1], [2], [0, 0, 0, 1, 1, 2], [0], [0]>} : vector<2x40x40xbf16>, vector<2x40x8xbf16>, vector<2x40x8xf32> -> vector<2x40x8xf32>
    "tpu.trace_stop"() : () -> ()
    %347 = vector.shape_cast %346 : vector<2x40x8xf32> to vector<80x8xf32>
    %348 = arith.truncf %347 : vector<80x8xf32> to vector<80x8xbf16>
    %c1_257 = arith.constant 1 : index
    %c1_258 = arith.constant 1 : index
    %c0_259 = arith.constant 0 : index
    %c0_260 = arith.constant 0 : index
    %349 = vector.load %arg6[%c1_257, %c1_258, %c0_259, %c0_260] : memref<2x4x8x32xbf16, #tpu.memory_space<vmem>>, vector<1x1x8x32xbf16>
    %350 = vector.shape_cast %349 : vector<1x1x8x32xbf16> to vector<8x32xbf16>
    %cst_261 = arith.constant dense<0.000000e+00> : vector<80x32xf32>
    %351 = tpu.matmul %348, %350, %cst_261 {dimension_numbers = #tpu.dot_dimension_numbers<[1], [0], [0], [1], [0, 0, 1, 1], [], []>} : vector<80x8xbf16>, vector<8x32xbf16>, vector<80x32xf32> -> vector<80x32xf32>
    %352 = arith.addf %307, %351 : vector<80x32xf32>
    %c1_262 = arith.constant 1 : index
    %c2_263 = arith.constant 2 : index
    %c0_264 = arith.constant 0 : index
    %c0_265 = arith.constant 0 : index
    %353 = vector.load %arg4[%c1_262, %c2_263, %c0_264, %c0_265] : memref<2x12x32x8xbf16, #tpu.memory_space<vmem>>, vector<1x1x32x8xbf16>
    %354 = vector.shape_cast %353 : vector<1x1x32x8xbf16> to vector<32x8xbf16>
    %cst_266 = arith.constant dense<0.000000e+00> : vector<80x8xf32>
    %355 = tpu.matmul %259, %354, %cst_266 {dimension_numbers = #tpu.dot_dimension_numbers<[1], [0], [0], [1], [0, 0, 1, 1], [], []>} : vector<80x32xbf16>, vector<32x8xbf16>, vector<80x8xf32> -> vector<80x8xf32>
    %c1_267 = arith.constant 1 : index
    %c2_268 = arith.constant 2 : index
    %c0_269 = arith.constant 0 : index
    %c0_270 = arith.constant 0 : index
    %356 = vector.load %arg5[%c1_267, %c2_268, %c0_269, %c0_270] : memref<2x12x1x8xf32, #tpu.memory_space<vmem>>, vector<1x1x1x8xf32>
    %357 = vector.shape_cast %356 : vector<1x1x1x8xf32> to vector<1x8xf32>
    %358 = vector.broadcast %357 : vector<1x8xf32> to vector<80x8xf32>
    %359 = arith.addf %355, %358 : vector<80x8xf32>
    %c1_271 = arith.constant 1 : index
    %c6_272 = arith.constant 6 : index
    %c0_273 = arith.constant 0 : index
    %c0_274 = arith.constant 0 : index
    %360 = vector.load %arg4[%c1_271, %c6_272, %c0_273, %c0_274] : memref<2x12x32x8xbf16, #tpu.memory_space<vmem>>, vector<1x1x32x8xbf16>
    %361 = vector.shape_cast %360 : vector<1x1x32x8xbf16> to vector<32x8xbf16>
    %cst_275 = arith.constant dense<0.000000e+00> : vector<80x8xf32>
    %362 = tpu.matmul %259, %361, %cst_275 {dimension_numbers = #tpu.dot_dimension_numbers<[1], [0], [0], [1], [0, 0, 1, 1], [], []>} : vector<80x32xbf16>, vector<32x8xbf16>, vector<80x8xf32> -> vector<80x8xf32>
    %c1_276 = arith.constant 1 : index
    %c6_277 = arith.constant 6 : index
    %c0_278 = arith.constant 0 : index
    %c0_279 = arith.constant 0 : index
    %363 = vector.load %arg5[%c1_276, %c6_277, %c0_278, %c0_279] : memref<2x12x1x8xf32, #tpu.memory_space<vmem>>, vector<1x1x1x8xf32>
    %364 = vector.shape_cast %363 : vector<1x1x1x8xf32> to vector<1x8xf32>
    %365 = vector.broadcast %364 : vector<1x8xf32> to vector<80x8xf32>
    %366 = arith.addf %362, %365 : vector<80x8xf32>
    %c1_280 = arith.constant 1 : index
    %c10_281 = arith.constant 10 : index
    %c0_282 = arith.constant 0 : index
    %c0_283 = arith.constant 0 : index
    %367 = vector.load %arg4[%c1_280, %c10_281, %c0_282, %c0_283] : memref<2x12x32x8xbf16, #tpu.memory_space<vmem>>, vector<1x1x32x8xbf16>
    %368 = vector.shape_cast %367 : vector<1x1x32x8xbf16> to vector<32x8xbf16>
    %cst_284 = arith.constant dense<0.000000e+00> : vector<80x8xf32>
    %369 = tpu.matmul %259, %368, %cst_284 {dimension_numbers = #tpu.dot_dimension_numbers<[1], [0], [0], [1], [0, 0, 1, 1], [], []>} : vector<80x32xbf16>, vector<32x8xbf16>, vector<80x8xf32> -> vector<80x8xf32>
    %c1_285 = arith.constant 1 : index
    %c10_286 = arith.constant 10 : index
    %c0_287 = arith.constant 0 : index
    %c0_288 = arith.constant 0 : index
    %370 = vector.load %arg5[%c1_285, %c10_286, %c0_287, %c0_288] : memref<2x12x1x8xf32, #tpu.memory_space<vmem>>, vector<1x1x1x8xf32>
    %371 = vector.shape_cast %370 : vector<1x1x1x8xf32> to vector<1x8xf32>
    %372 = vector.broadcast %371 : vector<1x8xf32> to vector<80x8xf32>
    %373 = arith.addf %369, %372 : vector<80x8xf32>
    %374 = vector.shape_cast %359 : vector<80x8xf32> to vector<2x40x8xf32>
    %375 = arith.truncf %374 : vector<2x40x8xf32> to vector<2x40x8xbf16>
    %376 = vector.shape_cast %366 : vector<80x8xf32> to vector<2x40x8xf32>
    %377 = arith.truncf %376 : vector<2x40x8xf32> to vector<2x40x8xbf16>
    %378 = vector.shape_cast %373 : vector<80x8xf32> to vector<2x40x8xf32>
    %379 = arith.truncf %378 : vector<2x40x8xf32> to vector<2x40x8xbf16>
    "tpu.trace_start"() <{level = 10 : i32, message = "bqe,bke->bqk"}> : () -> ()
    %cst_289 = arith.constant dense<0.000000e+00> : vector<2x40x40xf32>
    %380 = tpu.matmul %375, %377, %cst_289 {dimension_numbers = #tpu.dot_dimension_numbers<[2], [2], [1], [1], [0, 0, 0, 1, 1, 1], [0], [0]>} : vector<2x40x8xbf16>, vector<2x40x8xbf16>, vector<2x40x40xf32> -> vector<2x40x40xf32>
    "tpu.trace_stop"() : () -> ()
    %cst_290 = arith.constant dense<0xFF800000> : vector<2x40xf32>
    %381 = vector.multi_reduction <maximumf>, %380, %cst_290 [2] : vector<2x40x40xf32> to vector<2x40xf32>
    %382 = vector.shape_cast %381 : vector<2x40xf32> to vector<2x40x1xf32>
    %383 = vector.broadcast %382 : vector<2x40x1xf32> to vector<2x40x40xf32>
    %384 = arith.subf %380, %383 : vector<2x40x40xf32>
    %385 = math.exp %384 : vector<2x40x40xf32>
    %cst_291 = arith.constant dense<0.000000e+00> : vector<2x40xf32>
    %386 = vector.multi_reduction <add>, %385, %cst_291 [2] : vector<2x40x40xf32> to vector<2x40xf32>
    %387 = vector.shape_cast %386 : vector<2x40xf32> to vector<2x40x1xf32>
    %388 = vector.broadcast %387 : vector<2x40x1xf32> to vector<2x40x40xf32>
    %389 = arith.divf %385, %388 : vector<2x40x40xf32>
    %390 = arith.truncf %389 : vector<2x40x40xf32> to vector<2x40x40xbf16>
    "tpu.trace_start"() <{level = 10 : i32, message = "bqk,bke->bqe"}> : () -> ()
    %cst_292 = arith.constant dense<0.000000e+00> : vector<2x40x8xf32>
    %391 = tpu.matmul %390, %379, %cst_292 {dimension_numbers = #tpu.dot_dimension_numbers<[2], [1], [1], [2], [0, 0, 0, 1, 1, 2], [0], [0]>} : vector<2x40x40xbf16>, vector<2x40x8xbf16>, vector<2x40x8xf32> -> vector<2x40x8xf32>
    "tpu.trace_stop"() : () -> ()
    %392 = vector.shape_cast %391 : vector<2x40x8xf32> to vector<80x8xf32>
    %393 = arith.truncf %392 : vector<80x8xf32> to vector<80x8xbf16>
    %c1_293 = arith.constant 1 : index
    %c2_294 = arith.constant 2 : index
    %c0_295 = arith.constant 0 : index
    %c0_296 = arith.constant 0 : index
    %394 = vector.load %arg6[%c1_293, %c2_294, %c0_295, %c0_296] : memref<2x4x8x32xbf16, #tpu.memory_space<vmem>>, vector<1x1x8x32xbf16>
    %395 = vector.shape_cast %394 : vector<1x1x8x32xbf16> to vector<8x32xbf16>
    %cst_297 = arith.constant dense<0.000000e+00> : vector<80x32xf32>
    %396 = tpu.matmul %393, %395, %cst_297 {dimension_numbers = #tpu.dot_dimension_numbers<[1], [0], [0], [1], [0, 0, 1, 1], [], []>} : vector<80x8xbf16>, vector<8x32xbf16>, vector<80x32xf32> -> vector<80x32xf32>
    %397 = arith.addf %352, %396 : vector<80x32xf32>
    %c1_298 = arith.constant 1 : index
    %c3_299 = arith.constant 3 : index
    %c0_300 = arith.constant 0 : index
    %c0_301 = arith.constant 0 : index
    %398 = vector.load %arg4[%c1_298, %c3_299, %c0_300, %c0_301] : memref<2x12x32x8xbf16, #tpu.memory_space<vmem>>, vector<1x1x32x8xbf16>
    %399 = vector.shape_cast %398 : vector<1x1x32x8xbf16> to vector<32x8xbf16>
    %cst_302 = arith.constant dense<0.000000e+00> : vector<80x8xf32>
    %400 = tpu.matmul %259, %399, %cst_302 {dimension_numbers = #tpu.dot_dimension_numbers<[1], [0], [0], [1], [0, 0, 1, 1], [], []>} : vector<80x32xbf16>, vector<32x8xbf16>, vector<80x8xf32> -> vector<80x8xf32>
    %c1_303 = arith.constant 1 : index
    %c3_304 = arith.constant 3 : index
    %c0_305 = arith.constant 0 : index
    %c0_306 = arith.constant 0 : index
    %401 = vector.load %arg5[%c1_303, %c3_304, %c0_305, %c0_306] : memref<2x12x1x8xf32, #tpu.memory_space<vmem>>, vector<1x1x1x8xf32>
    %402 = vector.shape_cast %401 : vector<1x1x1x8xf32> to vector<1x8xf32>
    %403 = vector.broadcast %402 : vector<1x8xf32> to vector<80x8xf32>
    %404 = arith.addf %400, %403 : vector<80x8xf32>
    %c1_307 = arith.constant 1 : index
    %c7_308 = arith.constant 7 : index
    %c0_309 = arith.constant 0 : index
    %c0_310 = arith.constant 0 : index
    %405 = vector.load %arg4[%c1_307, %c7_308, %c0_309, %c0_310] : memref<2x12x32x8xbf16, #tpu.memory_space<vmem>>, vector<1x1x32x8xbf16>
    %406 = vector.shape_cast %405 : vector<1x1x32x8xbf16> to vector<32x8xbf16>
    %cst_311 = arith.constant dense<0.000000e+00> : vector<80x8xf32>
    %407 = tpu.matmul %259, %406, %cst_311 {dimension_numbers = #tpu.dot_dimension_numbers<[1], [0], [0], [1], [0, 0, 1, 1], [], []>} : vector<80x32xbf16>, vector<32x8xbf16>, vector<80x8xf32> -> vector<80x8xf32>
    %c1_312 = arith.constant 1 : index
    %c7_313 = arith.constant 7 : index
    %c0_314 = arith.constant 0 : index
    %c0_315 = arith.constant 0 : index
    %408 = vector.load %arg5[%c1_312, %c7_313, %c0_314, %c0_315] : memref<2x12x1x8xf32, #tpu.memory_space<vmem>>, vector<1x1x1x8xf32>
    %409 = vector.shape_cast %408 : vector<1x1x1x8xf32> to vector<1x8xf32>
    %410 = vector.broadcast %409 : vector<1x8xf32> to vector<80x8xf32>
    %411 = arith.addf %407, %410 : vector<80x8xf32>
    %c1_316 = arith.constant 1 : index
    %c11_317 = arith.constant 11 : index
    %c0_318 = arith.constant 0 : index
    %c0_319 = arith.constant 0 : index
    %412 = vector.load %arg4[%c1_316, %c11_317, %c0_318, %c0_319] : memref<2x12x32x8xbf16, #tpu.memory_space<vmem>>, vector<1x1x32x8xbf16>
    %413 = vector.shape_cast %412 : vector<1x1x32x8xbf16> to vector<32x8xbf16>
    %cst_320 = arith.constant dense<0.000000e+00> : vector<80x8xf32>
    %414 = tpu.matmul %259, %413, %cst_320 {dimension_numbers = #tpu.dot_dimension_numbers<[1], [0], [0], [1], [0, 0, 1, 1], [], []>} : vector<80x32xbf16>, vector<32x8xbf16>, vector<80x8xf32> -> vector<80x8xf32>
    %c1_321 = arith.constant 1 : index
    %c11_322 = arith.constant 11 : index
    %c0_323 = arith.constant 0 : index
    %c0_324 = arith.constant 0 : index
    %415 = vector.load %arg5[%c1_321, %c11_322, %c0_323, %c0_324] : memref<2x12x1x8xf32, #tpu.memory_space<vmem>>, vector<1x1x1x8xf32>
    %416 = vector.shape_cast %415 : vector<1x1x1x8xf32> to vector<1x8xf32>
    %417 = vector.broadcast %416 : vector<1x8xf32> to vector<80x8xf32>
    %418 = arith.addf %414, %417 : vector<80x8xf32>
    %419 = vector.shape_cast %404 : vector<80x8xf32> to vector<2x40x8xf32>
    %420 = arith.truncf %419 : vector<2x40x8xf32> to vector<2x40x8xbf16>
    %421 = vector.shape_cast %411 : vector<80x8xf32> to vector<2x40x8xf32>
    %422 = arith.truncf %421 : vector<2x40x8xf32> to vector<2x40x8xbf16>
    %423 = vector.shape_cast %418 : vector<80x8xf32> to vector<2x40x8xf32>
    %424 = arith.truncf %423 : vector<2x40x8xf32> to vector<2x40x8xbf16>
    "tpu.trace_start"() <{level = 10 : i32, message = "bqe,bke->bqk"}> : () -> ()
    %cst_325 = arith.constant dense<0.000000e+00> : vector<2x40x40xf32>
    %425 = tpu.matmul %420, %422, %cst_325 {dimension_numbers = #tpu.dot_dimension_numbers<[2], [2], [1], [1], [0, 0, 0, 1, 1, 1], [0], [0]>} : vector<2x40x8xbf16>, vector<2x40x8xbf16>, vector<2x40x40xf32> -> vector<2x40x40xf32>
    "tpu.trace_stop"() : () -> ()
    %cst_326 = arith.constant dense<0xFF800000> : vector<2x40xf32>
    %426 = vector.multi_reduction <maximumf>, %425, %cst_326 [2] : vector<2x40x40xf32> to vector<2x40xf32>
    %427 = vector.shape_cast %426 : vector<2x40xf32> to vector<2x40x1xf32>
    %428 = vector.broadcast %427 : vector<2x40x1xf32> to vector<2x40x40xf32>
    %429 = arith.subf %425, %428 : vector<2x40x40xf32>
    %430 = math.exp %429 : vector<2x40x40xf32>
    %cst_327 = arith.constant dense<0.000000e+00> : vector<2x40xf32>
    %431 = vector.multi_reduction <add>, %430, %cst_327 [2] : vector<2x40x40xf32> to vector<2x40xf32>
    %432 = vector.shape_cast %431 : vector<2x40xf32> to vector<2x40x1xf32>
    %433 = vector.broadcast %432 : vector<2x40x1xf32> to vector<2x40x40xf32>
    %434 = arith.divf %430, %433 : vector<2x40x40xf32>
    %435 = arith.truncf %434 : vector<2x40x40xf32> to vector<2x40x40xbf16>
    "tpu.trace_start"() <{level = 10 : i32, message = "bqk,bke->bqe"}> : () -> ()
    %cst_328 = arith.constant dense<0.000000e+00> : vector<2x40x8xf32>
    %436 = tpu.matmul %435, %424, %cst_328 {dimension_numbers = #tpu.dot_dimension_numbers<[2], [1], [1], [2], [0, 0, 0, 1, 1, 2], [0], [0]>} : vector<2x40x40xbf16>, vector<2x40x8xbf16>, vector<2x40x8xf32> -> vector<2x40x8xf32>
    "tpu.trace_stop"() : () -> ()
    %437 = vector.shape_cast %436 : vector<2x40x8xf32> to vector<80x8xf32>
    %438 = arith.truncf %437 : vector<80x8xf32> to vector<80x8xbf16>
    %c1_329 = arith.constant 1 : index
    %c3_330 = arith.constant 3 : index
    %c0_331 = arith.constant 0 : index
    %c0_332 = arith.constant 0 : index
    %439 = vector.load %arg6[%c1_329, %c3_330, %c0_331, %c0_332] : memref<2x4x8x32xbf16, #tpu.memory_space<vmem>>, vector<1x1x8x32xbf16>
    %440 = vector.shape_cast %439 : vector<1x1x8x32xbf16> to vector<8x32xbf16>
    %cst_333 = arith.constant dense<0.000000e+00> : vector<80x32xf32>
    %441 = tpu.matmul %438, %440, %cst_333 {dimension_numbers = #tpu.dot_dimension_numbers<[1], [0], [0], [1], [0, 0, 1, 1], [], []>} : vector<80x8xbf16>, vector<8x32xbf16>, vector<80x32xf32> -> vector<80x32xf32>
    %442 = arith.addf %397, %441 : vector<80x32xf32>
    %443 = arith.addf %258, %442 : vector<80x32xf32>
    %c1_334 = arith.constant 1 : index
    %c1_335 = arith.constant 1 : index
    %c0_336 = arith.constant 0 : index
    %c0_337 = arith.constant 0 : index
    %444 = vector.load %arg10[%c1_334, %c1_335, %c0_336, %c0_337] : memref<2x6x1x32xf32, #tpu.memory_space<vmem>>, vector<1x1x1x32xf32>
    %445 = vector.shape_cast %444 : vector<1x1x1x32xf32> to vector<1x32xf32>
    %c1_338 = arith.constant 1 : index
    %c2_339 = arith.constant 2 : index
    %c0_340 = arith.constant 0 : index
    %c0_341 = arith.constant 0 : index
    %446 = vector.load %arg10[%c1_338, %c2_339, %c0_340, %c0_341] : memref<2x6x1x32xf32, #tpu.memory_space<vmem>>, vector<1x1x1x32xf32>
    %447 = vector.shape_cast %446 : vector<1x1x1x32xf32> to vector<1x32xf32>
    %cst_342 = arith.constant dense<0.000000e+00> : vector<80xf32>
    %448 = vector.multi_reduction <add>, %443, %cst_342 [1] : vector<80x32xf32> to vector<80xf32>
    %449 = vector.shape_cast %448 : vector<80xf32> to vector<80x1xf32>
    %cst_343 = arith.constant 3.200000e+01 : f32
    %450 = vector.broadcast %cst_343 : f32 to vector<80x1xf32>
    %451 = arith.divf %449, %450 : vector<80x1xf32>
    %452 = vector.broadcast %451 : vector<80x1xf32> to vector<80x32xf32>
    %453 = arith.subf %443, %452 : vector<80x32xf32>
    %454 = arith.mulf %453, %453 : vector<80x32xf32>
    %cst_344 = arith.constant dense<0.000000e+00> : vector<80xf32>
    %455 = vector.multi_reduction <add>, %454, %cst_344 [1] : vector<80x32xf32> to vector<80xf32>
    %456 = vector.shape_cast %455 : vector<80xf32> to vector<80x1xf32>
    %cst_345 = arith.constant 3.200000e+01 : f32
    %457 = vector.broadcast %cst_345 : f32 to vector<80x1xf32>
    %458 = arith.divf %456, %457 : vector<80x1xf32>
    %cst_346 = arith.constant 9.99999974E-6 : f32
    %459 = vector.broadcast %cst_346 : f32 to vector<80x1xf32>
    %460 = arith.addf %458, %459 : vector<80x1xf32>
    %461 = math.rsqrt %460 : vector<80x1xf32>
    %462 = vector.broadcast %461 : vector<80x1xf32> to vector<80x32xf32>
    %463 = arith.mulf %453, %462 : vector<80x32xf32>
    %464 = vector.broadcast %445 : vector<1x32xf32> to vector<80x32xf32>
    %465 = arith.mulf %463, %464 : vector<80x32xf32>
    %466 = vector.broadcast %447 : vector<1x32xf32> to vector<80x32xf32>
    %467 = arith.addf %465, %466 : vector<80x32xf32>
    %468 = arith.truncf %467 : vector<80x32xf32> to vector<80x32xbf16>
    %c1_347 = arith.constant 1 : index
    %c0_348 = arith.constant 0 : index
    %c0_349 = arith.constant 0 : index
    %469 = vector.load %arg7[%c1_347, %c0_348, %c0_349] : memref<2x32x64xbf16, #tpu.memory_space<vmem>>, vector<1x32x64xbf16>
    %470 = vector.shape_cast %469 : vector<1x32x64xbf16> to vector<32x64xbf16>
    %cst_350 = arith.constant dense<0.000000e+00> : vector<80x64xf32>
    %471 = tpu.matmul %468, %470, %cst_350 {dimension_numbers = #tpu.dot_dimension_numbers<[1], [0], [0], [1], [0, 0, 1, 1], [], []>} : vector<80x32xbf16>, vector<32x64xbf16>, vector<80x64xf32> -> vector<80x64xf32>
    %c1_351 = arith.constant 1 : index
    %c0_352 = arith.constant 0 : index
    %c0_353 = arith.constant 0 : index
    %472 = vector.load %arg8[%c1_351, %c0_352, %c0_353] : memref<2x1x64xf32, #tpu.memory_space<vmem>>, vector<1x1x64xf32>
    %473 = vector.shape_cast %472 : vector<1x1x64xf32> to vector<1x64xf32>
    %474 = vector.broadcast %473 : vector<1x64xf32> to vector<80x64xf32>
    %475 = arith.addf %471, %474 : vector<80x64xf32>
    %cst_354 = arith.constant 0.000000e+00 : f32
    %476 = vector.broadcast %cst_354 : f32 to vector<80x64xf32>
    %477 = arith.maximumf %475, %476 : vector<80x64xf32>
    %478 = arith.truncf %477 : vector<80x64xf32> to vector<80x64xbf16>
    %c1_355 = arith.constant 1 : index
    %c0_356 = arith.constant 0 : index
    %c0_357 = arith.constant 0 : index
    %479 = vector.load %arg9[%c1_355, %c0_356, %c0_357] : memref<2x64x32xbf16, #tpu.memory_space<vmem>>, vector<1x64x32xbf16>
    %480 = vector.shape_cast %479 : vector<1x64x32xbf16> to vector<64x32xbf16>
    %cst_358 = arith.constant dense<0.000000e+00> : vector<80x32xf32>
    %481 = tpu.matmul %478, %480, %cst_358 {dimension_numbers = #tpu.dot_dimension_numbers<[1], [0], [0], [1], [0, 0, 1, 1], [], []>} : vector<80x64xbf16>, vector<64x32xbf16>, vector<80x32xf32> -> vector<80x32xf32>
    %c1_359 = arith.constant 1 : index
    %c3_360 = arith.constant 3 : index
    %c0_361 = arith.constant 0 : index
    %c0_362 = arith.constant 0 : index
    %482 = vector.load %arg10[%c1_359, %c3_360, %c0_361, %c0_362] : memref<2x6x1x32xf32, #tpu.memory_space<vmem>>, vector<1x1x1x32xf32>
    %483 = vector.shape_cast %482 : vector<1x1x1x32xf32> to vector<1x32xf32>
    %484 = vector.broadcast %483 : vector<1x32xf32> to vector<80x32xf32>
    %485 = arith.addf %481, %484 : vector<80x32xf32>
    %486 = arith.addf %467, %485 : vector<80x32xf32>
    %c1_363 = arith.constant 1 : index
    %c4_364 = arith.constant 4 : index
    %c0_365 = arith.constant 0 : index
    %c0_366 = arith.constant 0 : index
    %487 = vector.load %arg10[%c1_363, %c4_364, %c0_365, %c0_366] : memref<2x6x1x32xf32, #tpu.memory_space<vmem>>, vector<1x1x1x32xf32>
    %488 = vector.shape_cast %487 : vector<1x1x1x32xf32> to vector<1x32xf32>
    %c1_367 = arith.constant 1 : index
    %c5_368 = arith.constant 5 : index
    %c0_369 = arith.constant 0 : index
    %c0_370 = arith.constant 0 : index
    %489 = vector.load %arg10[%c1_367, %c5_368, %c0_369, %c0_370] : memref<2x6x1x32xf32, #tpu.memory_space<vmem>>, vector<1x1x1x32xf32>
    %490 = vector.shape_cast %489 : vector<1x1x1x32xf32> to vector<1x32xf32>
    %cst_371 = arith.constant dense<0.000000e+00> : vector<80xf32>
    %491 = vector.multi_reduction <add>, %486, %cst_371 [1] : vector<80x32xf32> to vector<80xf32>
    %492 = vector.shape_cast %491 : vector<80xf32> to vector<80x1xf32>
    %cst_372 = arith.constant 3.200000e+01 : f32
    %493 = vector.broadcast %cst_372 : f32 to vector<80x1xf32>
    %494 = arith.divf %492, %493 : vector<80x1xf32>
    %495 = vector.broadcast %494 : vector<80x1xf32> to vector<80x32xf32>
    %496 = arith.subf %486, %495 : vector<80x32xf32>
    %497 = arith.mulf %496, %496 : vector<80x32xf32>
    %cst_373 = arith.constant dense<0.000000e+00> : vector<80xf32>
    %498 = vector.multi_reduction <add>, %497, %cst_373 [1] : vector<80x32xf32> to vector<80xf32>
    %499 = vector.shape_cast %498 : vector<80xf32> to vector<80x1xf32>
    %cst_374 = arith.constant 3.200000e+01 : f32
    %500 = vector.broadcast %cst_374 : f32 to vector<80x1xf32>
    %501 = arith.divf %499, %500 : vector<80x1xf32>
    %cst_375 = arith.constant 9.99999974E-6 : f32
    %502 = vector.broadcast %cst_375 : f32 to vector<80x1xf32>
    %503 = arith.addf %501, %502 : vector<80x1xf32>
    %504 = math.rsqrt %503 : vector<80x1xf32>
    %505 = vector.broadcast %504 : vector<80x1xf32> to vector<80x32xf32>
    %506 = arith.mulf %496, %505 : vector<80x32xf32>
    %507 = vector.broadcast %488 : vector<1x32xf32> to vector<80x32xf32>
    %508 = arith.mulf %506, %507 : vector<80x32xf32>
    %509 = vector.broadcast %490 : vector<1x32xf32> to vector<80x32xf32>
    %510 = arith.addf %508, %509 : vector<80x32xf32>
    %511 = vector.shape_cast %510 : vector<80x32xf32> to vector<2x40x32xf32>
    %c0_376 = arith.constant 0 : index
    %c0_377 = arith.constant 0 : index
    %c0_378 = arith.constant 0 : index
    %512 = vector.load %arg11[%c0_376, %c0_377, %c0_378] : memref<2x40x32xf32, #tpu.memory_space<vmem>>, vector<2x40x32xf32>
    tpu.vector_store %arg11[%c0_376, %c0_377, %c0_378], %511 {strides = array<i32>} : memref<2x40x32xf32, #tpu.memory_space<vmem>>, vector<2x40x32xf32>,
    return
  }
  func.func @transform_0(%arg0: i32) -> (i32, i32, i32) {
    %c0_i32 = arith.constant 0 : i32
    %c0_i32_0 = arith.constant 0 : i32
    %c0_i32_1 = arith.constant 0 : i32
    return %arg0, %c0_i32, %c0_i32_0 : i32, i32, i32
  }
  func.func @transform_1(%arg0: i32) -> (i32, i32, i32) {
    %c0_i32 = arith.constant 0 : i32
    %c0_i32_0 = arith.constant 0 : i32
    %c0_i32_1 = arith.constant 0 : i32
    return %arg0, %c0_i32, %c0_i32_0 : i32, i32, i32
  }
  func.func @transform_2(%arg0: i32) -> (i32, i32) {
    %c0_i32 = arith.constant 0 : i32
    %c0_i32_0 = arith.constant 0 : i32
    %c0_i32_1 = arith.constant 0 : i32
    return %c0_i32, %c0_i32_0 : i32, i32
  }
  func.func @transform_3(%arg0: i32) -> (i32, i32, i32, i32) {
    %c0_i32 = arith.constant 0 : i32
    %c0_i32_0 = arith.constant 0 : i32
    %c0_i32_1 = arith.constant 0 : i32
    %c0_i32_2 = arith.constant 0 : i32
    %c0_i32_3 = arith.constant 0 : i32
    return %c0_i32, %c0_i32_0, %c0_i32_1, %c0_i32_2 : i32, i32, i32, i32
  }
  func.func @transform_4(%arg0: i32) -> (i32, i32, i32, i32) {
    %c0_i32 = arith.constant 0 : i32
    %c0_i32_0 = arith.constant 0 : i32
    %c0_i32_1 = arith.constant 0 : i32
    %c0_i32_2 = arith.constant 0 : i32
    %c0_i32_3 = arith.constant 0 : i32
    return %c0_i32, %c0_i32_0, %c0_i32_1, %c0_i32_2 : i32, i32, i32, i32
  }
  func.func @transform_5(%arg0: i32) -> (i32, i32, i32, i32) {
    %c0_i32 = arith.constant 0 : i32
    %c0_i32_0 = arith.constant 0 : i32
    %c0_i32_1 = arith.constant 0 : i32
    %c0_i32_2 = arith.constant 0 : i32
    %c0_i32_3 = arith.constant 0 : i32
    return %c0_i32, %c0_i32_0, %c0_i32_1, %c0_i32_2 : i32, i32, i32, i32
  }
  func.func @transform_6(%arg0: i32) -> (i32, i32, i32) {
    %c0_i32 = arith.constant 0 : i32
    %c0_i32_0 = arith.constant 0 : i32
    %c0_i32_1 = arith.constant 0 : i32
    %c0_i32_2 = arith.constant 0 : i32
    return %c0_i32, %c0_i32_0, %c0_i32_1 : i32, i32, i32
  }
  func.func @transform_7(%arg0: i32) -> (i32, i32, i32) {
    %c0_i32 = arith.constant 0 : i32
    %c0_i32_0 = arith.constant 0 : i32
    %c0_i32_1 = arith.constant 0 : i32
    %c0_i32_2 = arith.constant 0 : i32
    return %c0_i32, %c0_i32_0, %c0_i32_1 : i32, i32, i32
  }
  func.func @transform_8(%arg0: i32) -> (i32, i32, i32) {
    %c0_i32 = arith.constant 0 : i32
    %c0_i32_0 = arith.constant 0 : i32
    %c0_i32_1 = arith.constant 0 : i32
    %c0_i32_2 = arith.constant 0 : i32
    return %c0_i32, %c0_i32_0, %c0_i32_1 : i32, i32, i32
  }
  func.func @transform_9(%arg0: i32) -> (i32, i32, i32, i32) {
    %c0_i32 = arith.constant 0 : i32
    %c0_i32_0 = arith.constant 0 : i32
    %c0_i32_1 = arith.constant 0 : i32
    %c0_i32_2 = arith.constant 0 : i32
    %c0_i32_3 = arith.constant 0 : i32
    return %c0_i32, %c0_i32_0, %c0_i32_1, %c0_i32_2 : i32, i32, i32, i32
  }
  func.func @transform_10(%arg0: i32) -> (i32, i32, i32) {
    %c0_i32 = arith.constant 0 : i32
    %c0_i32_0 = arith.constant 0 : i32
    %c0_i32_1 = arith.constant 0 : i32
    return %arg0, %c0_i32, %c0_i32_0 : i32, i32, i32
  }
}

</mosaic_0001>

<bundles_post_ra>
// kernel: mccformers_s_forward.1
= control target key start
LH: loop header
LB: loop body
LE: loop exit
PB: predicated region body
PF: predicated region fallthrough
CT: control target
= control target key end

     0   :  { %s11472_s13 = smov 0   ;;  %s14805_s0 = inlined_call_operand.vmem [shape: f32[4,40,6], index: 0, kind: input, shape index: {}]   ;;  %s14806_s1 = inlined_call_operand.vmem [shape: f32[4,40,32], index: 1, kind: input, shape index: {}]   ;;  %s14807_s2 = inlined_call_operand.vmem [shape: f32[6,32], index: 2, kind: input, shape index: {}]   ;;  %s14808_s3 = inlined_call_operand.vmem [shape: bf16[2,12,32,8], index: 3, kind: input, shape index: {}]   ;;  %s14809_s4 = inlined_call_operand.vmem [shape: f32[2,12,1,8], index: 4, kind: input, shape index: {}]   ;;  %s14810_s5 = inlined_call_operand.vmem [shape: bf16[2,4,8,32], index: 5, kind: input, shape index: {}]   ;;  %s14811_s6 = inlined_call_operand.vmem [shape: bf16[2,32,64], index: 6, kind: input, shape index: {}]   ;;  %s14812_s7 = inlined_call_operand.vmem [shape: f32[2,1,64], index: 7, kind: input, shape index: {}]   ;;  %s14813_s8 = inlined_call_operand.vmem [shape: bf16[2,64,32], index: 8, kind: input, shape index: {}]   ;;  %s14814_s9 = inlined_call_operand.vmem [shape: f32[2,6,1,32], index: 9, kind: input, shape index: {}]   ;;  %s14815_s10 = inlined_call_operand.vmem [shape: f32[4,40,32], index: 10, kind: output, shape index: {}]  }
   0x1 LB: > { %s8488_s14 = sadd.s32 4294967295, %s11413_s13   ;;  %p8492_p0 = scmp.ge.s32.totalorder %s11413_s13, 1  ;;  %s11413_s13 = sphi %s11472_s13, %s20_s13  }
   0x2   : > { %p326_p1 = scmp.lt.s32.totalorder %s11413_s13, 3 }
   0x4   : > { %p327_p2 = pnand %p8492_p0, %p326_p1 }
   0x6   : > { %330 = sbr.rel (%p327_p2) target bundleno = 11028 (0x2b14), region = 60 }
   0xd   : > { %v404_v0 = vld [vmem:[%s14807_s2] sm:$0x3f]  ;;  %vm446_vm0 = vcmask 1045504   ;;  %s8493_s17 = sshll.u32 %s8488_s14, 1  ;;  %v11415_v2 = vmov 0.0   ;;  %vm415_vm1 = vcmask 48128  }
   0xe   : > { %9483 = vmatprep.subr.msk.mxu0 %vm446_vm0, %v404_v0  ;;  %p373_p3 = scmp.lt.s32.totalorder %s8493_s17, 3  ;;  %v10947_v1 = vld [vmem:[%s14808_s3] sm:$0xff]   ;;  %10932 = vmatprep.subr.bf16.mxu1 %v11415_v2  ;;  %v10948_v13 = vld [vmem:[%s14808_s3 + $0x8] sm:$0xff]   ;;  %vm11416_vm2 = vmmov 0   ;;  %vm594_vm3 = vcmask 261120   ;;  %vm897_vm4 = vcmask 64512  }
   0xf   : > { %9484 = vmatpush3.msk.msra.mxu0 %vm446_vm0, %v404_v0  ;;  %10934 = vmatpush3.bf16.msra.mxu1 %v10947_v1  ;;  %v10949_v22 = vld [vmem:[%s14808_s3 + $0x40] sm:$0xff]   ;;  %v10950_v29 = vld [vmem:[%s14808_s3 + $0x48] sm:$0xff]   ;;  %vm1172_vm5 = vcmask 1043456   ;;  %vm1046_vm6 = vcmask 326656   ;;  %vm4221_vm7 = vcmask 523264  }
  0x10   : > { %s14861_s17 = smov (!%p373_p3, %s8493_s17), 3  ;;  %9500 = vmatprep.subr.bf16.mxu0 %v11415_v2  ;;  %10933 = vmatprep.subr.bf16.mxu1 %v11415_v2  ;;  %v10951_v33 = vld [vmem:[%s14808_s3 + $0x80] sm:$0xff]   ;;  %v10952_v40 = vld [vmem:[%s14808_s3 + $0x88] sm:$0xff]  }
  0x11   : > { %s11489_s20 = smul.u32 40, %s14861_s17  ;;  %9508 = vmatprep.mubr.msk.bf16.mxu1 %vm11416_vm2, %v11415_v2  ;;  %v11650_v53 = vld [vmem:[%s14809_s4] ss:$0 sm:$0xff] }
  0x13   : > { %s377_s23 = scalar_lea.vmem %s14805_s0, %s11489_s20  ;;  %10935 = vmatpush3.bf16.msra.mxu1 %v10948_v13  ;;  %s11519_s28 = scalar_lea.vmem %s14806_s1, %s11489_s20 }
  0x14   : > { %v394_v3 = vld [vmem:[%s377_s23] sm:$0xff]  ;;  %v395_v4 = vld [vmem:[%s377_s23 + $0x8] sm:$0xff]  ;;  %v396_v5 = vld [vmem:[%s377_s23 + $0x10] sm:$0xff]  ;;  %9548 = vmatprep.subr.bf16.mxu1 %v11415_v2 }
  0x15   : > { %9485 = vmatprep.mubr.msk.f32.mxu0 %vm415_vm1, %v394_v3  ;;  %v397_v6 = vld [vmem:[%s377_s23 + $0x18] sm:$0xff]  ;;  %v398_v7 = vld [vmem:[%s377_s23 + $0x20] sm:$0xff]  ;;  %v399_v8 = vld [vmem:[%s377_s23 + $0x28] sm:$0xff] }
  0x16   : > { %9486 = vmatmul.mubr.msk.f32.vlgmr.msra.gmra.mrb[0].mxu0 %vm415_vm1, %v395_v4  ;;  %v400_v9 = vld [vmem:[%s377_s23 + $0x30] sm:$0xff]  ;;  %v401_v10 = vld [vmem:[%s377_s23 + $0x38] sm:$0xff]  ;;  %v402_v11 = vld [vmem:[%s377_s23 + $0x40] sm:$0xff] }
  0x17   : > { %9488 = vmatprep.mubr.msk.f32.mxu0 %vm415_vm1, %v396_v5  ;;  %9501 = vmatpush3.bf16.msra.mxu0 %v10947_v1  ;;  %v403_v12 = vld [vmem:[%s377_s23 + $0x48] sm:$0xff]  ;;  %v405_v15 = vld [vmem:[%s11519_s28] sm:$0xff]  ;;  %v408_v20 = vld [vmem:[%s11519_s28 + $0x18] sm:$0xff]  ;;  %s14753_s23 = scalar_lea.vmem %s14815_s10, %s11489_s20 }
  0x18   : > { %9502 = vmatprep.subr.bf16.mxu0 %v11415_v2  ;;  %v406_v14 = vld [vmem:[%s11519_s28 + $0x8] sm:$0xff]  ;;  %v407_v21 = vld [vmem:[%s11519_s28 + $0x10] sm:$0xff]  ;;  %v409_v30 = vld [vmem:[%s11519_s28 + $0x20] sm:$0xff] }
  0x19   : > { %v410_v28 = vld [vmem:[%s11519_s28 + $0x28] sm:$0xff]  ;;  %v412_v37 = vld [vmem:[%s11519_s28 + $0x38] sm:$0xff]  ;;  %v411_v38 = vld [vmem:[%s11519_s28 + $0x30] sm:$0xff] }
  0x1a   : > { %9489 = vmatmul.mubr.msk.f32.gmra.mrb[2].mxu0 %vm415_vm1, %v397_v6  ;;  %v414_v45 = vld [vmem:[%s11519_s28 + $0x48] sm:$0xff]  ;;  %v413_v46 = vld [vmem:[%s11519_s28 + $0x40] sm:$0xff] }
  0x1b   : > { %9491 = vmatprep.mubr.msk.f32.mxu0 %vm415_vm1, %v398_v7  ;;  %9503 = vmatpush3.bf16.msra.mxu0 %v10948_v13  ;;  %v11669_v4 = vld [vmem:[%s14809_s4 + $0x4] ss:$0 sm:$0xff] }
  0x1c   : > { %9524 = vmatprep.subr.bf16.mxu0 %v11415_v2 }
  0x1e   : > { %9492 = vmatmul.mubr.msk.f32.gmra.mrb[4].mxu0 %vm415_vm1, %v399_v8 }
  0x1f   : > { %9494 = vmatprep.mubr.msk.f32.mxu0 %vm415_vm1, %v400_v9 }
  0x22   : > { %9495 = vmatmul.mubr.msk.f32.gmra.mrb[6].mxu0 %vm415_vm1, %v401_v10 }
  0x23   : > { %9497 = vmatprep.mubr.msk.f32.mxu0 %vm415_vm1, %v402_v11 }
  0x26   : > { %9498 = vmatmul.mubr.msk.f32.gmra.mrb[8].mxu0 %vm415_vm1, %v403_v12 }
  0x27   : > { %9504 = vmatprep.mubr.msk.bf16.mxu0 %vm11416_vm2, %v11415_v2 }
  0xe9   : > { %v9487_v16 = vpop.f32.mrb[0].mxu0 }
  0xea   : > { %v11523_v17 = vadd.f32 %v9487_v16, %v406_v14  ;;  %v516_v18 = vpop.f32.mrb[1].mxu0 }
  0xeb   : > { %v11525_v19 = vadd.f32 %v516_v18, %v405_v15 }
  0xed   : > { %v11534_v23 = vpack.c.bf16 %v11523_v17, %v11525_v19  ;;  %v9490_v24 = vpop.f32.mrb[2].mxu0 }
  0xee   : > { %v11536_v25 = vadd.f32 %v9490_v24, %v408_v20  ;;  %v526_v26 = vpop.f32.mrb[3].mxu0 }
  0xef   : > { %v11538_v27 = vadd.f32 %v526_v26, %v407_v21  ;;  %9505 = vmatmul.mubr.msk.bf16.vlgmr.msra.gmra.mrb[12].mxu0 %vm594_vm3, %v11534_v23 }
  0xf0   : > { %9525 = vmatpush3.bf16.msra.mxu0 %v10949_v22  ;;  %9528 = vmatprep.mubr.msk.bf16.mxu0 %vm11416_vm2, %v11415_v2 }
  0xf1   : > { %v11551_v31 = vpack.c.bf16 %v11536_v25, %v11538_v27  ;;  %9526 = vmatprep.subr.bf16.mxu0 %v11415_v2  ;;  %v9493_v32 = vpop.f32.mrb[4].mxu0 }
  0xf2   : > { %v11557_v34 = vadd.f32 %v9493_v32, %v410_v28  ;;  %v536_v35 = vpop.f32.mrb[5].mxu0 }
  0xf3   : > { %9509 = vmatmul.mubr.msk.bf16.vlgmr.msra.gmra.mrb[0].mxu1 %vm594_vm3, %v11551_v31  ;;  %v11561_v36 = vadd.f32 %v536_v35, %v409_v30 }
  0xf4   : > { %9527 = vmatpush3.bf16.msra.mxu0 %v10950_v29  ;;  %9512 = vmatprep.mubr.msk.bf16.mxu1 %vm11416_vm2, %v11415_v2 }
  0xf5   : > { %v9496_v39 = vpop.f32.mrb[6].mxu0  ;;  %9549 = vmatpush3.bf16.msra.mxu1 %v10951_v33  ;;  %9572 = vmatprep.subr.bf16.mxu0 %v11415_v2  ;;  %v11576_v43 = vpack.c.bf16 %v11557_v34, %v11561_v36 }
  0xf6   : > { %v11571_v41 = vadd.f32 %v9496_v39, %v412_v37  ;;  %v546_v42 = vpop.f32.mrb[7].mxu0  ;;  %9550 = vmatprep.subr.bf16.mxu1 %v11415_v2 }
  0xf7   : > { %9529 = vmatmul.mubr.msk.bf16.vlgmr.msra.gmra.mrb[16].mxu0 %vm594_vm3, %v11534_v23  ;;  %v11580_v44 = vadd.f32 %v546_v42, %v411_v38 }
  0xf8   : > { %9532 = vmatprep.mubr.msk.bf16.mxu0 %vm11416_vm2, %v11415_v2 }
  0xf9   : > { %v9499_v47 = vpop.f32.mrb[8].mxu0  ;;  %9551 = vmatpush3.bf16.msra.mxu1 %v10952_v40  ;;  %v11597_v51 = vpack.c.bf16 %v11571_v41, %v11580_v44 }
  0xfa   : > { %v11586_v48 = vadd.f32 %v9499_v47, %v414_v45  ;;  %v556_v49 = vpop.f32.mrb[9].mxu0  ;;  %9608 = vmatprep.subr.bf16.mxu1 %v11415_v2 }
  0xfb   : > { %9513 = vmatmul.mubr.msk.bf16.gmra.mrb[4].mxu1 %vm594_vm3, %v11576_v43  ;;  %v11591_v50 = vadd.f32 %v556_v49, %v413_v46 }
  0xfc   : > { %14818 = vst [vmem:[#allocation2_spill] sm:$0xff] %v11586_v48  ;;  %9516 = vmatprep.mubr.msk.bf16.mxu1 %vm11416_vm2, %v11415_v2 }
  0xfd   : > { %v11609_v52 = vpack.c.bf16 %v11586_v48, %v11591_v50 }
  0xff   : > { %9533 = vmatmul.mubr.msk.bf16.gmra.mrb[20].mxu0 %vm594_vm3, %v11551_v31 }
 0x100   : > { %9536 = vmatprep.mubr.msk.bf16.mxu0 %vm11416_vm2, %v11415_v2 }
 0x103   : > { %9517 = vmatmul.mubr.msk.bf16.gmra.mrb[8].mxu1 %vm594_vm3, %v11597_v51 }
 0x104   : > { %9520 = vmatprep.mubr.msk.bf16.mxu1 %vm11416_vm2, %v11415_v2 }
 0x107   : > { %9537 = vmatmul.mubr.msk.bf16.gmra.mrb[24].mxu0 %vm594_vm3, %v11576_v43 }
 0x108   : > { %9540 = vmatprep.mubr.msk.bf16.mxu0 %vm11416_vm2, %v11415_v2 }
 0x10b   : > { %9521 = vmatmul.mubr.msk.bf16.gmra.mrb[12].mxu1 %vm594_vm3, %v11609_v52 }
 0x10c   : > { %9552 = vmatprep.mubr.msk.bf16.mxu1 %vm11416_vm2, %v11415_v2 }
 0x10f   : > { %9541 = vmatmul.mubr.msk.bf16.gmra.mrb[28].mxu0 %vm594_vm3, %v11597_v51 }
 0x110   : > { %9544 = vmatprep.mubr.msk.bf16.mxu0 %vm11416_vm2, %v11415_v2 }
 0x113   : > { %9553 = vmatmul.mubr.msk.bf16.vlgmr.msra.gmra.mrb[16].mxu1 %vm594_vm3, %v11534_v23 }
 0x114   : > { %9556 = vmatprep.mubr.msk.bf16.mxu1 %vm11416_vm2, %v11415_v2 }
 0x117   : > { %9545 = vmatmul.mubr.msk.bf16.gmra.mrb[32].mxu0 %vm594_vm3, %v11609_v52 }
 0x118   : > { %9578 = vmatprep.mubr.msk.bf16.mxu0 %vm11416_vm2, %v11415_v2 }
 0x11b   : > { %9557 = vmatmul.mubr.msk.bf16.gmra.mrb[20].mxu1 %vm594_vm3, %v11551_v31 }
 0x11c   : > { %9560 = vmatprep.mubr.msk.bf16.mxu1 %vm11416_vm2, %v11415_v2 }
 0x123   : > { %9561 = vmatmul.mubr.msk.bf16.gmra.mrb[24].mxu1 %vm594_vm3, %v11576_v43 }
 0x124   : > { %9564 = vmatprep.mubr.msk.bf16.mxu1 %vm11416_vm2, %v11415_v2 }
 0x12b   : > { %9565 = vmatmul.mubr.msk.bf16.gmra.mrb[28].mxu1 %vm594_vm3, %v11597_v51 }
 0x12c   : > { %9568 = vmatprep.mubr.msk.bf16.mxu1 %vm11416_vm2, %v11415_v2 }
 0x133   : > { %9569 = vmatmul.mubr.msk.bf16.gmra.mrb[32].mxu1 %vm594_vm3, %v11609_v52 }
 0x134   : > { %9614 = vmatprep.mubr.msk.bf16.mxu1 %vm11416_vm2, %v11415_v2 }
 0x1c2   : > { %v644_v54 = vpop.f32.mrb[12].mxu0 }
 0x1c3   : > { %v9506_v55 = vpop.f32.mrb[13].mxu0  ;;  %v11653_v57 = vadd.f32 %v11650_v53, %v644_v54 }
 0x1c4   : > { %v647_v56 = vpop.f32.mrb[14].mxu0 }
 0x1c5   : > { %v11656_v58 = vadd.f32 %v11650_v53, %v647_v56  ;;  %v9507_v59 = vpop.f32.mrb[15].mxu0 }
 0x1c6   : > { %v652_v60 = vpop.f32.mrb[0].mxu1 }
 0x1c7   : > { %v879_v61 = vpack.c.bf16 %v11656_v58, %v11653_v57  ;;  %v11661_v62 = vadd.f32 %v11650_v53, %v652_v60  ;;  %v9510_v63 = vpop.f32.mrb[1].mxu1 }
 0x1c8   : > { %v655_v0 = vpop.f32.mrb[2].mxu1 }
 0x1c9   : > { %v11664_v1 = vadd.f32 %v11650_v53, %v655_v0  ;;  %v9511_v3 = vpop.f32.mrb[3].mxu1 }
 0x1ca   : > { %v742_v5 = vpop.f32.mrb[16].mxu0 }
 0x1cb   : > { %v9530_v6 = vpop.f32.mrb[17].mxu0  ;;  %v880_v7 = vpack.c.bf16 %v11664_v1, %v11661_v62  ;;  %v743_v9 = vadd.f32 %v11669_v4, %v742_v5 }
 0x1cc   : > { %v745_v8 = vpop.f32.mrb[18].mxu0 }
 0x1cd   : > { %v746_v10 = vadd.f32 %v11669_v4, %v745_v8  ;;  %v9531_v11 = vpop.f32.mrb[19].mxu0 }
 0x1ce   : > { %v11675_v12 = vpop.f32.mrb[4].mxu1 }
 0x1cf   : > { %v885_v13 = vpack.c.bf16 %v746_v10, %v743_v9  ;;  %v9514_v14 = vpop.f32.mrb[5].mxu1 }
 0x1d0   : > { %v663_v15 = vpop.f32.mrb[6].mxu1 }
 0x1d1   : > { %v908_v16 = vsel %vm897_vm4, %v885_v13, 0  ;;  %v9515_v18 = vpop.f32.mrb[7].mxu1  ;;  %v11682_v29 = vadd.f32 %v11650_v53, %v663_v15  ;;  %v11709_v15 = vld [vmem:[%s14809_s4 + $0x8] ss:$0 sm:$0xff] }
 0x1d2   : > { %v750_v20 = vpop.f32.mrb[20].mxu0  ;;  %9573 = vmatpush3.bf16.xpose.msra.mxu0 %v908_v16 }
 0x1d3   : > { %v9534_v21 = vpop.f32.mrb[21].mxu0  ;;  %9574 = vmatprep.subr.bf16.mxu0 %v11415_v2  ;;  %v751_v24 = vadd.f32 %v11669_v4, %v750_v20 }
 0x1d4   : > { %v753_v22 = vpop.f32.mrb[22].mxu0 }
 0x1d5   : > { %v754_v26 = vadd.f32 %v11669_v4, %v753_v22  ;;  %v9535_v28 = vpop.f32.mrb[23].mxu0 }
 0x1d6   : > { %v668_v30 = vpop.f32.mrb[8].mxu1 }
 0x1d7   : > { %v886_v32 = vpack.c.bf16 %v754_v26, %v751_v24  ;;  %v11685_v33 = vadd.f32 %v11650_v53, %v668_v30  ;;  %v9518_v35 = vpop.f32.mrb[9].mxu1 }
 0x1d8   : > { %v671_v37 = vpop.f32.mrb[10].mxu1 }
 0x1d9   : > { %v911_v38 = vsel %vm897_vm4, %v886_v32, 0  ;;  %v882_v39 = vpack.c.bf16 %v11685_v33, %v11682_v29  ;;  %v9519_v40 = vpop.f32.mrb[11].mxu1  ;;  %v11693_v55 = vadd.f32 %v11650_v53, %v671_v37 }
 0x1da   : > { %v758_v42 = vpop.f32.mrb[24].mxu0  ;;  %9575 = vmatpush3.bf16.xpose.msra.mxu0 %v911_v38 }
 0x1db   : > { %v759_v45 = vadd.f32 %v11669_v4, %v758_v42  ;;  %v9538_v46 = vpop.f32.mrb[25].mxu0  ;;  %9576 = vmatprep.subr.bf16.mxu0 %v11415_v2 }
 0x1dc   : > { %v761_v47 = vpop.f32.mrb[26].mxu0 }
 0x1dd   : > { %v887_v49 = vpack.c.bf16 %v759_v45, %v759_v45  ;;  %v9539_v54 = vpop.f32.mrb[27].mxu0  ;;  %v762_v8 = vadd.f32 %v11669_v4, %v761_v47 }
 0x1de   : > { %v676_v56 = vpop.f32.mrb[12].mxu1 }
 0x1df   : > { %v11696_v59 = vadd.f32 %v11650_v53, %v676_v56  ;;  %v914_v60 = vsel %vm897_vm4, %v887_v49, 0  ;;  %v9522_v63 = vpop.f32.mrb[13].mxu1  ;;  %v661_v56 = vadd.f32 %v11650_v53, %v11675_v12 }
 0x1e0   : > { %v11699_v0 = vpop.f32.mrb[14].mxu1 }
 0x1e1   : > { %v883_v3 = vpack.c.bf16 %v11696_v59, %v11693_v55  ;;  %v9523_v5 = vpop.f32.mrb[15].mxu1  ;;  %v881_v62 = vpack.c.bf16 %v661_v56, %v661_v56  ;;  %v680_v29 = vadd.f32 %v11650_v53, %v11699_v0 }
 0x1e2   : > { %v766_v6 = vpop.f32.mrb[28].mxu0  ;;  %9577 = vmatpush3.bf16.xpose.msra.mxu0 %v914_v60 }
 0x1e3   : > { %v767_v9 = vadd.f32 %v11669_v4, %v766_v6  ;;  %v9542_v10 = vpop.f32.mrb[29].mxu0  ;;  %9590 = vmatprep.subr.bf16.mxu0 %v11415_v2 }
 0x1e4   : > { %v769_v11 = vpop.f32.mrb[30].mxu0 }
 0x1e5   : > { %v9543_v13 = vpop.f32.mrb[31].mxu0  ;;  %v888_v14 = vpack.c.bf16 %v767_v9, %v762_v8  ;;  %v770_v30 = vadd.f32 %v11669_v4, %v769_v11 }
 0x1e6   : > { %v840_v16 = vpop.f32.mrb[16].mxu1 }
 0x1e7   : > { %v9554_v18 = vpop.f32.mrb[17].mxu1  ;;  %v841_v21 = vadd.f32 %v11709_v15, %v840_v16  ;;  %v982_v26 = vsel %vm897_vm4, %v888_v14, 0 }
 0x1e8   : > { %v843_v20 = vpop.f32.mrb[18].mxu1 }
 0x1e9   : > { %v844_v22 = vadd.f32 %v11709_v15, %v843_v20  ;;  %v9555_v24 = vpop.f32.mrb[19].mxu1  ;;  %9579 = vmatmul.mubr.msk.bf16.vlgmr.msra.gmra.mrb[36].mxu0 %vm897_vm4, %v879_v61 }
 0x1ea   : > { %v774_v28 = vpop.f32.mrb[32].mxu0  ;;  %9591 = vmatpush3.bf16.xpose.msra.mxu0 %v982_v26  ;;  %9582 = vmatprep.mubr.msk.bf16.mxu0 %vm11416_vm2, %v11415_v2 }
 0x1eb   : > { %v891_v32 = vpack.c.bf16 %v844_v22, %v841_v21  ;;  %v775_v35 = vadd.f32 %v11669_v4, %v774_v28  ;;  %v9546_v37 = vpop.f32.mrb[33].mxu0  ;;  %9592 = vmatprep.subr.bf16.mxu0 %v11415_v2 }
 0x1ec   : > { %v777_v38 = vpop.f32.mrb[34].mxu0  ;;  %v884_v37 = vpack.c.bf16 %v680_v29, %v680_v29 }
 0x1ed   : > { %v9547_v40 = vpop.f32.mrb[35].mxu0  ;;  %9609 = vmatpush3.bf16.msra.mxu1 %v891_v32  ;;  %v889_v57 = vpack.c.bf16 %v775_v35, %v770_v30  ;;  %v778_v45 = vadd.f32 %v11669_v4, %v777_v38 }
 0x1ee   : > { %v848_v58 = vpop.f32.mrb[20].mxu1  ;;  %9610 = vmatprep.subr.bf16.mxu1 %v11415_v2 }
 0x1ef   : > { %v9558_v61 = vpop.f32.mrb[21].mxu1  ;;  %v849_v46 = vadd.f32 %v11709_v15, %v848_v58  ;;  %v985_v54 = vsel %vm897_vm4, %v889_v57, 0  ;;  %v890_v60 = vpack.c.bf16 %v778_v45, %v778_v45 }
 0x1f0   : > { %v851_v42 = vpop.f32.mrb[22].mxu1 }
 0x1f1   : > { %v852_v47 = vadd.f32 %v11709_v15, %v851_v42  ;;  %v9559_v49 = vpop.f32.mrb[23].mxu1  ;;  %9583 = vmatmul.mubr.msk.bf16.gmra.mrb[40].mxu0 %vm897_vm4, %v880_v7  ;;  %v988_v12 = vsel %vm897_vm4, %v890_v60, 0 }
 0x1f2   : > { %9593 = vmatpush3.bf16.xpose.msra.mxu0 %v985_v54  ;;  %9586 = vmatprep.mubr.msk.bf16.mxu0 %vm11416_vm2, %v11415_v2 }
 0x1f3   : > { %v892_v4 = vpack.c.bf16 %v852_v47, %v849_v46  ;;  %9594 = vmatprep.subr.bf16.mxu0 %v11415_v2 }
 0x1f5   : > { %9611 = vmatpush3.bf16.msra.mxu1 %v892_v4 }
 0x1f6   : > { %v856_v63 = vpop.f32.mrb[24].mxu1  ;;  %9612 = vmatprep.subr.bf16.mxu1 %v11415_v2 }
 0x1f7   : > { %v857_v1 = vadd.f32 %v11709_v15, %v856_v63  ;;  %v9562_v7 = vpop.f32.mrb[25].mxu1 }
 0x1f8   : > { %v859_v5 = vpop.f32.mrb[26].mxu1 }
 0x1f9   : > { %v893_v6 = vpack.c.bf16 %v857_v1, %v857_v1  ;;  %v9563_v8 = vpop.f32.mrb[27].mxu1  ;;  %9587 = vmatmul.mubr.msk.bf16.gmra.mrb[44].mxu0 %vm897_vm4, %v881_v62  ;;  %v860_v11 = vadd.f32 %v11709_v15, %v859_v5 }
 0x1fa   : > { %9595 = vmatpush3.bf16.xpose.msra.mxu0 %v988_v12  ;;  %9596 = vmatprep.mubr.msk.bf16.mxu0 %vm11416_vm2, %v11415_v2 }
 0x1fb   : > { %v1174_v9 = vsel %vm1172_vm5, %v893_v6, 0  ;;  %9626 = vmatprep.subr.bf16.mxu0 %v11415_v2 }
 0x1fc   : > { %9613 = vmatpush3.bf16.msra.mxu1 %v1174_v9 }
 0x1fd   : > { %9644 = vmatprep.subr.bf16.mxu1 %v11415_v2 }
 0x1fe   : > { %v864_v10 = vpop.f32.mrb[28].mxu1 }
 0x1ff   : > { %v865_v13 = vadd.f32 %v11709_v15, %v864_v10  ;;  %v9566_v14 = vpop.f32.mrb[29].mxu1 }
 0x200   : > { %v867_v16 = vpop.f32.mrb[30].mxu1 }
 0x201   : > { %v894_v18 = vpack.c.bf16 %v865_v13, %v860_v11  ;;  %v9567_v20 = vpop.f32.mrb[31].mxu1  ;;  %9597 = vmatmul.mubr.msk.bf16.vlgmr.msra.gmra.mrb[48].mxu0 %vm897_vm4, %v882_v39  ;;  %v868_v22 = vadd.f32 %v11709_v15, %v867_v16 }
 0x202   : > { %9600 = vmatprep.mubr.msk.bf16.mxu0 %vm11416_vm2, %v11415_v2 }
 0x203   : > { %9627 = vmatpush3.bf16.msra.mxu0 %v894_v18 }
 0x204   : > { %9628 = vmatprep.subr.bf16.mxu0 %v11415_v2 }
 0x206   : > { %v872_v21 = vpop.f32.mrb[32].mxu1 }
 0x207   : > { %v873_v24 = vadd.f32 %v11709_v15, %v872_v21  ;;  %v9570_v26 = vpop.f32.mrb[33].mxu1 }
 0x208   : > { %v875_v28 = vpop.f32.mrb[34].mxu1 }
 0x209   : > { %v895_v30 = vpack.c.bf16 %v873_v24, %v868_v22  ;;  %v876_v32 = vadd.f32 %v11709_v15, %v875_v28  ;;  %v9571_v35 = vpop.f32.mrb[35].mxu1  ;;  %9601 = vmatmul.mubr.msk.bf16.gmra.mrb[52].mxu0 %vm897_vm4, %v883_v3 }
 0x20a   : > { %9604 = vmatprep.mubr.msk.bf16.mxu0 %vm11416_vm2, %v11415_v2 }
 0x20b   : > { %v896_v33 = vpack.c.bf16 %v876_v32, %v876_v32  ;;  %9629 = vmatpush3.bf16.msra.mxu0 %v895_v30 }
 0x20c   : > { %9630 = vmatprep.subr.bf16.mxu0 %v11415_v2 }
 0x20d   : > { %v1242_v39 = vsel %vm1172_vm5, %v896_v33, 0 }
 0x20f   : > { %9631 = vmatpush3.bf16.msra.mxu0 %v1242_v39 }
 0x210   : > { %9666 = vmatprep.subr.bf16.mxu0 %v11415_v2 }
 0x211   : > { %9605 = vmatmul.mubr.msk.bf16.gmra.mrb[56].mxu0 %vm897_vm4, %v884_v37 }
 0x212   : > { %9632 = vmatprep.mubr.msk.bf16.mxu0 %vm11416_vm2, %v11415_v2 }
 0x2bc   : > { %v950_v55 = vpop.f32.mrb[36].mxu0 }
 0x2bd   : > { %v9580_v59 = vpop.f32.mrb[37].mxu0  ;;  %v1047_v53 = vsel %vm1046_vm6, %v950_v55, -inf }
 0x2be   : > { %1048 = vmax.xlane.f32.xlu0 %v1047_v53  ;;  %v953_v0 = vpop.f32.mrb[38].mxu0 }
 0x2bf   : > { %v9581_v3 = vpop.f32.mrb[39].mxu0  ;;  %v1050_v15 = vsel %vm1046_vm6, %v953_v0, -inf }
 0x2c2   : > { %1051 = vmax.xlane.f32.xlu0 %v1050_v15 }
 0x2c4   : > { %v958_v38 = vpop.f32.mrb[40].mxu0 }
 0x2c5   : > { %v9584_v40 = vpop.f32.mrb[41].mxu0  ;;  %v1053_v57 = vsel %vm1046_vm6, %v958_v38, -inf }
 0x2c6   : > { %1054 = vmax.xlane.f32.xlu1 %v1053_v57  ;;  %v961_v58 = vpop.f32.mrb[42].mxu0 }
 0x2c7   : > { %v9585_v61 = vpop.f32.mrb[43].mxu0  ;;  %v1056_v42 = vsel %vm1046_vm6, %v961_v58, -inf }
 0x2ca   : > { %1057 = vmax.xlane.f32.xlu1 %v1056_v42 }
 0x2cc   : > { %v966_v45 = vpop.f32.mrb[44].mxu0 }
 0x2cd   : > { %v9588_v46 = vpop.f32.mrb[45].mxu0  ;;  %v1059_v47 = vsel %vm1046_vm6, %v966_v45, -inf }
 0x2ce   : > { %1060 = vmax.xlane.f32.xlu0 %v1059_v47  ;;  %v969_v49 = vpop.f32.mrb[46].mxu0 }
 0x2cf   : > { %v9589_v54 = vpop.f32.mrb[47].mxu0 }
 0x2d4   : > { %v1024_v56 = vpop.f32.mrb[48].mxu0 }
 0x2d5   : > { %v9598_v4 = vpop.f32.mrb[49].mxu0  ;;  %v1062_v60 = vsel %vm1046_vm6, %v1024_v56, -inf }
 0x2d6   : > { %1063 = vmax.xlane.f32.xlu1 %v1062_v60  ;;  %v1027_v63 = vpop.f32.mrb[50].mxu0 }
 0x2d7   : > { %v9599_v62 = vpop.f32.mrb[51].mxu0  ;;  %v1065_v1 = vsel %vm1046_vm6, %v1027_v63, -inf }
 0x2d8   : > { %1066 = vmax.xlane.f32.xlu0 %v1065_v1 }
 0x2dc   : > { %v1032_v7 = vpop.f32.mrb[52].mxu0 }
 0x2dd   : > { %v9602_v5 = vpop.f32.mrb[53].mxu0  ;;  %v1068_v6 = vsel %vm1046_vm6, %v1032_v7, -inf }
 0x2de   : > { %1069 = vmax.xlane.f32.xlu1 %v1068_v6  ;;  %v1035_v8 = vpop.f32.mrb[54].mxu0 }
 0x2df   : > { %v9603_v12 = vpop.f32.mrb[55].mxu0  ;;  %v1071_v9 = vsel %vm1046_vm6, %v1035_v8, -inf }
 0x2e0   : > { %1072 = vmax.xlane.f32.xlu0 %v1071_v9 }
 0x2e4   : > { %v11781_v10 = vpop.f32.mrb[56].mxu0 }
 0x2e5   : > { %v9606_v11 = vpop.f32.mrb[57].mxu0  ;;  %v1074_v13 = vsel %vm1046_vm6, %v11781_v10, -inf }
 0x2e6   : > { %1075 = vmax.xlane.f32.xlu1 %v1074_v13  ;;  %v1043_v14 = vpop.f32.mrb[58].mxu0 }
 0x2e7   : > { %v9607_v16 = vpop.f32.mrb[59].mxu0 }
 0x34b   : > { %v1049_v18 = vpop.xlane.xlu0 %1048 }
 0x34c   : > { %v1077_v20 = vsub.f32 %v950_v55, %v1049_v18 }
 0x34e   : > { %v1087_v21 = vmul.f32 1.442695, %v1077_v20 }
 0x34f   : > { %v1052_v22 = vpop.xlane.xlu0 %1051 }
 0x350   : > { %11007 = vpow2.f32 %v1087_v21  ;;  %v1078_v24 = vsub.f32 %v953_v0, %v1052_v22 }
 0x352   : > { %v1089_v26 = vmul.f32 1.442695, %v1078_v24 }
 0x353   : > { %v1055_v28 = vpop.xlane.xlu1 %1054 }
 0x354   : > { %11009 = vpow2.f32 %v1089_v26  ;;  %v1079_v30 = vsub.f32 %v958_v38, %v1055_v28 }
 0x356   : > { %v1091_v32 = vmul.f32 1.442695, %v1079_v30 }
 0x357   : > { %v1058_v35 = vpop.xlane.xlu1 %1057 }
 0x358   : > { %11011 = vpow2.f32 %v1091_v32  ;;  %v1080_v29 = vsub.f32 %v961_v58, %v1058_v35 }
 0x35a   : > { %v11785_v33 = vpop.eup %11007  ;;  %v1093_v39 = vmul.f32 1.442695, %v1080_v29 }
 0x35b   : > { %v1061_v37 = vpop.xlane.xlu0 %1060  ;;  %v1107_v59 = vsel %vm1046_vm6, %v11785_v33, 0.0 }
 0x35c   : > { %11013 = vpow2.f32 %v1093_v39  ;;  %v1081_v55 = vsub.f32 %v966_v45, %v1061_v37  ;;  %1108 = vadd.xlane.f32.xlu0 %v1107_v59 }
 0x35e   : > { %v11010_v53 = vpop.eup %11009  ;;  %v1095_v0 = vmul.f32 1.442695, %v1081_v55 }
 0x35f   : > { %v1110_v3 = vsel %vm1046_vm6, %v11010_v53, 0.0 }
 0x360   : > { %11015 = vpow2.f32 %v1095_v0  ;;  %1111 = vadd.xlane.f32.xlu1 %v1110_v3 }
 0x362   : > { %v11790_v15 = vpop.eup %11011 }
 0x363   : > { %v1064_v38 = vpop.xlane.xlu1 %1063  ;;  %v1113_v40 = vsel %vm1046_vm6, %v11790_v15, 0.0 }
 0x364   : > { %v1082_v57 = vsub.f32 %v1024_v56, %v1064_v38  ;;  %1114 = vadd.xlane.f32.xlu0 %v1113_v40 }
 0x365   : > { %v1067_v58 = vpop.xlane.xlu0 %1066 }
 0x366   : > { %v11014_v61 = vpop.eup %11013  ;;  %v1097_v42 = vmul.f32 1.442695, %v1082_v57  ;;  %v1083_v46 = vsub.f32 %v1027_v63, %v1067_v58 }
 0x367   : > { %v1116_v45 = vsel %vm1046_vm6, %v11014_v61, 0.0 }
 0x368   : > { %11017 = vpow2.f32 %v1097_v42  ;;  %v1099_v47 = vmul.f32 1.442695, %v1083_v46  ;;  %1117 = vadd.xlane.f32.xlu1 %v1116_v45 }
 0x36a   : > { %v11016_v49 = vpop.eup %11015  ;;  %11019 = vpow2.f32 %v1099_v47  ;;  %v10953_v47 = vld [vmem:[%s14808_s3 + $0x10] sm:$0xff]  }
 0x36b   : > { %v1070_v54 = vpop.xlane.xlu1 %1069  ;;  %v1119_v4 = vsel %vm1046_vm6, %v11016_v49, 0.0 }
 0x36c   : > { %v1084_v60 = vsub.f32 %v1032_v7, %v1070_v54  ;;  %1120 = vadd.xlane.f32.xlu0 %v1119_v4 }
 0x36d   : > { %v1073_v62 = vpop.xlane.xlu0 %1072 }
 0x36e   : > { %v1101_v1 = vmul.f32 1.442695, %v1084_v60  ;;  %v1085_v56 = vsub.f32 %v1035_v8, %v1073_v62  ;;  %v10954_v60 = vld [vmem:[%s14808_s3 + $0x18] sm:$0xff]  }
 0x370   : > { %11021 = vpow2.f32 %v1101_v1  ;;  %v1103_v5 = vmul.f32 1.442695, %v1085_v56 }
 0x372   : > { %v11018_v6 = vpop.eup %11017  ;;  %11023 = vpow2.f32 %v1103_v5 }
 0x373   : > { %v1076_v63 = vpop.xlane.xlu1 %1075  ;;  %v1122_v12 = vsel %vm1046_vm6, %v11018_v6, 0.0 }
 0x374   : > { %v11020_v9 = vpop.eup %11019  ;;  %v1086_v11 = vsub.f32 %v11781_v10, %v1076_v63  ;;  %1123 = vadd.xlane.f32.xlu1 %v1122_v12 }
 0x375   : > { %v1125_v13 = vsel %vm1046_vm6, %v11020_v9, 0.0 }
 0x376   : > { %v1105_v14 = vmul.f32 1.442695, %v1086_v11  ;;  %1126 = vadd.xlane.f32.xlu0 %v1125_v13  ;;  %v10956_v11 = vld [vmem:[%s14808_s3 + $0x98] sm:$0xff]   ;;  %v1305_v13 = vld [vmem:[%s14810_s5] sm:$0xf] }
 0x378   : > { %11025 = vpow2.f32 %v1105_v14  ;;  %v1322_v14 = vsel %vm1172_vm5, %v1305_v13, 0 }
 0x37a   : > { %v11022_v7 = vpop.eup %11021 }
 0x37b   : > { %v1128_v16 = vsel %vm1046_vm6, %v11022_v7, 0.0 }
 0x37c   : > { %v11024_v8 = vpop.eup %11023  ;;  %1129 = vadd.xlane.f32.xlu1 %v1128_v16 }
 0x37d   : > { %v1131_v18 = vsel %vm1046_vm6, %v11024_v8, 0.0 }
 0x37e   : > { %1132 = vadd.xlane.f32.xlu0 %v1131_v18  ;;  %v10957_v18 = vld [vmem:[%s14808_s3 + $0x50] sm:$0xff]  }
 0x382   : > { %v11801_v20 = vpop.eup %11025 }
 0x383   : > { %v1134_v21 = vsel %vm1046_vm6, %v11801_v20, 0.0 }
 0x384   : > { %1135 = vadd.xlane.f32.xlu1 %v1134_v21 }
 0x3e9   : > { %v1109_v10 = vpop.xlane.xlu0 %1108 }
 0x3ea   : > { %11027 = vrcp.f32 %v1109_v10  ;;  %v10958_v10 = vld [vmem:[%s14808_s3 + $0x58] sm:$0xff]  }
 0x3ed   : > { %v1112_v22 = vpop.xlane.xlu1 %1111 }
 0x3ee   : > { %11029 = vrcp.f32 %v1112_v22 }
 0x3f1   : > { %v1115_v24 = vpop.xlane.xlu0 %1114 }
 0x3f2   : > { %11031 = vrcp.f32 %v1115_v24 }
 0x3f4   : > { %v11028_v28 = vpop.eup %11027 }
 0x3f5   : > { %v1118_v26 = vpop.xlane.xlu1 %1117  ;;  %v1138_v32 = vmul.f32 %v11028_v28, %v11785_v33 }
 0x3f6   : > { %11033 = vrcp.f32 %v1118_v26 }
 0x3f8   : > { %v11030_v30 = vpop.eup %11029 }
 0x3f9   : > { %v1140_v35 = vmul.f32 %v11030_v30, %v11010_v53  ;;  %v1121_v29 = vpop.xlane.xlu0 %1120 }
 0x3fa   : > { %11035 = vrcp.f32 %v1121_v29 }
 0x3fb   : > { %v1157_v39 = vpack.c.bf16 %v1140_v35, %v1138_v32 }
 0x3fc   : > { %v11032_v37 = vpop.eup %11031 }
 0x3fd   : > { %9615 = vmatmul.mubr.msk.bf16.vlgmr.msra.gmra.mrb[36].mxu1 %vm1046_vm6, %v1157_v39  ;;  %v1142_v0 = vmul.f32 %v11032_v37, %v11790_v15 }
 0x3fe   : > { %9618 = vmatprep.mubr.msk.bf16.mxu1 %vm11416_vm2, %v11415_v2  ;;  %9645 = vmatpush3.bf16.msra.mxu1 %v1322_v14 }
 0x3ff   : > { %9690 = vmatprep.subr.bf16.mxu1 %v11415_v2 }
 0x400   : > { %v11034_v59 = vpop.eup %11033 }
 0x401   : > { %v1124_v55 = vpop.xlane.xlu1 %1123  ;;  %v1144_v3 = vmul.f32 %v11034_v59, %v11014_v61 }
 0x402   : > { %11037 = vrcp.f32 %v1124_v55 }
 0x403   : > { %v1127_v38 = vpop.xlane.xlu0 %1126  ;;  %v1158_v40 = vpack.c.bf16 %v1144_v3, %v1142_v0 }
 0x404   : > { %v11036_v57 = vpop.eup %11035  ;;  %11039 = vrcp.f32 %v1127_v38 }
 0x405   : > { %9619 = vmatmul.mubr.msk.bf16.gmra.mrb[40].mxu1 %vm1046_vm6, %v1158_v40  ;;  %v1146_v33 = vmul.f32 %v11036_v57, %v11016_v49 }
 0x406   : > { %9622 = vmatprep.mubr.msk.bf16.mxu1 %vm11416_vm2, %v11415_v2 }
 0x407   : > { %v1159_v42 = vpack.c.bf16 %v1146_v33, %v1146_v33 }
 0x409   : > { %v1130_v53 = vpop.xlane.xlu1 %1129 }
 0x40a   : > { %11041 = vrcp.f32 %v1130_v53 }
 0x40b   : > { %v1133_v58 = vpop.xlane.xlu0 %1132 }
 0x40c   : > { %v11038_v46 = vpop.eup %11037  ;;  %11043 = vrcp.f32 %v1133_v58 }
 0x40d   : > { %9623 = vmatmul.mubr.msk.bf16.gmra.mrb[44].mxu1 %vm1046_vm6, %v1159_v42  ;;  %v1148_v61 = vmul.f32 %v11038_v46, %v11018_v6 }
 0x40e   : > { %v11040_v15 = vpop.eup %11039  ;;  %9646 = vmatprep.mubr.msk.bf16.mxu1 %vm11416_vm2, %v11415_v2 }
 0x40f   : > { %v1150_v45 = vmul.f32 %v11040_v15, %v11020_v9  ;;  %v10955_v9 = vld [vmem:[%s14808_s3 + $0x90] sm:$0xff]  }
 0x411   : > { %v1160_v54 = vpack.c.bf16 %v1150_v45, %v1148_v61  ;;  %v1136_v49 = vpop.xlane.xlu1 %1135  ;;  %v11913_v45 = vld [vmem:[%s14809_s4 + $0x1] ss:$0 sm:$0xff] }
 0x412   : > { %11045 = vrcp.f32 %v1136_v49 }
 0x413   : > { %9633 = vmatmul.mubr.msk.bf16.vlgmr.msra.gmra.mrb[60].mxu0 %vm1046_vm6, %v1160_v54 }
 0x414   : > { %v11042_v4 = vpop.eup %11041  ;;  %9636 = vmatprep.mubr.msk.bf16.mxu0 %vm11416_vm2, %v11415_v2  ;;  %9667 = vmatpush3.bf16.msra.mxu0 %v10953_v47 }
 0x415   : > { %9668 = vmatprep.subr.bf16.mxu0 %v11415_v2  ;;  %v1152_v1 = vmul.f32 %v11042_v4, %v11022_v7 }
 0x416   : > { %v11044_v62 = vpop.eup %11043 }
 0x417   : > { %v1154_v56 = vmul.f32 %v11044_v62, %v11024_v8 }
 0x418   : > { %9669 = vmatpush3.bf16.msra.mxu0 %v10954_v60 }
 0x419   : > { %v1161_v5 = vpack.c.bf16 %v1154_v56, %v1152_v1  ;;  %9714 = vmatprep.subr.bf16.mxu0 %v11415_v2 }
 0x41b   : > { %9637 = vmatmul.mubr.msk.bf16.gmra.mrb[64].mxu0 %vm1046_vm6, %v1161_v5 }
 0x41c   : > { %v11046_v6 = vpop.eup %11045  ;;  %9640 = vmatprep.mubr.msk.bf16.mxu0 %vm11416_vm2, %v11415_v2 }
 0x41d   : > { %v1156_v63 = vmul.f32 %v11046_v6, %v11801_v20 }
 0x41f   : > { %v1162_v12 = vpack.c.bf16 %v1156_v63, %v1156_v63 }
 0x423   : > { %9641 = vmatmul.mubr.msk.bf16.gmra.mrb[68].mxu0 %vm1046_vm6, %v1162_v12 }
 0x424   : > { %9670 = vmatprep.mubr.msk.bf16.mxu0 %vm11416_vm2, %v11415_v2 }
 0x42b   : > { %9671 = vmatmul.mubr.msk.bf16.vlgmr.msra.gmra.mrb[72].mxu0 %vm594_vm3, %v11534_v23 }
 0x42c   : > { %9674 = vmatprep.mubr.msk.bf16.mxu0 %vm11416_vm2, %v11415_v2  ;;  %9715 = vmatpush3.bf16.msra.mxu0 %v10955_v9 }
 0x42d   : > { %9716 = vmatprep.subr.bf16.mxu0 %v11415_v2 }
 0x430   : > { %9717 = vmatpush3.bf16.msra.mxu0 %v10956_v11 }
 0x431   : > { %9756 = vmatprep.subr.bf16.mxu0 %v11415_v2 }
 0x433   : > { %9675 = vmatmul.mubr.msk.bf16.gmra.mrb[76].mxu0 %vm594_vm3, %v11551_v31 }
 0x434   : > { %9678 = vmatprep.mubr.msk.bf16.mxu0 %vm11416_vm2, %v11415_v2 }
 0x43b   : > { %9679 = vmatmul.mubr.msk.bf16.gmra.mrb[80].mxu0 %vm594_vm3, %v11576_v43 }
 0x43c   : > { %9682 = vmatprep.mubr.msk.bf16.mxu0 %vm11416_vm2, %v11415_v2 }
 0x443   : > { %9683 = vmatmul.mubr.msk.bf16.gmra.mrb[84].mxu0 %vm594_vm3, %v11597_v51 }
 0x444   : > { %9686 = vmatprep.mubr.msk.bf16.mxu0 %vm11416_vm2, %v11415_v2 }
 0x44b   : > { %9687 = vmatmul.mubr.msk.bf16.gmra.mrb[88].mxu0 %vm594_vm3, %v11609_v52 }
 0x44c   : > { %9718 = vmatprep.mubr.msk.bf16.mxu0 %vm11416_vm2, %v11415_v2 }
 0x453   : > { %9719 = vmatmul.mubr.msk.bf16.vlgmr.msra.gmra.mrb[92].mxu0 %vm594_vm3, %v11534_v23 }
 0x454   : > { %9722 = vmatprep.mubr.msk.bf16.mxu0 %vm11416_vm2, %v11415_v2 }
 0x45b   : > { %9723 = vmatmul.mubr.msk.bf16.gmra.mrb[96].mxu0 %vm594_vm3, %v11551_v31 }
 0x45c   : > { %9726 = vmatprep.mubr.msk.bf16.mxu0 %vm11416_vm2, %v11415_v2 }
 0x463   : > { %9727 = vmatmul.mubr.msk.bf16.gmra.mrb[100].mxu0 %vm594_vm3, %v11576_v43 }
 0x464   : > { %9730 = vmatprep.mubr.msk.bf16.mxu0 %vm11416_vm2, %v11415_v2 }
 0x46b   : > { %9731 = vmatmul.mubr.msk.bf16.gmra.mrb[104].mxu0 %vm594_vm3, %v11597_v51 }
 0x46c   : > { %9734 = vmatprep.mubr.msk.bf16.mxu0 %vm11416_vm2, %v11415_v2 }
 0x473   : > { %9735 = vmatmul.mubr.msk.bf16.gmra.mrb[108].mxu0 %vm594_vm3, %v11609_v52 }
 0x474   : > { %9762 = vmatprep.mubr.msk.bf16.mxu0 %vm11416_vm2, %v11415_v2 }
 0x4d0   : > { %v1210_v7 = vpop.f32.mrb[36].mxu1 }
 0x4d1   : > { %v9616_v16 = vpop.f32.mrb[37].mxu1 }
 0x4d2   : > { %v1213_v8 = vpop.f32.mrb[38].mxu1 }
 0x4d3   : > { %v1300_v20 = vpack.c.bf16 %v1213_v8, %v1210_v7  ;;  %v9617_v21 = vpop.f32.mrb[39].mxu1 }
 0x4d5   : > { %9647 = vmatmul.mubr.msk.bf16.vlgmr.msra.gmra.mrb[48].mxu1 %vm897_vm4, %v1300_v20 }
 0x4d6   : > { %9650 = vmatprep.mubr.msk.bf16.mxu1 %vm11416_vm2, %v11415_v2  ;;  %9691 = vmatpush3.bf16.msra.mxu1 %v10957_v18 }
 0x4d7   : > { %9692 = vmatprep.subr.bf16.mxu1 %v11415_v2 }
 0x4d8   : > { %v1218_v22 = vpop.f32.mrb[40].mxu1 }
 0x4d9   : > { %v9620_v24 = vpop.f32.mrb[41].mxu1 }
 0x4da   : > { %v1221_v26 = vpop.f32.mrb[42].mxu1  ;;  %9693 = vmatpush3.bf16.msra.mxu1 %v10958_v10 }
 0x4db   : > { %v1301_v28 = vpack.c.bf16 %v1221_v26, %v1218_v22  ;;  %v9621_v30 = vpop.f32.mrb[43].mxu1  ;;  %9738 = vmatprep.subr.bf16.mxu1 %v11415_v2 }
 0x4dd   : > { %9651 = vmatmul.mubr.msk.bf16.gmra.mrb[52].mxu1 %vm897_vm4, %v1301_v28 }
 0x4de   : > { %9654 = vmatprep.mubr.msk.bf16.mxu1 %vm11416_vm2, %v11415_v2 }
 0x4e0   : > { %v1226_v32 = vpop.f32.mrb[44].mxu1 }
 0x4e1   : > { %v9624_v35 = vpop.f32.mrb[45].mxu1 }
 0x4e2   : > { %v1229_v29 = vpop.f32.mrb[46].mxu1 }
 0x4e3   : > { %v9625_v39 = vpop.f32.mrb[47].mxu1 }
 0x4e6   : > { %v1278_v37 = vpop.f32.mrb[60].mxu0 }
 0x4e7   : > { %v1302_v59 = vpack.c.bf16 %v1278_v37, %v1226_v32  ;;  %v9634_v55 = vpop.f32.mrb[61].mxu0  ;;  %v11974_v37 = vld [vmem:[%s14809_s4 + $0x9] ss:$0 sm:$0xff] }
 0x4e8   : > { %v1281_v0 = vpop.f32.mrb[62].mxu0 }
 0x4e9   : > { %v9635_v3 = vpop.f32.mrb[63].mxu0  ;;  %9655 = vmatmul.mubr.msk.bf16.gmra.mrb[56].mxu1 %vm897_vm4, %v1302_v59 }
 0x4ea   : > { %9658 = vmatprep.mubr.msk.bf16.mxu1 %vm11416_vm2, %v11415_v2 }
 0x4ee   : > { %v1286_v38 = vpop.f32.mrb[64].mxu0 }
 0x4ef   : > { %v1303_v40 = vpack.c.bf16 %v1286_v38, %v1281_v0  ;;  %v9638_v57 = vpop.f32.mrb[65].mxu0 }
 0x4f0   : > { %v1289_v33 = vpop.f32.mrb[66].mxu0 }
 0x4f1   : > { %v9639_v53 = vpop.f32.mrb[67].mxu0  ;;  %9659 = vmatmul.mubr.msk.bf16.gmra.mrb[60].mxu1 %vm897_vm4, %v1303_v40 }
 0x4f2   : > { %9662 = vmatprep.mubr.msk.bf16.mxu1 %vm11416_vm2, %v11415_v2 }
 0x4f6   : > { %v1294_v58 = vpop.f32.mrb[68].mxu0 }
 0x4f7   : > { %v1304_v42 = vpack.c.bf16 %v1294_v58, %v1289_v33  ;;  %v9642_v46 = vpop.f32.mrb[69].mxu0 }
 0x4f8   : > { %v1297_v15 = vpop.f32.mrb[70].mxu0 }
 0x4f9   : > { %v9643_v61 = vpop.f32.mrb[71].mxu0  ;;  %9663 = vmatmul.mubr.msk.bf16.gmra.mrb[64].mxu1 %vm897_vm4, %v1304_v42 }
 0x4fa   : > { %9694 = vmatprep.mubr.msk.bf16.mxu1 %vm11416_vm2, %v11415_v2 }
 0x4fe   : > { %v1472_v47 = vpop.f32.mrb[72].mxu0 }
 0x4ff   : > { %v9672_v54 = vpop.f32.mrb[73].mxu0  ;;  %v11916_v4 = vadd.f32 %v11913_v45, %v1472_v47 }
 0x500   : > { %v1475_v49 = vpop.f32.mrb[74].mxu0 }
 0x501   : > { %v11919_v60 = vadd.f32 %v11913_v45, %v1475_v49  ;;  %v9673_v62 = vpop.f32.mrb[75].mxu0  ;;  %9695 = vmatmul.mubr.msk.bf16.vlgmr.msra.gmra.mrb[68].mxu1 %vm594_vm3, %v11534_v23 }
 0x502   : > { %9698 = vmatprep.mubr.msk.bf16.mxu1 %vm11416_vm2, %v11415_v2 }
 0x506   : > { %v1480_v56 = vpop.f32.mrb[76].mxu0 }
 0x507   : > { %v9676_v5 = vpop.f32.mrb[77].mxu0  ;;  %v11928_v63 = vadd.f32 %v11913_v45, %v1480_v56 }
 0x508   : > { %v1483_v6 = vpop.f32.mrb[78].mxu0 }
 0x509   : > { %v11931_v12 = vadd.f32 %v11913_v45, %v1483_v6  ;;  %v9677_v9 = vpop.f32.mrb[79].mxu0  ;;  %9699 = vmatmul.mubr.msk.bf16.gmra.mrb[72].mxu1 %vm594_vm3, %v11551_v31 }
 0x50a   : > { %9702 = vmatprep.mubr.msk.bf16.mxu1 %vm11416_vm2, %v11415_v2 }
 0x50e   : > { %v11939_v13 = vpop.f32.mrb[80].mxu0 }
 0x50f   : > { %v9680_v14 = vpop.f32.mrb[81].mxu0 }
 0x510   : > { %v1491_v7 = vpop.f32.mrb[82].mxu0 }
 0x511   : > { %v9681_v16 = vpop.f32.mrb[83].mxu0  ;;  %9703 = vmatmul.mubr.msk.bf16.gmra.mrb[76].mxu1 %vm594_vm3, %v11576_v43  ;;  %v11946_v18 = vadd.f32 %v11913_v45, %v1491_v7 }
 0x512   : > { %9706 = vmatprep.mubr.msk.bf16.mxu1 %vm11416_vm2, %v11415_v2 }
 0x516   : > { %v1496_v8 = vpop.f32.mrb[84].mxu0 }
 0x517   : > { %v11949_v20 = vadd.f32 %v11913_v45, %v1496_v8  ;;  %v9684_v21 = vpop.f32.mrb[85].mxu0 }
 0x518   : > { %v1499_v10 = vpop.f32.mrb[86].mxu0 }
 0x519   : > { %v9685_v24 = vpop.f32.mrb[87].mxu0  ;;  %9707 = vmatmul.mubr.msk.bf16.gmra.mrb[80].mxu1 %vm594_vm3, %v11597_v51  ;;  %v11958_v28 = vadd.f32 %v11913_v45, %v1499_v10 }
 0x51a   : > { %9710 = vmatprep.mubr.msk.bf16.mxu1 %vm11416_vm2, %v11415_v2 }
 0x51e   : > { %v1504_v26 = vpop.f32.mrb[88].mxu0 }
 0x51f   : > { %v11961_v30 = vadd.f32 %v11913_v45, %v1504_v26  ;;  %v9688_v32 = vpop.f32.mrb[89].mxu0 }
 0x520   : > { %v11963_v35 = vpop.f32.mrb[90].mxu0 }
 0x521   : > { %v9689_v39 = vpop.f32.mrb[91].mxu0  ;;  %9711 = vmatmul.mubr.msk.bf16.gmra.mrb[84].mxu1 %vm594_vm3, %v11609_v52 }
 0x522   : > { %9744 = vmatprep.mubr.msk.bf16.mxu1 %vm11416_vm2, %v11415_v2 }
 0x526   : > { %v1668_v59 = vpop.f32.mrb[92].mxu0 }
 0x527   : > { %v9720_v55 = vpop.f32.mrb[93].mxu0  ;;  %v11977_v3 = vadd.f32 %v11974_v37, %v1668_v59 }
 0x528   : > { %v1671_v0 = vpop.f32.mrb[94].mxu0 }
 0x529   : > { %v11980_v38 = vadd.f32 %v11974_v37, %v1671_v0  ;;  %v9721_v40 = vpop.f32.mrb[95].mxu0 }
 0x52e   : > { %v1676_v33 = vpop.f32.mrb[96].mxu0 }
 0x52f   : > { %v9724_v53 = vpop.f32.mrb[97].mxu0  ;;  %v11985_v42 = vadd.f32 %v11974_v37, %v1676_v33 }
 0x530   : > { %v1679_v58 = vpop.f32.mrb[98].mxu0 }
 0x531   : > { %v11988_v46 = vadd.f32 %v11974_v37, %v1679_v58  ;;  %v9725_v15 = vpop.f32.mrb[99].mxu0 }
 0x536   : > { %v11992_v47 = vpop.f32.mrb[100].mxu0 }
 0x537   : > { %v9728_v54 = vpop.f32.mrb[101].mxu0 }
 0x538   : > { %v1687_v49 = vpop.f32.mrb[102].mxu0 }
 0x539   : > { %v9729_v62 = vpop.f32.mrb[103].mxu0  ;;  %v11995_v5 = vadd.f32 %v11974_v37, %v1687_v49 }
 0x53e   : > { %v1692_v56 = vpop.f32.mrb[104].mxu0 }
 0x53f   : > { %v11998_v6 = vadd.f32 %v11974_v37, %v1692_v56  ;;  %v9732_v9 = vpop.f32.mrb[105].mxu0 }
 0x540   : > { %v1695_v14 = vpop.f32.mrb[106].mxu0 }
 0x541   : > { %v9733_v16 = vpop.f32.mrb[107].mxu0  ;;  %v12003_v21 = vadd.f32 %v11974_v37, %v1695_v14 }
 0x546   : > { %v1700_v8 = vpop.f32.mrb[108].mxu0 }
 0x547   : > { %v12006_v10 = vadd.f32 %v11974_v37, %v1700_v8  ;;  %v9736_v24 = vpop.f32.mrb[109].mxu0 }
 0x548   : > { %v12008_v26 = vpop.f32.mrb[110].mxu0 }
 0x549   : > { %v9737_v39 = vpop.f32.mrb[111].mxu0 }
 0x5a8   : > { %v12012_v59 = vpop.f32.mrb[48].mxu1 }
 0x5a9   : > { %v9648_v55 = vpop.f32.mrb[49].mxu1 }
 0x5aa   : > { %v12014_v0 = vpop.f32.mrb[50].mxu1 }
 0x5ab   : > { %v9649_v40 = vpop.f32.mrb[51].mxu1 }
 0x5b0   : > { %v12016_v33 = vpop.f32.mrb[52].mxu1 }
 0x5b1   : > { %v9652_v53 = vpop.f32.mrb[53].mxu1 }
 0x5b2   : > { %v12018_v58 = vpop.f32.mrb[54].mxu1  ;;  %v8580_v53 = vld [vmem:[%s14809_s4 + $0x5] ss:$0 sm:$0xff] }
 0x5b3   : > { %v9653_v15 = vpop.f32.mrb[55].mxu1 }
 0x5bc   : > { %v12020_v54 = vpop.f32.mrb[56].mxu1 }
 0x5bd   : > { %v9656_v49 = vpop.f32.mrb[57].mxu1 }
 0x5be   : > { %v12022_v62 = vpop.f32.mrb[58].mxu1 }
 0x5bf   : > { %v9657_v56 = vpop.f32.mrb[59].mxu1 }
 0x5c4   : > { %v12024_v9 = vpop.f32.mrb[60].mxu1 }
 0x5c5   : > { %v9660_v14 = vpop.f32.mrb[61].mxu1 }
 0x5c6   : > { %v12026_v16 = vpop.f32.mrb[62].mxu1 }
 0x5c7   : > { %v9661_v8 = vpop.f32.mrb[63].mxu1 }
 0x5cc   : > { %v12028_v24 = vpop.f32.mrb[64].mxu1 }
 0x5cd   : > { %v9664_v39 = vpop.f32.mrb[65].mxu1 }
 0x5ce   : > { %v12030_v55 = vpop.f32.mrb[66].mxu1 }
 0x5cf   : > { %v9665_v40 = vpop.f32.mrb[67].mxu1 }
 0x5d4   : > { %v1570_v15 = vpop.f32.mrb[68].mxu1 }
 0x5d5   : > { %v9696_v49 = vpop.f32.mrb[69].mxu1  ;;  %v1571_v56 = vadd.f32 %v8580_v53, %v1570_v15 }
 0x5d6   : > { %v1573_v29 = vpop.f32.mrb[70].mxu1 }
 0x5d7   : > { %v1574_v32 = vadd.f32 %v8580_v53, %v1573_v29  ;;  %v9697_v7 = vpop.f32.mrb[71].mxu1 }
 0x5d9   : > { %v1713_v14 = vpack.c.bf16 %v1574_v32, %v1571_v56 }
 0x5db   : > { %v1735_v22 = vsel %vm897_vm4, %v1713_v14, 0 }
 0x5dc   : > { %v1578_v8 = vpop.f32.mrb[72].mxu1  ;;  %9739 = vmatpush3.bf16.xpose.msra.mxu1 %v1735_v22 }
 0x5dd   : > { %v9700_v11 = vpop.f32.mrb[73].mxu1  ;;  %9740 = vmatprep.subr.bf16.mxu1 %v11415_v2  ;;  %v1579_v40 = vadd.f32 %v8580_v53, %v1578_v8 }
 0x5de   : > { %v1581_v39 = vpop.f32.mrb[74].mxu1 }
 0x5df   : > { %v1582_v61 = vadd.f32 %v8580_v53, %v1581_v39  ;;  %v9701_v57 = vpop.f32.mrb[75].mxu1 }
 0x5e1   : > { %v1714_v1 = vpack.c.bf16 %v1582_v61, %v1579_v40  ;;  %v1685_v40 = vadd.f32 %v11974_v37, %v11992_v47 }
 0x5e3   : > { %v1738_v48 = vsel %vm897_vm4, %v1714_v1, 0 }
 0x5e4   : > { %v1586_v49 = vpop.f32.mrb[76].mxu1  ;;  %9741 = vmatpush3.bf16.xpose.msra.mxu1 %v1738_v48 }
 0x5e5   : > { %v1587_v15 = vadd.f32 %v8580_v53, %v1586_v49  ;;  %v9704_v29 = vpop.f32.mrb[77].mxu1  ;;  %9742 = vmatprep.subr.bf16.mxu1 %v11415_v2  ;;  %v14819_v49 = vpack.c.bf16 %v11919_v60, %v11916_v4 }
 0x5e6   : > { %v1589_v7 = vpop.f32.mrb[78].mxu1  ;;  %v14820_v29 = vpack.c.bf16 %v11980_v38, %v11977_v3  ;;  %v14822_v38 = vpack.c.bf16 %v11931_v12, %v11928_v63  ;;  %v1704_v63 = vadd.f32 %v11974_v37, %v12008_v26  ;;  %v14823_v12 = vpack.c.bf16 %v11949_v20, %v11946_v18 }
 0x5e7   : > { %v1715_v32 = vpack.c.bf16 %v1587_v15, %v1587_v15  ;;  %v9705_v56 = vpop.f32.mrb[79].mxu1  ;;  %v1590_v14 = vadd.f32 %v8580_v53, %v1589_v7  ;;  %v14826_v18 = vpack.c.bf16 %v11961_v30, %v11958_v28  ;;  %v1508_v37 = vadd.f32 %v11913_v45, %v11963_v35 }
 0x5e9   : > { %v1741_v11 = vsel %vm897_vm4, %v1715_v32, 0 }
 0x5ec   : > { %v1594_v22 = vpop.f32.mrb[80].mxu1  ;;  %9743 = vmatpush3.bf16.xpose.msra.mxu1 %v1741_v11  ;;  %v1721_v11 = vpack.c.bf16 %v1685_v40, %v1685_v40 }
 0x5ed   : > { %v1595_v8 = vadd.f32 %v8580_v53, %v1594_v22  ;;  %v9708_v39 = vpop.f32.mrb[81].mxu1  ;;  %9774 = vmatprep.subr.bf16.mxu1 %v11415_v2  ;;  %v14821_v22 = vpack.c.bf16 %v11988_v46, %v11985_v42  ;;  %v1489_v42 = vadd.f32 %v11913_v45, %v11939_v13  ;;  %v14824_v13 = vpack.c.bf16 %v11998_v6, %v11995_v5 }
 0x5ee   : > { %v1597_v57 = vpop.f32.mrb[82].mxu1  ;;  %v1712_v5 = vpack.c.bf16 %v1508_v37, %v1508_v37 }
 0x5ef   : > { %v9709_v1 = vpop.f32.mrb[83].mxu1  ;;  %v1716_v61 = vpack.c.bf16 %v1595_v8, %v1590_v14  ;;  %v1598_v7 = vadd.f32 %v8580_v53, %v1597_v57  ;;  %v1999_v8 = vsel %vm1172_vm5, %v1721_v11, 0  ;;  %v1724_v57 = vpack.c.bf16 %v1704_v63, %v1704_v63 }
 0x5f0   : > { %v14825_v1 = vpack.c.bf16 %v12006_v10, %v12003_v21 }
 0x5f1   : > { %v1809_v48 = vsel %vm897_vm4, %v1716_v61, 0  ;;  %v2067_v20 = vsel %vm1172_vm5, %v1724_v57, 0 }
 0x5f2   : > { %9757 = vmatpush3.bf16.xpose.msra.mxu0 %v1809_v48 }
 0x5f3   : > { %9745 = vmatmul.mubr.msk.bf16.vlgmr.msra.gmra.mrb[88].mxu1 %vm897_vm4, %v14819_v49  ;;  %9758 = vmatprep.subr.bf16.mxu0 %v11415_v2 }
 0x5f4   : > { %v1602_v15 = vpop.f32.mrb[84].mxu1  ;;  %9775 = vmatpush3.bf16.msra.mxu1 %v14820_v29  ;;  %9748 = vmatprep.mubr.msk.bf16.mxu1 %vm11416_vm2, %v11415_v2 }
 0x5f5   : > { %v1603_v32 = vadd.f32 %v8580_v53, %v1602_v15  ;;  %v9712_v56 = vpop.f32.mrb[85].mxu1  ;;  %9776 = vmatprep.subr.bf16.mxu1 %v11415_v2 }
 0x5f6   : > { %v1605_v47 = vpop.f32.mrb[86].mxu1 }
 0x5f7   : > { %v9713_v4 = vpop.f32.mrb[87].mxu1  ;;  %v1717_v60 = vpack.c.bf16 %v1603_v32, %v1598_v7  ;;  %v1606_v14 = vadd.f32 %v8580_v53, %v1605_v47  ;;  %v1709_v53 = vpack.c.bf16 %v1489_v42, %v1489_v42 }
 0x5f8   : > { %9777 = vmatpush3.bf16.msra.mxu1 %v14821_v22 }
 0x5f9   : > { %v1812_v3 = vsel %vm897_vm4, %v1717_v60, 0  ;;  %9778 = vmatprep.subr.bf16.mxu1 %v11415_v2  ;;  %v1718_v46 = vpack.c.bf16 %v1606_v14, %v1606_v14 }
 0x5fa   : > { %9759 = vmatpush3.bf16.xpose.msra.mxu0 %v1812_v3 }
 0x5fb   : > { %9749 = vmatmul.mubr.msk.bf16.gmra.mrb[92].mxu1 %vm897_vm4, %v14822_v38  ;;  %9760 = vmatprep.subr.bf16.mxu0 %v11415_v2  ;;  %v1815_v39 = vsel %vm897_vm4, %v1718_v46, 0 }
 0x5fc   : > { %9779 = vmatpush3.bf16.msra.mxu1 %v1999_v8  ;;  %9752 = vmatprep.mubr.msk.bf16.mxu1 %vm11416_vm2, %v11415_v2 }
 0x5fd   : > { %9810 = vmatprep.subr.bf16.mxu1 %v11415_v2 }
 0x602   : > { %9761 = vmatpush3.bf16.xpose.msra.mxu0 %v1815_v39 }
 0x603   : > { %9753 = vmatmul.mubr.msk.bf16.gmra.mrb[96].mxu1 %vm897_vm4, %v1709_v53  ;;  %9792 = vmatprep.subr.bf16.mxu0 %v11415_v2 }
 0x604   : > { %9780 = vmatprep.mubr.msk.bf16.mxu1 %vm11416_vm2, %v11415_v2 }
 0x609   : > { %9763 = vmatmul.mubr.msk.bf16.vlgmr.msra.gmra.mrb[112].mxu0 %vm897_vm4, %v14823_v12 }
 0x60a   : > { %9793 = vmatpush3.bf16.msra.mxu0 %v14824_v13  ;;  %9766 = vmatprep.mubr.msk.bf16.mxu0 %vm11416_vm2, %v11415_v2 }
 0x60b   : > { %9794 = vmatprep.subr.bf16.mxu0 %v11415_v2 }
 0x60e   : > { %9795 = vmatpush3.bf16.msra.mxu0 %v14825_v1 }
 0x60f   : > { %9796 = vmatprep.subr.bf16.mxu0 %v11415_v2 }
 0x611   : > { %9767 = vmatmul.mubr.msk.bf16.gmra.mrb[116].mxu0 %vm897_vm4, %v14826_v18 }
 0x612   : > { %9797 = vmatpush3.bf16.msra.mxu0 %v2067_v20  ;;  %9770 = vmatprep.mubr.msk.bf16.mxu0 %vm11416_vm2, %v11415_v2 }
 0x613   : > { %9832 = vmatprep.subr.bf16.mxu0 %v11415_v2 }
 0x619   : > { %9771 = vmatmul.mubr.msk.bf16.gmra.mrb[120].mxu0 %vm897_vm4, %v1712_v5 }
 0x61a   : > { %9798 = vmatprep.mubr.msk.bf16.mxu0 %vm11416_vm2, %v11415_v2 }
 0x6c6   : > { %v1777_v28 = vpop.f32.mrb[88].mxu1 }
 0x6c7   : > { %v9746_v30 = vpop.f32.mrb[89].mxu1  ;;  %v1873_v6 = vsel %vm1046_vm6, %v1777_v28, -inf }
 0x6c8   : > { %1874 = vmax.xlane.f32.xlu0 %v1873_v6  ;;  %v1780_v21 = vpop.f32.mrb[90].mxu1 }
 0x6c9   : > { %v9747_v10 = vpop.f32.mrb[91].mxu1  ;;  %v1876_v26 = vsel %vm1046_vm6, %v1780_v21, -inf }
 0x6ca   : > { %1877 = vmax.xlane.f32.xlu1 %v1876_v26 }
 0x6ce   : > { %v1785_v61 = vpop.f32.mrb[92].mxu1 }
 0x6cf   : > { %v9750_v45 = vpop.f32.mrb[93].mxu1  ;;  %v1879_v35 = vsel %vm1046_vm6, %v1785_v61, -inf }
 0x6d0   : > { %1880 = vmax.xlane.f32.xlu0 %v1879_v35  ;;  %v1788_v48 = vpop.f32.mrb[94].mxu1 }
 0x6d1   : > { %v9751_v40 = vpop.f32.mrb[95].mxu1  ;;  %v1882_v49 = vsel %vm1046_vm6, %v1788_v48, -inf }
 0x6d2   : > { %1883 = vmax.xlane.f32.xlu1 %v1882_v49 }
 0x6d6   : > { %v1793_v15 = vpop.f32.mrb[96].mxu1 }
 0x6d7   : > { %v9754_v29 = vpop.f32.mrb[97].mxu1  ;;  %v1885_v7 = vsel %vm1046_vm6, %v1793_v15, -inf }
 0x6d8   : > { %1886 = vmax.xlane.f32.xlu0 %v1885_v7  ;;  %v1796_v32 = vpop.f32.mrb[98].mxu1 }
 0x6d9   : > { %v9755_v56 = vpop.f32.mrb[99].mxu1 }
 0x6dc   : > { %v1851_v47 = vpop.f32.mrb[112].mxu0 }
 0x6dd   : > { %v9764_v11 = vpop.f32.mrb[113].mxu0  ;;  %v1888_v4 = vsel %vm1046_vm6, %v1851_v47, -inf }
 0x6de   : > { %1889 = vmax.xlane.f32.xlu1 %v1888_v4  ;;  %v1854_v60 = vpop.f32.mrb[114].mxu0 }
 0x6df   : > { %v9765_v22 = vpop.f32.mrb[115].mxu0  ;;  %v1891_v14 = vsel %vm1046_vm6, %v1854_v60, -inf }
 0x6e0   : > { %1892 = vmax.xlane.f32.xlu0 %v1891_v14 }
 0x6e4   : > { %v1859_v3 = vpop.f32.mrb[116].mxu0 }
 0x6e5   : > { %v9768_v38 = vpop.f32.mrb[117].mxu0  ;;  %v1894_v8 = vsel %vm1046_vm6, %v1859_v3, -inf }
 0x6e6   : > { %1895 = vmax.xlane.f32.xlu1 %v1894_v8  ;;  %v1862_v42 = vpop.f32.mrb[118].mxu0 }
 0x6e7   : > { %v9769_v46 = vpop.f32.mrb[119].mxu0  ;;  %v1897_v53 = vsel %vm1046_vm6, %v1862_v42, -inf }
 0x6e8   : > { %1898 = vmax.xlane.f32.xlu0 %v1897_v53 }
 0x6ec   : > { %v12114_v39 = vpop.f32.mrb[120].mxu0 }
 0x6ed   : > { %v9772_v63 = vpop.f32.mrb[121].mxu0  ;;  %v1900_v12 = vsel %vm1046_vm6, %v12114_v39, -inf }
 0x6ee   : > { %1901 = vmax.xlane.f32.xlu1 %v1900_v12  ;;  %v1870_v13 = vpop.f32.mrb[122].mxu0 }
 0x6ef   : > { %v9773_v57 = vpop.f32.mrb[123].mxu0 }
 0x755   : > { %v1875_v1 = vpop.xlane.xlu0 %1874 }
 0x756   : > { %v1903_v18 = vsub.f32 %v1777_v28, %v1875_v1 }
 0x757   : > { %v1878_v20 = vpop.xlane.xlu1 %1877 }
 0x758   : > { %v1913_v37 = vmul.f32 1.442695, %v1903_v18  ;;  %v1904_v5 = vsub.f32 %v1780_v21, %v1878_v20 }
 0x75a   : > { %11047 = vpow2.f32 %v1913_v37  ;;  %v1915_v30 = vmul.f32 1.442695, %v1904_v5 }
 0x75c   : > { %11049 = vpow2.f32 %v1915_v30 }
 0x75d   : > { %v1881_v6 = vpop.xlane.xlu0 %1880 }
 0x75e   : > { %v1905_v10 = vsub.f32 %v1785_v61, %v1881_v6 }
 0x75f   : > { %v1884_v26 = vpop.xlane.xlu1 %1883 }
 0x760   : > { %v1917_v45 = vmul.f32 1.442695, %v1905_v10  ;;  %v1906_v35 = vsub.f32 %v1788_v48, %v1884_v26 }
 0x762   : > { %11051 = vpow2.f32 %v1917_v45  ;;  %v1919_v40 = vmul.f32 1.442695, %v1906_v35 }
 0x764   : > { %v12118_v49 = vpop.eup %11047  ;;  %11053 = vpow2.f32 %v1919_v40 }
 0x765   : > { %v1887_v29 = vpop.xlane.xlu0 %1886  ;;  %v1933_v28 = vsel %vm1046_vm6, %v12118_v49, 0.0 }
 0x766   : > { %v11050_v7 = vpop.eup %11049  ;;  %v1907_v32 = vsub.f32 %v1793_v15, %v1887_v29  ;;  %1934 = vadd.xlane.f32.xlu0 %v1933_v28 }
 0x767   : > { %v1936_v21 = vsel %vm1046_vm6, %v11050_v7, 0.0 }
 0x768   : > { %v1921_v56 = vmul.f32 1.442695, %v1907_v32  ;;  %1937 = vadd.xlane.f32.xlu1 %v1936_v21 }
 0x76a   : > { %11055 = vpow2.f32 %v1921_v56 }
 0x76b   : > { %v1890_v61 = vpop.xlane.xlu1 %1889 }
 0x76c   : > { %v12123_v11 = vpop.eup %11051  ;;  %v1908_v48 = vsub.f32 %v1851_v47, %v1890_v61 }
 0x76d   : > { %v1893_v4 = vpop.xlane.xlu0 %1892  ;;  %v1939_v22 = vsel %vm1046_vm6, %v12123_v11, 0.0 }
 0x76e   : > { %v11054_v14 = vpop.eup %11053  ;;  %v1923_v38 = vmul.f32 1.442695, %v1908_v48  ;;  %v1909_v8 = vsub.f32 %v1854_v60, %v1893_v4  ;;  %1940 = vadd.xlane.f32.xlu0 %v1939_v22 }
 0x76f   : > { %v1942_v15 = vsel %vm1046_vm6, %v11054_v14, 0.0 }
 0x770   : > { %11057 = vpow2.f32 %v1923_v38  ;;  %v1925_v46 = vmul.f32 1.442695, %v1909_v8  ;;  %1943 = vadd.xlane.f32.xlu1 %v1942_v15 }
 0x772   : > { %11059 = vpow2.f32 %v1925_v46 }
 0x773   : > { %v1896_v53 = vpop.xlane.xlu1 %1895 }
 0x774   : > { %v11056_v63 = vpop.eup %11055  ;;  %v1910_v12 = vsub.f32 %v1859_v3, %v1896_v53 }
 0x775   : > { %v1899_v13 = vpop.xlane.xlu0 %1898  ;;  %v1945_v47 = vsel %vm1046_vm6, %v11056_v63, 0.0 }
 0x776   : > { %v1927_v57 = vmul.f32 1.442695, %v1910_v12  ;;  %v1911_v1 = vsub.f32 %v1862_v42, %v1899_v13  ;;  %1946 = vadd.xlane.f32.xlu0 %v1945_v47 }
 0x778   : > { %11061 = vpow2.f32 %v1927_v57  ;;  %v1929_v18 = vmul.f32 1.442695, %v1911_v1 }
 0x77a   : > { %v11058_v20 = vpop.eup %11057  ;;  %11063 = vpow2.f32 %v1929_v18 }
 0x77b   : > { %v1902_v60 = vpop.xlane.xlu1 %1901  ;;  %v1948_v37 = vsel %vm1046_vm6, %v11058_v20, 0.0 }
 0x77c   : > { %v11060_v5 = vpop.eup %11059  ;;  %v1912_v30 = vsub.f32 %v12114_v39, %v1902_v60  ;;  %1949 = vadd.xlane.f32.xlu1 %v1948_v37  ;;  %v10959_v37 = vld [vmem:[%s14808_s3 + $0x20] sm:$0xff]  }
 0x77d   : > { %v1951_v6 = vsel %vm1046_vm6, %v11060_v5, 0.0 }
 0x77e   : > { %v1931_v3 = vmul.f32 1.442695, %v1912_v30  ;;  %1952 = vadd.xlane.f32.xlu0 %v1951_v6 }
 0x780   : > { %11065 = vpow2.f32 %v1931_v3  ;;  %v10960_v3 = vld [vmem:[%s14808_s3 + $0x28] sm:$0xff]  }
 0x782   : > { %v11062_v10 = vpop.eup %11061 }
 0x783   : > { %v1954_v42 = vsel %vm1046_vm6, %v11062_v10, 0.0 }
 0x784   : > { %v11064_v26 = vpop.eup %11063  ;;  %1955 = vadd.xlane.f32.xlu1 %v1954_v42 }
 0x785   : > { %v1957_v45 = vsel %vm1046_vm6, %v11064_v26, 0.0 }
 0x786   : > { %1958 = vadd.xlane.f32.xlu0 %v1957_v45 }
 0x78a   : > { %v12134_v35 = vpop.eup %11065 }
 0x78b   : > { %v1960_v40 = vsel %vm1046_vm6, %v12134_v35, 0.0 }
 0x78c   : > { %1961 = vadd.xlane.f32.xlu1 %v1960_v40 }
 0x7f3   : > { %v1935_v39 = vpop.xlane.xlu0 %1934 }
 0x7f4   : > { %11067 = vrcp.f32 %v1935_v39 }
 0x7f5   : > { %v1938_v29 = vpop.xlane.xlu1 %1937 }
 0x7f6   : > { %11069 = vrcp.f32 %v1938_v29 }
 0x7fb   : > { %v1941_v28 = vpop.xlane.xlu0 %1940 }
 0x7fc   : > { %11071 = vrcp.f32 %v1941_v28 }
 0x7fd   : > { %v1944_v32 = vpop.xlane.xlu1 %1943 }
 0x7fe   : > { %v11068_v21 = vpop.eup %11067  ;;  %11073 = vrcp.f32 %v1944_v32 }
 0x7ff   : > { %v1964_v61 = vmul.f32 %v11068_v21, %v12118_v49 }
 0x800   : > { %v11070_v56 = vpop.eup %11069 }
 0x801   : > { %v1966_v48 = vmul.f32 %v11070_v56, %v11050_v7 }
 0x803   : > { %v1983_v4 = vpack.c.bf16 %v1966_v48, %v1964_v61  ;;  %v1947_v22 = vpop.xlane.xlu0 %1946  ;;  %v10963_v61 = vld [vmem:[%s14808_s3 + $0x60] sm:$0xff]  }
 0x804   : > { %11075 = vrcp.f32 %v1947_v22  ;;  %v10964_v22 = vld [vmem:[%s14808_s3 + $0x68] sm:$0xff]  }
 0x805   : > { %9781 = vmatmul.mubr.msk.bf16.vlgmr.msra.gmra.mrb[100].mxu1 %vm1046_vm6, %v1983_v4 }
 0x806   : > { %v11072_v38 = vpop.eup %11071  ;;  %9784 = vmatprep.mubr.msk.bf16.mxu1 %vm11416_vm2, %v11415_v2 }
 0x807   : > { %v1968_v46 = vmul.f32 %v11072_v38, %v12123_v11 }
 0x808   : > { %v11074_v8 = vpop.eup %11073 }
 0x809   : > { %v1950_v15 = vpop.xlane.xlu1 %1949  ;;  %v1970_v53 = vmul.f32 %v11074_v8, %v11054_v14 }
 0x80a   : > { %11077 = vrcp.f32 %v1950_v15 }
 0x80b   : > { %v1953_v12 = vpop.xlane.xlu0 %1952  ;;  %v1984_v13 = vpack.c.bf16 %v1970_v53, %v1968_v46 }
 0x80c   : > { %11079 = vrcp.f32 %v1953_v12 }
 0x80d   : > { %9785 = vmatmul.mubr.msk.bf16.gmra.mrb[104].mxu1 %vm1046_vm6, %v1984_v13 }
 0x80e   : > { %v11076_v49 = vpop.eup %11075  ;;  %9788 = vmatprep.mubr.msk.bf16.mxu1 %vm11416_vm2, %v11415_v2 }
 0x80f   : > { %v1972_v7 = vmul.f32 %v11076_v49, %v11056_v63 }
 0x811   : > { %v1956_v47 = vpop.xlane.xlu1 %1955  ;;  %v1985_v1 = vpack.c.bf16 %v1972_v7, %v1972_v7 }
 0x812   : > { %11081 = vrcp.f32 %v1956_v47 }
 0x813   : > { %v1959_v57 = vpop.xlane.xlu0 %1958 }
 0x814   : > { %v11078_v18 = vpop.eup %11077  ;;  %11083 = vrcp.f32 %v1959_v57 }
 0x815   : > { %9789 = vmatmul.mubr.msk.bf16.gmra.mrb[108].mxu1 %vm1046_vm6, %v1985_v1  ;;  %v1974_v14 = vmul.f32 %v11078_v18, %v11058_v20 }
 0x816   : > { %v11080_v11 = vpop.eup %11079  ;;  %9812 = vmatprep.mubr.msk.bf16.mxu1 %vm11416_vm2, %v11415_v2 }
 0x817   : > { %v1976_v60 = vmul.f32 %v11080_v11, %v11060_v5 }
 0x819   : > { %v1986_v30 = vpack.c.bf16 %v1976_v60, %v1974_v14  ;;  %v1962_v63 = vpop.xlane.xlu1 %1961 }
 0x81a   : > { %11085 = vrcp.f32 %v1962_v63 }
 0x81b   : > { %9799 = vmatmul.mubr.msk.bf16.vlgmr.msra.gmra.mrb[124].mxu0 %vm1046_vm6, %v1986_v30 }
 0x81c   : > { %v11082_v6 = vpop.eup %11081  ;;  %9802 = vmatprep.mubr.msk.bf16.mxu0 %vm11416_vm2, %v11415_v2  ;;  %9833 = vmatpush3.bf16.msra.mxu0 %v10959_v37 }
 0x81d   : > { %9834 = vmatprep.subr.bf16.mxu0 %v11415_v2  ;;  %v1978_v5 = vmul.f32 %v11082_v6, %v11062_v10  ;;  %v10961_v10 = vld [vmem:[%s14808_s3 + $0xa0] sm:$0xff]  }
 0x81e   : > { %v11084_v20 = vpop.eup %11083 }
 0x81f   : > { %v1980_v42 = vmul.f32 %v11084_v20, %v11064_v26  ;;  %v10962_v26 = vld [vmem:[%s14808_s3 + $0xa8] sm:$0xff]  }
 0x820   : > { %9835 = vmatpush3.bf16.msra.mxu0 %v10960_v3 }
 0x821   : > { %v1987_v45 = vpack.c.bf16 %v1980_v42, %v1978_v5  ;;  %9880 = vmatprep.subr.bf16.mxu0 %v11415_v2 }
 0x823   : > { %9803 = vmatmul.mubr.msk.bf16.gmra.mrb[128].mxu0 %vm1046_vm6, %v1987_v45  ;;  %v12246_v45 = vld [vmem:[%s14809_s4 + $0x2] ss:$0 sm:$0xff] }
 0x824   : > { %v11086_v40 = vpop.eup %11085  ;;  %9806 = vmatprep.mubr.msk.bf16.mxu0 %vm11416_vm2, %v11415_v2 }
 0x825   : > { %v1982_v39 = vmul.f32 %v11086_v40, %v12134_v35  ;;  %v8613_v35 = vld [vmem:[%s14810_s5 + $0x4] sm:$0xf] }
 0x826   : > { %v2148_v28 = vsel %vm1172_vm5, %v8613_v35, 0 }
 0x827   : > { %v1988_v29 = vpack.c.bf16 %v1982_v39, %v1982_v39  ;;  %9811 = vmatpush3.bf16.msra.mxu1 %v2148_v28 }
 0x828   : > { %9856 = vmatprep.subr.bf16.mxu1 %v11415_v2 }
 0x82b   : > { %9807 = vmatmul.mubr.msk.bf16.gmra.mrb[132].mxu0 %vm1046_vm6, %v1988_v29 }
 0x82c   : > { %9836 = vmatprep.mubr.msk.bf16.mxu0 %vm11416_vm2, %v11415_v2 }
 0x833   : > { %9837 = vmatmul.mubr.msk.bf16.vlgmr.msra.gmra.mrb[136].mxu0 %vm594_vm3, %v11534_v23 }
 0x834   : > { %9840 = vmatprep.mubr.msk.bf16.mxu0 %vm11416_vm2, %v11415_v2  ;;  %9881 = vmatpush3.bf16.msra.mxu0 %v10961_v10 }
 0x835   : > { %9882 = vmatprep.subr.bf16.mxu0 %v11415_v2 }
 0x838   : > { %9883 = vmatpush3.bf16.msra.mxu0 %v10962_v26 }
 0x839   : > { %9922 = vmatprep.subr.bf16.mxu0 %v11415_v2 }
 0x83b   : > { %9841 = vmatmul.mubr.msk.bf16.gmra.mrb[140].mxu0 %vm594_vm3, %v11551_v31 }
 0x83c   : > { %9844 = vmatprep.mubr.msk.bf16.mxu0 %vm11416_vm2, %v11415_v2 }
 0x843   : > { %9845 = vmatmul.mubr.msk.bf16.gmra.mrb[144].mxu0 %vm594_vm3, %v11576_v43 }
 0x844   : > { %9848 = vmatprep.mubr.msk.bf16.mxu0 %vm11416_vm2, %v11415_v2 }
 0x84b   : > { %9849 = vmatmul.mubr.msk.bf16.gmra.mrb[148].mxu0 %vm594_vm3, %v11597_v51 }
 0x84c   : > { %9852 = vmatprep.mubr.msk.bf16.mxu0 %vm11416_vm2, %v11415_v2 }
 0x853   : > { %9853 = vmatmul.mubr.msk.bf16.gmra.mrb[152].mxu0 %vm594_vm3, %v11609_v52 }
 0x854   : > { %9884 = vmatprep.mubr.msk.bf16.mxu0 %vm11416_vm2, %v11415_v2 }
 0x85b   : > { %9885 = vmatmul.mubr.msk.bf16.vlgmr.msra.gmra.mrb[156].mxu0 %vm594_vm3, %v11534_v23 }
 0x85c   : > { %9888 = vmatprep.mubr.msk.bf16.mxu0 %vm11416_vm2, %v11415_v2 }
 0x863   : > { %9889 = vmatmul.mubr.msk.bf16.gmra.mrb[160].mxu0 %vm594_vm3, %v11551_v31 }
 0x864   : > { %9892 = vmatprep.mubr.msk.bf16.mxu0 %vm11416_vm2, %v11415_v2 }
 0x86b   : > { %9893 = vmatmul.mubr.msk.bf16.gmra.mrb[164].mxu0 %vm594_vm3, %v11576_v43 }
 0x86c   : > { %9896 = vmatprep.mubr.msk.bf16.mxu0 %vm11416_vm2, %v11415_v2 }
 0x873   : > { %9897 = vmatmul.mubr.msk.bf16.gmra.mrb[168].mxu0 %vm594_vm3, %v11597_v51 }
 0x874   : > { %9900 = vmatprep.mubr.msk.bf16.mxu0 %vm11416_vm2, %v11415_v2 }
 0x87b   : > { %9901 = vmatmul.mubr.msk.bf16.gmra.mrb[172].mxu0 %vm594_vm3, %v11609_v52 }
 0x87c   : > { %9928 = vmatprep.mubr.msk.bf16.mxu0 %vm11416_vm2, %v11415_v2 }
 0x8d8   : > { %v2035_v32 = vpop.f32.mrb[100].mxu1 }
 0x8d9   : > { %v9782_v21 = vpop.f32.mrb[101].mxu1 }
 0x8da   : > { %v2038_v56 = vpop.f32.mrb[102].mxu1 }
 0x8db   : > { %v2125_v48 = vpack.c.bf16 %v2038_v56, %v2035_v32  ;;  %v9783_v4 = vpop.f32.mrb[103].mxu1 }
 0x8dd   : > { %9813 = vmatmul.mubr.msk.bf16.vlgmr.msra.gmra.mrb[112].mxu1 %vm897_vm4, %v2125_v48 }
 0x8de   : > { %9816 = vmatprep.mubr.msk.bf16.mxu1 %vm11416_vm2, %v11415_v2  ;;  %9857 = vmatpush3.bf16.msra.mxu1 %v10963_v61 }
 0x8df   : > { %9858 = vmatprep.subr.bf16.mxu1 %v11415_v2 }
 0x8e0   : > { %v2043_v38 = vpop.f32.mrb[104].mxu1 }
 0x8e1   : > { %v9786_v8 = vpop.f32.mrb[105].mxu1 }
 0x8e2   : > { %v2046_v15 = vpop.f32.mrb[106].mxu1  ;;  %9859 = vmatpush3.bf16.msra.mxu1 %v10964_v22 }
 0x8e3   : > { %v2126_v46 = vpack.c.bf16 %v2046_v15, %v2043_v38  ;;  %v9787_v53 = vpop.f32.mrb[107].mxu1  ;;  %9904 = vmatprep.subr.bf16.mxu1 %v11415_v2 }
 0x8e5   : > { %9817 = vmatmul.mubr.msk.bf16.gmra.mrb[116].mxu1 %vm897_vm4, %v2126_v46 }
 0x8e6   : > { %9820 = vmatprep.mubr.msk.bf16.mxu1 %vm11416_vm2, %v11415_v2 }
 0x8e8   : > { %v2051_v12 = vpop.f32.mrb[108].mxu1 }
 0x8e9   : > { %v9790_v13 = vpop.f32.mrb[109].mxu1 }
 0x8ea   : > { %v2054_v49 = vpop.f32.mrb[110].mxu1 }
 0x8eb   : > { %v9791_v7 = vpop.f32.mrb[111].mxu1 }
 0x8ee   : > { %v2103_v47 = vpop.f32.mrb[124].mxu0 }
 0x8ef   : > { %v2127_v57 = vpack.c.bf16 %v2103_v47, %v2051_v12  ;;  %v9800_v1 = vpop.f32.mrb[125].mxu0 }
 0x8f0   : > { %v2106_v18 = vpop.f32.mrb[126].mxu0 }
 0x8f1   : > { %v9801_v11 = vpop.f32.mrb[127].mxu0  ;;  %9821 = vmatmul.mubr.msk.bf16.gmra.mrb[120].mxu1 %vm897_vm4, %v2127_v57 }
 0x8f2   : > { %9824 = vmatprep.mubr.msk.bf16.mxu1 %vm11416_vm2, %v11415_v2 }
 0x8f6   : > { %v2111_v14 = vpop.f32.mrb[128].mxu0 }
 0x8f7   : > { %v2128_v60 = vpack.c.bf16 %v2111_v14, %v2106_v18  ;;  %v9804_v37 = vpop.f32.mrb[129].mxu0 }
 0x8f8   : > { %v2114_v30 = vpop.f32.mrb[130].mxu0 }
 0x8f9   : > { %v9805_v63 = vpop.f32.mrb[131].mxu0  ;;  %9825 = vmatmul.mubr.msk.bf16.gmra.mrb[124].mxu1 %vm897_vm4, %v2128_v60 }
 0x8fa   : > { %9828 = vmatprep.mubr.msk.bf16.mxu1 %vm11416_vm2, %v11415_v2  ;;  %v12307_v63 = vld [vmem:[%s14809_s4 + $0xa] ss:$0 sm:$0xff] }
 0x8fe   : > { %v2119_v6 = vpop.f32.mrb[132].mxu0 }
 0x8ff   : > { %v2129_v3 = vpack.c.bf16 %v2119_v6, %v2114_v30  ;;  %v9808_v20 = vpop.f32.mrb[133].mxu0 }
 0x900   : > { %v2122_v5 = vpop.f32.mrb[134].mxu0 }
 0x901   : > { %v9809_v42 = vpop.f32.mrb[135].mxu0  ;;  %9829 = vmatmul.mubr.msk.bf16.gmra.mrb[128].mxu1 %vm897_vm4, %v2129_v3 }
 0x902   : > { %9860 = vmatprep.mubr.msk.bf16.mxu1 %vm11416_vm2, %v11415_v2 }
 0x906   : > { %v2292_v40 = vpop.f32.mrb[136].mxu0 }
 0x907   : > { %v9838_v39 = vpop.f32.mrb[137].mxu0  ;;  %v12249_v10 = vadd.f32 %v12246_v45, %v2292_v40 }
 0x908   : > { %v2295_v29 = vpop.f32.mrb[138].mxu0 }
 0x909   : > { %v12252_v26 = vadd.f32 %v12246_v45, %v2295_v29  ;;  %v9839_v35 = vpop.f32.mrb[139].mxu0  ;;  %9861 = vmatmul.mubr.msk.bf16.vlgmr.msra.gmra.mrb[132].mxu1 %vm594_vm3, %v11534_v23 }
 0x90a   : > { %9864 = vmatprep.mubr.msk.bf16.mxu1 %vm11416_vm2, %v11415_v2 }
 0x90e   : > { %v2300_v32 = vpop.f32.mrb[140].mxu0 }
 0x90f   : > { %v9842_v21 = vpop.f32.mrb[141].mxu0  ;;  %v12261_v61 = vadd.f32 %v12246_v45, %v2300_v32 }
 0x910   : > { %v2303_v56 = vpop.f32.mrb[142].mxu0 }
 0x911   : > { %v12264_v48 = vadd.f32 %v12246_v45, %v2303_v56  ;;  %v9843_v4 = vpop.f32.mrb[143].mxu0  ;;  %9865 = vmatmul.mubr.msk.bf16.gmra.mrb[136].mxu1 %vm594_vm3, %v11551_v31 }
 0x912   : > { %9868 = vmatprep.mubr.msk.bf16.mxu1 %vm11416_vm2, %v11415_v2 }
 0x916   : > { %v12272_v38 = vpop.f32.mrb[144].mxu0 }
 0x917   : > { %v9846_v8 = vpop.f32.mrb[145].mxu0 }
 0x918   : > { %v2311_v15 = vpop.f32.mrb[146].mxu0 }
 0x919   : > { %v9847_v46 = vpop.f32.mrb[147].mxu0  ;;  %9869 = vmatmul.mubr.msk.bf16.gmra.mrb[140].mxu1 %vm594_vm3, %v11576_v43  ;;  %v12279_v12 = vadd.f32 %v12246_v45, %v2311_v15 }
 0x91a   : > { %9872 = vmatprep.mubr.msk.bf16.mxu1 %vm11416_vm2, %v11415_v2 }
 0x91e   : > { %v2316_v53 = vpop.f32.mrb[148].mxu0 }
 0x91f   : > { %v12282_v13 = vadd.f32 %v12246_v45, %v2316_v53  ;;  %v9850_v49 = vpop.f32.mrb[149].mxu0 }
 0x920   : > { %v2319_v7 = vpop.f32.mrb[150].mxu0 }
 0x921   : > { %v9851_v57 = vpop.f32.mrb[151].mxu0  ;;  %9873 = vmatmul.mubr.msk.bf16.gmra.mrb[144].mxu1 %vm594_vm3, %v11597_v51  ;;  %v12291_v18 = vadd.f32 %v12246_v45, %v2319_v7 }
 0x922   : > { %9876 = vmatprep.mubr.msk.bf16.mxu1 %vm11416_vm2, %v11415_v2 }
 0x926   : > { %v2324_v1 = vpop.f32.mrb[152].mxu0 }
 0x927   : > { %v12294_v11 = vadd.f32 %v12246_v45, %v2324_v1  ;;  %v9854_v14 = vpop.f32.mrb[153].mxu0 }
 0x928   : > { %v12296_v60 = vpop.f32.mrb[154].mxu0 }
 0x929   : > { %v9855_v30 = vpop.f32.mrb[155].mxu0  ;;  %9877 = vmatmul.mubr.msk.bf16.gmra.mrb[148].mxu1 %vm594_vm3, %v11609_v52 }
 0x92a   : > { %9910 = vmatprep.mubr.msk.bf16.mxu1 %vm11416_vm2, %v11415_v2 }
 0x92e   : > { %v2488_v6 = vpop.f32.mrb[156].mxu0 }
 0x92f   : > { %v9886_v3 = vpop.f32.mrb[157].mxu0  ;;  %v12310_v5 = vadd.f32 %v12307_v63, %v2488_v6 }
 0x930   : > { %v2491_v20 = vpop.f32.mrb[158].mxu0 }
 0x931   : > { %v12313_v42 = vadd.f32 %v12307_v63, %v2491_v20  ;;  %v9887_v40 = vpop.f32.mrb[159].mxu0 }
 0x936   : > { %v2496_v29 = vpop.f32.mrb[160].mxu0 }
 0x937   : > { %v9890_v35 = vpop.f32.mrb[161].mxu0  ;;  %v12318_v21 = vadd.f32 %v12307_v63, %v2496_v29 }
 0x938   : > { %v2499_v32 = vpop.f32.mrb[162].mxu0 }
 0x939   : > { %v12321_v56 = vadd.f32 %v12307_v63, %v2499_v32  ;;  %v9891_v4 = vpop.f32.mrb[163].mxu0 }
 0x93e   : > { %v12325_v15 = vpop.f32.mrb[164].mxu0 }
 0x93f   : > { %v9894_v46 = vpop.f32.mrb[165].mxu0 }
 0x940   : > { %v2507_v53 = vpop.f32.mrb[166].mxu0 }
 0x941   : > { %v9895_v49 = vpop.f32.mrb[167].mxu0  ;;  %v12328_v57 = vadd.f32 %v12307_v63, %v2507_v53  ;;  %v8561_v53 = vld [vmem:[%s14814_s9] ss:$0 sm:$0xff] }
 0x942   : > { %v1403_v49 = vadd.f32 %v8561_v53, %v12012_v59  ;;  %v1405_v6 = vadd.f32 %v8561_v53, %v12016_v33 }
 0x946   : > { %v2512_v7 = vpop.f32.mrb[168].mxu0 }
 0x947   : > { %v12331_v1 = vadd.f32 %v12307_v63, %v2512_v7  ;;  %v9898_v14 = vpop.f32.mrb[169].mxu0 }
 0x948   : > { %v2515_v30 = vpop.f32.mrb[170].mxu0  ;;  %v1404_v14 = vadd.f32 %v8561_v53, %v12014_v0  ;;  %v1407_v0 = vadd.f32 %v8561_v53, %v12020_v54 }
 0x949   : > { %v9899_v3 = vpop.f32.mrb[171].mxu0  ;;  %v12336_v40 = vadd.f32 %v12307_v63, %v2515_v30 }
 0x94e   : > { %v2520_v20 = vpop.f32.mrb[172].mxu0 }
 0x94f   : > { %v12339_v29 = vadd.f32 %v12307_v63, %v2520_v20  ;;  %v9902_v35 = vpop.f32.mrb[173].mxu0 }
 0x950   : > { %v12341_v32 = vpop.f32.mrb[174].mxu0 }
 0x951   : > { %v9903_v46 = vpop.f32.mrb[175].mxu0 }
 0x952   : > { %v1406_v46 = vadd.f32 %v8561_v53, %v12018_v58  ;;  %v1409_v58 = vadd.f32 %v8561_v53, %v12024_v9 }
 0x9b0   : > { %v2184_v7 = vpop.f32.mrb[112].mxu1 }
 0x9b1   : > { %v12350_v30 = vadd.f32 %v2184_v7, %v1403_v49  ;;  %v9814_v3 = vpop.f32.mrb[113].mxu1  ;;  %v1408_v7 = vadd.f32 %v8561_v53, %v12022_v62  ;;  %v1411_v62 = vadd.f32 %v8561_v53, %v12028_v24 }
 0x9b2   : > { %v2187_v20 = vpop.f32.mrb[114].mxu1 }
 0x9b3   : > { %v12352_v35 = vadd.f32 %v2187_v20, %v1404_v14  ;;  %v9815_v37 = vpop.f32.mrb[115].mxu1 }
 0x9b8   : > { %v2192_v4 = vpop.f32.mrb[116].mxu1 }
 0x9b9   : > { %v12356_v47 = vadd.f32 %v2192_v4, %v1405_v6  ;;  %v9818_v22 = vpop.f32.mrb[117].mxu1 }
 0x9ba   : > { %v2195_v8 = vpop.f32.mrb[118].mxu1  ;;  %v1410_v22 = vadd.f32 %v8561_v53, %v12026_v16  ;;  %v8637_v16 = vld [vmem:[%s14809_s4 + $0x6] ss:$0 sm:$0xff] }
 0x9bb   : > { %v12358_v59 = vadd.f32 %v2195_v8, %v1406_v46  ;;  %v9819_v39 = vpop.f32.mrb[119].mxu1 }
 0x9c4   : > { %v2200_v49 = vpop.f32.mrb[120].mxu1 }
 0x9c5   : > { %v12362_v14 = vadd.f32 %v2200_v49, %v1407_v0  ;;  %v9822_v37 = vpop.f32.mrb[121].mxu1  ;;  %v1412_v49 = vadd.f32 %v8561_v53, %v12030_v55 }
 0x9c6   : > { %v2203_v3 = vpop.f32.mrb[122].mxu1 }
 0x9c7   : > { %v12364_v33 = vadd.f32 %v2203_v3, %v1408_v7  ;;  %v9823_v20 = vpop.f32.mrb[123].mxu1 }
 0x9cc   : > { %v2208_v6 = vpop.f32.mrb[124].mxu1 }
 0x9cd   : > { %v12368_v8 = vadd.f32 %v2208_v6, %v1409_v58  ;;  %v9826_v39 = vpop.f32.mrb[125].mxu1 }
 0x9ce   : > { %v2211_v4 = vpop.f32.mrb[126].mxu1 }
 0x9cf   : > { %v12370_v54 = vadd.f32 %v2211_v4, %v1410_v22  ;;  %v9827_v46 = vpop.f32.mrb[127].mxu1 }
 0x9d4   : > { %v2216_v0 = vpop.f32.mrb[128].mxu1 }
 0x9d5   : > { %v12374_v7 = vadd.f32 %v2216_v0, %v1411_v62  ;;  %v9830_v37 = vpop.f32.mrb[129].mxu1 }
 0x9d6   : > { %v2219_v3 = vpop.f32.mrb[130].mxu1 }
 0x9d7   : > { %v12376_v9 = vadd.f32 %v2219_v3, %v1412_v49  ;;  %v9831_v20 = vpop.f32.mrb[131].mxu1 }
 0x9dc   : > { %v2390_v58 = vpop.f32.mrb[132].mxu1 }
 0x9dd   : > { %v9862_v6 = vpop.f32.mrb[133].mxu1  ;;  %v2391_v39 = vadd.f32 %v8637_v16, %v2390_v58 }
 0x9de   : > { %v2393_v22 = vpop.f32.mrb[134].mxu1 }
 0x9df   : > { %v2394_v4 = vadd.f32 %v8637_v16, %v2393_v22  ;;  %v9863_v24 = vpop.f32.mrb[135].mxu1 }
 0x9e1   : > { %v2533_v46 = vpack.c.bf16 %v2394_v4, %v2391_v39 }
 0x9e3   : > { %v2555_v55 = vsel %vm897_vm4, %v2533_v46, 0 }
 0x9e4   : > { %v2398_v53 = vpop.f32.mrb[136].mxu1  ;;  %9905 = vmatpush3.bf16.xpose.msra.mxu1 %v2555_v55 }
 0x9e5   : > { %v9866_v62 = vpop.f32.mrb[137].mxu1  ;;  %9906 = vmatprep.subr.bf16.mxu1 %v11415_v2  ;;  %v2399_v49 = vadd.f32 %v8637_v16, %v2398_v53 }
 0x9e6   : > { %v2401_v0 = vpop.f32.mrb[138].mxu1 }
 0x9e7   : > { %v2402_v37 = vadd.f32 %v8637_v16, %v2401_v0  ;;  %v9867_v3 = vpop.f32.mrb[139].mxu1 }
 0x9e9   : > { %v2534_v20 = vpack.c.bf16 %v2402_v37, %v2399_v49 }
 0x9eb   : > { %v2558_v28 = vsel %vm897_vm4, %v2534_v20, 0  ;;  %v2505_v20 = vadd.f32 %v12307_v63, %v12325_v15 }
 0x9ec   : > { %v2406_v6 = vpop.f32.mrb[140].mxu1  ;;  %9907 = vmatpush3.bf16.xpose.msra.mxu1 %v2558_v28 }
 0x9ed   : > { %v2407_v58 = vadd.f32 %v8637_v16, %v2406_v6  ;;  %v9870_v22 = vpop.f32.mrb[141].mxu1  ;;  %9908 = vmatprep.subr.bf16.mxu1 %v11415_v2  ;;  %v14827_v6 = vpack.c.bf16 %v12252_v26, %v12249_v10 }
 0x9ee   : > { %v2409_v39 = vpop.f32.mrb[142].mxu1  ;;  %v14828_v22 = vpack.c.bf16 %v12313_v42, %v12310_v5  ;;  %v14830_v42 = vpack.c.bf16 %v12264_v48, %v12261_v61  ;;  %v2524_v61 = vadd.f32 %v12307_v63, %v12341_v32  ;;  %v14831_v48 = vpack.c.bf16 %v12282_v13, %v12279_v12 }
 0x9ef   : > { %v2535_v4 = vpack.c.bf16 %v2407_v58, %v2407_v58  ;;  %v9871_v24 = vpop.f32.mrb[143].mxu1  ;;  %v2410_v62 = vadd.f32 %v8637_v16, %v2409_v39  ;;  %v14834_v12 = vpack.c.bf16 %v12294_v11, %v12291_v18  ;;  %v2328_v63 = vadd.f32 %v12246_v45, %v12296_v60 }
 0x9f1   : > { %v2561_v46 = vsel %vm897_vm4, %v2535_v4, 0 }
 0x9f4   : > { %v2414_v55 = vpop.f32.mrb[144].mxu1  ;;  %9909 = vmatpush3.bf16.xpose.msra.mxu1 %v2561_v46  ;;  %v2541_v46 = vpack.c.bf16 %v2505_v20, %v2505_v20 }
 0x9f5   : > { %v2415_v53 = vadd.f32 %v8637_v16, %v2414_v55  ;;  %v9874_v0 = vpop.f32.mrb[145].mxu1  ;;  %9940 = vmatprep.subr.bf16.mxu1 %v11415_v2  ;;  %v14829_v55 = vpack.c.bf16 %v12321_v56, %v12318_v21  ;;  %v2309_v21 = vadd.f32 %v12246_v45, %v12272_v38  ;;  %v14832_v38 = vpack.c.bf16 %v12331_v1, %v12328_v57 }
 0x9f6   : > { %v2417_v49 = vpop.f32.mrb[146].mxu1  ;;  %v2532_v57 = vpack.c.bf16 %v2328_v63, %v2328_v63 }
 0x9f7   : > { %v9875_v37 = vpop.f32.mrb[147].mxu1  ;;  %v2536_v3 = vpack.c.bf16 %v2415_v53, %v2410_v62  ;;  %v2418_v39 = vadd.f32 %v8637_v16, %v2417_v49  ;;  %v2819_v53 = vsel %vm1172_vm5, %v2541_v46, 0  ;;  %v2544_v49 = vpack.c.bf16 %v2524_v61, %v2524_v61 }
 0x9f8   : > { %v14833_v37 = vpack.c.bf16 %v12339_v29, %v12336_v40 }
 0x9f9   : > { %v2629_v28 = vsel %vm897_vm4, %v2536_v3, 0  ;;  %v2887_v13 = vsel %vm1172_vm5, %v2544_v49, 0 }
 0x9fa   : > { %9923 = vmatpush3.bf16.xpose.msra.mxu0 %v2629_v28 }
 0x9fb   : > { %9911 = vmatmul.mubr.msk.bf16.vlgmr.msra.gmra.mrb[152].mxu1 %vm897_vm4, %v14827_v6  ;;  %9924 = vmatprep.subr.bf16.mxu0 %v11415_v2 }
 0x9fc   : > { %v2422_v58 = vpop.f32.mrb[148].mxu1  ;;  %9941 = vmatpush3.bf16.msra.mxu1 %v14828_v22  ;;  %9914 = vmatprep.mubr.msk.bf16.mxu1 %vm11416_vm2, %v11415_v2 }
 0x9fd   : > { %v2423_v4 = vadd.f32 %v8637_v16, %v2422_v58  ;;  %v9878_v24 = vpop.f32.mrb[149].mxu1  ;;  %9942 = vmatprep.subr.bf16.mxu1 %v11415_v2 }
 0x9fe   : > { %v2425_v15 = vpop.f32.mrb[150].mxu1 }
 0x9ff   : > { %v9879_v10 = vpop.f32.mrb[151].mxu1  ;;  %v2537_v26 = vpack.c.bf16 %v2423_v4, %v2418_v39  ;;  %v2426_v62 = vadd.f32 %v8637_v16, %v2425_v15  ;;  %v2529_v16 = vpack.c.bf16 %v2309_v21, %v2309_v21 }
 0xa00   : > { %9943 = vmatpush3.bf16.msra.mxu1 %v14829_v55 }
 0xa01   : > { %v2632_v5 = vsel %vm897_vm4, %v2537_v26, 0  ;;  %9944 = vmatprep.subr.bf16.mxu1 %v11415_v2  ;;  %v2538_v56 = vpack.c.bf16 %v2426_v62, %v2426_v62 }
 0xa02   : > { %9925 = vmatpush3.bf16.xpose.msra.mxu0 %v2632_v5 }
 0xa03   : > { %9915 = vmatmul.mubr.msk.bf16.gmra.mrb[156].mxu1 %vm897_vm4, %v14830_v42  ;;  %9926 = vmatprep.subr.bf16.mxu0 %v11415_v2  ;;  %v2635_v0 = vsel %vm897_vm4, %v2538_v56, 0 }
 0xa04   : > { %9945 = vmatpush3.bf16.msra.mxu1 %v2819_v53  ;;  %9918 = vmatprep.mubr.msk.bf16.mxu1 %vm11416_vm2, %v11415_v2 }
 0xa05   : > { %9976 = vmatprep.subr.bf16.mxu1 %v11415_v2 }
 0xa0a   : > { %9927 = vmatpush3.bf16.xpose.msra.mxu0 %v2635_v0 }
 0xa0b   : > { %9919 = vmatmul.mubr.msk.bf16.gmra.mrb[160].mxu1 %vm897_vm4, %v2529_v16  ;;  %9958 = vmatprep.subr.bf16.mxu0 %v11415_v2 }
 0xa0c   : > { %9946 = vmatprep.mubr.msk.bf16.mxu1 %vm11416_vm2, %v11415_v2 }
 0xa11   : > { %9929 = vmatmul.mubr.msk.bf16.vlgmr.msra.gmra.mrb[176].mxu0 %vm897_vm4, %v14831_v48 }
 0xa12   : > { %9959 = vmatpush3.bf16.msra.mxu0 %v14832_v38  ;;  %9932 = vmatprep.mubr.msk.bf16.mxu0 %vm11416_vm2, %v11415_v2 }
 0xa13   : > { %9960 = vmatprep.subr.bf16.mxu0 %v11415_v2 }
 0xa16   : > { %9961 = vmatpush3.bf16.msra.mxu0 %v14833_v37 }
 0xa17   : > { %9962 = vmatprep.subr.bf16.mxu0 %v11415_v2 }
 0xa19   : > { %9933 = vmatmul.mubr.msk.bf16.gmra.mrb[180].mxu0 %vm897_vm4, %v14834_v12 }
 0xa1a   : > { %9963 = vmatpush3.bf16.msra.mxu0 %v2887_v13  ;;  %9936 = vmatprep.mubr.msk.bf16.mxu0 %vm11416_vm2, %v11415_v2 }
 0xa1b   : > { %9998 = vmatprep.subr.bf16.mxu0 %v11415_v2 }
 0xa21   : > { %9937 = vmatmul.mubr.msk.bf16.gmra.mrb[184].mxu0 %vm897_vm4, %v2532_v57 }
 0xa22   : > { %9964 = vmatprep.mubr.msk.bf16.mxu0 %vm11416_vm2, %v11415_v2 }
 0xace   : > { %v2597_v18 = vpop.f32.mrb[152].mxu1 }
 0xacf   : > { %v9912_v11 = vpop.f32.mrb[153].mxu1  ;;  %v2693_v1 = vsel %vm1046_vm6, %v2597_v18, -inf }
 0xad0   : > { %2694 = vmax.xlane.f32.xlu0 %v2693_v1  ;;  %v2600_v40 = vpop.f32.mrb[154].mxu1 }
 0xad1   : > { %v9913_v29 = vpop.f32.mrb[155].mxu1  ;;  %v2696_v32 = vsel %vm1046_vm6, %v2600_v40, -inf }
 0xad2   : > { %2697 = vmax.xlane.f32.xlu1 %v2696_v32 }
 0xad6   : > { %v2605_v3 = vpop.f32.mrb[156].mxu1 }
 0xad7   : > { %v9916_v45 = vpop.f32.mrb[157].mxu1  ;;  %v2699_v60 = vsel %vm1046_vm6, %v2605_v3, -inf }
 0xad8   : > { %2700 = vmax.xlane.f32.xlu0 %v2699_v60  ;;  %v2608_v28 = vpop.f32.mrb[158].mxu1 }
 0xad9   : > { %v9917_v20 = vpop.f32.mrb[159].mxu1  ;;  %v2702_v6 = vsel %vm1046_vm6, %v2608_v28, -inf }
 0xada   : > { %2703 = vmax.xlane.f32.xlu1 %v2702_v6 }
 0xade   : > { %v2613_v58 = vpop.f32.mrb[160].mxu1 }
 0xadf   : > { %v9920_v22 = vpop.f32.mrb[161].mxu1  ;;  %v2705_v39 = vsel %vm1046_vm6, %v2613_v58, -inf }
 0xae0   : > { %2706 = vmax.xlane.f32.xlu0 %v2705_v39  ;;  %v2616_v4 = vpop.f32.mrb[162].mxu1 }
 0xae1   : > { %v9921_v24 = vpop.f32.mrb[163].mxu1 }
 0xae4   : > { %v2671_v15 = vpop.f32.mrb[176].mxu0 }
 0xae5   : > { %v9930_v46 = vpop.f32.mrb[177].mxu0  ;;  %v2708_v10 = vsel %vm1046_vm6, %v2671_v15, -inf }
 0xae6   : > { %2709 = vmax.xlane.f32.xlu1 %v2708_v10  ;;  %v2674_v26 = vpop.f32.mrb[178].mxu0 }
 0xae7   : > { %v9931_v55 = vpop.f32.mrb[179].mxu0  ;;  %v2711_v62 = vsel %vm1046_vm6, %v2674_v26, -inf }
 0xae8   : > { %2712 = vmax.xlane.f32.xlu0 %v2711_v62 }
 0xaec   : > { %v2679_v5 = vpop.f32.mrb[180].mxu0 }
 0xaed   : > { %v9934_v42 = vpop.f32.mrb[181].mxu0  ;;  %v2714_v53 = vsel %vm1046_vm6, %v2679_v5, -inf }
 0xaee   : > { %2715 = vmax.xlane.f32.xlu1 %v2714_v53  ;;  %v2682_v21 = vpop.f32.mrb[182].mxu0 }
 0xaef   : > { %v9935_v56 = vpop.f32.mrb[183].mxu0  ;;  %v2717_v16 = vsel %vm1046_vm6, %v2682_v21, -inf }
 0xaf0   : > { %2718 = vmax.xlane.f32.xlu0 %v2717_v16 }
 0xaf4   : > { %v12460_v0 = vpop.f32.mrb[184].mxu0 }
 0xaf5   : > { %v9938_v61 = vpop.f32.mrb[185].mxu0  ;;  %v2720_v48 = vsel %vm1046_vm6, %v12460_v0, -inf }
 0xaf6   : > { %2721 = vmax.xlane.f32.xlu1 %v2720_v48  ;;  %v2690_v38 = vpop.f32.mrb[186].mxu0 }
 0xaf7   : > { %v9939_v49 = vpop.f32.mrb[187].mxu0 }
 0xb5d   : > { %v2695_v37 = vpop.xlane.xlu0 %2694 }
 0xb5e   : > { %v2723_v12 = vsub.f32 %v2597_v18, %v2695_v37 }
 0xb5f   : > { %v2698_v13 = vpop.xlane.xlu1 %2697 }
 0xb60   : > { %v2733_v63 = vmul.f32 1.442695, %v2723_v12  ;;  %v2724_v57 = vsub.f32 %v2600_v40, %v2698_v13 }
 0xb62   : > { %11087 = vpow2.f32 %v2733_v63  ;;  %v2735_v11 = vmul.f32 1.442695, %v2724_v57 }
 0xb64   : > { %11089 = vpow2.f32 %v2735_v11 }
 0xb65   : > { %v2701_v1 = vpop.xlane.xlu0 %2700 }
 0xb66   : > { %v2725_v29 = vsub.f32 %v2605_v3, %v2701_v1 }
 0xb67   : > { %v2704_v32 = vpop.xlane.xlu1 %2703 }
 0xb68   : > { %v2737_v45 = vmul.f32 1.442695, %v2725_v29  ;;  %v2726_v60 = vsub.f32 %v2608_v28, %v2704_v32 }
 0xb6a   : > { %11091 = vpow2.f32 %v2737_v45  ;;  %v2739_v20 = vmul.f32 1.442695, %v2726_v60 }
 0xb6c   : > { %v12464_v6 = vpop.eup %11087  ;;  %11093 = vpow2.f32 %v2739_v20 }
 0xb6d   : > { %v2707_v22 = vpop.xlane.xlu0 %2706  ;;  %v2753_v18 = vsel %vm1046_vm6, %v12464_v6, 0.0 }
 0xb6e   : > { %v11090_v39 = vpop.eup %11089  ;;  %v2727_v4 = vsub.f32 %v2613_v58, %v2707_v22  ;;  %2754 = vadd.xlane.f32.xlu0 %v2753_v18 }
 0xb6f   : > { %v2756_v40 = vsel %vm1046_vm6, %v11090_v39, 0.0 }
 0xb70   : > { %v2741_v24 = vmul.f32 1.442695, %v2727_v4  ;;  %2757 = vadd.xlane.f32.xlu1 %v2756_v40 }
 0xb72   : > { %11095 = vpow2.f32 %v2741_v24 }
 0xb73   : > { %v2710_v3 = vpop.xlane.xlu1 %2709 }
 0xb74   : > { %v12469_v46 = vpop.eup %11091  ;;  %v2728_v28 = vsub.f32 %v2671_v15, %v2710_v3 }
 0xb75   : > { %v2713_v10 = vpop.xlane.xlu0 %2712  ;;  %v2759_v55 = vsel %vm1046_vm6, %v12469_v46, 0.0 }
 0xb76   : > { %v11094_v62 = vpop.eup %11093  ;;  %v2743_v42 = vmul.f32 1.442695, %v2728_v28  ;;  %v2729_v53 = vsub.f32 %v2674_v26, %v2713_v10  ;;  %2760 = vadd.xlane.f32.xlu0 %v2759_v55 }
 0xb77   : > { %v2762_v58 = vsel %vm1046_vm6, %v11094_v62, 0.0 }
 0xb78   : > { %11097 = vpow2.f32 %v2743_v42  ;;  %v2745_v56 = vmul.f32 1.442695, %v2729_v53  ;;  %2763 = vadd.xlane.f32.xlu1 %v2762_v58 }
 0xb7a   : > { %11099 = vpow2.f32 %v2745_v56 }
 0xb7b   : > { %v2716_v16 = vpop.xlane.xlu1 %2715 }
 0xb7c   : > { %v11096_v61 = vpop.eup %11095  ;;  %v2730_v48 = vsub.f32 %v2679_v5, %v2716_v16 }
 0xb7d   : > { %v2719_v38 = vpop.xlane.xlu0 %2718  ;;  %v2765_v15 = vsel %vm1046_vm6, %v11096_v61, 0.0 }
 0xb7e   : > { %v2747_v49 = vmul.f32 1.442695, %v2730_v48  ;;  %v2731_v37 = vsub.f32 %v2682_v21, %v2719_v38  ;;  %2766 = vadd.xlane.f32.xlu0 %v2765_v15 }
 0xb80   : > { %11101 = vpow2.f32 %v2747_v49  ;;  %v2749_v12 = vmul.f32 1.442695, %v2731_v37 }
 0xb82   : > { %v11098_v13 = vpop.eup %11097  ;;  %11103 = vpow2.f32 %v2749_v12 }
 0xb83   : > { %v2722_v26 = vpop.xlane.xlu1 %2721  ;;  %v2768_v63 = vsel %vm1046_vm6, %v11098_v13, 0.0 }
 0xb84   : > { %v11100_v57 = vpop.eup %11099  ;;  %v2732_v11 = vsub.f32 %v12460_v0, %v2722_v26  ;;  %2769 = vadd.xlane.f32.xlu1 %v2768_v63  ;;  %v10965_v63 = vld [vmem:[%s14808_s3 + $0x30] sm:$0xff]  }
 0xb85   : > { %v2771_v1 = vsel %vm1046_vm6, %v11100_v57, 0.0 }
 0xb86   : > { %v2751_v5 = vmul.f32 1.442695, %v2732_v11  ;;  %2772 = vadd.xlane.f32.xlu0 %v2771_v1 }
 0xb88   : > { %11105 = vpow2.f32 %v2751_v5  ;;  %v10966_v5 = vld [vmem:[%s14808_s3 + $0x38] sm:$0xff]  }
 0xb8a   : > { %v11102_v29 = vpop.eup %11101 }
 0xb8b   : > { %v2774_v21 = vsel %vm1046_vm6, %v11102_v29, 0.0 }
 0xb8c   : > { %v11104_v32 = vpop.eup %11103  ;;  %2775 = vadd.xlane.f32.xlu1 %v2774_v21 }
 0xb8d   : > { %v2777_v45 = vsel %vm1046_vm6, %v11104_v32, 0.0 }
 0xb8e   : > { %2778 = vadd.xlane.f32.xlu0 %v2777_v45 }
 0xb92   : > { %v12480_v60 = vpop.eup %11105 }
 0xb93   : > { %v2780_v20 = vsel %vm1046_vm6, %v12480_v60, 0.0 }
 0xb94   : > { %2781 = vadd.xlane.f32.xlu1 %v2780_v20 }
 0xbfb   : > { %v2755_v0 = vpop.xlane.xlu0 %2754 }
 0xbfc   : > { %11107 = vrcp.f32 %v2755_v0 }
 0xbfd   : > { %v2758_v22 = vpop.xlane.xlu1 %2757 }
 0xbfe   : > { %11109 = vrcp.f32 %v2758_v22 }
 0xc03   : > { %v2761_v18 = vpop.xlane.xlu0 %2760 }
 0xc04   : > { %11111 = vrcp.f32 %v2761_v18 }
 0xc05   : > { %v2764_v4 = vpop.xlane.xlu1 %2763 }
 0xc06   : > { %v11108_v40 = vpop.eup %11107  ;;  %11113 = vrcp.f32 %v2764_v4 }
 0xc07   : > { %v2784_v3 = vmul.f32 %v11108_v40, %v12464_v6 }
 0xc08   : > { %v11110_v24 = vpop.eup %11109 }
 0xc09   : > { %v2786_v28 = vmul.f32 %v11110_v24, %v11090_v39 }
 0xc0b   : > { %v2803_v10 = vpack.c.bf16 %v2786_v28, %v2784_v3  ;;  %v2767_v55 = vpop.xlane.xlu0 %2766  ;;  %v10969_v3 = vld [vmem:[%s14808_s3 + $0x70] sm:$0xff]  }
 0xc0c   : > { %11115 = vrcp.f32 %v2767_v55  ;;  %v10970_v55 = vld [vmem:[%s14808_s3 + $0x78] sm:$0xff]  }
 0xc0d   : > { %9947 = vmatmul.mubr.msk.bf16.vlgmr.msra.gmra.mrb[164].mxu1 %vm1046_vm6, %v2803_v10 }
 0xc0e   : > { %v11112_v42 = vpop.eup %11111  ;;  %9950 = vmatprep.mubr.msk.bf16.mxu1 %vm11416_vm2, %v11415_v2 }
 0xc0f   : > { %v2788_v56 = vmul.f32 %v11112_v42, %v12469_v46 }
 0xc10   : > { %v11114_v53 = vpop.eup %11113 }
 0xc11   : > { %v2770_v58 = vpop.xlane.xlu1 %2769  ;;  %v2790_v16 = vmul.f32 %v11114_v53, %v11094_v62 }
 0xc12   : > { %11117 = vrcp.f32 %v2770_v58 }
 0xc13   : > { %v2773_v48 = vpop.xlane.xlu0 %2772  ;;  %v2804_v38 = vpack.c.bf16 %v2790_v16, %v2788_v56 }
 0xc14   : > { %11119 = vrcp.f32 %v2773_v48 }
 0xc15   : > { %9951 = vmatmul.mubr.msk.bf16.gmra.mrb[168].mxu1 %vm1046_vm6, %v2804_v38 }
 0xc16   : > { %v11116_v6 = vpop.eup %11115  ;;  %9954 = vmatprep.mubr.msk.bf16.mxu1 %vm11416_vm2, %v11415_v2 }
 0xc17   : > { %v2792_v39 = vmul.f32 %v11116_v6, %v11096_v61 }
 0xc19   : > { %v2776_v15 = vpop.xlane.xlu1 %2775  ;;  %v2805_v37 = vpack.c.bf16 %v2792_v39, %v2792_v39 }
 0xc1a   : > { %11121 = vrcp.f32 %v2776_v15 }
 0xc1b   : > { %v2779_v49 = vpop.xlane.xlu0 %2778 }
 0xc1c   : > { %v11118_v12 = vpop.eup %11117  ;;  %11123 = vrcp.f32 %v2779_v49 }
 0xc1d   : > { %9955 = vmatmul.mubr.msk.bf16.gmra.mrb[172].mxu1 %vm1046_vm6, %v2805_v37  ;;  %v2794_v62 = vmul.f32 %v11118_v12, %v11098_v13 }
 0xc1e   : > { %v11120_v46 = vpop.eup %11119  ;;  %9978 = vmatprep.mubr.msk.bf16.mxu1 %vm11416_vm2, %v11415_v2 }
 0xc1f   : > { %v2796_v26 = vmul.f32 %v11120_v46, %v11100_v57 }
 0xc21   : > { %v2806_v11 = vpack.c.bf16 %v2796_v26, %v2794_v62  ;;  %v2782_v61 = vpop.xlane.xlu1 %2781 }
 0xc22   : > { %11125 = vrcp.f32 %v2782_v61 }
 0xc23   : > { %9965 = vmatmul.mubr.msk.bf16.vlgmr.msra.gmra.mrb[188].mxu0 %vm1046_vm6, %v2806_v11 }
 0xc24   : > { %v11122_v1 = vpop.eup %11121  ;;  %9968 = vmatprep.mubr.msk.bf16.mxu0 %vm11416_vm2, %v11415_v2  ;;  %9999 = vmatpush3.bf16.msra.mxu0 %v10965_v63 }
 0xc25   : > { %10000 = vmatprep.subr.bf16.mxu0 %v11415_v2  ;;  %v2798_v57 = vmul.f32 %v11122_v1, %v11102_v29  ;;  %v10967_v29 = vld [vmem:[%s14808_s3 + $0xb0] sm:$0xff]  }
 0xc26   : > { %v11124_v13 = vpop.eup %11123 }
 0xc27   : > { %v2800_v21 = vmul.f32 %v11124_v13, %v11104_v32  ;;  %v10968_v32 = vld [vmem:[%s14808_s3 + $0xb8] sm:$0xff]  }
 0xc28   : > { %10001 = vmatpush3.bf16.msra.mxu0 %v10966_v5 }
 0xc29   : > { %v2807_v45 = vpack.c.bf16 %v2800_v21, %v2798_v57  ;;  %10046 = vmatprep.subr.bf16.mxu0 %v11415_v2 }
 0xc2b   : > { %9969 = vmatmul.mubr.msk.bf16.gmra.mrb[192].mxu0 %vm1046_vm6, %v2807_v45  ;;  %v12592_v45 = vld [vmem:[%s14809_s4 + $0x3] ss:$0 sm:$0xff] }
 0xc2c   : > { %v11126_v20 = vpop.eup %11125  ;;  %9972 = vmatprep.mubr.msk.bf16.mxu0 %vm11416_vm2, %v11415_v2 }
 0xc2d   : > { %v2802_v0 = vmul.f32 %v11126_v20, %v12480_v60  ;;  %v8670_v60 = vld [vmem:[%s14810_s5 + $0x8] sm:$0xf] }
 0xc2e   : > { %v2968_v18 = vsel %vm1172_vm5, %v8670_v60, 0 }
 0xc2f   : > { %v2808_v22 = vpack.c.bf16 %v2802_v0, %v2802_v0  ;;  %9977 = vmatpush3.bf16.msra.mxu1 %v2968_v18 }
 0xc30   : > { %10022 = vmatprep.subr.bf16.mxu1 %v11415_v2 }
 0xc33   : > { %9973 = vmatmul.mubr.msk.bf16.gmra.mrb[196].mxu0 %vm1046_vm6, %v2808_v22 }
 0xc34   : > { %10002 = vmatprep.mubr.msk.bf16.mxu0 %vm11416_vm2, %v11415_v2 }
 0xc3b   : > { %10003 = vmatmul.mubr.msk.bf16.vlgmr.msra.gmra.mrb[200].mxu0 %vm594_vm3, %v11534_v23 }
 0xc3c   : > { %10006 = vmatprep.mubr.msk.bf16.mxu0 %vm11416_vm2, %v11415_v2  ;;  %10047 = vmatpush3.bf16.msra.mxu0 %v10967_v29 }
 0xc3d   : > { %10048 = vmatprep.subr.bf16.mxu0 %v11415_v2 }
 0xc40   : > { %10049 = vmatpush3.bf16.msra.mxu0 %v10968_v32 }
 0xc41   : > { %10088 = vmatprep.subr.bf16.mxu0 %v11415_v2 }
 0xc43   : > { %10007 = vmatmul.mubr.msk.bf16.gmra.mrb[204].mxu0 %vm594_vm3, %v11551_v31 }
 0xc44   : > { %10010 = vmatprep.mubr.msk.bf16.mxu0 %vm11416_vm2, %v11415_v2 }
 0xc4b   : > { %10011 = vmatmul.mubr.msk.bf16.gmra.mrb[208].mxu0 %vm594_vm3, %v11576_v43 }
 0xc4c   : > { %10014 = vmatprep.mubr.msk.bf16.mxu0 %vm11416_vm2, %v11415_v2 }
 0xc53   : > { %10015 = vmatmul.mubr.msk.bf16.gmra.mrb[212].mxu0 %vm594_vm3, %v11597_v51 }
 0xc54   : > { %10018 = vmatprep.mubr.msk.bf16.mxu0 %vm11416_vm2, %v11415_v2 }
 0xc5b   : > { %10019 = vmatmul.mubr.msk.bf16.gmra.mrb[216].mxu0 %vm594_vm3, %v11609_v52 }
 0xc5c   : > { %10050 = vmatprep.mubr.msk.bf16.mxu0 %vm11416_vm2, %v11415_v2 }
 0xc63   : > { %10051 = vmatmul.mubr.msk.bf16.vlgmr.msra.gmra.mrb[220].mxu0 %vm594_vm3, %v11534_v23 }
 0xc64   : > { %10054 = vmatprep.mubr.msk.bf16.mxu0 %vm11416_vm2, %v11415_v2 }
 0xc6b   : > { %10055 = vmatmul.mubr.msk.bf16.gmra.mrb[224].mxu0 %vm594_vm3, %v11551_v31 }
 0xc6c   : > { %10058 = vmatprep.mubr.msk.bf16.mxu0 %vm11416_vm2, %v11415_v2 }
 0xc73   : > { %10059 = vmatmul.mubr.msk.bf16.gmra.mrb[228].mxu0 %vm594_vm3, %v11576_v43 }
 0xc74   : > { %10062 = vmatprep.mubr.msk.bf16.mxu0 %vm11416_vm2, %v11415_v2 }
 0xc7b   : > { %10063 = vmatmul.mubr.msk.bf16.gmra.mrb[232].mxu0 %vm594_vm3, %v11597_v51 }
 0xc7c   : > { %10066 = vmatprep.mubr.msk.bf16.mxu0 %vm11416_vm2, %v11415_v2 }
 0xc83   : > { %10067 = vmatmul.mubr.msk.bf16.gmra.mrb[236].mxu0 %vm594_vm3, %v11609_v52 }
 0xc84   : > { %10094 = vmatprep.mubr.msk.bf16.mxu0 %vm11416_vm2, %v11415_v2 }
 0xce0   : > { %v2855_v4 = vpop.f32.mrb[164].mxu1 }
 0xce1   : > { %v9948_v40 = vpop.f32.mrb[165].mxu1 }
 0xce2   : > { %v2858_v24 = vpop.f32.mrb[166].mxu1 }
 0xce3   : > { %v2945_v28 = vpack.c.bf16 %v2858_v24, %v2855_v4  ;;  %v9949_v10 = vpop.f32.mrb[167].mxu1 }
 0xce5   : > { %9979 = vmatmul.mubr.msk.bf16.vlgmr.msra.gmra.mrb[176].mxu1 %vm897_vm4, %v2945_v28 }
 0xce6   : > { %9982 = vmatprep.mubr.msk.bf16.mxu1 %vm11416_vm2, %v11415_v2  ;;  %10023 = vmatpush3.bf16.msra.mxu1 %v10969_v3 }
 0xce7   : > { %10024 = vmatprep.subr.bf16.mxu1 %v11415_v2 }
 0xce8   : > { %v2863_v42 = vpop.f32.mrb[168].mxu1 }
 0xce9   : > { %v9952_v53 = vpop.f32.mrb[169].mxu1 }
 0xcea   : > { %v2866_v58 = vpop.f32.mrb[170].mxu1  ;;  %10025 = vmatpush3.bf16.msra.mxu1 %v10970_v55 }
 0xceb   : > { %v2946_v56 = vpack.c.bf16 %v2866_v58, %v2863_v42  ;;  %v9953_v16 = vpop.f32.mrb[171].mxu1  ;;  %10070 = vmatprep.subr.bf16.mxu1 %v11415_v2 }
 0xced   : > { %9983 = vmatmul.mubr.msk.bf16.gmra.mrb[180].mxu1 %vm897_vm4, %v2946_v56 }
 0xcee   : > { %9986 = vmatprep.mubr.msk.bf16.mxu1 %vm11416_vm2, %v11415_v2 }
 0xcf0   : > { %v2871_v48 = vpop.f32.mrb[172].mxu1 }
 0xcf1   : > { %v9956_v38 = vpop.f32.mrb[173].mxu1 }
 0xcf2   : > { %v2874_v6 = vpop.f32.mrb[174].mxu1 }
 0xcf3   : > { %v9957_v39 = vpop.f32.mrb[175].mxu1 }
 0xcf6   : > { %v2923_v15 = vpop.f32.mrb[188].mxu0 }
 0xcf7   : > { %v2947_v49 = vpack.c.bf16 %v2923_v15, %v2871_v48  ;;  %v9966_v37 = vpop.f32.mrb[189].mxu0 }
 0xcf8   : > { %v2926_v12 = vpop.f32.mrb[190].mxu0 }
 0xcf9   : > { %v9967_v46 = vpop.f32.mrb[191].mxu0  ;;  %9987 = vmatmul.mubr.msk.bf16.gmra.mrb[184].mxu1 %vm897_vm4, %v2947_v49 }
 0xcfa   : > { %9990 = vmatprep.mubr.msk.bf16.mxu1 %vm11416_vm2, %v11415_v2 }
 0xcfe   : > { %v2931_v62 = vpop.f32.mrb[192].mxu0 }
 0xcff   : > { %v2948_v26 = vpack.c.bf16 %v2931_v62, %v2926_v12  ;;  %v9970_v63 = vpop.f32.mrb[193].mxu0 }
 0xd00   : > { %v2934_v11 = vpop.f32.mrb[194].mxu0 }
 0xd01   : > { %v9971_v61 = vpop.f32.mrb[195].mxu0  ;;  %9991 = vmatmul.mubr.msk.bf16.gmra.mrb[188].mxu1 %vm897_vm4, %v2948_v26 }
 0xd02   : > { %9994 = vmatprep.mubr.msk.bf16.mxu1 %vm11416_vm2, %v11415_v2 }
 0xd06   : > { %v2939_v1 = vpop.f32.mrb[196].mxu0 }
 0xd07   : > { %v2949_v5 = vpack.c.bf16 %v2939_v1, %v2934_v11  ;;  %v9974_v13 = vpop.f32.mrb[197].mxu0 }
 0xd08   : > { %v2942_v57 = vpop.f32.mrb[198].mxu0 }
 0xd09   : > { %v9975_v21 = vpop.f32.mrb[199].mxu0  ;;  %9995 = vmatmul.mubr.msk.bf16.gmra.mrb[192].mxu1 %vm897_vm4, %v2949_v5 }
 0xd0a   : > { %10026 = vmatprep.mubr.msk.bf16.mxu1 %vm11416_vm2, %v11415_v2 }
 0xd0e   : > { %v3112_v20 = vpop.f32.mrb[200].mxu0 }
 0xd0f   : > { %v10004_v0 = vpop.f32.mrb[201].mxu0  ;;  %v12595_v29 = vadd.f32 %v12592_v45, %v3112_v20 }
 0xd10   : > { %v3115_v22 = vpop.f32.mrb[202].mxu0 }
 0xd11   : > { %v12598_v32 = vadd.f32 %v12592_v45, %v3115_v22  ;;  %v10005_v60 = vpop.f32.mrb[203].mxu0  ;;  %10027 = vmatmul.mubr.msk.bf16.vlgmr.msra.gmra.mrb[196].mxu1 %vm594_vm3, %v11534_v23 }
 0xd12   : > { %10030 = vmatprep.mubr.msk.bf16.mxu1 %vm11416_vm2, %v11415_v2 }
 0xd13   : > { %v3347_v18 = vpack.c.bf16 %v12598_v32, %v12595_v29 }
 0xd16   : > { %v3120_v4 = vpop.f32.mrb[204].mxu0 }
 0xd17   : > { %v10008_v40 = vpop.f32.mrb[205].mxu0  ;;  %v12607_v3 = vadd.f32 %v12592_v45, %v3120_v4 }
 0xd18   : > { %v3123_v24 = vpop.f32.mrb[206].mxu0 }
 0xd19   : > { %v12610_v28 = vadd.f32 %v12592_v45, %v3123_v24  ;;  %v10009_v10 = vpop.f32.mrb[207].mxu0  ;;  %10031 = vmatmul.mubr.msk.bf16.gmra.mrb[200].mxu1 %vm594_vm3, %v11551_v31 }
 0xd1a   : > { %10034 = vmatprep.mubr.msk.bf16.mxu1 %vm11416_vm2, %v11415_v2 }
 0xd1b   : > { %v3348_v23 = vpack.c.bf16 %v12610_v28, %v12607_v3 }
 0xd1e   : > { %v12618_v55 = vpop.f32.mrb[208].mxu0 }
 0xd1f   : > { %v10012_v42 = vpop.f32.mrb[209].mxu0 }
 0xd20   : > { %v3131_v53 = vpop.f32.mrb[210].mxu0 }
 0xd21   : > { %v10013_v58 = vpop.f32.mrb[211].mxu0  ;;  %10035 = vmatmul.mubr.msk.bf16.gmra.mrb[204].mxu1 %vm594_vm3, %v11576_v43  ;;  %v12625_v31 = vadd.f32 %v12592_v45, %v3131_v53 }
 0xd22   : > { %10038 = vmatprep.mubr.msk.bf16.mxu1 %vm11416_vm2, %v11415_v2 }
 0xd26   : > { %v3136_v56 = vpop.f32.mrb[212].mxu0 }
 0xd27   : > { %v12628_v16 = vadd.f32 %v12592_v45, %v3136_v56  ;;  %v10016_v48 = vpop.f32.mrb[213].mxu0 }
 0xd28   : > { %v3139_v38 = vpop.f32.mrb[214].mxu0 }
 0xd29   : > { %v3350_v6 = vpack.c.bf16 %v12628_v16, %v12625_v31  ;;  %v10017_v39 = vpop.f32.mrb[215].mxu0  ;;  %10039 = vmatmul.mubr.msk.bf16.gmra.mrb[208].mxu1 %vm594_vm3, %v11597_v51  ;;  %v12637_v15 = vadd.f32 %v12592_v45, %v3139_v38  ;;  %v12653_v51 = vld [vmem:[%s14809_s4 + $0xb] ss:$0 sm:$0xff] }
 0xd2a   : > { %10042 = vmatprep.mubr.msk.bf16.mxu1 %vm11416_vm2, %v11415_v2 }
 0xd2e   : > { %v3144_v43 = vpop.f32.mrb[216].mxu0 }
 0xd2f   : > { %v12640_v49 = vadd.f32 %v12592_v45, %v3144_v43  ;;  %v10020_v37 = vpop.f32.mrb[217].mxu0 }
 0xd30   : > { %v12642_v12 = vpop.f32.mrb[218].mxu0 }
 0xd31   : > { %v10021_v62 = vpop.f32.mrb[219].mxu0  ;;  %10043 = vmatmul.mubr.msk.bf16.gmra.mrb[212].mxu1 %vm594_vm3, %v11609_v52  ;;  %v14837_v31 = vpack.c.bf16 %v12640_v49, %v12637_v15 }
 0xd32   : > { %10076 = vmatprep.mubr.msk.bf16.mxu1 %vm11416_vm2, %v11415_v2 }
 0xd36   : > { %v3308_v26 = vpop.f32.mrb[220].mxu0 }
 0xd37   : > { %v10052_v63 = vpop.f32.mrb[221].mxu0  ;;  %v12656_v61 = vadd.f32 %v12653_v51, %v3308_v26 }
 0xd38   : > { %v3311_v11 = vpop.f32.mrb[222].mxu0 }
 0xd39   : > { %v12659_v1 = vadd.f32 %v12653_v51, %v3311_v11  ;;  %v10053_v5 = vpop.f32.mrb[223].mxu0 }
 0xd3b   : > { %v3359_v52 = vpack.c.bf16 %v12659_v1, %v12656_v61 }
 0xd3e   : > { %v3316_v13 = vpop.f32.mrb[224].mxu0 }
 0xd3f   : > { %v10056_v57 = vpop.f32.mrb[225].mxu0  ;;  %v12664_v20 = vadd.f32 %v12653_v51, %v3316_v13 }
 0xd40   : > { %v3319_v21 = vpop.f32.mrb[226].mxu0 }
 0xd41   : > { %v12667_v0 = vadd.f32 %v12653_v51, %v3319_v21  ;;  %v10057_v22 = vpop.f32.mrb[227].mxu0 }
 0xd43   : > { %v3360_v60 = vpack.c.bf16 %v12667_v0, %v12664_v20 }
 0xd46   : > { %v12671_v4 = vpop.f32.mrb[228].mxu0 }
 0xd47   : > { %v10060_v40 = vpop.f32.mrb[229].mxu0 }
 0xd48   : > { %v3327_v24 = vpop.f32.mrb[230].mxu0 }
 0xd49   : > { %v10061_v10 = vpop.f32.mrb[231].mxu0  ;;  %v12674_v53 = vadd.f32 %v12653_v51, %v3327_v24 }
 0xd4e   : > { %v3332_v42 = vpop.f32.mrb[232].mxu0 }
 0xd4f   : > { %v12677_v58 = vadd.f32 %v12653_v51, %v3332_v42  ;;  %v10064_v56 = vpop.f32.mrb[233].mxu0 }
 0xd50   : > { %v3335_v48 = vpop.f32.mrb[234].mxu0 }
 0xd51   : > { %v10065_v39 = vpop.f32.mrb[235].mxu0  ;;  %v12682_v37 = vadd.f32 %v12653_v51, %v3335_v48  ;;  %v14835_v28 = vpack.c.bf16 %v12677_v58, %v12674_v53 }
 0xd56   : > { %v3340_v43 = vpop.f32.mrb[236].mxu0 }
 0xd57   : > { %v12685_v62 = vadd.f32 %v12653_v51, %v3340_v43  ;;  %v10068_v26 = vpop.f32.mrb[237].mxu0 }
 0xd58   : > { %v12687_v63 = vpop.f32.mrb[238].mxu0 }
 0xd59   : > { %v10069_v5 = vpop.f32.mrb[239].mxu0  ;;  %v3344_v3 = vadd.f32 %v12653_v51, %v12687_v63 }
 0xdb8   : > { %v3004_v13 = vpop.f32.mrb[176].mxu1 }
 0xdb9   : > { %v12692_v57 = vadd.f32 %v3004_v13, %v12350_v30  ;;  %v9980_v21 = vpop.f32.mrb[177].mxu1 }
 0xdba   : > { %v3007_v22 = vpop.f32.mrb[178].mxu1 }
 0xdbb   : > { %v12695_v40 = vadd.f32 %v3007_v22, %v12352_v35  ;;  %v9981_v24 = vpop.f32.mrb[179].mxu1 }
 0xdc0   : > { %v3012_v10 = vpop.f32.mrb[180].mxu1 }
 0xdc1   : > { %v12698_v42 = vadd.f32 %v3012_v10, %v12356_v47  ;;  %v9984_v56 = vpop.f32.mrb[181].mxu1 }
 0xdc2   : > { %v3015_v48 = vpop.f32.mrb[182].mxu1 }
 0xdc3   : > { %v12701_v39 = vadd.f32 %v3015_v48, %v12358_v59  ;;  %v9985_v43 = vpop.f32.mrb[183].mxu1 }
 0xdcc   : > { %v3020_v26 = vpop.f32.mrb[184].mxu1 }
 0xdcd   : > { %v12704_v30 = vadd.f32 %v3020_v26, %v12362_v14  ;;  %v9988_v5 = vpop.f32.mrb[185].mxu1 }
 0xdce   : > { %v3023_v13 = vpop.f32.mrb[186].mxu1 }
 0xdcf   : > { %v12707_v35 = vadd.f32 %v3023_v13, %v12364_v33  ;;  %v9989_v21 = vpop.f32.mrb[187].mxu1 }
 0xdd4   : > { %v3028_v22 = vpop.f32.mrb[188].mxu1 }
 0xdd5   : > { %v12710_v47 = vadd.f32 %v3028_v22, %v12368_v8  ;;  %v9992_v24 = vpop.f32.mrb[189].mxu1  ;;  %v8694_v8 = vld [vmem:[%s14809_s4 + $0x7] ss:$0 sm:$0xff] }
 0xdd6   : > { %v3031_v10 = vpop.f32.mrb[190].mxu1 }
 0xdd7   : > { %v12713_v59 = vadd.f32 %v3031_v10, %v12370_v54  ;;  %v9993_v56 = vpop.f32.mrb[191].mxu1 }
 0xddc   : > { %v3036_v48 = vpop.f32.mrb[192].mxu1 }
 0xddd   : > { %v12716_v14 = vadd.f32 %v3036_v48, %v12374_v7  ;;  %v9996_v43 = vpop.f32.mrb[193].mxu1 }
 0xdde   : > { %v3039_v26 = vpop.f32.mrb[194].mxu1 }
 0xddf   : > { %v12719_v33 = vadd.f32 %v3039_v26, %v12376_v9  ;;  %v9997_v5 = vpop.f32.mrb[195].mxu1 }
 0xde4   : > { %v3210_v13 = vpop.f32.mrb[196].mxu1 }
 0xde5   : > { %v10028_v21 = vpop.f32.mrb[197].mxu1  ;;  %v3211_v54 = vadd.f32 %v8694_v8, %v3210_v13 }
 0xde6   : > { %v3213_v22 = vpop.f32.mrb[198].mxu1 }
 0xde7   : > { %v3214_v24 = vadd.f32 %v8694_v8, %v3213_v22  ;;  %v10029_v10 = vpop.f32.mrb[199].mxu1 }
 0xde9   : > { %v3353_v56 = vpack.c.bf16 %v3214_v24, %v3211_v54 }
 0xdeb   : > { %v3375_v7 = vsel %vm897_vm4, %v3353_v56, 0 }
 0xdec   : > { %v3218_v48 = vpop.f32.mrb[200].mxu1  ;;  %10071 = vmatpush3.bf16.xpose.msra.mxu1 %v3375_v7 }
 0xded   : > { %v10032_v43 = vpop.f32.mrb[201].mxu1  ;;  %10072 = vmatprep.subr.bf16.mxu1 %v11415_v2  ;;  %v3219_v26 = vadd.f32 %v8694_v8, %v3218_v48 }
 0xdee   : > { %v3221_v9 = vpop.f32.mrb[202].mxu1 }
 0xdef   : > { %v3222_v5 = vadd.f32 %v8694_v8, %v3221_v9  ;;  %v10033_v46 = vpop.f32.mrb[203].mxu1 }
 0xdf1   : > { %v3354_v11 = vpack.c.bf16 %v3222_v5, %v3219_v26  ;;  %v3325_v5 = vadd.f32 %v12653_v51, %v12671_v4 }
 0xdf3   : > { %v3378_v38 = vsel %vm897_vm4, %v3354_v11, 0 }
 0xdf4   : > { %v3226_v21 = vpop.f32.mrb[204].mxu1  ;;  %10073 = vmatpush3.bf16.xpose.msra.mxu1 %v3378_v38 }
 0xdf5   : > { %v3227_v13 = vadd.f32 %v8694_v8, %v3226_v21  ;;  %v10036_v22 = vpop.f32.mrb[205].mxu1  ;;  %10074 = vmatprep.subr.bf16.mxu1 %v11415_v2 }
 0xdf6   : > { %v3229_v54 = vpop.f32.mrb[206].mxu1 }
 0xdf7   : > { %v3355_v24 = vpack.c.bf16 %v3227_v13, %v3227_v13  ;;  %v10037_v10 = vpop.f32.mrb[207].mxu1  ;;  %v3230_v43 = vadd.f32 %v8694_v8, %v3229_v54 }
 0xdf9   : > { %v3381_v56 = vsel %vm897_vm4, %v3355_v24, 0  ;;  %v3361_v24 = vpack.c.bf16 %v3325_v5, %v3325_v5 }
 0xdfb   : > { %v3639_v1 = vsel %vm1172_vm5, %v3361_v24, 0 }
 0xdfc   : > { %v3234_v7 = vpop.f32.mrb[208].mxu1  ;;  %10075 = vmatpush3.bf16.xpose.msra.mxu1 %v3381_v56 }
 0xdfd   : > { %v3235_v48 = vadd.f32 %v8694_v8, %v3234_v7  ;;  %v10040_v9 = vpop.f32.mrb[209].mxu1  ;;  %10106 = vmatprep.subr.bf16.mxu1 %v11415_v2 }
 0xdfe   : > { %v3237_v46 = vpop.f32.mrb[210].mxu1 }
 0xdff   : > { %v10041_v11 = vpop.f32.mrb[211].mxu1  ;;  %v3356_v26 = vpack.c.bf16 %v3235_v48, %v3230_v43  ;;  %v3238_v13 = vadd.f32 %v8694_v8, %v3237_v46 }
 0xe01   : > { %v3449_v38 = vsel %vm897_vm4, %v3356_v26, 0 }
 0xe02   : > { %10089 = vmatpush3.bf16.xpose.msra.mxu0 %v3449_v38 }
 0xe03   : > { %10077 = vmatmul.mubr.msk.bf16.vlgmr.msra.gmra.mrb[216].mxu1 %vm897_vm4, %v3347_v18  ;;  %10090 = vmatprep.subr.bf16.mxu0 %v11415_v2 }
 0xe04   : > { %v3242_v21 = vpop.f32.mrb[212].mxu1  ;;  %10107 = vmatpush3.bf16.msra.mxu1 %v3359_v52  ;;  %10080 = vmatprep.mubr.msk.bf16.mxu1 %vm11416_vm2, %v11415_v2  ;;  %v3129_v52 = vadd.f32 %v12592_v45, %v12618_v55  ;;  %v14836_v55 = vpack.c.bf16 %v12685_v62, %v12682_v37 }
 0xe05   : > { %v3243_v22 = vadd.f32 %v8694_v8, %v3242_v21  ;;  %v10044_v54 = vpop.f32.mrb[213].mxu1  ;;  %10108 = vmatprep.subr.bf16.mxu1 %v11415_v2 }
 0xe06   : > { %v3245_v4 = vpop.f32.mrb[214].mxu1  ;;  %v3349_v0 = vpack.c.bf16 %v3129_v52, %v3129_v52 }
 0xe07   : > { %v10045_v29 = vpop.f32.mrb[215].mxu1  ;;  %v3357_v32 = vpack.c.bf16 %v3243_v22, %v3238_v13  ;;  %v3246_v18 = vadd.f32 %v8694_v8, %v3245_v4 }
 0xe08   : > { %10109 = vmatpush3.bf16.msra.mxu1 %v3360_v60 }
 0xe09   : > { %v3452_v61 = vsel %vm897_vm4, %v3357_v32, 0  ;;  %10110 = vmatprep.subr.bf16.mxu1 %v11415_v2  ;;  %v3358_v20 = vpack.c.bf16 %v3246_v18, %v3246_v18 }
 0xe0a   : > { %10091 = vmatpush3.bf16.xpose.msra.mxu0 %v3452_v61 }
 0xe0b   : > { %10081 = vmatmul.mubr.msk.bf16.gmra.mrb[220].mxu1 %vm897_vm4, %v3348_v23  ;;  %10092 = vmatprep.subr.bf16.mxu0 %v11415_v2  ;;  %v3455_v60 = vsel %vm897_vm4, %v3358_v20, 0  ;;  %v3364_v23 = vpack.c.bf16 %v3344_v3, %v3344_v3 }
 0xe0c   : > { %10111 = vmatpush3.bf16.msra.mxu1 %v3639_v1  ;;  %10084 = vmatprep.mubr.msk.bf16.mxu1 %vm11416_vm2, %v11415_v2 }
 0xe0d   : > { %10142 = vmatprep.subr.bf16.mxu1 %v11415_v2  ;;  %v3707_v16 = vsel %vm1172_vm5, %v3364_v23, 0 }
 0xe12   : > { %10093 = vmatpush3.bf16.xpose.msra.mxu0 %v3455_v60 }
 0xe13   : > { %10085 = vmatmul.mubr.msk.bf16.gmra.mrb[224].mxu1 %vm897_vm4, %v3349_v0  ;;  %10124 = vmatprep.subr.bf16.mxu0 %v11415_v2 }
 0xe14   : > { %10112 = vmatprep.mubr.msk.bf16.mxu1 %vm11416_vm2, %v11415_v2 }
 0xe19   : > { %10095 = vmatmul.mubr.msk.bf16.vlgmr.msra.gmra.mrb[240].mxu0 %vm897_vm4, %v3350_v6  ;;  %v3148_v6 = vadd.f32 %v12592_v45, %v12642_v12 }
 0xe1a   : > { %10125 = vmatpush3.bf16.msra.mxu0 %v14835_v28  ;;  %10098 = vmatprep.mubr.msk.bf16.mxu0 %vm11416_vm2, %v11415_v2 }
 0xe1b   : > { %10126 = vmatprep.subr.bf16.mxu0 %v11415_v2  ;;  %v3352_v51 = vpack.c.bf16 %v3148_v6, %v3148_v6 }
 0xe1e   : > { %10127 = vmatpush3.bf16.msra.mxu0 %v14836_v55 }
 0xe1f   : > { %10128 = vmatprep.subr.bf16.mxu0 %v11415_v2 }
 0xe21   : > { %10099 = vmatmul.mubr.msk.bf16.gmra.mrb[244].mxu0 %vm897_vm4, %v14837_v31 }
 0xe22   : > { %10129 = vmatpush3.bf16.msra.mxu0 %v3707_v16  ;;  %10102 = vmatprep.mubr.msk.bf16.mxu0 %vm11416_vm2, %v11415_v2 }
 0xe23   : > { %10164 = vmatprep.subr.bf16.mxu0 %v11415_v2 }
 0xe29   : > { %10103 = vmatmul.mubr.msk.bf16.gmra.mrb[248].mxu0 %vm897_vm4, %v3352_v51 }
 0xe2a   : > { %10130 = vmatprep.mubr.msk.bf16.mxu0 %vm11416_vm2, %v11415_v2 }
 0xed6   : > { %v3417_v15 = vpop.f32.mrb[216].mxu1 }
 0xed7   : > { %v10078_v49 = vpop.f32.mrb[217].mxu1  ;;  %v3513_v53 = vsel %vm1046_vm6, %v3417_v15, -inf }
 0xed8   : > { %3514 = vmax.xlane.f32.xlu0 %v3513_v53  ;;  %v3420_v58 = vpop.f32.mrb[218].mxu1 }
 0xed9   : > { %v10079_v37 = vpop.f32.mrb[219].mxu1  ;;  %v3516_v62 = vsel %vm1046_vm6, %v3420_v58, -inf }
 0xeda   : > { %3517 = vmax.xlane.f32.xlu1 %v3516_v62 }
 0xede   : > { %v3425_v63 = vpop.f32.mrb[220].mxu1 }
 0xedf   : > { %v10082_v45 = vpop.f32.mrb[221].mxu1  ;;  %v3519_v12 = vsel %vm1046_vm6, %v3425_v63, -inf }
 0xee0   : > { %3520 = vmax.xlane.f32.xlu0 %v3519_v12  ;;  %v3428_v8 = vpop.f32.mrb[222].mxu1 }
 0xee1   : > { %v10083_v10 = vpop.f32.mrb[223].mxu1  ;;  %v3522_v56 = vsel %vm1046_vm6, %v3428_v8, -inf }
 0xee2   : > { %3523 = vmax.xlane.f32.xlu1 %v3522_v56 }
 0xee6   : > { %v3433_v7 = vpop.f32.mrb[224].mxu1 }
 0xee7   : > { %v10086_v43 = vpop.f32.mrb[225].mxu1  ;;  %v3525_v48 = vsel %vm1046_vm6, %v3433_v7, -inf }
 0xee8   : > { %3526 = vmax.xlane.f32.xlu0 %v3525_v48  ;;  %v3436_v9 = vpop.f32.mrb[226].mxu1 }
 0xee9   : > { %v10087_v46 = vpop.f32.mrb[227].mxu1 }
 0xeec   : > { %v3491_v11 = vpop.f32.mrb[240].mxu0 }
 0xeed   : > { %v10096_v26 = vpop.f32.mrb[241].mxu0  ;;  %v3528_v38 = vsel %vm1046_vm6, %v3491_v11, -inf }
 0xeee   : > { %3529 = vmax.xlane.f32.xlu1 %v3528_v38  ;;  %v3494_v5 = vpop.f32.mrb[242].mxu0 }
 0xeef   : > { %v10097_v21 = vpop.f32.mrb[243].mxu0  ;;  %v3531_v13 = vsel %vm1046_vm6, %v3494_v5, -inf }
 0xef0   : > { %3532 = vmax.xlane.f32.xlu0 %v3531_v13 }
 0xef4   : > { %v3499_v22 = vpop.f32.mrb[244].mxu0 }
 0xef5   : > { %v10100_v54 = vpop.f32.mrb[245].mxu0  ;;  %v3534_v4 = vsel %vm1046_vm6, %v3499_v22, -inf }
 0xef6   : > { %3535 = vmax.xlane.f32.xlu1 %v3534_v4  ;;  %v3502_v24 = vpop.f32.mrb[246].mxu0 }
 0xef7   : > { %v10101_v29 = vpop.f32.mrb[247].mxu0  ;;  %v3537_v32 = vsel %vm1046_vm6, %v3502_v24, -inf }
 0xef8   : > { %3538 = vmax.xlane.f32.xlu0 %v3537_v32 }
 0xefc   : > { %v12803_v18 = vpop.f32.mrb[248].mxu0 }
 0xefd   : > { %v10104_v61 = vpop.f32.mrb[249].mxu0  ;;  %v3540_v1 = vsel %vm1046_vm6, %v12803_v18, -inf }
 0xefe   : > { %3541 = vmax.xlane.f32.xlu1 %v3540_v1  ;;  %v3510_v52 = vpop.f32.mrb[250].mxu0 }
 0xeff   : > { %v10105_v20 = vpop.f32.mrb[251].mxu0 }
 0xf65   : > { %v3515_v0 = vpop.xlane.xlu0 %3514 }
 0xf66   : > { %v3543_v60 = vsub.f32 %v3417_v15, %v3515_v0 }
 0xf67   : > { %v3518_v3 = vpop.xlane.xlu1 %3517 }
 0xf68   : > { %v3553_v28 = vmul.f32 1.442695, %v3543_v60  ;;  %v3544_v23 = vsub.f32 %v3420_v58, %v3518_v3 }
 0xf6a   : > { %11127 = vpow2.f32 %v3553_v28  ;;  %v3555_v55 = vmul.f32 1.442695, %v3544_v23 }
 0xf6c   : > { %11129 = vpow2.f32 %v3555_v55 }
 0xf6d   : > { %v3521_v31 = vpop.xlane.xlu0 %3520 }
 0xf6e   : > { %v3545_v16 = vsub.f32 %v3425_v63, %v3521_v31 }
 0xf6f   : > { %v3524_v6 = vpop.xlane.xlu1 %3523 }
 0xf70   : > { %v3557_v51 = vmul.f32 1.442695, %v3545_v16  ;;  %v3546_v49 = vsub.f32 %v3428_v8, %v3524_v6 }
 0xf72   : > { %11131 = vpow2.f32 %v3557_v51  ;;  %v3559_v53 = vmul.f32 1.442695, %v3546_v49 }
 0xf74   : > { %v12807_v37 = vpop.eup %11127  ;;  %11133 = vpow2.f32 %v3559_v53 }
 0xf75   : > { %v3527_v62 = vpop.xlane.xlu0 %3526  ;;  %v3573_v15 = vsel %vm1046_vm6, %v12807_v37, 0.0 }
 0xf76   : > { %v11130_v45 = vpop.eup %11129  ;;  %v3547_v12 = vsub.f32 %v3433_v7, %v3527_v62  ;;  %3574 = vadd.xlane.f32.xlu0 %v3573_v15 }
 0xf77   : > { %v3576_v58 = vsel %vm1046_vm6, %v11130_v45, 0.0 }
 0xf78   : > { %v3561_v10 = vmul.f32 1.442695, %v3547_v12  ;;  %3577 = vadd.xlane.f32.xlu1 %v3576_v58 }
 0xf7a   : > { %11135 = vpow2.f32 %v3561_v10 }
 0xf7b   : > { %v3530_v63 = vpop.xlane.xlu1 %3529 }
 0xf7c   : > { %v12812_v56 = vpop.eup %11131  ;;  %v3548_v8 = vsub.f32 %v3491_v11, %v3530_v63 }
 0xf7d   : > { %v3533_v43 = vpop.xlane.xlu0 %3532  ;;  %v3579_v48 = vsel %vm1046_vm6, %v12812_v56, 0.0 }
 0xf7e   : > { %v11134_v9 = vpop.eup %11133  ;;  %v3563_v46 = vmul.f32 1.442695, %v3548_v8  ;;  %v3549_v26 = vsub.f32 %v3494_v5, %v3533_v43  ;;  %3580 = vadd.xlane.f32.xlu0 %v3579_v48 }
 0xf7f   : > { %v3582_v7 = vsel %vm1046_vm6, %v11134_v9, 0.0 }
 0xf80   : > { %11137 = vpow2.f32 %v3563_v46  ;;  %v3565_v38 = vmul.f32 1.442695, %v3549_v26  ;;  %3583 = vadd.xlane.f32.xlu1 %v3582_v7 }
 0xf82   : > { %11139 = vpow2.f32 %v3565_v38 }
 0xf83   : > { %v3536_v21 = vpop.xlane.xlu1 %3535 }
 0xf84   : > { %v11136_v13 = vpop.eup %11135  ;;  %v3550_v54 = vsub.f32 %v3499_v22, %v3536_v21 }
 0xf85   : > { %v3539_v4 = vpop.xlane.xlu0 %3538  ;;  %v3585_v11 = vsel %vm1046_vm6, %v11136_v13, 0.0 }
 0xf86   : > { %v3567_v29 = vmul.f32 1.442695, %v3550_v54  ;;  %v3551_v32 = vsub.f32 %v3502_v24, %v3539_v4  ;;  %3586 = vadd.xlane.f32.xlu0 %v3585_v11 }
 0xf88   : > { %11141 = vpow2.f32 %v3567_v29  ;;  %v3569_v61 = vmul.f32 1.442695, %v3551_v32 }
 0xf8a   : > { %v11138_v1 = vpop.eup %11137  ;;  %11143 = vpow2.f32 %v3569_v61 }
 0xf8b   : > { %v3542_v5 = vpop.xlane.xlu1 %3541  ;;  %v3588_v52 = vsel %vm1046_vm6, %v11138_v1, 0.0 }
 0xf8c   : > { %v11140_v20 = vpop.eup %11139  ;;  %v3552_v0 = vsub.f32 %v12803_v18, %v3542_v5  ;;  %3589 = vadd.xlane.f32.xlu1 %v3588_v52 }
 0xf8d   : > { %v3591_v60 = vsel %vm1046_vm6, %v11140_v20, 0.0 }
 0xf8e   : > { %v3571_v22 = vmul.f32 1.442695, %v3552_v0  ;;  %3592 = vadd.xlane.f32.xlu0 %v3591_v60  ;;  %v8727_v60 = vld [vmem:[%s14810_s5 + $0xc] sm:$0xf] }
 0xf90   : > { %11145 = vpow2.f32 %v3571_v22  ;;  %v3788_v22 = vsel %vm1172_vm5, %v8727_v60, 0 }
 0xf92   : > { %v11142_v3 = vpop.eup %11141 }
 0xf93   : > { %v3594_v24 = vsel %vm1046_vm6, %v11142_v3, 0.0 }
 0xf94   : > { %v11144_v28 = vpop.eup %11143  ;;  %3595 = vadd.xlane.f32.xlu1 %v3594_v24 }
 0xf95   : > { %v3597_v23 = vsel %vm1046_vm6, %v11144_v28, 0.0 }
 0xf96   : > { %3598 = vadd.xlane.f32.xlu0 %v3597_v23 }
 0xf9a   : > { %v11146_v55 = vpop.eup %11145 }
 0xf9b   : > { %v3600_v31 = vsel %vm1046_vm6, %v11146_v55, 0.0 }
 0xf9c   : > { %3601 = vadd.xlane.f32.xlu1 %v3600_v31 }
0x1003   : > { %v3575_v16 = vpop.xlane.xlu0 %3574 }
0x1004   : > { %11147 = vrcp.f32 %v3575_v16 }
0x1005   : > { %v3578_v18 = vpop.xlane.xlu1 %3577 }
0x1006   : > { %11149 = vrcp.f32 %v3578_v18 }
0x100b   : > { %v3581_v6 = vpop.xlane.xlu0 %3580 }
0x100c   : > { %11151 = vrcp.f32 %v3581_v6 }
0x100d   : > { %v3584_v51 = vpop.xlane.xlu1 %3583 }
0x100e   : > { %v11148_v49 = vpop.eup %11147  ;;  %11153 = vrcp.f32 %v3584_v51 }
0x100f   : > { %v3604_v62 = vmul.f32 %v11148_v49, %v12807_v37 }
0x1010   : > { %v11150_v53 = vpop.eup %11149 }
0x1011   : > { %v3606_v15 = vmul.f32 %v11150_v53, %v11130_v45 }
0x1013   : > { %v3623_v12 = vpack.c.bf16 %v3606_v15, %v3604_v62  ;;  %v3587_v58 = vpop.xlane.xlu0 %3586 }
0x1014   : > { %11155 = vrcp.f32 %v3587_v58 }
0x1015   : > { %10113 = vmatmul.mubr.msk.bf16.vlgmr.msra.gmra.mrb[228].mxu1 %vm1046_vm6, %v3623_v12 }
0x1016   : > { %v11152_v10 = vpop.eup %11151  ;;  %10116 = vmatprep.mubr.msk.bf16.mxu1 %vm11416_vm2, %v11415_v2  ;;  %10143 = vmatpush3.bf16.msra.mxu1 %v3788_v22 }
0x1017   : > { %v3608_v43 = vmul.f32 %v11152_v10, %v12812_v56  ;;  %10188 = vmatprep.subr.bf16.mxu1 %v11415_v2 }
0x1018   : > { %v11154_v63 = vpop.eup %11153 }
0x1019   : > { %v3590_v8 = vpop.xlane.xlu1 %3589  ;;  %v3610_v48 = vmul.f32 %v11154_v63, %v11134_v9 }
0x101a   : > { %11157 = vrcp.f32 %v3590_v8 }
0x101b   : > { %v3593_v46 = vpop.xlane.xlu0 %3592  ;;  %v3624_v26 = vpack.c.bf16 %v3610_v48, %v3608_v43 }
0x101c   : > { %11159 = vrcp.f32 %v3593_v46 }
0x101d   : > { %10117 = vmatmul.mubr.msk.bf16.gmra.mrb[232].mxu1 %vm1046_vm6, %v3624_v26 }
0x101e   : > { %v11156_v37 = vpop.eup %11155  ;;  %10120 = vmatprep.mubr.msk.bf16.mxu1 %vm11416_vm2, %v11415_v2 }
0x101f   : > { %v3612_v45 = vmul.f32 %v11156_v37, %v11136_v13 }
0x1021   : > { %v3596_v7 = vpop.xlane.xlu1 %3595  ;;  %v3625_v21 = vpack.c.bf16 %v3612_v45, %v3612_v45 }
0x1022   : > { %11161 = vrcp.f32 %v3596_v7 }
0x1023   : > { %v3599_v38 = vpop.xlane.xlu0 %3598 }
0x1024   : > { %v11158_v54 = vpop.eup %11157  ;;  %11163 = vrcp.f32 %v3599_v38 }
0x1025   : > { %10121 = vmatmul.mubr.msk.bf16.gmra.mrb[236].mxu1 %vm1046_vm6, %v3625_v21  ;;  %v3614_v9 = vmul.f32 %v11158_v54, %v11138_v1 }
0x1026   : > { %v11160_v56 = vpop.eup %11159  ;;  %10144 = vmatprep.mubr.msk.bf16.mxu1 %vm11416_vm2, %v11415_v2 }
0x1027   : > { %v3616_v4 = vmul.f32 %v11160_v56, %v11140_v20 }
0x1029   : > { %v3626_v11 = vpack.c.bf16 %v3616_v4, %v3614_v9  ;;  %v3602_v29 = vpop.xlane.xlu1 %3601 }
0x102a   : > { %11165 = vrcp.f32 %v3602_v29 }
0x102b   : > { %10131 = vmatmul.mubr.msk.bf16.vlgmr.msra.gmra.mrb[252].mxu0 %vm1046_vm6, %v3626_v11 }
0x102c   : > { %v11162_v13 = vpop.eup %11161  ;;  %10134 = vmatprep.mubr.msk.bf16.mxu0 %vm11416_vm2, %v11415_v2 }
0x102d   : > { %v3618_v61 = vmul.f32 %v11162_v13, %v11142_v3 }
0x102e   : > { %v11164_v32 = vpop.eup %11163 }
0x102f   : > { %v3620_v5 = vmul.f32 %v11164_v32, %v11144_v28 }
0x1031   : > { %v3627_v52 = vpack.c.bf16 %v3620_v5, %v3618_v61 }
0x1033   : > { %10135 = vmatmul.mubr.msk.bf16.gmra.mrb[0].mxu0 %vm1046_vm6, %v3627_v52 }
0x1034   : > { %v11166_v0 = vpop.eup %11165  ;;  %10138 = vmatprep.mubr.msk.bf16.mxu0 %vm11416_vm2, %v11415_v2 }
0x1035   : > { %v3622_v1 = vmul.f32 %v11166_v0, %v11146_v55 }
0x1037   : > { %v3628_v20 = vpack.c.bf16 %v3622_v1, %v3622_v1 }
0x103b   : > { %10139 = vmatmul.mubr.msk.bf16.gmra.mrb[4].mxu0 %vm1046_vm6, %v3628_v20 }
0x103c   : > { %10168 = vmatprep.mubr.msk.bf16.mxu0 %vm11416_vm2, %v11415_v2 }
0x10e8   : > { %v3675_v3 = vpop.f32.mrb[228].mxu1 }
0x10e9   : > { %v10114_v24 = vpop.f32.mrb[229].mxu1 }
0x10ea   : > { %v3678_v28 = vpop.f32.mrb[230].mxu1 }
0x10eb   : > { %v3765_v23 = vpack.c.bf16 %v3678_v28, %v3675_v3  ;;  %v10115_v55 = vpop.f32.mrb[231].mxu1 }
0x10ed   : > { %10145 = vmatmul.mubr.msk.bf16.vlgmr.msra.gmra.mrb[240].mxu1 %vm897_vm4, %v3765_v23 }
0x10ee   : > { %10148 = vmatprep.mubr.msk.bf16.mxu1 %vm11416_vm2, %v11415_v2 }
0x10f0   : > { %v3683_v31 = vpop.f32.mrb[232].mxu1 }
0x10f1   : > { %v10118_v16 = vpop.f32.mrb[233].mxu1 }
0x10f2   : > { %v3686_v18 = vpop.f32.mrb[234].mxu1 }
0x10f3   : > { %v3766_v6 = vpack.c.bf16 %v3686_v18, %v3683_v31  ;;  %v10119_v51 = vpop.f32.mrb[235].mxu1 }
0x10f5   : > { %10149 = vmatmul.mubr.msk.bf16.gmra.mrb[244].mxu1 %vm897_vm4, %v3766_v6 }
0x10f6   : > { %10152 = vmatprep.mubr.msk.bf16.mxu1 %vm11416_vm2, %v11415_v2 }
0x10f8   : > { %v3691_v49 = vpop.f32.mrb[236].mxu1 }
0x10f9   : > { %v10122_v53 = vpop.f32.mrb[237].mxu1 }
0x10fa   : > { %v3694_v62 = vpop.f32.mrb[238].mxu1 }
0x10fb   : > { %v10123_v15 = vpop.f32.mrb[239].mxu1 }
0x10fe   : > { %v3743_v12 = vpop.f32.mrb[252].mxu0 }
0x10ff   : > { %v3767_v58 = vpack.c.bf16 %v3743_v12, %v3691_v49  ;;  %v10132_v10 = vpop.f32.mrb[253].mxu0 }
0x1100   : > { %v3746_v63 = vpop.f32.mrb[254].mxu0 }
0x1101   : > { %v10133_v8 = vpop.f32.mrb[255].mxu0  ;;  %10153 = vmatmul.mubr.msk.bf16.gmra.mrb[248].mxu1 %vm897_vm4, %v3767_v58 }
0x1102   : > { %10156 = vmatprep.mubr.msk.bf16.mxu1 %vm11416_vm2, %v11415_v2  ;;  %v14838_v8 = vld [vmem:[#allocation2_spill] sm:$0xff] }
0x1106   : > { %v3751_v43 = vpop.f32.mrb[0].mxu0 }
0x1107   : > { %v3768_v48 = vpack.c.bf16 %v3751_v43, %v3746_v63  ;;  %v10136_v46 = vpop.f32.mrb[1].mxu0 }
0x1108   : > { %v3754_v26 = vpop.f32.mrb[2].mxu0 }
0x1109   : > { %v10137_v37 = vpop.f32.mrb[3].mxu0  ;;  %10157 = vmatmul.mubr.msk.bf16.gmra.mrb[252].mxu1 %vm897_vm4, %v3768_v48 }
0x110a   : > { %10160 = vmatprep.mubr.msk.bf16.mxu1 %vm11416_vm2, %v11415_v2 }
0x110e   : > { %v3759_v45 = vpop.f32.mrb[4].mxu0 }
0x110f   : > { %v3769_v7 = vpack.c.bf16 %v3759_v45, %v3754_v26  ;;  %v10140_v38 = vpop.f32.mrb[5].mxu0 }
0x1110   : > { %v3762_v21 = vpop.f32.mrb[6].mxu0 }
0x1111   : > { %v10141_v54 = vpop.f32.mrb[7].mxu0  ;;  %10161 = vmatmul.mubr.msk.bf16.gmra.mrb[0].mxu1 %vm897_vm4, %v3769_v7 }
0x1112   : > { %10196 = vmatprep.mubr.msk.bf16.mxu1 %vm11416_vm2, %v11415_v2 }
0x11c0   : > { %v3824_v56 = vpop.f32.mrb[240].mxu1 }
0x11c1   : > { %v3863_v9 = vadd.f32 %v3824_v56, %v12692_v57  ;;  %v10146_v4 = vpop.f32.mrb[241].mxu1 }
0x11c2   : > { %v3827_v11 = vpop.f32.mrb[242].mxu1 }
0x11c3   : > { %v3864_v29 = vadd.f32 %v3827_v11, %v12695_v40  ;;  %v10147_v13 = vpop.f32.mrb[243].mxu1  ;;  %v3873_v32 = vadd.f32 %v3863_v9, %v11525_v19 }
0x11c5   : > { %v3887_v61 = vsel %vm594_vm3, %v3873_v32, 0.0  ;;  %v3874_v5 = vadd.f32 %v3864_v29, %v11523_v17 }
0x11c6   : > { %3888 = vadd.xlane.f32.xlu0 %v3887_v61 }
0x11c7   : > { %v3890_v52 = vsel %vm594_vm3, %v3874_v5, 0.0 }
0x11c8   : > { %3891 = vadd.xlane.f32.xlu1 %v3890_v52  ;;  %v3832_v0 = vpop.f32.mrb[244].mxu1 }
0x11c9   : > { %v3865_v1 = vadd.f32 %v3832_v0, %v12698_v42  ;;  %v10150_v20 = vpop.f32.mrb[245].mxu1 }
0x11ca   : > { %v3835_v57 = vpop.f32.mrb[246].mxu1 }
0x11cb   : > { %v3866_v60 = vadd.f32 %v3835_v57, %v12701_v39  ;;  %v10151_v22 = vpop.f32.mrb[247].mxu1  ;;  %v3875_v40 = vadd.f32 %v3865_v1, %v11538_v27 }
0x11cd   : > { %v3893_v19 = vsel %vm594_vm3, %v3875_v40, 0.0  ;;  %v3876_v3 = vadd.f32 %v3866_v60, %v11536_v25 }
0x11ce   : > { %3894 = vadd.xlane.f32.xlu0 %v3893_v19 }
0x11cf   : > { %v3896_v17 = vsel %vm594_vm3, %v3876_v3, 0.0 }
0x11d0   : > { %3897 = vadd.xlane.f32.xlu1 %v3896_v17 }
0x11d4   : > { %v3840_v24 = vpop.f32.mrb[248].mxu1 }
0x11d5   : > { %v3867_v28 = vadd.f32 %v3840_v24, %v12704_v30  ;;  %v10154_v23 = vpop.f32.mrb[249].mxu1 }
0x11d6   : > { %v3843_v42 = vpop.f32.mrb[250].mxu1 }
0x11d7   : > { %v3868_v55 = vadd.f32 %v3843_v42, %v12707_v35  ;;  %v10155_v31 = vpop.f32.mrb[251].mxu1  ;;  %v3877_v39 = vadd.f32 %v3867_v28, %v11561_v36 }
0x11d9   : > { %v3899_v27 = vsel %vm594_vm3, %v3877_v39, 0.0  ;;  %v3878_v16 = vadd.f32 %v3868_v55, %v11557_v34 }
0x11da   : > { %3900 = vadd.xlane.f32.xlu0 %v3899_v27 }
0x11db   : > { %v3902_v25 = vsel %vm594_vm3, %v3878_v16, 0.0 }
0x11dc   : > { %3903 = vadd.xlane.f32.xlu1 %v3902_v25  ;;  %v3848_v18 = vpop.f32.mrb[252].mxu1 }
0x11dd   : > { %v3869_v6 = vadd.f32 %v3848_v18, %v12710_v47  ;;  %v10158_v51 = vpop.f32.mrb[253].mxu1 }
0x11de   : > { %v3851_v30 = vpop.f32.mrb[254].mxu1 }
0x11df   : > { %v3870_v49 = vadd.f32 %v3851_v30, %v12713_v59  ;;  %v10159_v53 = vpop.f32.mrb[255].mxu1  ;;  %v3879_v35 = vadd.f32 %v3869_v6, %v11580_v44  ;;  %v10971_v6 = vld [vmem:[%s14811_s6] sm:$0xff]  }
0x11e0   : > { %10165 = vmatpush3.bf16.msra.mxu0 %v10971_v6 }
0x11e1   : > { %v3905_v36 = vsel %vm594_vm3, %v3879_v35, 0.0  ;;  %v3880_v62 = vadd.f32 %v3870_v49, %v11571_v41  ;;  %10166 = vmatprep.subr.bf16.mxu0 %v11415_v2 }
0x11e2   : > { %3906 = vadd.xlane.f32.xlu0 %v3905_v36 }
0x11e3   : > { %v3908_v34 = vsel %vm594_vm3, %v3880_v62, 0.0 }
0x11e4   : > { %3909 = vadd.xlane.f32.xlu1 %v3908_v34  ;;  %v3856_v15 = vpop.f32.mrb[0].mxu1 }
0x11e5   : > { %v3871_v12 = vadd.f32 %v3856_v15, %v12716_v14  ;;  %v10162_v58 = vpop.f32.mrb[1].mxu1  ;;  %v10973_v15 = vld [vmem:[%s14813_s8] sm:$0xff]  }
0x11e6   : > { %v3859_v47 = vpop.f32.mrb[2].mxu1  ;;  %10189 = vmatpush3.bf16.msra.mxu1 %v10973_v15 }
0x11e7   : > { %v3872_v10 = vadd.f32 %v3859_v47, %v12719_v33  ;;  %v10163_v63 = vpop.f32.mrb[3].mxu1  ;;  %v3881_v59 = vadd.f32 %v3871_v12, %v11591_v50  ;;  %v10974_v12 = vld [vmem:[%s14813_s8 + $0x8] sm:$0xff]   ;;  %10190 = vmatprep.subr.bf16.mxu1 %v11415_v2 }
0x11e9   : > { %v3911_v44 = vsel %vm594_vm3, %v3881_v59, 0.0  ;;  %v3882_v43 = vadd.f32 %v3872_v10, %v14838_v8 }
0x11ea   : > { %3912 = vadd.xlane.f32.xlu0 %v3911_v44  ;;  %10191 = vmatpush3.bf16.msra.mxu1 %v10974_v12 }
0x11eb   : > { %v3914_v41 = vsel %vm594_vm3, %v3882_v43, 0.0  ;;  %10192 = vmatprep.subr.bf16.mxu1 %v11415_v2 }
0x11ec   : > { %3915 = vadd.xlane.f32.xlu1 %v3914_v41 }
0x1253   : > { %v3889_v48 = vpop.xlane.xlu0 %3888 }
0x1254   : > { %v3918_v46 = vmul.f32 0.03125, %v3889_v48 }
0x1255   : > { %v3892_v26 = vpop.xlane.xlu1 %3891 }
0x1256   : > { %v12894_v37 = vsub.f32 %v3873_v32, %v3918_v46  ;;  %v3919_v14 = vmul.f32 0.03125, %v3892_v26 }
0x1258   : > { %v12896_v45 = vsub.f32 %v3874_v5, %v3919_v14  ;;  %v3938_v33 = vmul.f32 %v12894_v37, %v12894_v37 }
0x125a   : > { %v3948_v50 = vsel %vm594_vm3, %v3938_v33, 0.0  ;;  %v3939_v7 = vmul.f32 %v12896_v45, %v12896_v45  ;;  %v12963_v33 = vld [vmem:[%s14814_s9 + $0x1] ss:$0 sm:$0xff] }
0x125b   : > { %v3895_v38 = vpop.xlane.xlu0 %3894  ;;  %3949 = vadd.xlane.f32.xlu0 %v3948_v50 }
0x125c   : > { %v3920_v21 = vmul.f32 0.03125, %v3895_v38  ;;  %v3951_v54 = vsel %vm594_vm3, %v3939_v7, 0.0 }
0x125d   : > { %v3898_v56 = vpop.xlane.xlu1 %3897  ;;  %3952 = vadd.xlane.f32.xlu1 %v3951_v54  ;;  %v12971_v54 = vld [vmem:[%s14814_s9 + $0x2] ss:$0 sm:$0xff] }
0x125e   : > { %v12904_v9 = vsub.f32 %v3875_v40, %v3920_v21  ;;  %v3921_v4 = vmul.f32 0.03125, %v3898_v56 }
0x1260   : > { %v12906_v11 = vsub.f32 %v3876_v3, %v3921_v4  ;;  %v3940_v29 = vmul.f32 %v12904_v9, %v12904_v9 }
0x1262   : > { %v3954_v13 = vsel %vm594_vm3, %v3940_v29, 0.0  ;;  %v3941_v32 = vmul.f32 %v12906_v11, %v12906_v11 }
0x1263   : > { %3955 = vadd.xlane.f32.xlu0 %v3954_v13 }
0x1264   : > { %v3957_v61 = vsel %vm594_vm3, %v3941_v32, 0.0 }
0x1265   : > { %3958 = vadd.xlane.f32.xlu1 %v3957_v61 }
0x1267   : > { %v3901_v5 = vpop.xlane.xlu0 %3900 }
0x1268   : > { %v3922_v52 = vmul.f32 0.03125, %v3901_v5 }
0x1269   : > { %v3904_v0 = vpop.xlane.xlu1 %3903 }
0x126a   : > { %v12914_v1 = vsub.f32 %v3877_v39, %v3922_v52  ;;  %v3923_v20 = vmul.f32 0.03125, %v3904_v0 }
0x126c   : > { %v12916_v57 = vsub.f32 %v3878_v16, %v3923_v20  ;;  %v3942_v60 = vmul.f32 %v12914_v1, %v12914_v1 }
0x126e   : > { %v3960_v22 = vsel %vm594_vm3, %v3942_v60, 0.0  ;;  %v3943_v40 = vmul.f32 %v12916_v57, %v12916_v57 }
0x126f   : > { %v3907_v19 = vpop.xlane.xlu0 %3906  ;;  %3961 = vadd.xlane.f32.xlu0 %v3960_v22 }
0x1270   : > { %v3924_v3 = vmul.f32 0.03125, %v3907_v19  ;;  %v3963_v17 = vsel %vm594_vm3, %v3943_v40, 0.0 }
0x1271   : > { %v3910_v24 = vpop.xlane.xlu1 %3909  ;;  %3964 = vadd.xlane.f32.xlu1 %v3963_v17 }
0x1272   : > { %v12924_v28 = vsub.f32 %v3879_v35, %v3924_v3  ;;  %v3925_v23 = vmul.f32 0.03125, %v3910_v24  ;;  %v10972_v35 = vld [vmem:[%s14811_s6 + $0x8] sm:$0xff]  }
0x1273   : > { %10167 = vmatpush3.bf16.msra.mxu0 %v10972_v35 }
0x1274   : > { %v12926_v42 = vsub.f32 %v3880_v62, %v3925_v23  ;;  %v3944_v55 = vmul.f32 %v12924_v28, %v12924_v28  ;;  %10216 = vmatprep.subr.bf16.mxu0 %v11415_v2 }
0x1276   : > { %v3966_v31 = vsel %vm594_vm3, %v3944_v55, 0.0  ;;  %v3945_v39 = vmul.f32 %v12926_v42, %v12926_v42 }
0x1277   : > { %3967 = vadd.xlane.f32.xlu0 %v3966_v31  ;;  %v3913_v27 = vpop.xlane.xlu0 %3912 }
0x1278   : > { %v3926_v16 = vmul.f32 0.03125, %v3913_v27  ;;  %v3969_v25 = vsel %vm594_vm3, %v3945_v39, 0.0 }
0x1279   : > { %3970 = vadd.xlane.f32.xlu1 %v3969_v25  ;;  %v3916_v18 = vpop.xlane.xlu1 %3915 }
0x127a   : > { %v12937_v51 = vsub.f32 %v3881_v59, %v3926_v16  ;;  %v3927_v30 = vmul.f32 0.03125, %v3916_v18 }
0x127c   : > { %v12939_v49 = vsub.f32 %v3882_v43, %v3927_v30  ;;  %v3946_v53 = vmul.f32 %v12937_v51, %v12937_v51 }
0x127e   : > { %v3972_v36 = vsel %vm594_vm3, %v3946_v53, 0.0  ;;  %v3947_v62 = vmul.f32 %v12939_v49, %v12939_v49 }
0x127f   : > { %3973 = vadd.xlane.f32.xlu0 %v3972_v36 }
0x1280   : > { %v3975_v34 = vsel %vm594_vm3, %v3947_v62, 0.0 }
0x1281   : > { %3976 = vadd.xlane.f32.xlu1 %v3975_v34 }
0x12e8   : > { %v3950_v58 = vpop.xlane.xlu0 %3949 }
0x12e9   : > { %v3978_v47 = vmul.f32 0.03125, %v3950_v58 }
0x12ea   : > { %v3953_v10 = vpop.xlane.xlu1 %3952 }
0x12eb   : > { %v3988_v63 = vadd.f32 1e-05, %v3978_v47  ;;  %v3979_v59 = vmul.f32 0.03125, %v3953_v10 }
0x12ed   : > { %11167 = vrsqrt.f32 %v3988_v63  ;;  %v3989_v44 = vadd.f32 1e-05, %v3979_v59 }
0x12ef   : > { %11169 = vrsqrt.f32 %v3989_v44 }
0x12f0   : > { %v3956_v8 = vpop.xlane.xlu0 %3955 }
0x12f1   : > { %v3980_v43 = vmul.f32 0.03125, %v3956_v8 }
0x12f2   : > { %v3959_v41 = vpop.xlane.xlu1 %3958 }
0x12f3   : > { %v3990_v48 = vadd.f32 1e-05, %v3980_v43  ;;  %v3981_v46 = vmul.f32 0.03125, %v3959_v41 }
0x12f5   : > { %11171 = vrsqrt.f32 %v3990_v48  ;;  %v3991_v26 = vadd.f32 1e-05, %v3981_v46 }
0x12f7   : > { %v11168_v14 = vpop.eup %11167  ;;  %11173 = vrsqrt.f32 %v3991_v26 }
0x12f8   : > { %v4008_v50 = vmul.f32 %v11168_v14, %v12894_v37 }
0x12f9   : > { %v11170_v7 = vpop.eup %11169 }
0x12fa   : > { %v4024_v38 = vmul.f32 %v12963_v33, %v4008_v50  ;;  %v4009_v21 = vmul.f32 %v11170_v7, %v12896_v45 }
0x12fc   : > { %v4025_v56 = vmul.f32 %v12963_v33, %v4009_v21  ;;  %v3962_v4 = vpop.xlane.xlu0 %3961  ;;  %v12975_v13 = vadd.f32 %v12971_v54, %v4024_v38  ;;  %v8737_v38 = vld [vmem:[%s14812_s7] ss:$0 sm:$0xff] }
0x12fd   : > { %v3982_v29 = vmul.f32 0.03125, %v3962_v4 }
0x12fe   : > { %v12978_v32 = vadd.f32 %v12971_v54, %v4025_v56  ;;  %v3965_v37 = vpop.xlane.xlu1 %3964 }
0x12ff   : > { %v11172_v61 = vpop.eup %11171  ;;  %v3992_v5 = vadd.f32 1e-05, %v3982_v29  ;;  %v3983_v52 = vmul.f32 0.03125, %v3965_v37 }
0x1300   : > { %v4050_v45 = vpack.c.bf16 %v12978_v32, %v12975_v13  ;;  %v4010_v0 = vmul.f32 %v11172_v61, %v12904_v9 }
0x1301   : > { %v11174_v20 = vpop.eup %11173  ;;  %11175 = vrsqrt.f32 %v3992_v5  ;;  %v3993_v60 = vadd.f32 1e-05, %v3983_v52 }
0x1302   : > { %v4026_v22 = vmul.f32 %v12963_v33, %v4010_v0  ;;  %v4011_v40 = vmul.f32 %v11174_v20, %v12906_v11  ;;  %10169 = vmatmul.mubr.msk.bf16.vlgmr.msra.gmra.mrb[8].mxu0 %vm594_vm3, %v4050_v45 }
0x1303   : > { %11177 = vrsqrt.f32 %v3993_v60  ;;  %10172 = vmatprep.mubr.msk.bf16.mxu0 %vm11416_vm2, %v11415_v2 }
0x1304   : > { %v4027_v19 = vmul.f32 %v12963_v33, %v4011_v40  ;;  %v3968_v3 = vpop.xlane.xlu0 %3967  ;;  %v12990_v24 = vadd.f32 %v12971_v54, %v4026_v22 }
0x1305   : > { %v3984_v17 = vmul.f32 0.03125, %v3968_v3 }
0x1306   : > { %v12993_v9 = vadd.f32 %v12971_v54, %v4027_v19  ;;  %v3971_v23 = vpop.xlane.xlu1 %3970 }
0x1307   : > { %v3994_v55 = vadd.f32 1e-05, %v3984_v17  ;;  %v3985_v31 = vmul.f32 0.03125, %v3971_v23 }
0x1308   : > { %v4051_v11 = vpack.c.bf16 %v12993_v9, %v12990_v24 }
0x1309   : > { %11179 = vrsqrt.f32 %v3994_v55  ;;  %v3995_v39 = vadd.f32 1e-05, %v3985_v31 }
0x130a   : > { %10173 = vmatmul.mubr.msk.bf16.gmra.mrb[12].mxu0 %vm594_vm3, %v4051_v11 }
0x130b   : > { %v11176_v27 = vpop.eup %11175  ;;  %11181 = vrsqrt.f32 %v3995_v39  ;;  %10176 = vmatprep.mubr.msk.bf16.mxu0 %vm11416_vm2, %v11415_v2 }
0x130c   : > { %v4012_v16 = vmul.f32 %v11176_v27, %v12914_v1  ;;  %v3974_v25 = vpop.xlane.xlu0 %3973 }
0x130d   : > { %v11178_v18 = vpop.eup %11177  ;;  %v3986_v6 = vmul.f32 0.03125, %v3974_v25 }
0x130e   : > { %v4028_v30 = vmul.f32 %v12963_v33, %v4012_v16  ;;  %v4013_v53 = vmul.f32 %v11178_v18, %v12916_v57  ;;  %v3977_v35 = vpop.xlane.xlu1 %3976 }
0x130f   : > { %v3996_v36 = vadd.f32 1e-05, %v3986_v6  ;;  %v3987_v62 = vmul.f32 0.03125, %v3977_v35 }
0x1310   : > { %v4029_v34 = vmul.f32 %v12963_v33, %v4013_v53  ;;  %v13005_v12 = vadd.f32 %v12971_v54, %v4028_v30 }
0x1311   : > { %11183 = vrsqrt.f32 %v3996_v36  ;;  %v3997_v15 = vadd.f32 1e-05, %v3987_v62 }
0x1312   : > { %v13008_v58 = vadd.f32 %v12971_v54, %v4029_v34 }
0x1313   : > { %v11180_v1 = vpop.eup %11179  ;;  %11185 = vrsqrt.f32 %v3997_v15 }
0x1314   : > { %v4052_v47 = vpack.c.bf16 %v13008_v58, %v13005_v12  ;;  %v4014_v57 = vmul.f32 %v11180_v1, %v12924_v28 }
0x1315   : > { %v11182_v10 = vpop.eup %11181 }
0x1316   : > { %v4030_v63 = vmul.f32 %v12963_v33, %v4014_v57  ;;  %v4015_v59 = vmul.f32 %v11182_v10, %v12926_v42  ;;  %10177 = vmatmul.mubr.msk.bf16.gmra.mrb[16].mxu0 %vm594_vm3, %v4052_v47 }
0x1317   : > { %10180 = vmatprep.mubr.msk.bf16.mxu0 %vm11416_vm2, %v11415_v2 }
0x1318   : > { %v4031_v44 = vmul.f32 %v12963_v33, %v4015_v59  ;;  %v13020_v8 = vadd.f32 %v12971_v54, %v4030_v63 }
0x131a   : > { %v13023_v43 = vadd.f32 %v12971_v54, %v4031_v44 }
0x131b   : > { %v11184_v41 = vpop.eup %11183 }
0x131c   : > { %v4053_v28 = vpack.c.bf16 %v13023_v43, %v13020_v8  ;;  %v4016_v48 = vmul.f32 %v11184_v41, %v12937_v51 }
0x131d   : > { %v11186_v42 = vpop.eup %11185 }
0x131e   : > { %v4032_v46 = vmul.f32 %v12963_v33, %v4016_v48  ;;  %v4017_v26 = vmul.f32 %v11186_v42, %v12939_v49  ;;  %10181 = vmatmul.mubr.msk.bf16.gmra.mrb[20].mxu0 %vm594_vm3, %v4053_v28  ;;  %v10975_v49 = vld [vmem:[%s14813_s8 + $0x10] sm:$0xff]   ;;  %v8746_v42 = vld [vmem:[%s14814_s9 + $0x3] ss:$0 sm:$0xff] }
0x131f   : > { %10184 = vmatprep.mubr.msk.bf16.mxu0 %vm11416_vm2, %v11415_v2  ;;  %10193 = vmatpush3.bf16.msra.mxu1 %v10975_v49 }
0x1320   : > { %v4033_v14 = vmul.f32 %v12963_v33, %v4017_v26  ;;  %v13035_v50 = vadd.f32 %v12971_v54, %v4032_v46  ;;  %10194 = vmatprep.subr.bf16.mxu1 %v11415_v2  ;;  %v10976_v33 = vld [vmem:[%s14813_s8 + $0x18] sm:$0xff]  }
0x1322   : > { %v13038_v7 = vadd.f32 %v12971_v54, %v4033_v14 }
0x1323   : > { %10195 = vmatpush3.bf16.msra.mxu1 %v10976_v33 }
0x1324   : > { %v4054_v51 = vpack.c.bf16 %v13038_v7, %v13035_v50  ;;  %10240 = vmatprep.subr.bf16.mxu1 %v11415_v2 }
0x1326   : > { %10185 = vmatmul.mubr.msk.bf16.gmra.mrb[24].mxu0 %vm594_vm3, %v4054_v51 }
0x1327   : > { %10220 = vmatprep.mubr.msk.bf16.mxu0 %vm11416_vm2, %v11415_v2 }
0x13d5   : > { %v4127_v21 = vpop.f32.mrb[8].mxu0 }
0x13d6   : > { %v4128_v54 = vadd.f32 %v8737_v38, %v4127_v21  ;;  %v10170_v56 = vpop.f32.mrb[9].mxu0 }
0x13d7   : > { %v4130_v4 = vpop.f32.mrb[10].mxu0 }
0x13d8   : > { %v4131_v29 = vadd.f32 %v8737_v38, %v4130_v4  ;;  %v10171_v37 = vpop.f32.mrb[11].mxu0  ;;  %v4166_v61 = vmax.f32 %v4128_v54, 0.0 }
0x13da   : > { %v4167_v5 = vmax.f32 %v4131_v29, 0.0 }
0x13dc   : > { %v4176_v52 = vpack.c.bf16 %v4167_v5, %v4166_v61 }
0x13dd   : > { %v4135_v45 = vpop.f32.mrb[12].mxu0 }
0x13de   : > { %v4136_v0 = vadd.f32 %v8737_v38, %v4135_v45  ;;  %v10174_v20 = vpop.f32.mrb[13].mxu0  ;;  %10197 = vmatmul.mubr.msk.bf16.vlgmr.msra.gmra.mrb[4].mxu1 %vm4221_vm7, %v4176_v52 }
0x13df   : > { %v4138_v60 = vpop.f32.mrb[14].mxu0  ;;  %10200 = vmatprep.mubr.msk.bf16.mxu1 %vm11416_vm2, %v11415_v2 }
0x13e0   : > { %v4139_v22 = vadd.f32 %v8737_v38, %v4138_v60  ;;  %v10175_v40 = vpop.f32.mrb[15].mxu0  ;;  %v4168_v19 = vmax.f32 %v4136_v0, 0.0 }
0x13e2   : > { %v4169_v3 = vmax.f32 %v4139_v22, 0.0 }
0x13e4   : > { %v4177_v17 = vpack.c.bf16 %v4169_v3, %v4168_v19 }
0x13e6   : > { %10201 = vmatmul.mubr.msk.bf16.gmra.mrb[8].mxu1 %vm4221_vm7, %v4177_v17 }
0x13e7   : > { %10204 = vmatprep.mubr.msk.bf16.mxu1 %vm11416_vm2, %v11415_v2 }
0x13e9   : > { %v4143_v23 = vpop.f32.mrb[16].mxu0 }
0x13ea   : > { %v4144_v55 = vadd.f32 %v8737_v38, %v4143_v23  ;;  %v10178_v31 = vpop.f32.mrb[17].mxu0 }
0x13eb   : > { %v4146_v11 = vpop.f32.mrb[18].mxu0 }
0x13ec   : > { %v4147_v39 = vadd.f32 %v8737_v38, %v4146_v11  ;;  %v10179_v27 = vpop.f32.mrb[19].mxu0  ;;  %v4170_v16 = vmax.f32 %v4144_v55, 0.0 }
0x13ee   : > { %v4171_v25 = vmax.f32 %v4147_v39, 0.0 }
0x13f0   : > { %v4178_v18 = vpack.c.bf16 %v4171_v25, %v4170_v16 }
0x13f1   : > { %v4151_v6 = vpop.f32.mrb[20].mxu0 }
0x13f2   : > { %v4152_v30 = vadd.f32 %v8737_v38, %v4151_v6  ;;  %v10182_v53 = vpop.f32.mrb[21].mxu0  ;;  %10205 = vmatmul.mubr.msk.bf16.gmra.mrb[12].mxu1 %vm4221_vm7, %v4178_v18 }
0x13f3   : > { %v4154_v35 = vpop.f32.mrb[22].mxu0  ;;  %10208 = vmatprep.mubr.msk.bf16.mxu1 %vm11416_vm2, %v11415_v2 }
0x13f4   : > { %v4155_v36 = vadd.f32 %v8737_v38, %v4154_v35  ;;  %v10183_v62 = vpop.f32.mrb[23].mxu0  ;;  %v4172_v34 = vmax.f32 %v4152_v30, 0.0 }
0x13f6   : > { %v4173_v15 = vmax.f32 %v4155_v36, 0.0 }
0x13f8   : > { %v4179_v1 = vpack.c.bf16 %v4173_v15, %v4172_v34 }
0x13f9   : > { %v4159_v47 = vpop.f32.mrb[24].mxu0 }
0x13fa   : > { %v4160_v57 = vadd.f32 %v8737_v38, %v4159_v47  ;;  %v10186_v10 = vpop.f32.mrb[25].mxu0  ;;  %10209 = vmatmul.mubr.msk.bf16.gmra.mrb[16].mxu1 %vm4221_vm7, %v4179_v1 }
0x13fb   : > { %v4162_v63 = vpop.f32.mrb[26].mxu0  ;;  %10212 = vmatprep.mubr.msk.bf16.mxu1 %vm11416_vm2, %v11415_v2 }
0x13fc   : > { %v4163_v59 = vadd.f32 %v8737_v38, %v4162_v63  ;;  %v10187_v44 = vpop.f32.mrb[27].mxu0  ;;  %v4174_v41 = vmax.f32 %v4160_v57, 0.0 }
0x13fe   : > { %v4175_v28 = vmax.f32 %v4163_v59, 0.0 }
0x1400   : > { %v4180_v48 = vpack.c.bf16 %v4175_v28, %v4174_v41 }
0x1402   : > { %10213 = vmatmul.mubr.msk.bf16.gmra.mrb[20].mxu1 %vm4221_vm7, %v4180_v48 }
0x1403   : > { %10244 = vmatprep.mubr.msk.bf16.mxu1 %vm11416_vm2, %v11415_v2 }
0x14b1   : > { %v4271_v46 = vpop.f32.mrb[4].mxu1 }
0x14b2   : > { %v4272_v26 = vadd.f32 %v8746_v42, %v4271_v46  ;;  %v10198_v14 = vpop.f32.mrb[5].mxu1 }
0x14b3   : > { %v4274_v51 = vpop.f32.mrb[6].mxu1 }
0x14b4   : > { %v4275_v49 = vadd.f32 %v8746_v42, %v4274_v51  ;;  %v10199_v33 = vpop.f32.mrb[7].mxu1  ;;  %v4310_v38 = vadd.f32 %v4272_v26, %v12975_v13 }
0x14b6   : > { %v4324_v21 = vsel %vm594_vm3, %v4310_v38, 0.0  ;;  %v4311_v54 = vadd.f32 %v4275_v49, %v12978_v32 }
0x14b7   : > { %4325 = vadd.xlane.f32.xlu0 %v4324_v21 }
0x14b8   : > { %v4327_v56 = vsel %vm594_vm3, %v4311_v54, 0.0 }
0x14b9   : > { %4328 = vadd.xlane.f32.xlu1 %v4327_v56  ;;  %v4279_v4 = vpop.f32.mrb[8].mxu1 }
0x14ba   : > { %v4280_v29 = vadd.f32 %v8746_v42, %v4279_v4  ;;  %v10202_v37 = vpop.f32.mrb[9].mxu1 }
0x14bb   : > { %v4282_v61 = vpop.f32.mrb[10].mxu1 }
0x14bc   : > { %v4283_v5 = vadd.f32 %v8746_v42, %v4282_v61  ;;  %v10203_v52 = vpop.f32.mrb[11].mxu1  ;;  %v4312_v45 = vadd.f32 %v4280_v29, %v12990_v24 }
0x14be   : > { %v4330_v0 = vsel %vm594_vm3, %v4312_v45, 0.0  ;;  %v4313_v13 = vadd.f32 %v4283_v5, %v12993_v9 }
0x14bf   : > { %4331 = vadd.xlane.f32.xlu0 %v4330_v0 }
0x14c0   : > { %v4333_v20 = vsel %vm594_vm3, %v4313_v13, 0.0 }
0x14c1   : > { %4334 = vadd.xlane.f32.xlu1 %v4333_v20 }
0x14c5   : > { %v4287_v32 = vpop.f32.mrb[12].mxu1 }
0x14c6   : > { %v4288_v60 = vadd.f32 %v8746_v42, %v4287_v32  ;;  %v10206_v22 = vpop.f32.mrb[13].mxu1 }
0x14c7   : > { %v4290_v40 = vpop.f32.mrb[14].mxu1 }
0x14c8   : > { %v4291_v19 = vadd.f32 %v8746_v42, %v4290_v40  ;;  %v10207_v3 = vpop.f32.mrb[15].mxu1  ;;  %v4314_v17 = vadd.f32 %v4288_v60, %v13005_v12 }
0x14ca   : > { %v4336_v23 = vsel %vm594_vm3, %v4314_v17, 0.0  ;;  %v4315_v24 = vadd.f32 %v4291_v19, %v13008_v58 }
0x14cb   : > { %4337 = vadd.xlane.f32.xlu0 %v4336_v23 }
0x14cc   : > { %v4339_v55 = vsel %vm594_vm3, %v4315_v24, 0.0 }
0x14cd   : > { %4340 = vadd.xlane.f32.xlu1 %v4339_v55  ;;  %v4295_v9 = vpop.f32.mrb[16].mxu1 }
0x14ce   : > { %v4296_v31 = vadd.f32 %v8746_v42, %v4295_v9  ;;  %v10210_v11 = vpop.f32.mrb[17].mxu1  ;;  %v10977_v9 = vld [vmem:[%s14808_s3 + $0x100] sm:$0xff]  }
0x14cf   : > { %v4298_v39 = vpop.f32.mrb[18].mxu1  ;;  %10241 = vmatpush3.bf16.msra.mxu1 %v10977_v9 }
0x14d0   : > { %v4299_v27 = vadd.f32 %v8746_v42, %v4298_v39  ;;  %v10211_v16 = vpop.f32.mrb[19].mxu1  ;;  %v4316_v25 = vadd.f32 %v4296_v31, %v13020_v8  ;;  %v10978_v31 = vld [vmem:[%s14808_s3 + $0xc0] sm:$0xff]   ;;  %10242 = vmatprep.subr.bf16.mxu1 %v11415_v2 }
0x14d1   : > { %10217 = vmatpush3.bf16.msra.mxu0 %v10978_v31 }
0x14d2   : > { %v4342_v18 = vsel %vm594_vm3, %v4316_v25, 0.0  ;;  %v4317_v12 = vadd.f32 %v4299_v27, %v13023_v43  ;;  %10218 = vmatprep.subr.bf16.mxu0 %v11415_v2 }
0x14d3   : > { %4343 = vadd.xlane.f32.xlu0 %v4342_v18  ;;  %v10980_v18 = vld [vmem:[%s14808_s3 + $0x108] sm:$0xff]  }
0x14d4   : > { %v4345_v6 = vsel %vm594_vm3, %v4317_v12, 0.0  ;;  %10243 = vmatpush3.bf16.msra.mxu1 %v10980_v18 }
0x14d5   : > { %4346 = vadd.xlane.f32.xlu1 %v4345_v6  ;;  %v4303_v58 = vpop.f32.mrb[20].mxu1  ;;  %10288 = vmatprep.subr.bf16.mxu1 %v11415_v2 }
0x14d6   : > { %v4304_v30 = vadd.f32 %v8746_v42, %v4303_v58  ;;  %v10214_v53 = vpop.f32.mrb[21].mxu1 }
0x14d7   : > { %v4306_v35 = vpop.f32.mrb[22].mxu1 }
0x14d8   : > { %v4307_v36 = vadd.f32 %v8746_v42, %v4306_v35  ;;  %v10215_v62 = vpop.f32.mrb[23].mxu1  ;;  %v4318_v34 = vadd.f32 %v4304_v30, %v13035_v50 }
0x14da   : > { %v4348_v15 = vsel %vm594_vm3, %v4318_v34, 0.0  ;;  %v4319_v8 = vadd.f32 %v4307_v36, %v13038_v7 }
0x14db   : > { %4349 = vadd.xlane.f32.xlu0 %v4348_v15 }
0x14dc   : > { %v4351_v1 = vsel %vm594_vm3, %v4319_v8, 0.0 }
0x14dd   : > { %4352 = vadd.xlane.f32.xlu1 %v4351_v1 }
0x1544   : > { %v4326_v43 = vpop.xlane.xlu0 %4325 }
0x1545   : > { %v4354_v47 = vmul.f32 0.03125, %v4326_v43 }
0x1546   : > { %v4329_v57 = vpop.xlane.xlu1 %4328 }
0x1547   : > { %v13094_v10 = vsub.f32 %v4310_v38, %v4354_v47  ;;  %v4355_v63 = vmul.f32 0.03125, %v4329_v57 }
0x1549   : > { %v13096_v59 = vsub.f32 %v4311_v54, %v4355_v63  ;;  %v4374_v44 = vmul.f32 %v13094_v10, %v13094_v10 }
0x154b   : > { %v4384_v50 = vsel %vm594_vm3, %v4374_v44, 0.0  ;;  %v4375_v7 = vmul.f32 %v13096_v59, %v13096_v59  ;;  %v13163_v44 = vld [vmem:[%s14814_s9 + $0x4] ss:$0 sm:$0xff] }
0x154c   : > { %v4332_v41 = vpop.xlane.xlu0 %4331  ;;  %4385 = vadd.xlane.f32.xlu0 %v4384_v50 }
0x154d   : > { %v4356_v28 = vmul.f32 0.03125, %v4332_v41  ;;  %v4387_v48 = vsel %vm594_vm3, %v4375_v7, 0.0 }
0x154e   : > { %v4335_v42 = vpop.xlane.xlu1 %4334  ;;  %4388 = vadd.xlane.f32.xlu1 %v4387_v48  ;;  %v13171_v48 = vld [vmem:[%s14814_s9 + $0x5] ss:$0 sm:$0xff] }
0x154f   : > { %v13104_v46 = vsub.f32 %v4312_v45, %v4356_v28  ;;  %v4357_v26 = vmul.f32 0.03125, %v4335_v42 }
0x1551   : > { %v13106_v14 = vsub.f32 %v4313_v13, %v4357_v26  ;;  %v4376_v51 = vmul.f32 %v13104_v46, %v13104_v46 }
0x1553   : > { %v4390_v49 = vsel %vm594_vm3, %v4376_v51, 0.0  ;;  %v4377_v33 = vmul.f32 %v13106_v14, %v13106_v14 }
0x1554   : > { %4391 = vadd.xlane.f32.xlu0 %v4390_v49 }
0x1555   : > { %v4393_v38 = vsel %vm594_vm3, %v4377_v33, 0.0 }
0x1556   : > { %4394 = vadd.xlane.f32.xlu1 %v4393_v38 }
0x1558   : > { %v4338_v21 = vpop.xlane.xlu0 %4337 }
0x1559   : > { %v4358_v54 = vmul.f32 0.03125, %v4338_v21 }
0x155a   : > { %v4341_v56 = vpop.xlane.xlu1 %4340 }
0x155b   : > { %v13114_v4 = vsub.f32 %v4314_v17, %v4358_v54  ;;  %v4359_v29 = vmul.f32 0.03125, %v4341_v56 }
0x155d   : > { %v13116_v37 = vsub.f32 %v4315_v24, %v4359_v29  ;;  %v4378_v61 = vmul.f32 %v13114_v4, %v13114_v4  ;;  %v10981_v29 = vld [vmem:[%s14808_s3 + $0x140] sm:$0xff]  }
0x155f   : > { %v4396_v5 = vsel %vm594_vm3, %v4378_v61, 0.0  ;;  %v4379_v52 = vmul.f32 %v13116_v37, %v13116_v37 }
0x1560   : > { %v4344_v45 = vpop.xlane.xlu0 %4343  ;;  %4397 = vadd.xlane.f32.xlu0 %v4396_v5 }
0x1561   : > { %v4360_v0 = vmul.f32 0.03125, %v4344_v45  ;;  %v4399_v13 = vsel %vm594_vm3, %v4379_v52, 0.0 }
0x1562   : > { %v4347_v20 = vpop.xlane.xlu1 %4346  ;;  %4400 = vadd.xlane.f32.xlu1 %v4399_v13 }
0x1563   : > { %v13124_v32 = vsub.f32 %v4316_v25, %v4360_v0  ;;  %v4361_v60 = vmul.f32 0.03125, %v4347_v20  ;;  %v10979_v25 = vld [vmem:[%s14808_s3 + $0xc8] sm:$0xff]  }
0x1564   : > { %10219 = vmatpush3.bf16.msra.mxu0 %v10979_v25 }
0x1565   : > { %v13126_v22 = vsub.f32 %v4317_v12, %v4361_v60  ;;  %v4380_v40 = vmul.f32 %v13124_v32, %v13124_v32  ;;  %10264 = vmatprep.subr.bf16.mxu0 %v11415_v2 }
0x1567   : > { %v4402_v19 = vsel %vm594_vm3, %v4380_v40, 0.0  ;;  %v4381_v3 = vmul.f32 %v13126_v22, %v13126_v22 }
0x1568   : > { %4403 = vadd.xlane.f32.xlu0 %v4402_v19  ;;  %v4350_v17 = vpop.xlane.xlu0 %4349 }
0x1569   : > { %v4362_v23 = vmul.f32 0.03125, %v4350_v17  ;;  %v4405_v24 = vsel %vm594_vm3, %v4381_v3, 0.0 }
0x156a   : > { %4406 = vadd.xlane.f32.xlu1 %v4405_v24  ;;  %v4353_v55 = vpop.xlane.xlu1 %4352 }
0x156b   : > { %v13140_v11 = vsub.f32 %v4318_v34, %v4362_v23  ;;  %v4363_v39 = vmul.f32 0.03125, %v4353_v55 }
0x156d   : > { %v13142_v27 = vsub.f32 %v4319_v8, %v4363_v39  ;;  %v4382_v16 = vmul.f32 %v13140_v11, %v13140_v11 }
0x156f   : > { %v4408_v12 = vsel %vm594_vm3, %v4382_v16, 0.0  ;;  %v4383_v6 = vmul.f32 %v13142_v27, %v13142_v27 }
0x1570   : > { %4409 = vadd.xlane.f32.xlu0 %v4408_v12 }
0x1571   : > { %v4411_v58 = vsel %vm594_vm3, %v4383_v6, 0.0 }
0x1572   : > { %4412 = vadd.xlane.f32.xlu1 %v4411_v58 }
0x15d9   : > { %v4386_v30 = vpop.xlane.xlu0 %4385 }
0x15da   : > { %v4414_v53 = vmul.f32 0.03125, %v4386_v30 }
0x15db   : > { %v4389_v35 = vpop.xlane.xlu1 %4388 }
0x15dc   : > { %v4424_v36 = vadd.f32 1e-05, %v4414_v53  ;;  %v4415_v62 = vmul.f32 0.03125, %v4389_v35 }
0x15de   : > { %11187 = vrsqrt.f32 %v4424_v36  ;;  %v4425_v34 = vadd.f32 1e-05, %v4415_v62 }
0x15e0   : > { %11189 = vrsqrt.f32 %v4425_v34 }
0x15e1   : > { %v4392_v15 = vpop.xlane.xlu0 %4391 }
0x15e2   : > { %v4416_v8 = vmul.f32 0.03125, %v4392_v15 }
0x15e3   : > { %v4395_v1 = vpop.xlane.xlu1 %4394 }
0x15e4   : > { %v4426_v43 = vadd.f32 1e-05, %v4416_v8  ;;  %v4417_v47 = vmul.f32 0.03125, %v4395_v1 }
0x15e6   : > { %11191 = vrsqrt.f32 %v4426_v43  ;;  %v4427_v57 = vadd.f32 1e-05, %v4417_v47 }
0x15e8   : > { %v11188_v63 = vpop.eup %11187  ;;  %11193 = vrsqrt.f32 %v4427_v57 }
0x15e9   : > { %v4444_v50 = vmul.f32 %v11188_v63, %v13094_v10 }
0x15ea   : > { %v11190_v7 = vpop.eup %11189 }
0x15eb   : > { %v4460_v41 = vmul.f32 %v13163_v44, %v4444_v50  ;;  %v4445_v28 = vmul.f32 %v11190_v7, %v13096_v59 }
0x15ed   : > { %v4461_v42 = vmul.f32 %v13163_v44, %v4445_v28  ;;  %v4398_v26 = vpop.xlane.xlu0 %4397  ;;  %v13175_v49 = vadd.f32 %v13171_v48, %v4460_v41 }
0x15ee   : > { %v4418_v51 = vmul.f32 0.03125, %v4398_v26 }
0x15ef   : > { %v13178_v33 = vadd.f32 %v13171_v48, %v4461_v42  ;;  %v4401_v10 = vpop.xlane.xlu1 %4400 }
0x15f0   : > { %v11192_v38 = vpop.eup %11191  ;;  %v4428_v21 = vadd.f32 1e-05, %v4418_v51  ;;  %v4419_v54 = vmul.f32 0.03125, %v4401_v10 }
0x15f1   : > { %v13182_v59 = vpack.c.bf16 %v13178_v33, %v13175_v49  ;;  %v4446_v56 = vmul.f32 %v11192_v38, %v13104_v46 }
0x15f2   : > { %v11194_v61 = vpop.eup %11193  ;;  %11195 = vrsqrt.f32 %v4428_v21  ;;  %v4429_v5 = vadd.f32 1e-05, %v4419_v54 }
0x15f3   : > { %v4462_v52 = vmul.f32 %v13163_v44, %v4446_v56  ;;  %v4447_v45 = vmul.f32 %v11194_v61, %v13106_v14  ;;  %10221 = vmatmul.mubr.msk.bf16.vlgmr.msra.gmra.mrb[28].mxu0 %vm594_vm3, %v13182_v59  ;;  %10245 = vmatmul.mubr.msk.bf16.vlgmr.msra.gmra.mrb[24].mxu1 %vm594_vm3, %v13182_v59  ;;  %v10982_v14 = vld [vmem:[%s14808_s3 + $0x148] sm:$0xff]  }
0x15f4   : > { %11197 = vrsqrt.f32 %v4429_v5  ;;  %10224 = vmatprep.mubr.msk.bf16.mxu0 %vm11416_vm2, %v11415_v2  ;;  %10248 = vmatprep.mubr.msk.bf16.mxu1 %vm11416_vm2, %v11415_v2 }
0x15f5   : > { %v4463_v46 = vmul.f32 %v13163_v44, %v4447_v45  ;;  %v4404_v0 = vpop.xlane.xlu0 %4403  ;;  %10265 = vmatpush3.bf16.msra.mxu0 %v10981_v29  ;;  %v13204_v20 = vadd.f32 %v13171_v48, %v4462_v52 }
0x15f6   : > { %v4420_v13 = vmul.f32 0.03125, %v4404_v0  ;;  %10266 = vmatprep.subr.bf16.mxu0 %v11415_v2 }
0x15f7   : > { %v13207_v60 = vadd.f32 %v13171_v48, %v4463_v46  ;;  %v4407_v40 = vpop.xlane.xlu1 %4406 }
0x15f8   : > { %v4430_v19 = vadd.f32 1e-05, %v4420_v13  ;;  %v4421_v3 = vmul.f32 0.03125, %v4407_v40 }
0x15f9   : > { %v13211_v17 = vpack.c.bf16 %v13207_v60, %v13204_v20  ;;  %10267 = vmatpush3.bf16.msra.mxu0 %v10982_v14 }
0x15fa   : > { %11199 = vrsqrt.f32 %v4430_v19  ;;  %v4431_v23 = vadd.f32 1e-05, %v4421_v3  ;;  %10306 = vmatprep.subr.bf16.mxu0 %v11415_v2 }
0x15fb   : > { %10225 = vmatmul.mubr.msk.bf16.gmra.mrb[32].mxu0 %vm594_vm3, %v13211_v17  ;;  %10249 = vmatmul.mubr.msk.bf16.gmra.mrb[28].mxu1 %vm594_vm3, %v13211_v17 }
0x15fc   : > { %v11196_v24 = vpop.eup %11195  ;;  %11201 = vrsqrt.f32 %v4431_v23  ;;  %10228 = vmatprep.mubr.msk.bf16.mxu0 %vm11416_vm2, %v11415_v2  ;;  %10252 = vmatprep.mubr.msk.bf16.mxu1 %vm11416_vm2, %v11415_v2 }
0x15fd   : > { %v4448_v55 = vmul.f32 %v11196_v24, %v13114_v4  ;;  %v4410_v9 = vpop.xlane.xlu0 %4409 }
0x15fe   : > { %v11198_v31 = vpop.eup %11197  ;;  %v4422_v39 = vmul.f32 0.03125, %v4410_v9 }
0x15ff   : > { %v4464_v16 = vmul.f32 %v13163_v44, %v4448_v55  ;;  %v4449_v25 = vmul.f32 %v11198_v31, %v13116_v37  ;;  %v4413_v18 = vpop.xlane.xlu1 %4412 }
0x1600   : > { %v4432_v12 = vadd.f32 1e-05, %v4422_v39  ;;  %v4423_v6 = vmul.f32 0.03125, %v4413_v18 }
0x1601   : > { %v4465_v58 = vmul.f32 %v13163_v44, %v4449_v25  ;;  %v13227_v53 = vadd.f32 %v13171_v48, %v4464_v16 }
0x1602   : > { %11203 = vrsqrt.f32 %v4432_v12  ;;  %v4433_v30 = vadd.f32 1e-05, %v4423_v6 }
0x1603   : > { %v13230_v35 = vadd.f32 %v13171_v48, %v4465_v58 }
0x1604   : > { %v11200_v4 = vpop.eup %11199  ;;  %11205 = vrsqrt.f32 %v4433_v30 }
0x1605   : > { %v13234_v36 = vpack.c.bf16 %v13230_v35, %v13227_v53  ;;  %v4450_v37 = vmul.f32 %v11200_v4, %v13124_v32 }
0x1606   : > { %v11202_v62 = vpop.eup %11201 }
0x1607   : > { %v4466_v34 = vmul.f32 %v13163_v44, %v4450_v37  ;;  %v4451_v15 = vmul.f32 %v11202_v62, %v13126_v22  ;;  %10229 = vmatmul.mubr.msk.bf16.gmra.mrb[36].mxu0 %vm594_vm3, %v13234_v36  ;;  %10253 = vmatmul.mubr.msk.bf16.gmra.mrb[32].mxu1 %vm594_vm3, %v13234_v36 }
0x1608   : > { %10232 = vmatprep.mubr.msk.bf16.mxu0 %vm11416_vm2, %v11415_v2  ;;  %10256 = vmatprep.mubr.msk.bf16.mxu1 %vm11416_vm2, %v11415_v2 }
0x1609   : > { %v4467_v8 = vmul.f32 %v13163_v44, %v4451_v15  ;;  %v13249_v32 = vadd.f32 %v13171_v48, %v4466_v34 }
0x160b   : > { %v13252_v1 = vadd.f32 %v13171_v48, %v4467_v8 }
0x160c   : > { %v11204_v22 = vpop.eup %11203 }
0x160d   : > { %v13256_v43 = vpack.c.bf16 %v13252_v1, %v13249_v32  ;;  %v4452_v47 = vmul.f32 %v11204_v22, %v13140_v11 }
0x160e   : > { %v11206_v57 = vpop.eup %11205 }
0x160f   : > { %v4468_v63 = vmul.f32 %v13163_v44, %v4452_v47  ;;  %v4453_v50 = vmul.f32 %v11206_v57, %v13142_v27  ;;  %10233 = vmatmul.mubr.msk.bf16.gmra.mrb[40].mxu0 %vm594_vm3, %v13256_v43  ;;  %10257 = vmatmul.mubr.msk.bf16.gmra.mrb[36].mxu1 %vm594_vm3, %v13256_v43 }
0x1610   : > { %10236 = vmatprep.mubr.msk.bf16.mxu0 %vm11416_vm2, %v11415_v2  ;;  %10260 = vmatprep.mubr.msk.bf16.mxu1 %vm11416_vm2, %v11415_v2 }
0x1611   : > { %v4469_v7 = vmul.f32 %v13163_v44, %v4453_v50  ;;  %v13271_v11 = vadd.f32 %v13171_v48, %v4468_v63  ;;  %v13311_v44 = vld [vmem:[%s14809_s4 + $0xc] ss:$0 sm:$0xff] }
0x1613   : > { %v13274_v41 = vadd.f32 %v13171_v48, %v4469_v7  ;;  %v13316_v48 = vld [vmem:[%s14809_s4 + $0x10] ss:$0 sm:$0xff] }
0x1615   : > { %14839 = vst [vmem:[#allocation2_spill] sm:$0xff] %v13274_v41  ;;  %v13278_v27 = vpack.c.bf16 %v13274_v41, %v13271_v11 }
0x1617   : > { %10237 = vmatmul.mubr.msk.bf16.gmra.mrb[44].mxu0 %vm594_vm3, %v13278_v27  ;;  %10261 = vmatmul.mubr.msk.bf16.gmra.mrb[40].mxu1 %vm594_vm3, %v13278_v27 }
0x1618   : > { %10268 = vmatprep.mubr.msk.bf16.mxu0 %vm11416_vm2, %v11415_v2  ;;  %10294 = vmatprep.mubr.msk.bf16.mxu1 %vm11416_vm2, %v11415_v2 }
0x161f   : > { %10269 = vmatmul.mubr.msk.bf16.vlgmr.msra.gmra.mrb[48].mxu0 %vm594_vm3, %v13182_v59 }
0x1620   : > { %10272 = vmatprep.mubr.msk.bf16.mxu0 %vm11416_vm2, %v11415_v2 }
0x1627   : > { %10273 = vmatmul.mubr.msk.bf16.gmra.mrb[52].mxu0 %vm594_vm3, %v13211_v17 }
0x1628   : > { %10276 = vmatprep.mubr.msk.bf16.mxu0 %vm11416_vm2, %v11415_v2 }
0x162f   : > { %10277 = vmatmul.mubr.msk.bf16.gmra.mrb[56].mxu0 %vm594_vm3, %v13234_v36 }
0x1630   : > { %10280 = vmatprep.mubr.msk.bf16.mxu0 %vm11416_vm2, %v11415_v2 }
0x1637   : > { %10281 = vmatmul.mubr.msk.bf16.gmra.mrb[60].mxu0 %vm594_vm3, %v13256_v43 }
0x1638   : > { %10284 = vmatprep.mubr.msk.bf16.mxu0 %vm11416_vm2, %v11415_v2 }
0x163f   : > { %10285 = vmatmul.mubr.msk.bf16.gmra.mrb[64].mxu0 %vm594_vm3, %v13278_v27 }
0x1640   : > { %10312 = vmatprep.mubr.msk.bf16.mxu0 %vm11416_vm2, %v11415_v2 }
0x16c6   : > { %v4567_v28 = vpop.f32.mrb[28].mxu0  ;;  %v4665_v42 = vpop.f32.mrb[24].mxu1 }
0x16c7   : > { %v10222_v26 = vpop.f32.mrb[29].mxu0  ;;  %v10246_v51 = vpop.f32.mrb[25].mxu1  ;;  %v4568_v21 = vadd.f32 %v13311_v44, %v4567_v28  ;;  %v4666_v54 = vadd.f32 %v13316_v48, %v4665_v42 }
0x16c8   : > { %v4570_v10 = vpop.f32.mrb[30].mxu0  ;;  %v4668_v38 = vpop.f32.mrb[26].mxu1 }
0x16c9   : > { %v4571_v56 = vadd.f32 %v13311_v44, %v4570_v10  ;;  %v4669_v29 = vadd.f32 %v13316_v48, %v4668_v38  ;;  %v10223_v61 = vpop.f32.mrb[31].mxu0  ;;  %v10247_v5 = vpop.f32.mrb[27].mxu1 }
0x16cb   : > { %v4802_v52 = vpack.c.bf16 %v4571_v56, %v4568_v21  ;;  %v4808_v45 = vpack.c.bf16 %v4669_v29, %v4666_v54 }
0x16cd   : > { %v4830_v46 = vsel %vm897_vm4, %v4808_v45, 0 }
0x16ce   : > { %v4575_v0 = vpop.f32.mrb[32].mxu0  ;;  %v4673_v14 = vpop.f32.mrb[28].mxu1  ;;  %10289 = vmatpush3.bf16.xpose.msra.mxu1 %v4830_v46 }
0x16cf   : > { %v10226_v13 = vpop.f32.mrb[33].mxu0  ;;  %v10250_v40 = vpop.f32.mrb[29].mxu1  ;;  %10290 = vmatprep.subr.bf16.mxu1 %v11415_v2  ;;  %v4576_v23 = vadd.f32 %v13311_v44, %v4575_v0  ;;  %v4674_v24 = vadd.f32 %v13316_v48, %v4673_v14 }
0x16d0   : > { %v4578_v19 = vpop.f32.mrb[34].mxu0  ;;  %v4676_v3 = vpop.f32.mrb[30].mxu1 }
0x16d1   : > { %v4579_v55 = vadd.f32 %v13311_v44, %v4578_v19  ;;  %v4677_v9 = vadd.f32 %v13316_v48, %v4676_v3  ;;  %v10227_v31 = vpop.f32.mrb[35].mxu0  ;;  %v10251_v39 = vpop.f32.mrb[31].mxu1 }
0x16d3   : > { %v4803_v16 = vpack.c.bf16 %v4579_v55, %v4576_v23  ;;  %v4809_v25 = vpack.c.bf16 %v4677_v9, %v4674_v24 }
0x16d5   : > { %v4833_v18 = vsel %vm897_vm4, %v4809_v25, 0  ;;  %v8792_v25 = vld [vmem:[%s14809_s4 + $0x14] ss:$0 sm:$0xff] }
0x16d6   : > { %10291 = vmatpush3.bf16.xpose.msra.mxu1 %v4833_v18 }
0x16d7   : > { %10292 = vmatprep.subr.bf16.mxu1 %v11415_v2 }
0x16da   : > { %v4583_v12 = vpop.f32.mrb[36].mxu0  ;;  %v4681_v6 = vpop.f32.mrb[32].mxu1 }
0x16db   : > { %v4682_v58 = vadd.f32 %v13316_v48, %v4681_v6  ;;  %v10230_v30 = vpop.f32.mrb[37].mxu0  ;;  %v10254_v4 = vpop.f32.mrb[33].mxu1  ;;  %v4584_v39 = vadd.f32 %v13311_v44, %v4583_v12 }
0x16dc   : > { %v4586_v37 = vpop.f32.mrb[38].mxu0  ;;  %v4684_v62 = vpop.f32.mrb[34].mxu1 }
0x16dd   : > { %v4810_v34 = vpack.c.bf16 %v4682_v58, %v4682_v58  ;;  %v10231_v15 = vpop.f32.mrb[39].mxu0  ;;  %v10255_v8 = vpop.f32.mrb[35].mxu1  ;;  %v13334_v63 = vadd.f32 %v13311_v44, %v4586_v37  ;;  %v4685_v50 = vadd.f32 %v13316_v48, %v4684_v62  ;;  %v4804_v30 = vpack.c.bf16 %v4584_v39, %v4584_v39 }
0x16df   : > { %v4836_v22 = vsel %vm897_vm4, %v4810_v34, 0 }
0x16e0   : > { %10293 = vmatpush3.bf16.xpose.msra.mxu1 %v4836_v22 }
0x16e1   : > { %10324 = vmatprep.subr.bf16.mxu1 %v11415_v2 }
0x16e2   : > { %v4591_v47 = vpop.f32.mrb[40].mxu0  ;;  %v4689_v57 = vpop.f32.mrb[36].mxu1 }
0x16e3   : > { %v4592_v7 = vadd.f32 %v13311_v44, %v4591_v47  ;;  %v4690_v28 = vadd.f32 %v13316_v48, %v4689_v57  ;;  %v10234_v42 = vpop.f32.mrb[41].mxu0  ;;  %v10258_v26 = vpop.f32.mrb[37].mxu1 }
0x16e4   : > { %v4594_v51 = vpop.f32.mrb[42].mxu0  ;;  %v4692_v10 = vpop.f32.mrb[38].mxu1 }
0x16e5   : > { %v4805_v38 = vpack.c.bf16 %v4592_v7, %v13334_v63  ;;  %v10235_v21 = vpop.f32.mrb[43].mxu0  ;;  %v10259_v54 = vpop.f32.mrb[39].mxu1  ;;  %v4811_v56 = vpack.c.bf16 %v4690_v28, %v4685_v50  ;;  %v4595_v45 = vadd.f32 %v13311_v44, %v4594_v51  ;;  %v4693_v46 = vadd.f32 %v13316_v48, %v4692_v10 }
0x16e7   : > { %10295 = vmatmul.mubr.msk.bf16.vlgmr.msra.gmra.mrb[44].mxu1 %vm897_vm4, %v4802_v52  ;;  %v4904_v29 = vsel %vm897_vm4, %v4811_v56, 0 }
0x16e8   : > { %10307 = vmatpush3.bf16.xpose.msra.mxu0 %v4904_v29  ;;  %10298 = vmatprep.mubr.msk.bf16.mxu1 %vm11416_vm2, %v11415_v2 }
0x16e9   : > { %10308 = vmatprep.subr.bf16.mxu0 %v11415_v2 }
0x16ea   : > { %v4599_v61 = vpop.f32.mrb[44].mxu0  ;;  %v4697_v5 = vpop.f32.mrb[40].mxu1 }
0x16eb   : > { %v4600_v0 = vadd.f32 %v13311_v44, %v4599_v61  ;;  %v4698_v14 = vadd.f32 %v13316_v48, %v4697_v5  ;;  %v10238_v13 = vpop.f32.mrb[45].mxu0  ;;  %v10262_v52 = vpop.f32.mrb[41].mxu1 }
0x16ec   : > { %v4602_v40 = vpop.f32.mrb[46].mxu0  ;;  %v4700_v19 = vpop.f32.mrb[42].mxu1 }
0x16ed   : > { %v4806_v3 = vpack.c.bf16 %v4600_v0, %v4595_v45  ;;  %v10239_v23 = vpop.f32.mrb[47].mxu0  ;;  %v10263_v24 = vpop.f32.mrb[43].mxu1  ;;  %v4812_v55 = vpack.c.bf16 %v4698_v14, %v4693_v46  ;;  %v4701_v9 = vadd.f32 %v13316_v48, %v4700_v19 }
0x16ef   : > { %10299 = vmatmul.mubr.msk.bf16.gmra.mrb[48].mxu1 %vm897_vm4, %v4803_v16  ;;  %v4907_v31 = vsel %vm897_vm4, %v4812_v55, 0  ;;  %v4813_v6 = vpack.c.bf16 %v4701_v9, %v4701_v9 }
0x16f0   : > { %10309 = vmatpush3.bf16.xpose.msra.mxu0 %v4907_v31  ;;  %10302 = vmatprep.mubr.msk.bf16.mxu1 %vm11416_vm2, %v11415_v2 }
0x16f1   : > { %10310 = vmatprep.subr.bf16.mxu0 %v11415_v2  ;;  %v4910_v34 = vsel %vm897_vm4, %v4813_v6, 0 }
0x16f2   : > { %v4763_v18 = vpop.f32.mrb[48].mxu0 }
0x16f3   : > { %v10270_v58 = vpop.f32.mrb[49].mxu0  ;;  %v4764_v16 = vadd.f32 %v8792_v25, %v4763_v18 }
0x16f4   : > { %v4766_v48 = vpop.f32.mrb[50].mxu0 }
0x16f5   : > { %v4767_v4 = vadd.f32 %v8792_v25, %v4766_v48  ;;  %v10271_v37 = vpop.f32.mrb[51].mxu0 }
0x16f7   : > { %v4814_v62 = vpack.c.bf16 %v4767_v4, %v4764_v16  ;;  %10303 = vmatmul.mubr.msk.bf16.gmra.mrb[52].mxu1 %vm897_vm4, %v4804_v30 }
0x16f8   : > { %10311 = vmatpush3.bf16.xpose.msra.mxu0 %v4910_v34  ;;  %10330 = vmatprep.mubr.msk.bf16.mxu1 %vm11416_vm2, %v11415_v2 }
0x16f9   : > { %10325 = vmatpush3.bf16.msra.mxu1 %v4814_v62  ;;  %10342 = vmatprep.subr.bf16.mxu0 %v11415_v2 }
0x16fa   : > { %v4771_v12 = vpop.f32.mrb[52].mxu0  ;;  %10326 = vmatprep.subr.bf16.mxu1 %v11415_v2 }
0x16fb   : > { %v10274_v15 = vpop.f32.mrb[53].mxu0  ;;  %v4772_v22 = vadd.f32 %v8792_v25, %v4771_v12 }
0x16fc   : > { %v4774_v8 = vpop.f32.mrb[54].mxu0 }
0x16fd   : > { %v4775_v47 = vadd.f32 %v8792_v25, %v4774_v8  ;;  %v10275_v57 = vpop.f32.mrb[55].mxu0 }
0x16ff   : > { %v4815_v63 = vpack.c.bf16 %v4775_v47, %v4772_v22  ;;  %10313 = vmatmul.mubr.msk.bf16.vlgmr.msra.gmra.mrb[68].mxu0 %vm897_vm4, %v4805_v38  ;;  %v4603_v38 = vadd.f32 %v13311_v44, %v4602_v40 }
0x1700   : > { %10316 = vmatprep.mubr.msk.bf16.mxu0 %vm11416_vm2, %v11415_v2 }
0x1701   : > { %10327 = vmatpush3.bf16.msra.mxu1 %v4815_v63  ;;  %v4807_v5 = vpack.c.bf16 %v4603_v38, %v4603_v38 }
0x1702   : > { %v4779_v50 = vpop.f32.mrb[56].mxu0  ;;  %10328 = vmatprep.subr.bf16.mxu1 %v11415_v2 }
0x1703   : > { %v4780_v7 = vadd.f32 %v8792_v25, %v4779_v50  ;;  %v10278_v28 = vpop.f32.mrb[57].mxu0 }
0x1704   : > { %v4782_v42 = vpop.f32.mrb[58].mxu0 }
0x1705   : > { %v4816_v26 = vpack.c.bf16 %v4780_v7, %v4780_v7  ;;  %v10279_v51 = vpop.f32.mrb[59].mxu0  ;;  %v4783_v54 = vadd.f32 %v8792_v25, %v4782_v42 }
0x1707   : > { %v5094_v10 = vsel %vm1172_vm5, %v4816_v26, 0  ;;  %10317 = vmatmul.mubr.msk.bf16.gmra.mrb[72].mxu0 %vm897_vm4, %v4806_v3 }
0x1708   : > { %10329 = vmatpush3.bf16.msra.mxu1 %v5094_v10  ;;  %10320 = vmatprep.mubr.msk.bf16.mxu0 %vm11416_vm2, %v11415_v2 }
0x1709   : > { %10360 = vmatprep.subr.bf16.mxu1 %v11415_v2 }
0x170a   : > { %v4787_v21 = vpop.f32.mrb[60].mxu0 }
0x170b   : > { %v4788_v56 = vadd.f32 %v8792_v25, %v4787_v21  ;;  %v10282_v29 = vpop.f32.mrb[61].mxu0 }
0x170c   : > { %v4790_v61 = vpop.f32.mrb[62].mxu0 }
0x170d   : > { %v4817_v45 = vpack.c.bf16 %v4788_v56, %v4783_v54  ;;  %v10283_v46 = vpop.f32.mrb[63].mxu0  ;;  %v4791_v44 = vadd.f32 %v8792_v25, %v4790_v61 }
0x170f   : > { %10321 = vmatmul.mubr.msk.bf16.gmra.mrb[76].mxu0 %vm897_vm4, %v4807_v5 }
0x1710   : > { %10343 = vmatpush3.bf16.msra.mxu0 %v4817_v45  ;;  %10348 = vmatprep.mubr.msk.bf16.mxu0 %vm11416_vm2, %v11415_v2 }
0x1711   : > { %10344 = vmatprep.subr.bf16.mxu0 %v11415_v2 }
0x1712   : > { %v4795_v0 = vpop.f32.mrb[64].mxu0 }
0x1713   : > { %v4796_v14 = vadd.f32 %v8792_v25, %v4795_v0  ;;  %v10286_v13 = vpop.f32.mrb[65].mxu0 }
0x1714   : > { %v4798_v52 = vpop.f32.mrb[66].mxu0 }
0x1715   : > { %v4818_v40 = vpack.c.bf16 %v4796_v14, %v4791_v44  ;;  %v4799_v19 = vadd.f32 %v8792_v25, %v4798_v52  ;;  %v10287_v3 = vpop.f32.mrb[67].mxu0 }
0x1717   : > { %v4819_v23 = vpack.c.bf16 %v4799_v19, %v4799_v19  ;;  %10345 = vmatpush3.bf16.msra.mxu0 %v4818_v40 }
0x1718   : > { %10346 = vmatprep.subr.bf16.mxu0 %v11415_v2 }
0x1719   : > { %v5162_v24 = vsel %vm1172_vm5, %v4819_v23, 0 }
0x171b   : > { %10347 = vmatpush3.bf16.msra.mxu0 %v5162_v24 }
0x171c   : > { %10382 = vmatprep.subr.bf16.mxu0 %v11415_v2 }
0x17ba   : > { %v4872_v55 = vpop.f32.mrb[44].mxu1 }
0x17bb   : > { %v10296_v9 = vpop.f32.mrb[45].mxu1  ;;  %v4968_v31 = vsel %vm1046_vm6, %v4872_v55, -inf }
0x17bc   : > { %4969 = vmax.xlane.f32.xlu0 %v4968_v31  ;;  %v4875_v39 = vpop.f32.mrb[46].mxu1 }
0x17bd   : > { %v10297_v18 = vpop.f32.mrb[47].mxu1  ;;  %v4971_v6 = vsel %vm1046_vm6, %v4875_v39, -inf }
0x17be   : > { %4972 = vmax.xlane.f32.xlu1 %v4971_v6 }
0x17c2   : > { %v4880_v25 = vpop.f32.mrb[48].mxu1 }
0x17c3   : > { %v10300_v58 = vpop.f32.mrb[49].mxu1  ;;  %v4974_v48 = vsel %vm1046_vm6, %v4880_v25, -inf }
0x17c4   : > { %4975 = vmax.xlane.f32.xlu0 %v4974_v48  ;;  %v4883_v30 = vpop.f32.mrb[50].mxu1 }
0x17c5   : > { %v10301_v16 = vpop.f32.mrb[51].mxu1  ;;  %v4977_v4 = vsel %vm1046_vm6, %v4883_v30, -inf }
0x17c6   : > { %4978 = vmax.xlane.f32.xlu1 %v4977_v4 }
0x17ca   : > { %v4888_v37 = vpop.f32.mrb[52].mxu1 }
0x17cb   : > { %v10304_v62 = vpop.f32.mrb[53].mxu1  ;;  %v4980_v34 = vsel %vm1046_vm6, %v4888_v37, -inf }
0x17cc   : > { %4981 = vmax.xlane.f32.xlu0 %v4980_v34  ;;  %v4891_v12 = vpop.f32.mrb[54].mxu1 }
0x17cd   : > { %v10305_v15 = vpop.f32.mrb[55].mxu1 }
0x17d2   : > { %v4946_v8 = vpop.f32.mrb[68].mxu0 }
0x17d3   : > { %v10314_v22 = vpop.f32.mrb[69].mxu0  ;;  %v4983_v47 = vsel %vm1046_vm6, %v4946_v8, -inf }
0x17d4   : > { %4984 = vmax.xlane.f32.xlu1 %v4983_v47  ;;  %v4949_v57 = vpop.f32.mrb[70].mxu0 }
0x17d5   : > { %v10315_v63 = vpop.f32.mrb[71].mxu0  ;;  %v4986_v50 = vsel %vm1046_vm6, %v4949_v57, -inf }
0x17d6   : > { %4987 = vmax.xlane.f32.xlu0 %v4986_v50 }
0x17da   : > { %v4954_v7 = vpop.f32.mrb[72].mxu0 }
0x17db   : > { %v10318_v28 = vpop.f32.mrb[73].mxu0  ;;  %v4989_v42 = vsel %vm1046_vm6, %v4954_v7, -inf }
0x17dc   : > { %4990 = vmax.xlane.f32.xlu1 %v4989_v42  ;;  %v4957_v26 = vpop.f32.mrb[74].mxu0 }
0x17dd   : > { %v10319_v51 = vpop.f32.mrb[75].mxu0  ;;  %v4992_v10 = vsel %vm1046_vm6, %v4957_v26, -inf }
0x17de   : > { %4993 = vmax.xlane.f32.xlu0 %v4992_v10 }
0x17e2   : > { %v13391_v38 = vpop.f32.mrb[76].mxu0 }
0x17e3   : > { %v10322_v21 = vpop.f32.mrb[77].mxu0  ;;  %v4995_v54 = vsel %vm1046_vm6, %v13391_v38, -inf }
0x17e4   : > { %4996 = vmax.xlane.f32.xlu1 %v4995_v54  ;;  %v4965_v56 = vpop.f32.mrb[78].mxu0 }
0x17e5   : > { %v10323_v29 = vpop.f32.mrb[79].mxu0 }
0x1849   : > { %v4970_v61 = vpop.xlane.xlu0 %4969 }
0x184a   : > { %v4998_v5 = vsub.f32 %v4872_v55, %v4970_v61 }
0x184b   : > { %v4973_v45 = vpop.xlane.xlu1 %4972 }
0x184c   : > { %v5008_v46 = vmul.f32 1.442695, %v4998_v5  ;;  %v4999_v0 = vsub.f32 %v4875_v39, %v4973_v45 }
0x184e   : > { %11207 = vpow2.f32 %v5008_v46  ;;  %v5010_v44 = vmul.f32 1.442695, %v4999_v0 }
0x1850   : > { %11209 = vpow2.f32 %v5010_v44 }
0x1851   : > { %v4976_v14 = vpop.xlane.xlu0 %4975 }
0x1852   : > { %v5000_v13 = vsub.f32 %v4880_v25, %v4976_v14 }
0x1853   : > { %v4979_v52 = vpop.xlane.xlu1 %4978 }
0x1854   : > { %v5012_v40 = vmul.f32 1.442695, %v5000_v13  ;;  %v5001_v19 = vsub.f32 %v4883_v30, %v4979_v52 }
0x1856   : > { %11211 = vpow2.f32 %v5012_v40  ;;  %v5014_v3 = vmul.f32 1.442695, %v5001_v19 }
0x1858   : > { %v13395_v23 = vpop.eup %11207  ;;  %11213 = vpow2.f32 %v5014_v3 }
0x1859   : > { %v4982_v24 = vpop.xlane.xlu0 %4981  ;;  %v5028_v55 = vsel %vm1046_vm6, %v13395_v23, 0.0 }
0x185a   : > { %v11210_v9 = vpop.eup %11209  ;;  %v5002_v31 = vsub.f32 %v4888_v37, %v4982_v24  ;;  %5029 = vadd.xlane.f32.xlu0 %v5028_v55 }
0x185b   : > { %v5031_v39 = vsel %vm1046_vm6, %v11210_v9, 0.0 }
0x185c   : > { %v5016_v18 = vmul.f32 1.442695, %v5002_v31  ;;  %5032 = vadd.xlane.f32.xlu1 %v5031_v39 }
0x185e   : > { %11215 = vpow2.f32 %v5016_v18 }
0x1860   : > { %v13400_v6 = vpop.eup %11211 }
0x1861   : > { %v4985_v25 = vpop.xlane.xlu1 %4984  ;;  %v5034_v58 = vsel %vm1046_vm6, %v13400_v6, 0.0 }
0x1862   : > { %v11214_v48 = vpop.eup %11213  ;;  %v5003_v30 = vsub.f32 %v4946_v8, %v4985_v25  ;;  %5035 = vadd.xlane.f32.xlu0 %v5034_v58 }
0x1863   : > { %v4988_v16 = vpop.xlane.xlu0 %4987  ;;  %v5037_v4 = vsel %vm1046_vm6, %v11214_v48, 0.0 }
0x1864   : > { %v5018_v62 = vmul.f32 1.442695, %v5003_v30  ;;  %v5004_v37 = vsub.f32 %v4949_v57, %v4988_v16  ;;  %5038 = vadd.xlane.f32.xlu1 %v5037_v4 }
0x1866   : > { %11217 = vpow2.f32 %v5018_v62  ;;  %v5020_v34 = vmul.f32 1.442695, %v5004_v37 }
0x1868   : > { %v11216_v12 = vpop.eup %11215  ;;  %11219 = vpow2.f32 %v5020_v34  ;;  %v10983_v34 = vld [vmem:[%s14808_s3 + $0xd0] sm:$0xff]  }
0x1869   : > { %v4991_v15 = vpop.xlane.xlu1 %4990  ;;  %v5040_v22 = vsel %vm1046_vm6, %v11216_v12, 0.0 }
0x186a   : > { %v5005_v47 = vsub.f32 %v4954_v7, %v4991_v15  ;;  %5041 = vadd.xlane.f32.xlu0 %v5040_v22 }
0x186b   : > { %v4994_v63 = vpop.xlane.xlu0 %4993 }
0x186c   : > { %v5022_v50 = vmul.f32 1.442695, %v5005_v47  ;;  %v5006_v28 = vsub.f32 %v4957_v26, %v4994_v63  ;;  %v10984_v47 = vld [vmem:[%s14808_s3 + $0xd8] sm:$0xff]  }
0x186e   : > { %11221 = vpow2.f32 %v5022_v50  ;;  %v5024_v8 = vmul.f32 1.442695, %v5006_v28 }
0x1870   : > { %v11218_v42 = vpop.eup %11217  ;;  %11223 = vpow2.f32 %v5024_v8 }
0x1871   : > { %v4997_v51 = vpop.xlane.xlu1 %4996  ;;  %v5043_v57 = vsel %vm1046_vm6, %v11218_v42, 0.0 }
0x1872   : > { %v11220_v10 = vpop.eup %11219  ;;  %v5007_v21 = vsub.f32 %v13391_v38, %v4997_v51  ;;  %5044 = vadd.xlane.f32.xlu1 %v5043_v57 }
0x1873   : > { %v5046_v54 = vsel %vm1046_vm6, %v11220_v10, 0.0 }
0x1874   : > { %v5026_v56 = vmul.f32 1.442695, %v5007_v21  ;;  %5047 = vadd.xlane.f32.xlu0 %v5046_v54  ;;  %v10986_v21 = vld [vmem:[%s14808_s3 + $0x158] sm:$0xff]   ;;  %v8812_v54 = vld [vmem:[%s14810_s5 + $0x10] sm:$0xf] }
0x1876   : > { %11225 = vpow2.f32 %v5026_v56  ;;  %v5243_v56 = vsel %vm1172_vm5, %v8812_v54, 0 }
0x1878   : > { %v11222_v7 = vpop.eup %11221 }
0x1879   : > { %v5049_v29 = vsel %vm1046_vm6, %v11222_v7, 0.0 }
0x187a   : > { %v11224_v26 = vpop.eup %11223  ;;  %5050 = vadd.xlane.f32.xlu1 %v5049_v29 }
0x187b   : > { %v5052_v61 = vsel %vm1046_vm6, %v11224_v26, 0.0 }
0x187c   : > { %5053 = vadd.xlane.f32.xlu0 %v5052_v61  ;;  %v10987_v61 = vld [vmem:[%s14808_s3 + $0x110] sm:$0xff]  }
0x1880   : > { %v13411_v5 = vpop.eup %11225 }
0x1881   : > { %v5055_v45 = vsel %vm1046_vm6, %v13411_v5, 0.0 }
0x1882   : > { %5056 = vadd.xlane.f32.xlu1 %v5055_v45 }
0x18e7   : > { %v5030_v38 = vpop.xlane.xlu0 %5029 }
0x18e8   : > { %11227 = vrcp.f32 %v5030_v38  ;;  %v10988_v38 = vld [vmem:[%s14808_s3 + $0x118] sm:$0xff]  }
0x18e9   : > { %v5033_v46 = vpop.xlane.xlu1 %5032 }
0x18ea   : > { %11229 = vrcp.f32 %v5033_v46 }
0x18ef   : > { %v5036_v0 = vpop.xlane.xlu0 %5035 }
0x18f0   : > { %11231 = vrcp.f32 %v5036_v0 }
0x18f1   : > { %v5039_v44 = vpop.xlane.xlu1 %5038 }
0x18f2   : > { %v11228_v14 = vpop.eup %11227  ;;  %11233 = vrcp.f32 %v5039_v44 }
0x18f3   : > { %v5059_v52 = vmul.f32 %v11228_v14, %v13395_v23 }
0x18f4   : > { %v11230_v13 = vpop.eup %11229 }
0x18f5   : > { %v5061_v40 = vmul.f32 %v11230_v13, %v11210_v9 }
0x18f7   : > { %v5078_v19 = vpack.c.bf16 %v5061_v40, %v5059_v52  ;;  %v5042_v3 = vpop.xlane.xlu0 %5041 }
0x18f8   : > { %11235 = vrcp.f32 %v5042_v3 }
0x18f9   : > { %10331 = vmatmul.mubr.msk.bf16.vlgmr.msra.gmra.mrb[56].mxu1 %vm1046_vm6, %v5078_v19 }
0x18fa   : > { %v11232_v24 = vpop.eup %11231  ;;  %10334 = vmatprep.mubr.msk.bf16.mxu1 %vm11416_vm2, %v11415_v2  ;;  %10361 = vmatpush3.bf16.msra.mxu1 %v5243_v56 }
0x18fb   : > { %v5063_v31 = vmul.f32 %v11232_v24, %v13400_v6  ;;  %10406 = vmatprep.subr.bf16.mxu1 %v11415_v2 }
0x18fc   : > { %v11234_v55 = vpop.eup %11233 }
0x18fd   : > { %v5065_v39 = vmul.f32 %v11234_v55, %v11214_v48 }
0x18ff   : > { %v5079_v18 = vpack.c.bf16 %v5065_v39, %v5063_v31  ;;  %v5045_v25 = vpop.xlane.xlu1 %5044 }
0x1900   : > { %11237 = vrcp.f32 %v5045_v25 }
0x1901   : > { %v5048_v58 = vpop.xlane.xlu0 %5047  ;;  %10335 = vmatmul.mubr.msk.bf16.gmra.mrb[60].mxu1 %vm1046_vm6, %v5079_v18 }
0x1902   : > { %v11236_v23 = vpop.eup %11235  ;;  %11239 = vrcp.f32 %v5048_v58  ;;  %10338 = vmatprep.mubr.msk.bf16.mxu1 %vm11416_vm2, %v11415_v2 }
0x1903   : > { %v5067_v9 = vmul.f32 %v11236_v23, %v11216_v12 }
0x1905   : > { %v5080_v30 = vpack.c.bf16 %v5067_v9, %v5067_v9 }
0x1907   : > { %v5051_v16 = vpop.xlane.xlu1 %5050 }
0x1908   : > { %11241 = vrcp.f32 %v5051_v16 }
0x1909   : > { %v5054_v4 = vpop.xlane.xlu0 %5053  ;;  %10339 = vmatmul.mubr.msk.bf16.gmra.mrb[64].mxu1 %vm1046_vm6, %v5080_v30 }
0x190a   : > { %v11238_v6 = vpop.eup %11237  ;;  %11243 = vrcp.f32 %v5054_v4  ;;  %10362 = vmatprep.mubr.msk.bf16.mxu1 %vm11416_vm2, %v11415_v2 }
0x190b   : > { %v5069_v62 = vmul.f32 %v11238_v6, %v11218_v42 }
0x190c   : > { %v11240_v48 = vpop.eup %11239 }
0x190d   : > { %v5071_v37 = vmul.f32 %v11240_v48, %v11220_v10  ;;  %v10985_v10 = vld [vmem:[%s14808_s3 + $0x150] sm:$0xff]  }
0x190f   : > { %v5081_v15 = vpack.c.bf16 %v5071_v37, %v5069_v62  ;;  %v5057_v12 = vpop.xlane.xlu1 %5056  ;;  %v13523_v37 = vld [vmem:[%s14809_s4 + $0xd] ss:$0 sm:$0xff] }
0x1910   : > { %11245 = vrcp.f32 %v5057_v12 }
0x1911   : > { %10349 = vmatmul.mubr.msk.bf16.vlgmr.msra.gmra.mrb[80].mxu0 %vm1046_vm6, %v5081_v15 }
0x1912   : > { %v11242_v22 = vpop.eup %11241  ;;  %10352 = vmatprep.mubr.msk.bf16.mxu0 %vm11416_vm2, %v11415_v2  ;;  %10383 = vmatpush3.bf16.msra.mxu0 %v10983_v34 }
0x1913   : > { %10384 = vmatprep.subr.bf16.mxu0 %v11415_v2  ;;  %v5073_v50 = vmul.f32 %v11242_v22, %v11222_v7 }
0x1914   : > { %v11244_v63 = vpop.eup %11243 }
0x1915   : > { %v5075_v28 = vmul.f32 %v11244_v63, %v11224_v26 }
0x1916   : > { %10385 = vmatpush3.bf16.msra.mxu0 %v10984_v47 }
0x1917   : > { %v5082_v8 = vpack.c.bf16 %v5075_v28, %v5073_v50  ;;  %10430 = vmatprep.subr.bf16.mxu0 %v11415_v2 }
0x1919   : > { %10353 = vmatmul.mubr.msk.bf16.gmra.mrb[84].mxu0 %vm1046_vm6, %v5082_v8 }
0x191a   : > { %v11246_v42 = vpop.eup %11245  ;;  %10356 = vmatprep.mubr.msk.bf16.mxu0 %vm11416_vm2, %v11415_v2 }
0x191b   : > { %v5077_v51 = vmul.f32 %v11246_v42, %v13411_v5 }
0x191d   : > { %v5083_v57 = vpack.c.bf16 %v5077_v51, %v5077_v51 }
0x1921   : > { %10357 = vmatmul.mubr.msk.bf16.gmra.mrb[88].mxu0 %vm1046_vm6, %v5083_v57 }
0x1922   : > { %10386 = vmatprep.mubr.msk.bf16.mxu0 %vm11416_vm2, %v11415_v2 }
0x1929   : > { %10387 = vmatmul.mubr.msk.bf16.vlgmr.msra.gmra.mrb[92].mxu0 %vm594_vm3, %v13182_v59 }
0x192a   : > { %10390 = vmatprep.mubr.msk.bf16.mxu0 %vm11416_vm2, %v11415_v2  ;;  %10431 = vmatpush3.bf16.msra.mxu0 %v10985_v10 }
0x192b   : > { %10432 = vmatprep.subr.bf16.mxu0 %v11415_v2 }
0x192e   : > { %10433 = vmatpush3.bf16.msra.mxu0 %v10986_v21 }
0x192f   : > { %10472 = vmatprep.subr.bf16.mxu0 %v11415_v2 }
0x1931   : > { %10391 = vmatmul.mubr.msk.bf16.gmra.mrb[96].mxu0 %vm594_vm3, %v13211_v17 }
0x1932   : > { %10394 = vmatprep.mubr.msk.bf16.mxu0 %vm11416_vm2, %v11415_v2 }
0x1939   : > { %10395 = vmatmul.mubr.msk.bf16.gmra.mrb[100].mxu0 %vm594_vm3, %v13234_v36 }
0x193a   : > { %10398 = vmatprep.mubr.msk.bf16.mxu0 %vm11416_vm2, %v11415_v2 }
0x1941   : > { %10399 = vmatmul.mubr.msk.bf16.gmra.mrb[104].mxu0 %vm594_vm3, %v13256_v43 }
0x1942   : > { %10402 = vmatprep.mubr.msk.bf16.mxu0 %vm11416_vm2, %v11415_v2 }
0x1949   : > { %10403 = vmatmul.mubr.msk.bf16.gmra.mrb[108].mxu0 %vm594_vm3, %v13278_v27 }
0x194a   : > { %10434 = vmatprep.mubr.msk.bf16.mxu0 %vm11416_vm2, %v11415_v2 }
0x1951   : > { %10435 = vmatmul.mubr.msk.bf16.vlgmr.msra.gmra.mrb[112].mxu0 %vm594_vm3, %v13182_v59 }
0x1952   : > { %10438 = vmatprep.mubr.msk.bf16.mxu0 %vm11416_vm2, %v11415_v2 }
0x1959   : > { %10439 = vmatmul.mubr.msk.bf16.gmra.mrb[116].mxu0 %vm594_vm3, %v13211_v17 }
0x195a   : > { %10442 = vmatprep.mubr.msk.bf16.mxu0 %vm11416_vm2, %v11415_v2 }
0x1961   : > { %10443 = vmatmul.mubr.msk.bf16.gmra.mrb[120].mxu0 %vm594_vm3, %v13234_v36 }
0x1962   : > { %10446 = vmatprep.mubr.msk.bf16.mxu0 %vm11416_vm2, %v11415_v2 }
0x1969   : > { %10447 = vmatmul.mubr.msk.bf16.gmra.mrb[124].mxu0 %vm594_vm3, %v13256_v43 }
0x196a   : > { %10450 = vmatprep.mubr.msk.bf16.mxu0 %vm11416_vm2, %v11415_v2 }
0x1971   : > { %10451 = vmatmul.mubr.msk.bf16.gmra.mrb[128].mxu0 %vm594_vm3, %v13278_v27 }
0x1972   : > { %10478 = vmatprep.mubr.msk.bf16.mxu0 %vm11416_vm2, %v11415_v2 }
0x19cc   : > { %v5130_v7 = vpop.f32.mrb[56].mxu1 }
0x19cd   : > { %v10332_v29 = vpop.f32.mrb[57].mxu1 }
0x19ce   : > { %v5133_v26 = vpop.f32.mrb[58].mxu1 }
0x19cf   : > { %v5220_v5 = vpack.c.bf16 %v5133_v26, %v5130_v7  ;;  %v10333_v45 = vpop.f32.mrb[59].mxu1 }
0x19d1   : > { %10363 = vmatmul.mubr.msk.bf16.vlgmr.msra.gmra.mrb[68].mxu1 %vm897_vm4, %v5220_v5 }
0x19d2   : > { %10366 = vmatprep.mubr.msk.bf16.mxu1 %vm11416_vm2, %v11415_v2  ;;  %10407 = vmatpush3.bf16.msra.mxu1 %v10987_v61 }
0x19d3   : > { %10408 = vmatprep.subr.bf16.mxu1 %v11415_v2 }
0x19d4   : > { %v5138_v46 = vpop.f32.mrb[60].mxu1 }
0x19d5   : > { %v10336_v0 = vpop.f32.mrb[61].mxu1 }
0x19d6   : > { %v5141_v44 = vpop.f32.mrb[62].mxu1  ;;  %10409 = vmatpush3.bf16.msra.mxu1 %v10988_v38 }
0x19d7   : > { %v5221_v14 = vpack.c.bf16 %v5141_v44, %v5138_v46  ;;  %v10337_v13 = vpop.f32.mrb[63].mxu1  ;;  %10454 = vmatprep.subr.bf16.mxu1 %v11415_v2 }
0x19d9   : > { %10367 = vmatmul.mubr.msk.bf16.gmra.mrb[72].mxu1 %vm897_vm4, %v5221_v14 }
0x19da   : > { %10370 = vmatprep.mubr.msk.bf16.mxu1 %vm11416_vm2, %v11415_v2 }
0x19dc   : > { %v5146_v52 = vpop.f32.mrb[64].mxu1 }
0x19dd   : > { %v10340_v40 = vpop.f32.mrb[65].mxu1 }
0x19de   : > { %v5149_v19 = vpop.f32.mrb[66].mxu1 }
0x19df   : > { %v10341_v3 = vpop.f32.mrb[67].mxu1 }
0x19e4   : > { %v5198_v24 = vpop.f32.mrb[80].mxu0 }
0x19e5   : > { %v5222_v55 = vpack.c.bf16 %v5198_v24, %v5146_v52  ;;  %v10350_v31 = vpop.f32.mrb[81].mxu0  ;;  %v13584_v24 = vld [vmem:[%s14809_s4 + $0x15] ss:$0 sm:$0xff] }
0x19e6   : > { %v5201_v39 = vpop.f32.mrb[82].mxu0 }
0x19e7   : > { %v10351_v18 = vpop.f32.mrb[83].mxu0  ;;  %10371 = vmatmul.mubr.msk.bf16.gmra.mrb[76].mxu1 %vm897_vm4, %v5222_v55 }
0x19e8   : > { %10374 = vmatprep.mubr.msk.bf16.mxu1 %vm11416_vm2, %v11415_v2 }
0x19ec   : > { %v5206_v25 = vpop.f32.mrb[84].mxu0 }
0x19ed   : > { %v5223_v58 = vpack.c.bf16 %v5206_v25, %v5201_v39  ;;  %v10354_v23 = vpop.f32.mrb[85].mxu0 }
0x19ee   : > { %v5209_v9 = vpop.f32.mrb[86].mxu0 }
0x19ef   : > { %v10355_v30 = vpop.f32.mrb[87].mxu0  ;;  %10375 = vmatmul.mubr.msk.bf16.gmra.mrb[80].mxu1 %vm897_vm4, %v5223_v58 }
0x19f0   : > { %10378 = vmatprep.mubr.msk.bf16.mxu1 %vm11416_vm2, %v11415_v2 }
0x19f4   : > { %v5214_v16 = vpop.f32.mrb[88].mxu0 }
0x19f5   : > { %v5224_v4 = vpack.c.bf16 %v5214_v16, %v5209_v9  ;;  %v10358_v6 = vpop.f32.mrb[89].mxu0 }
0x19f6   : > { %v5217_v48 = vpop.f32.mrb[90].mxu0 }
0x19f7   : > { %v10359_v62 = vpop.f32.mrb[91].mxu0  ;;  %10379 = vmatmul.mubr.msk.bf16.gmra.mrb[84].mxu1 %vm897_vm4, %v5224_v4 }
0x19f8   : > { %10410 = vmatprep.mubr.msk.bf16.mxu1 %vm11416_vm2, %v11415_v2 }
0x19fc   : > { %v5393_v34 = vpop.f32.mrb[92].mxu0 }
0x19fd   : > { %v10388_v15 = vpop.f32.mrb[93].mxu0  ;;  %v13526_v22 = vadd.f32 %v13523_v37, %v5393_v34 }
0x19fe   : > { %v5396_v12 = vpop.f32.mrb[94].mxu0 }
0x19ff   : > { %v13529_v47 = vadd.f32 %v13523_v37, %v5396_v12  ;;  %v10389_v63 = vpop.f32.mrb[95].mxu0  ;;  %10411 = vmatmul.mubr.msk.bf16.vlgmr.msra.gmra.mrb[88].mxu1 %vm594_vm3, %v13182_v59 }
0x1a00   : > { %10414 = vmatprep.mubr.msk.bf16.mxu1 %vm11416_vm2, %v11415_v2 }
0x1a04   : > { %v5401_v28 = vpop.f32.mrb[96].mxu0 }
0x1a05   : > { %v10392_v8 = vpop.f32.mrb[97].mxu0  ;;  %v13538_v51 = vadd.f32 %v13523_v37, %v5401_v28 }
0x1a06   : > { %v5404_v42 = vpop.f32.mrb[98].mxu0 }
0x1a07   : > { %v13541_v57 = vadd.f32 %v13523_v37, %v5404_v42  ;;  %v10393_v10 = vpop.f32.mrb[99].mxu0  ;;  %10415 = vmatmul.mubr.msk.bf16.gmra.mrb[92].mxu1 %vm594_vm3, %v13211_v17 }
0x1a08   : > { %10418 = vmatprep.mubr.msk.bf16.mxu1 %vm11416_vm2, %v11415_v2 }
0x1a0c   : > { %v13549_v54 = vpop.f32.mrb[100].mxu0 }
0x1a0d   : > { %v10396_v56 = vpop.f32.mrb[101].mxu0 }
0x1a0e   : > { %v5412_v7 = vpop.f32.mrb[102].mxu0 }
0x1a0f   : > { %v10397_v29 = vpop.f32.mrb[103].mxu0  ;;  %10419 = vmatmul.mubr.msk.bf16.gmra.mrb[96].mxu1 %vm594_vm3, %v13234_v36  ;;  %v13556_v61 = vadd.f32 %v13523_v37, %v5412_v7 }
0x1a10   : > { %10422 = vmatprep.mubr.msk.bf16.mxu1 %vm11416_vm2, %v11415_v2 }
0x1a14   : > { %v5417_v26 = vpop.f32.mrb[104].mxu0 }
0x1a15   : > { %v13559_v5 = vadd.f32 %v13523_v37, %v5417_v26  ;;  %v10400_v45 = vpop.f32.mrb[105].mxu0 }
0x1a16   : > { %v5420_v38 = vpop.f32.mrb[106].mxu0 }
0x1a17   : > { %v10401_v0 = vpop.f32.mrb[107].mxu0  ;;  %10423 = vmatmul.mubr.msk.bf16.gmra.mrb[100].mxu1 %vm594_vm3, %v13256_v43  ;;  %v13568_v14 = vadd.f32 %v13523_v37, %v5420_v38 }
0x1a18   : > { %10426 = vmatprep.mubr.msk.bf16.mxu1 %vm11416_vm2, %v11415_v2 }
0x1a1c   : > { %v5425_v44 = vpop.f32.mrb[108].mxu0 }
0x1a1d   : > { %v13571_v13 = vadd.f32 %v13523_v37, %v5425_v44  ;;  %v10404_v52 = vpop.f32.mrb[109].mxu0 }
0x1a1e   : > { %v13573_v40 = vpop.f32.mrb[110].mxu0 }
0x1a1f   : > { %v10405_v3 = vpop.f32.mrb[111].mxu0  ;;  %10427 = vmatmul.mubr.msk.bf16.gmra.mrb[104].mxu1 %vm594_vm3, %v13278_v27 }
0x1a20   : > { %10460 = vmatprep.mubr.msk.bf16.mxu1 %vm11416_vm2, %v11415_v2 }
0x1a24   : > { %v5589_v55 = vpop.f32.mrb[112].mxu0 }
0x1a25   : > { %v10436_v31 = vpop.f32.mrb[113].mxu0  ;;  %v13587_v18 = vadd.f32 %v13584_v24, %v5589_v55 }
0x1a26   : > { %v5592_v39 = vpop.f32.mrb[114].mxu0 }
0x1a27   : > { %v13590_v25 = vadd.f32 %v13584_v24, %v5592_v39  ;;  %v10437_v58 = vpop.f32.mrb[115].mxu0 }
0x1a2c   : > { %v5597_v9 = vpop.f32.mrb[116].mxu0 }
0x1a2d   : > { %v10440_v30 = vpop.f32.mrb[117].mxu0  ;;  %v13595_v4 = vadd.f32 %v13584_v24, %v5597_v9 }
0x1a2e   : > { %v5600_v16 = vpop.f32.mrb[118].mxu0 }
0x1a2f   : > { %v13598_v6 = vadd.f32 %v13584_v24, %v5600_v16  ;;  %v10441_v48 = vpop.f32.mrb[119].mxu0 }
0x1a34   : > { %v13602_v34 = vpop.f32.mrb[120].mxu0 }
0x1a35   : > { %v10444_v15 = vpop.f32.mrb[121].mxu0 }
0x1a36   : > { %v5608_v12 = vpop.f32.mrb[122].mxu0 }
0x1a37   : > { %v10445_v63 = vpop.f32.mrb[123].mxu0  ;;  %v13605_v8 = vadd.f32 %v13584_v24, %v5608_v12 }
0x1a3c   : > { %v5613_v28 = vpop.f32.mrb[124].mxu0 }
0x1a3d   : > { %v13608_v42 = vadd.f32 %v13584_v24, %v5613_v28  ;;  %v10448_v10 = vpop.f32.mrb[125].mxu0 }
0x1a3e   : > { %v5616_v56 = vpop.f32.mrb[126].mxu0 }
0x1a3f   : > { %v10449_v29 = vpop.f32.mrb[127].mxu0  ;;  %v13613_v45 = vadd.f32 %v13584_v24, %v5616_v56 }
0x1a44   : > { %v5621_v26 = vpop.f32.mrb[128].mxu0 }
0x1a45   : > { %v13616_v38 = vadd.f32 %v13584_v24, %v5621_v26  ;;  %v10452_v0 = vpop.f32.mrb[129].mxu0 }
0x1a46   : > { %v13618_v44 = vpop.f32.mrb[130].mxu0 }
0x1a47   : > { %v10453_v3 = vpop.f32.mrb[131].mxu0 }
0x1aa4   : > { %v13622_v55 = vpop.f32.mrb[68].mxu1 }
0x1aa5   : > { %v10364_v31 = vpop.f32.mrb[69].mxu1 }
0x1aa6   : > { %v13624_v39 = vpop.f32.mrb[70].mxu1 }
0x1aa7   : > { %v10365_v58 = vpop.f32.mrb[71].mxu1 }
0x1aac   : > { %v13626_v9 = vpop.f32.mrb[72].mxu1 }
0x1aad   : > { %v10368_v30 = vpop.f32.mrb[73].mxu1 }
0x1aae   : > { %v13628_v16 = vpop.f32.mrb[74].mxu1  ;;  %v8837_v30 = vld [vmem:[%s14809_s4 + $0x11] ss:$0 sm:$0xff] }
0x1aaf   : > { %v10369_v48 = vpop.f32.mrb[75].mxu1 }
0x1aba   : > { %v13630_v15 = vpop.f32.mrb[76].mxu1 }
0x1abb   : > { %v10372_v12 = vpop.f32.mrb[77].mxu1 }
0x1abc   : > { %v13632_v63 = vpop.f32.mrb[78].mxu1 }
0x1abd   : > { %v10373_v28 = vpop.f32.mrb[79].mxu1 }
0x1ac2   : > { %v13634_v10 = vpop.f32.mrb[80].mxu1 }
0x1ac3   : > { %v10376_v56 = vpop.f32.mrb[81].mxu1 }
0x1ac4   : > { %v13636_v29 = vpop.f32.mrb[82].mxu1 }
0x1ac5   : > { %v10377_v26 = vpop.f32.mrb[83].mxu1 }
0x1aca   : > { %v13638_v0 = vpop.f32.mrb[84].mxu1 }
0x1acb   : > { %v10380_v3 = vpop.f32.mrb[85].mxu1 }
0x1acc   : > { %v13640_v31 = vpop.f32.mrb[86].mxu1 }
0x1acd   : > { %v10381_v58 = vpop.f32.mrb[87].mxu1 }
0x1ad2   : > { %v5491_v48 = vpop.f32.mrb[88].mxu1 }
0x1ad3   : > { %v10412_v12 = vpop.f32.mrb[89].mxu1  ;;  %v5492_v28 = vadd.f32 %v8837_v30, %v5491_v48 }
0x1ad4   : > { %v5494_v19 = vpop.f32.mrb[90].mxu1 }
0x1ad5   : > { %v5495_v52 = vadd.f32 %v8837_v30, %v5494_v19  ;;  %v10413_v7 = vpop.f32.mrb[91].mxu1 }
0x1ad7   : > { %v5634_v56 = vpack.c.bf16 %v5495_v52, %v5492_v28 }
0x1ad9   : > { %v5656_v46 = vsel %vm897_vm4, %v5634_v56, 0 }
0x1ada   : > { %v5499_v26 = vpop.f32.mrb[92].mxu1  ;;  %10455 = vmatpush3.bf16.xpose.msra.mxu1 %v5656_v46 }
0x1adb   : > { %v10416_v21 = vpop.f32.mrb[93].mxu1  ;;  %10456 = vmatprep.subr.bf16.mxu1 %v11415_v2  ;;  %v5500_v58 = vadd.f32 %v8837_v30, %v5499_v26 }
0x1adc   : > { %v5502_v3 = vpop.f32.mrb[94].mxu1 }
0x1add   : > { %v5503_v62 = vadd.f32 %v8837_v30, %v5502_v3  ;;  %v10417_v23 = vpop.f32.mrb[95].mxu1 }
0x1adf   : > { %v5635_v50 = vpack.c.bf16 %v5503_v62, %v5500_v58  ;;  %v5606_v58 = vadd.f32 %v13584_v24, %v13602_v34 }
0x1ae1   : > { %v5659_v41 = vsel %vm897_vm4, %v5635_v50, 0 }
0x1ae2   : > { %v5507_v12 = vpop.f32.mrb[96].mxu1  ;;  %10457 = vmatpush3.bf16.xpose.msra.mxu1 %v5659_v41 }
0x1ae3   : > { %v5508_v48 = vadd.f32 %v8837_v30, %v5507_v12  ;;  %v10420_v19 = vpop.f32.mrb[97].mxu1  ;;  %10458 = vmatprep.subr.bf16.mxu1 %v11415_v2  ;;  %v14840_v12 = vpack.c.bf16 %v13529_v47, %v13526_v22 }
0x1ae4   : > { %v5510_v7 = vpop.f32.mrb[98].mxu1  ;;  %v14841_v19 = vpack.c.bf16 %v13590_v25, %v13587_v18 }
0x1ae5   : > { %v5636_v52 = vpack.c.bf16 %v5508_v48, %v5508_v48  ;;  %v10421_v28 = vpop.f32.mrb[99].mxu1  ;;  %v5511_v56 = vadd.f32 %v8837_v30, %v5510_v7 }
0x1ae7   : > { %v5662_v21 = vsel %vm897_vm4, %v5636_v52, 0 }
0x1aea   : > { %v5515_v46 = vpop.f32.mrb[100].mxu1  ;;  %10459 = vmatpush3.bf16.xpose.msra.mxu1 %v5662_v21  ;;  %v5642_v21 = vpack.c.bf16 %v5606_v58, %v5606_v58 }
0x1aeb   : > { %v5516_v26 = vadd.f32 %v8837_v30, %v5515_v46  ;;  %v10424_v3 = vpop.f32.mrb[101].mxu1  ;;  %10490 = vmatprep.subr.bf16.mxu1 %v11415_v2  ;;  %v14842_v46 = vpack.c.bf16 %v13598_v6, %v13595_v4  ;;  %v5410_v4 = vadd.f32 %v13523_v37, %v13549_v54  ;;  %v14845_v54 = vpack.c.bf16 %v13608_v42, %v13605_v8 }
0x1aec   : > { %v5518_v23 = vpop.f32.mrb[102].mxu1  ;;  %v5920_v25 = vsel %vm1172_vm5, %v5642_v21, 0 }
0x1aed   : > { %v5637_v50 = vpack.c.bf16 %v5516_v26, %v5511_v56  ;;  %v10425_v62 = vpop.f32.mrb[103].mxu1  ;;  %v5519_v7 = vadd.f32 %v8837_v30, %v5518_v23  ;;  %v14843_v26 = vpack.c.bf16 %v13541_v57, %v13538_v51  ;;  %v5625_v51 = vadd.f32 %v13584_v24, %v13618_v44 }
0x1aee   : > { %v14844_v57 = vpack.c.bf16 %v13559_v5, %v13556_v61  ;;  %v14847_v5 = vpack.c.bf16 %v13571_v13, %v13568_v14  ;;  %v5429_v24 = vadd.f32 %v13523_v37, %v13573_v40 }
0x1aef   : > { %v5730_v41 = vsel %vm897_vm4, %v5637_v50, 0  ;;  %v5645_v23 = vpack.c.bf16 %v5625_v51, %v5625_v51  ;;  %v14846_v50 = vpack.c.bf16 %v13616_v38, %v13613_v45 }
0x1af0   : > { %10473 = vmatpush3.bf16.xpose.msra.mxu0 %v5730_v41  ;;  %v5633_v8 = vpack.c.bf16 %v5429_v24, %v5429_v24 }
0x1af1   : > { %10461 = vmatmul.mubr.msk.bf16.vlgmr.msra.gmra.mrb[108].mxu1 %vm897_vm4, %v14840_v12  ;;  %10474 = vmatprep.subr.bf16.mxu0 %v11415_v2  ;;  %v5988_v61 = vsel %vm1172_vm5, %v5645_v23, 0 }
0x1af2   : > { %v5523_v48 = vpop.f32.mrb[104].mxu1  ;;  %10491 = vmatpush3.bf16.msra.mxu1 %v14841_v19  ;;  %10464 = vmatprep.mubr.msk.bf16.mxu1 %vm11416_vm2, %v11415_v2 }
0x1af3   : > { %v5524_v52 = vadd.f32 %v8837_v30, %v5523_v48  ;;  %v10428_v28 = vpop.f32.mrb[105].mxu1  ;;  %10492 = vmatprep.subr.bf16.mxu1 %v11415_v2 }
0x1af4   : > { %v5526_v34 = vpop.f32.mrb[106].mxu1 }
0x1af5   : > { %v5638_v22 = vpack.c.bf16 %v5524_v52, %v5519_v7  ;;  %v10429_v47 = vpop.f32.mrb[107].mxu1  ;;  %v5527_v56 = vadd.f32 %v8837_v30, %v5526_v34  ;;  %v5630_v30 = vpack.c.bf16 %v5410_v4, %v5410_v4 }
0x1af6   : > { %10493 = vmatpush3.bf16.msra.mxu1 %v14842_v46 }
0x1af7   : > { %v5733_v18 = vsel %vm897_vm4, %v5638_v22, 0  ;;  %10494 = vmatprep.subr.bf16.mxu1 %v11415_v2  ;;  %v5639_v6 = vpack.c.bf16 %v5527_v56, %v5527_v56 }
0x1af8   : > { %10475 = vmatpush3.bf16.xpose.msra.mxu0 %v5733_v18 }
0x1af9   : > { %10465 = vmatmul.mubr.msk.bf16.gmra.mrb[112].mxu1 %vm897_vm4, %v14843_v26  ;;  %10476 = vmatprep.subr.bf16.mxu0 %v11415_v2  ;;  %v5736_v3 = vsel %vm897_vm4, %v5639_v6, 0 }
0x1afa   : > { %10495 = vmatpush3.bf16.msra.mxu1 %v5920_v25  ;;  %10468 = vmatprep.mubr.msk.bf16.mxu1 %vm11416_vm2, %v11415_v2 }
0x1afb   : > { %10526 = vmatprep.subr.bf16.mxu1 %v11415_v2 }
0x1b00   : > { %10477 = vmatpush3.bf16.xpose.msra.mxu0 %v5736_v3 }
0x1b01   : > { %10469 = vmatmul.mubr.msk.bf16.gmra.mrb[116].mxu1 %vm897_vm4, %v5630_v30  ;;  %10508 = vmatprep.subr.bf16.mxu0 %v11415_v2 }
0x1b02   : > { %10496 = vmatprep.mubr.msk.bf16.mxu1 %vm11416_vm2, %v11415_v2 }
0x1b07   : > { %10479 = vmatmul.mubr.msk.bf16.vlgmr.msra.gmra.mrb[132].mxu0 %vm897_vm4, %v14844_v57 }
0x1b08   : > { %10509 = vmatpush3.bf16.msra.mxu0 %v14845_v54  ;;  %10482 = vmatprep.mubr.msk.bf16.mxu0 %vm11416_vm2, %v11415_v2 }
0x1b09   : > { %10510 = vmatprep.subr.bf16.mxu0 %v11415_v2 }
0x1b0c   : > { %10511 = vmatpush3.bf16.msra.mxu0 %v14846_v50 }
0x1b0d   : > { %10512 = vmatprep.subr.bf16.mxu0 %v11415_v2 }
0x1b0f   : > { %10483 = vmatmul.mubr.msk.bf16.gmra.mrb[136].mxu0 %vm897_vm4, %v14847_v5 }
0x1b10   : > { %10513 = vmatpush3.bf16.msra.mxu0 %v5988_v61  ;;  %10486 = vmatprep.mubr.msk.bf16.mxu0 %vm11416_vm2, %v11415_v2 }
0x1b11   : > { %10548 = vmatprep.subr.bf16.mxu0 %v11415_v2 }
0x1b17   : > { %10487 = vmatmul.mubr.msk.bf16.gmra.mrb[140].mxu0 %vm897_vm4, %v5633_v8 }
0x1b18   : > { %10514 = vmatprep.mubr.msk.bf16.mxu0 %vm11416_vm2, %v11415_v2 }
0x1bc4   : > { %v5698_v42 = vpop.f32.mrb[108].mxu1 }
0x1bc5   : > { %v10462_v45 = vpop.f32.mrb[109].mxu1  ;;  %v5794_v14 = vsel %vm1046_vm6, %v5698_v42, -inf }
0x1bc6   : > { %5795 = vmax.xlane.f32.xlu0 %v5794_v14  ;;  %v5701_v13 = vpop.f32.mrb[110].mxu1 }
0x1bc7   : > { %v10463_v38 = vpop.f32.mrb[111].mxu1  ;;  %v5797_v44 = vsel %vm1046_vm6, %v5701_v13, -inf }
0x1bc8   : > { %5798 = vmax.xlane.f32.xlu1 %v5797_v44 }
0x1bcc   : > { %v5706_v62 = vpop.f32.mrb[112].mxu1 }
0x1bcd   : > { %v10466_v37 = vpop.f32.mrb[113].mxu1  ;;  %v5800_v40 = vsel %vm1046_vm6, %v5706_v62, -inf }
0x1bce   : > { %5801 = vmax.xlane.f32.xlu0 %v5800_v40  ;;  %v5709_v41 = vpop.f32.mrb[114].mxu1 }
0x1bcf   : > { %v10467_v58 = vpop.f32.mrb[115].mxu1  ;;  %v5803_v12 = vsel %vm1046_vm6, %v5709_v41, -inf }
0x1bd0   : > { %5804 = vmax.xlane.f32.xlu1 %v5803_v12 }
0x1bd4   : > { %v5714_v48 = vpop.f32.mrb[116].mxu1 }
0x1bd5   : > { %v10470_v19 = vpop.f32.mrb[117].mxu1  ;;  %v5806_v7 = vsel %vm1046_vm6, %v5714_v48, -inf }
0x1bd6   : > { %5807 = vmax.xlane.f32.xlu0 %v5806_v7  ;;  %v5717_v52 = vpop.f32.mrb[118].mxu1 }
0x1bd7   : > { %v10471_v28 = vpop.f32.mrb[119].mxu1 }
0x1bda   : > { %v5772_v34 = vpop.f32.mrb[132].mxu0 }
0x1bdb   : > { %v10480_v21 = vpop.f32.mrb[133].mxu0  ;;  %v5809_v22 = vsel %vm1046_vm6, %v5772_v34, -inf }
0x1bdc   : > { %5810 = vmax.xlane.f32.xlu1 %v5809_v22  ;;  %v5775_v47 = vpop.f32.mrb[134].mxu0 }
0x1bdd   : > { %v10481_v46 = vpop.f32.mrb[135].mxu0  ;;  %v5812_v56 = vsel %vm1046_vm6, %v5775_v47, -inf }
0x1bde   : > { %5813 = vmax.xlane.f32.xlu0 %v5812_v56 }
0x1be2   : > { %v5780_v18 = vpop.f32.mrb[136].mxu0 }
0x1be3   : > { %v10484_v25 = vpop.f32.mrb[137].mxu0  ;;  %v5815_v26 = vsel %vm1046_vm6, %v5780_v18, -inf }
0x1be4   : > { %5816 = vmax.xlane.f32.xlu1 %v5815_v26  ;;  %v5783_v4 = vpop.f32.mrb[138].mxu0 }
0x1be5   : > { %v10485_v6 = vpop.f32.mrb[139].mxu0  ;;  %v5818_v30 = vsel %vm1046_vm6, %v5783_v4, -inf }
0x1be6   : > { %5819 = vmax.xlane.f32.xlu0 %v5818_v30 }
0x1bea   : > { %v13724_v3 = vpop.f32.mrb[140].mxu0 }
0x1beb   : > { %v10488_v51 = vpop.f32.mrb[141].mxu0  ;;  %v5821_v57 = vsel %vm1046_vm6, %v13724_v3, -inf }
0x1bec   : > { %5822 = vmax.xlane.f32.xlu1 %v5821_v57  ;;  %v5791_v54 = vpop.f32.mrb[142].mxu0 }
0x1bed   : > { %v10489_v23 = vpop.f32.mrb[143].mxu0 }
0x1c53   : > { %v5796_v50 = vpop.xlane.xlu0 %5795 }
0x1c54   : > { %v5824_v61 = vsub.f32 %v5698_v42, %v5796_v50 }
0x1c55   : > { %v5799_v5 = vpop.xlane.xlu1 %5798 }
0x1c56   : > { %v5834_v24 = vmul.f32 1.442695, %v5824_v61  ;;  %v5825_v8 = vsub.f32 %v5701_v13, %v5799_v5 }
0x1c58   : > { %11247 = vpow2.f32 %v5834_v24  ;;  %v5836_v45 = vmul.f32 1.442695, %v5825_v8 }
0x1c5a   : > { %11249 = vpow2.f32 %v5836_v45 }
0x1c5b   : > { %v5802_v14 = vpop.xlane.xlu0 %5801 }
0x1c5c   : > { %v5826_v38 = vsub.f32 %v5706_v62, %v5802_v14 }
0x1c5d   : > { %v5805_v44 = vpop.xlane.xlu1 %5804 }
0x1c5e   : > { %v5838_v37 = vmul.f32 1.442695, %v5826_v38  ;;  %v5827_v40 = vsub.f32 %v5709_v41, %v5805_v44 }
0x1c60   : > { %11251 = vpow2.f32 %v5838_v37  ;;  %v5840_v58 = vmul.f32 1.442695, %v5827_v40 }
0x1c62   : > { %v13728_v12 = vpop.eup %11247  ;;  %11253 = vpow2.f32 %v5840_v58 }
0x1c63   : > { %v5808_v19 = vpop.xlane.xlu0 %5807  ;;  %v5854_v42 = vsel %vm1046_vm6, %v13728_v12, 0.0 }
0x1c64   : > { %v11250_v7 = vpop.eup %11249  ;;  %v5828_v52 = vsub.f32 %v5714_v48, %v5808_v19  ;;  %5855 = vadd.xlane.f32.xlu0 %v5854_v42 }
0x1c65   : > { %v5857_v13 = vsel %vm1046_vm6, %v11250_v7, 0.0 }
0x1c66   : > { %v5842_v28 = vmul.f32 1.442695, %v5828_v52  ;;  %5858 = vadd.xlane.f32.xlu1 %v5857_v13 }
0x1c68   : > { %11255 = vpow2.f32 %v5842_v28 }
0x1c69   : > { %v5811_v62 = vpop.xlane.xlu1 %5810 }
0x1c6a   : > { %v11252_v21 = vpop.eup %11251  ;;  %v5829_v41 = vsub.f32 %v5772_v34, %v5811_v62 }
0x1c6b   : > { %v5814_v22 = vpop.xlane.xlu0 %5813  ;;  %v5860_v46 = vsel %vm1046_vm6, %v11252_v21, 0.0 }
0x1c6c   : > { %v11254_v56 = vpop.eup %11253  ;;  %v5844_v25 = vmul.f32 1.442695, %v5829_v41  ;;  %v5830_v26 = vsub.f32 %v5775_v47, %v5814_v22  ;;  %5861 = vadd.xlane.f32.xlu0 %v5860_v46 }
0x1c6d   : > { %v5863_v6 = vsel %vm1046_vm6, %v11254_v56, 0.0 }
0x1c6e   : > { %11257 = vpow2.f32 %v5844_v25  ;;  %v5846_v48 = vmul.f32 1.442695, %v5830_v26  ;;  %5864 = vadd.xlane.f32.xlu1 %v5863_v6 }
0x1c70   : > { %11259 = vpow2.f32 %v5846_v48 }
0x1c71   : > { %v5817_v30 = vpop.xlane.xlu1 %5816 }
0x1c72   : > { %v11256_v51 = vpop.eup %11255  ;;  %v5831_v57 = vsub.f32 %v5780_v18, %v5817_v30 }
0x1c73   : > { %v5820_v54 = vpop.xlane.xlu0 %5819  ;;  %v5866_v23 = vsel %vm1046_vm6, %v11256_v51, 0.0 }
0x1c74   : > { %v5848_v34 = vmul.f32 1.442695, %v5831_v57  ;;  %v5832_v50 = vsub.f32 %v5783_v4, %v5820_v54  ;;  %5867 = vadd.xlane.f32.xlu0 %v5866_v23 }
0x1c76   : > { %11261 = vpow2.f32 %v5848_v34  ;;  %v5850_v61 = vmul.f32 1.442695, %v5832_v50 }
0x1c78   : > { %v11258_v5 = vpop.eup %11257  ;;  %11263 = vpow2.f32 %v5850_v61 }
0x1c79   : > { %v5823_v47 = vpop.xlane.xlu1 %5822  ;;  %v5869_v24 = vsel %vm1046_vm6, %v11258_v5, 0.0 }
0x1c7a   : > { %v11260_v8 = vpop.eup %11259  ;;  %v5833_v45 = vsub.f32 %v13724_v3, %v5823_v47  ;;  %5870 = vadd.xlane.f32.xlu1 %v5869_v24  ;;  %v10989_v24 = vld [vmem:[%s14808_s3 + $0xe0] sm:$0xff]  }
0x1c7b   : > { %v5872_v14 = vsel %vm1046_vm6, %v11260_v8, 0.0 }
0x1c7c   : > { %v5852_v18 = vmul.f32 1.442695, %v5833_v45  ;;  %5873 = vadd.xlane.f32.xlu0 %v5872_v14 }
0x1c7e   : > { %11265 = vpow2.f32 %v5852_v18  ;;  %v10990_v18 = vld [vmem:[%s14808_s3 + $0xe8] sm:$0xff]  }
0x1c80   : > { %v11262_v38 = vpop.eup %11261 }
0x1c81   : > { %v5875_v4 = vsel %vm1046_vm6, %v11262_v38, 0.0 }
0x1c82   : > { %v11264_v44 = vpop.eup %11263  ;;  %5876 = vadd.xlane.f32.xlu1 %v5875_v4 }
0x1c83   : > { %v5878_v37 = vsel %vm1046_vm6, %v11264_v44, 0.0 }
0x1c84   : > { %5879 = vadd.xlane.f32.xlu0 %v5878_v37 }
0x1c88   : > { %v13741_v40 = vpop.eup %11265 }
0x1c89   : > { %v5881_v58 = vsel %vm1046_vm6, %v13741_v40, 0.0 }
0x1c8a   : > { %5882 = vadd.xlane.f32.xlu1 %v5881_v58 }
0x1cf1   : > { %v5856_v3 = vpop.xlane.xlu0 %5855 }
0x1cf2   : > { %11267 = vrcp.f32 %v5856_v3 }
0x1cf3   : > { %v5859_v19 = vpop.xlane.xlu1 %5858 }
0x1cf4   : > { %11269 = vrcp.f32 %v5859_v19 }
0x1cf9   : > { %v5862_v42 = vpop.xlane.xlu0 %5861 }
0x1cfa   : > { %11271 = vrcp.f32 %v5862_v42 }
0x1cfb   : > { %v5865_v52 = vpop.xlane.xlu1 %5864 }
0x1cfc   : > { %v11268_v13 = vpop.eup %11267  ;;  %11273 = vrcp.f32 %v5865_v52 }
0x1cfd   : > { %v5885_v62 = vmul.f32 %v11268_v13, %v13728_v12 }
0x1cfe   : > { %v11270_v28 = vpop.eup %11269 }
0x1cff   : > { %v5887_v41 = vmul.f32 %v11270_v28, %v11250_v7 }
0x1d01   : > { %v5904_v22 = vpack.c.bf16 %v5887_v41, %v5885_v62  ;;  %v5868_v46 = vpop.xlane.xlu0 %5867  ;;  %v10993_v62 = vld [vmem:[%s14808_s3 + $0x120] sm:$0xff]  }
0x1d02   : > { %11275 = vrcp.f32 %v5868_v46  ;;  %v10994_v46 = vld [vmem:[%s14808_s3 + $0x128] sm:$0xff]  }
0x1d03   : > { %10497 = vmatmul.mubr.msk.bf16.vlgmr.msra.gmra.mrb[120].mxu1 %vm1046_vm6, %v5904_v22 }
0x1d04   : > { %v11272_v25 = vpop.eup %11271  ;;  %10500 = vmatprep.mubr.msk.bf16.mxu1 %vm11416_vm2, %v11415_v2 }
0x1d05   : > { %v5889_v6 = vmul.f32 %v11272_v25, %v11252_v21 }
0x1d06   : > { %v11274_v26 = vpop.eup %11273 }
0x1d07   : > { %v5891_v48 = vmul.f32 %v11274_v26, %v11254_v56  ;;  %v5871_v30 = vpop.xlane.xlu1 %5870 }
0x1d08   : > { %11277 = vrcp.f32 %v5871_v30 }
0x1d09   : > { %v5905_v57 = vpack.c.bf16 %v5891_v48, %v5889_v6  ;;  %v5874_v54 = vpop.xlane.xlu0 %5873 }
0x1d0a   : > { %11279 = vrcp.f32 %v5874_v54 }
0x1d0b   : > { %10501 = vmatmul.mubr.msk.bf16.gmra.mrb[124].mxu1 %vm1046_vm6, %v5905_v57 }
0x1d0c   : > { %v11276_v12 = vpop.eup %11275  ;;  %10504 = vmatprep.mubr.msk.bf16.mxu1 %vm11416_vm2, %v11415_v2 }
0x1d0d   : > { %v5893_v7 = vmul.f32 %v11276_v12, %v11256_v51 }
0x1d0f   : > { %v5877_v23 = vpop.xlane.xlu1 %5876  ;;  %v5906_v34 = vpack.c.bf16 %v5893_v7, %v5893_v7 }
0x1d10   : > { %11281 = vrcp.f32 %v5877_v23 }
0x1d11   : > { %v5880_v50 = vpop.xlane.xlu0 %5879 }
0x1d12   : > { %v11278_v61 = vpop.eup %11277  ;;  %11283 = vrcp.f32 %v5880_v50 }
0x1d13   : > { %10505 = vmatmul.mubr.msk.bf16.gmra.mrb[128].mxu1 %vm1046_vm6, %v5906_v34  ;;  %v5895_v56 = vmul.f32 %v11278_v61, %v11258_v5 }
0x1d14   : > { %v11280_v21 = vpop.eup %11279  ;;  %10528 = vmatprep.mubr.msk.bf16.mxu1 %vm11416_vm2, %v11415_v2 }
0x1d15   : > { %v5897_v47 = vmul.f32 %v11280_v21, %v11260_v8 }
0x1d17   : > { %v5907_v45 = vpack.c.bf16 %v5897_v47, %v5895_v56  ;;  %v5883_v51 = vpop.xlane.xlu1 %5882 }
0x1d18   : > { %11285 = vrcp.f32 %v5883_v51 }
0x1d19   : > { %10515 = vmatmul.mubr.msk.bf16.vlgmr.msra.gmra.mrb[144].mxu0 %vm1046_vm6, %v5907_v45 }
0x1d1a   : > { %v11282_v14 = vpop.eup %11281  ;;  %10518 = vmatprep.mubr.msk.bf16.mxu0 %vm11416_vm2, %v11415_v2  ;;  %10549 = vmatpush3.bf16.msra.mxu0 %v10989_v24 }
0x1d1b   : > { %10550 = vmatprep.subr.bf16.mxu0 %v11415_v2  ;;  %v5899_v8 = vmul.f32 %v11282_v14, %v11262_v38  ;;  %v10991_v38 = vld [vmem:[%s14808_s3 + $0x160] sm:$0xff]  }
0x1d1c   : > { %v11284_v5 = vpop.eup %11283 }
0x1d1d   : > { %v5901_v4 = vmul.f32 %v11284_v5, %v11264_v44  ;;  %v10992_v44 = vld [vmem:[%s14808_s3 + $0x168] sm:$0xff]  }
0x1d1e   : > { %10551 = vmatpush3.bf16.msra.mxu0 %v10990_v18 }
0x1d1f   : > { %v5908_v37 = vpack.c.bf16 %v5901_v4, %v5899_v8  ;;  %10596 = vmatprep.subr.bf16.mxu0 %v11415_v2 }
0x1d21   : > { %10519 = vmatmul.mubr.msk.bf16.gmra.mrb[148].mxu0 %vm1046_vm6, %v5908_v37  ;;  %v13852_v37 = vld [vmem:[%s14809_s4 + $0xe] ss:$0 sm:$0xff] }
0x1d22   : > { %v11286_v58 = vpop.eup %11285  ;;  %10522 = vmatprep.mubr.msk.bf16.mxu0 %vm11416_vm2, %v11415_v2 }
0x1d23   : > { %v5903_v3 = vmul.f32 %v11286_v58, %v13741_v40  ;;  %v8870_v40 = vld [vmem:[%s14810_s5 + $0x14] sm:$0xf] }
0x1d24   : > { %v6069_v42 = vsel %vm1172_vm5, %v8870_v40, 0 }
0x1d25   : > { %v5909_v19 = vpack.c.bf16 %v5903_v3, %v5903_v3  ;;  %10527 = vmatpush3.bf16.msra.mxu1 %v6069_v42 }
0x1d26   : > { %10572 = vmatprep.subr.bf16.mxu1 %v11415_v2 }
0x1d29   : > { %10523 = vmatmul.mubr.msk.bf16.gmra.mrb[152].mxu0 %vm1046_vm6, %v5909_v19 }
0x1d2a   : > { %10552 = vmatprep.mubr.msk.bf16.mxu0 %vm11416_vm2, %v11415_v2 }
0x1d31   : > { %10553 = vmatmul.mubr.msk.bf16.vlgmr.msra.gmra.mrb[156].mxu0 %vm594_vm3, %v13182_v59 }
0x1d32   : > { %10556 = vmatprep.mubr.msk.bf16.mxu0 %vm11416_vm2, %v11415_v2  ;;  %10597 = vmatpush3.bf16.msra.mxu0 %v10991_v38 }
0x1d33   : > { %10598 = vmatprep.subr.bf16.mxu0 %v11415_v2 }
0x1d36   : > { %10599 = vmatpush3.bf16.msra.mxu0 %v10992_v44 }
0x1d37   : > { %10638 = vmatprep.subr.bf16.mxu0 %v11415_v2 }
0x1d39   : > { %10557 = vmatmul.mubr.msk.bf16.gmra.mrb[160].mxu0 %vm594_vm3, %v13211_v17 }
0x1d3a   : > { %10560 = vmatprep.mubr.msk.bf16.mxu0 %vm11416_vm2, %v11415_v2 }
0x1d41   : > { %10561 = vmatmul.mubr.msk.bf16.gmra.mrb[164].mxu0 %vm594_vm3, %v13234_v36 }
0x1d42   : > { %10564 = vmatprep.mubr.msk.bf16.mxu0 %vm11416_vm2, %v11415_v2 }
0x1d49   : > { %10565 = vmatmul.mubr.msk.bf16.gmra.mrb[168].mxu0 %vm594_vm3, %v13256_v43 }
0x1d4a   : > { %10568 = vmatprep.mubr.msk.bf16.mxu0 %vm11416_vm2, %v11415_v2 }
0x1d51   : > { %10569 = vmatmul.mubr.msk.bf16.gmra.mrb[172].mxu0 %vm594_vm3, %v13278_v27 }
0x1d52   : > { %10600 = vmatprep.mubr.msk.bf16.mxu0 %vm11416_vm2, %v11415_v2 }
0x1d59   : > { %10601 = vmatmul.mubr.msk.bf16.vlgmr.msra.gmra.mrb[176].mxu0 %vm594_vm3, %v13182_v59 }
0x1d5a   : > { %10604 = vmatprep.mubr.msk.bf16.mxu0 %vm11416_vm2, %v11415_v2 }
0x1d61   : > { %10605 = vmatmul.mubr.msk.bf16.gmra.mrb[180].mxu0 %vm594_vm3, %v13211_v17 }
0x1d62   : > { %10608 = vmatprep.mubr.msk.bf16.mxu0 %vm11416_vm2, %v11415_v2 }
0x1d69   : > { %10609 = vmatmul.mubr.msk.bf16.gmra.mrb[184].mxu0 %vm594_vm3, %v13234_v36 }
0x1d6a   : > { %10612 = vmatprep.mubr.msk.bf16.mxu0 %vm11416_vm2, %v11415_v2 }
0x1d71   : > { %10613 = vmatmul.mubr.msk.bf16.gmra.mrb[188].mxu0 %vm594_vm3, %v13256_v43 }
0x1d72   : > { %10616 = vmatprep.mubr.msk.bf16.mxu0 %vm11416_vm2, %v11415_v2 }
0x1d79   : > { %10617 = vmatmul.mubr.msk.bf16.gmra.mrb[192].mxu0 %vm594_vm3, %v13278_v27 }
0x1d7a   : > { %10644 = vmatprep.mubr.msk.bf16.mxu0 %vm11416_vm2, %v11415_v2 }
0x1dd6   : > { %v5956_v52 = vpop.f32.mrb[120].mxu1 }
0x1dd7   : > { %v10498_v13 = vpop.f32.mrb[121].mxu1 }
0x1dd8   : > { %v5959_v28 = vpop.f32.mrb[122].mxu1 }
0x1dd9   : > { %v6046_v41 = vpack.c.bf16 %v5959_v28, %v5956_v52  ;;  %v10499_v22 = vpop.f32.mrb[123].mxu1 }
0x1ddb   : > { %10529 = vmatmul.mubr.msk.bf16.vlgmr.msra.gmra.mrb[132].mxu1 %vm897_vm4, %v6046_v41 }
0x1ddc   : > { %10532 = vmatprep.mubr.msk.bf16.mxu1 %vm11416_vm2, %v11415_v2  ;;  %10573 = vmatpush3.bf16.msra.mxu1 %v10993_v62 }
0x1ddd   : > { %10574 = vmatprep.subr.bf16.mxu1 %v11415_v2 }
0x1dde   : > { %v5964_v25 = vpop.f32.mrb[124].mxu1 }
0x1ddf   : > { %v10502_v26 = vpop.f32.mrb[125].mxu1 }
0x1de0   : > { %v5967_v6 = vpop.f32.mrb[126].mxu1  ;;  %10575 = vmatpush3.bf16.msra.mxu1 %v10994_v46 }
0x1de1   : > { %v6047_v48 = vpack.c.bf16 %v5967_v6, %v5964_v25  ;;  %v10503_v30 = vpop.f32.mrb[127].mxu1  ;;  %10620 = vmatprep.subr.bf16.mxu1 %v11415_v2 }
0x1de3   : > { %10533 = vmatmul.mubr.msk.bf16.gmra.mrb[136].mxu1 %vm897_vm4, %v6047_v48 }
0x1de4   : > { %10536 = vmatprep.mubr.msk.bf16.mxu1 %vm11416_vm2, %v11415_v2 }
0x1de6   : > { %v5972_v57 = vpop.f32.mrb[128].mxu1 }
0x1de7   : > { %v10506_v54 = vpop.f32.mrb[129].mxu1 }
0x1de8   : > { %v5975_v12 = vpop.f32.mrb[130].mxu1 }
0x1de9   : > { %v10507_v7 = vpop.f32.mrb[131].mxu1 }
0x1dec   : > { %v6024_v23 = vpop.f32.mrb[144].mxu0 }
0x1ded   : > { %v6048_v34 = vpack.c.bf16 %v6024_v23, %v5972_v57  ;;  %v10516_v50 = vpop.f32.mrb[145].mxu0 }
0x1dee   : > { %v6027_v61 = vpop.f32.mrb[146].mxu0 }
0x1def   : > { %v10517_v21 = vpop.f32.mrb[147].mxu0  ;;  %10537 = vmatmul.mubr.msk.bf16.gmra.mrb[140].mxu1 %vm897_vm4, %v6048_v34 }
0x1df0   : > { %10540 = vmatprep.mubr.msk.bf16.mxu1 %vm11416_vm2, %v11415_v2 }
0x1df4   : > { %v6032_v56 = vpop.f32.mrb[148].mxu0 }
0x1df5   : > { %v6049_v47 = vpack.c.bf16 %v6032_v56, %v6027_v61  ;;  %v10520_v24 = vpop.f32.mrb[149].mxu0 }
0x1df6   : > { %v6035_v45 = vpop.f32.mrb[150].mxu0 }
0x1df7   : > { %v10521_v51 = vpop.f32.mrb[151].mxu0  ;;  %10541 = vmatmul.mubr.msk.bf16.gmra.mrb[144].mxu1 %vm897_vm4, %v6049_v47 }
0x1df8   : > { %10544 = vmatprep.mubr.msk.bf16.mxu1 %vm11416_vm2, %v11415_v2  ;;  %v13913_v51 = vld [vmem:[%s14809_s4 + $0x16] ss:$0 sm:$0xff] }
0x1dfc   : > { %v6040_v14 = vpop.f32.mrb[152].mxu0 }
0x1dfd   : > { %v6050_v18 = vpack.c.bf16 %v6040_v14, %v6035_v45  ;;  %v10524_v5 = vpop.f32.mrb[153].mxu0 }
0x1dfe   : > { %v6043_v8 = vpop.f32.mrb[154].mxu0 }
0x1dff   : > { %v10525_v4 = vpop.f32.mrb[155].mxu0  ;;  %10545 = vmatmul.mubr.msk.bf16.gmra.mrb[148].mxu1 %vm897_vm4, %v6050_v18 }
0x1e00   : > { %10576 = vmatprep.mubr.msk.bf16.mxu1 %vm11416_vm2, %v11415_v2 }
0x1e04   : > { %v6213_v58 = vpop.f32.mrb[156].mxu0 }
0x1e05   : > { %v10554_v3 = vpop.f32.mrb[157].mxu0  ;;  %v13855_v38 = vadd.f32 %v13852_v37, %v6213_v58 }
0x1e06   : > { %v6216_v19 = vpop.f32.mrb[158].mxu0 }
0x1e07   : > { %v13858_v44 = vadd.f32 %v13852_v37, %v6216_v19  ;;  %v10555_v40 = vpop.f32.mrb[159].mxu0  ;;  %10577 = vmatmul.mubr.msk.bf16.vlgmr.msra.gmra.mrb[152].mxu1 %vm594_vm3, %v13182_v59 }
0x1e08   : > { %10580 = vmatprep.mubr.msk.bf16.mxu1 %vm11416_vm2, %v11415_v2 }
0x1e0c   : > { %v6221_v52 = vpop.f32.mrb[160].mxu0 }
0x1e0d   : > { %v10558_v13 = vpop.f32.mrb[161].mxu0  ;;  %v13867_v62 = vadd.f32 %v13852_v37, %v6221_v52 }
0x1e0e   : > { %v6224_v28 = vpop.f32.mrb[162].mxu0 }
0x1e0f   : > { %v13870_v41 = vadd.f32 %v13852_v37, %v6224_v28  ;;  %v10559_v22 = vpop.f32.mrb[163].mxu0  ;;  %10581 = vmatmul.mubr.msk.bf16.gmra.mrb[156].mxu1 %vm594_vm3, %v13211_v17 }
0x1e10   : > { %10584 = vmatprep.mubr.msk.bf16.mxu1 %vm11416_vm2, %v11415_v2 }
0x1e14   : > { %v13878_v25 = vpop.f32.mrb[164].mxu0 }
0x1e15   : > { %v10562_v26 = vpop.f32.mrb[165].mxu0 }
0x1e16   : > { %v6232_v6 = vpop.f32.mrb[166].mxu0 }
0x1e17   : > { %v10563_v48 = vpop.f32.mrb[167].mxu0  ;;  %10585 = vmatmul.mubr.msk.bf16.gmra.mrb[160].mxu1 %vm594_vm3, %v13234_v36  ;;  %v13885_v57 = vadd.f32 %v13852_v37, %v6232_v6 }
0x1e18   : > { %10588 = vmatprep.mubr.msk.bf16.mxu1 %vm11416_vm2, %v11415_v2 }
0x1e1c   : > { %v6237_v30 = vpop.f32.mrb[168].mxu0 }
0x1e1d   : > { %v13888_v54 = vadd.f32 %v13852_v37, %v6237_v30  ;;  %v10566_v12 = vpop.f32.mrb[169].mxu0 }
0x1e1e   : > { %v6240_v7 = vpop.f32.mrb[170].mxu0 }
0x1e1f   : > { %v10567_v34 = vpop.f32.mrb[171].mxu0  ;;  %10589 = vmatmul.mubr.msk.bf16.gmra.mrb[164].mxu1 %vm594_vm3, %v13256_v43  ;;  %v13897_v61 = vadd.f32 %v13852_v37, %v6240_v7 }
0x1e20   : > { %10592 = vmatprep.mubr.msk.bf16.mxu1 %vm11416_vm2, %v11415_v2 }
0x1e24   : > { %v6245_v50 = vpop.f32.mrb[172].mxu0 }
0x1e25   : > { %v13900_v21 = vadd.f32 %v13852_v37, %v6245_v50  ;;  %v10570_v56 = vpop.f32.mrb[173].mxu0 }
0x1e26   : > { %v13902_v47 = vpop.f32.mrb[174].mxu0 }
0x1e27   : > { %v10571_v45 = vpop.f32.mrb[175].mxu0  ;;  %10593 = vmatmul.mubr.msk.bf16.gmra.mrb[168].mxu1 %vm594_vm3, %v13278_v27 }
0x1e28   : > { %10626 = vmatprep.mubr.msk.bf16.mxu1 %vm11416_vm2, %v11415_v2 }
0x1e2c   : > { %v6409_v14 = vpop.f32.mrb[176].mxu0 }
0x1e2d   : > { %v10602_v18 = vpop.f32.mrb[177].mxu0  ;;  %v13916_v8 = vadd.f32 %v13913_v51, %v6409_v14 }
0x1e2e   : > { %v6412_v5 = vpop.f32.mrb[178].mxu0 }
0x1e2f   : > { %v13919_v4 = vadd.f32 %v13913_v51, %v6412_v5  ;;  %v10603_v58 = vpop.f32.mrb[179].mxu0 }
0x1e34   : > { %v6417_v19 = vpop.f32.mrb[180].mxu0 }
0x1e35   : > { %v10606_v40 = vpop.f32.mrb[181].mxu0  ;;  %v13924_v13 = vadd.f32 %v13913_v51, %v6417_v19 }
0x1e36   : > { %v6420_v52 = vpop.f32.mrb[182].mxu0 }
0x1e37   : > { %v13927_v28 = vadd.f32 %v13913_v51, %v6420_v52  ;;  %v10607_v22 = vpop.f32.mrb[183].mxu0 }
0x1e3c   : > { %v13931_v6 = vpop.f32.mrb[184].mxu0 }
0x1e3d   : > { %v10610_v48 = vpop.f32.mrb[185].mxu0 }
0x1e3e   : > { %v6428_v30 = vpop.f32.mrb[186].mxu0 }
0x1e3f   : > { %v10611_v12 = vpop.f32.mrb[187].mxu0  ;;  %v13934_v34 = vadd.f32 %v13913_v51, %v6428_v30  ;;  %v8818_v30 = vld [vmem:[%s14814_s9 + $0x6] ss:$0 sm:$0xff] }
0x1e40   : > { %v5324_v12 = vadd.f32 %v8818_v30, %v13622_v55  ;;  %v5326_v14 = vadd.f32 %v8818_v30, %v13626_v9 }
0x1e44   : > { %v6433_v7 = vpop.f32.mrb[188].mxu0 }
0x1e45   : > { %v13937_v50 = vadd.f32 %v13913_v51, %v6433_v7  ;;  %v10614_v56 = vpop.f32.mrb[189].mxu0 }
0x1e46   : > { %v6436_v45 = vpop.f32.mrb[190].mxu0  ;;  %v5325_v56 = vadd.f32 %v8818_v30, %v13624_v39  ;;  %v5328_v39 = vadd.f32 %v8818_v30, %v13630_v15 }
0x1e47   : > { %v10615_v18 = vpop.f32.mrb[191].mxu0  ;;  %v13942_v58 = vadd.f32 %v13913_v51, %v6436_v45 }
0x1e4c   : > { %v6441_v5 = vpop.f32.mrb[192].mxu0 }
0x1e4d   : > { %v13945_v19 = vadd.f32 %v13913_v51, %v6441_v5  ;;  %v10618_v40 = vpop.f32.mrb[193].mxu0 }
0x1e4e   : > { %v13947_v52 = vpop.f32.mrb[194].mxu0 }
0x1e4f   : > { %v10619_v48 = vpop.f32.mrb[195].mxu0 }
0x1e50   : > { %v5327_v48 = vadd.f32 %v8818_v30, %v13628_v16  ;;  %v5330_v16 = vadd.f32 %v8818_v30, %v13634_v10 }
0x1eae   : > { %v6105_v7 = vpop.f32.mrb[132].mxu1 }
0x1eaf   : > { %v13956_v45 = vadd.f32 %v6105_v7, %v5324_v12  ;;  %v10530_v18 = vpop.f32.mrb[133].mxu1  ;;  %v5329_v7 = vadd.f32 %v8818_v30, %v13632_v63  ;;  %v5332_v63 = vadd.f32 %v8818_v30, %v13638_v0 }
0x1eb0   : > { %v6108_v5 = vpop.f32.mrb[134].mxu1 }
0x1eb1   : > { %v13958_v40 = vadd.f32 %v6108_v5, %v5325_v56  ;;  %v10531_v24 = vpop.f32.mrb[135].mxu1 }
0x1eb6   : > { %v6113_v22 = vpop.f32.mrb[136].mxu1 }
0x1eb7   : > { %v13962_v23 = vadd.f32 %v6113_v22, %v5326_v14  ;;  %v10534_v46 = vpop.f32.mrb[137].mxu1 }
0x1eb8   : > { %v6116_v26 = vpop.f32.mrb[138].mxu1  ;;  %v5331_v46 = vadd.f32 %v8818_v30, %v13636_v29  ;;  %v8894_v29 = vld [vmem:[%s14809_s4 + $0x12] ss:$0 sm:$0xff] }
0x1eb9   : > { %v13964_v55 = vadd.f32 %v6116_v26, %v5327_v48  ;;  %v10535_v3 = vpop.f32.mrb[139].mxu1 }
0x1ec2   : > { %v6121_v12 = vpop.f32.mrb[140].mxu1 }
0x1ec3   : > { %v13968_v56 = vadd.f32 %v6121_v12, %v5328_v39  ;;  %v10538_v24 = vpop.f32.mrb[141].mxu1  ;;  %v5333_v12 = vadd.f32 %v8818_v30, %v13640_v31 }
0x1ec4   : > { %v6124_v18 = vpop.f32.mrb[142].mxu1 }
0x1ec5   : > { %v13970_v9 = vadd.f32 %v6124_v18, %v5329_v7  ;;  %v10539_v5 = vpop.f32.mrb[143].mxu1 }
0x1eca   : > { %v6129_v14 = vpop.f32.mrb[144].mxu1 }
0x1ecb   : > { %v13974_v26 = vadd.f32 %v6129_v14, %v5330_v16  ;;  %v10542_v3 = vpop.f32.mrb[145].mxu1 }
0x1ecc   : > { %v6132_v22 = vpop.f32.mrb[146].mxu1 }
0x1ecd   : > { %v13976_v15 = vadd.f32 %v6132_v22, %v5331_v46  ;;  %v10543_v48 = vpop.f32.mrb[147].mxu1 }
0x1ed2   : > { %v6137_v39 = vpop.f32.mrb[148].mxu1 }
0x1ed3   : > { %v13980_v7 = vadd.f32 %v6137_v39, %v5332_v63  ;;  %v10546_v24 = vpop.f32.mrb[149].mxu1 }
0x1ed4   : > { %v6140_v18 = vpop.f32.mrb[150].mxu1 }
0x1ed5   : > { %v13982_v10 = vadd.f32 %v6140_v18, %v5333_v12  ;;  %v10547_v5 = vpop.f32.mrb[151].mxu1 }
0x1eda   : > { %v6311_v16 = vpop.f32.mrb[152].mxu1 }
0x1edb   : > { %v10578_v14 = vpop.f32.mrb[153].mxu1  ;;  %v6312_v3 = vadd.f32 %v8894_v29, %v6311_v16 }
0x1edc   : > { %v6314_v46 = vpop.f32.mrb[154].mxu1 }
0x1edd   : > { %v6315_v22 = vadd.f32 %v8894_v29, %v6314_v46  ;;  %v10579_v0 = vpop.f32.mrb[155].mxu1 }
0x1edf   : > { %v6454_v48 = vpack.c.bf16 %v6315_v22, %v6312_v3 }
0x1ee1   : > { %v6476_v31 = vsel %vm897_vm4, %v6454_v48, 0 }
0x1ee2   : > { %v6319_v30 = vpop.f32.mrb[156].mxu1  ;;  %10621 = vmatpush3.bf16.xpose.msra.mxu1 %v6476_v31 }
0x1ee3   : > { %v10582_v63 = vpop.f32.mrb[157].mxu1  ;;  %10622 = vmatprep.subr.bf16.mxu1 %v11415_v2  ;;  %v6320_v12 = vadd.f32 %v8894_v29, %v6319_v30 }
0x1ee4   : > { %v6322_v39 = vpop.f32.mrb[158].mxu1 }
0x1ee5   : > { %v6323_v24 = vadd.f32 %v8894_v29, %v6322_v39  ;;  %v10583_v18 = vpop.f32.mrb[159].mxu1 }
0x1ee7   : > { %v6455_v5 = vpack.c.bf16 %v6323_v24, %v6320_v12 }
0x1ee9   : > { %v6479_v42 = vsel %vm897_vm4, %v6455_v5, 0  ;;  %v6426_v5 = vadd.f32 %v13913_v51, %v13931_v6 }
0x1eea   : > { %v6327_v14 = vpop.f32.mrb[160].mxu1  ;;  %10623 = vmatpush3.bf16.xpose.msra.mxu1 %v6479_v42 }
0x1eeb   : > { %v6328_v16 = vadd.f32 %v8894_v29, %v6327_v14  ;;  %v10586_v46 = vpop.f32.mrb[161].mxu1  ;;  %10624 = vmatprep.subr.bf16.mxu1 %v11415_v2  ;;  %v14848_v14 = vpack.c.bf16 %v13858_v44, %v13855_v38 }
0x1eec   : > { %v6330_v3 = vpop.f32.mrb[162].mxu1  ;;  %v14849_v46 = vpack.c.bf16 %v13919_v4, %v13916_v8 }
0x1eed   : > { %v6456_v22 = vpack.c.bf16 %v6328_v16, %v6328_v16  ;;  %v10587_v0 = vpop.f32.mrb[163].mxu1  ;;  %v6331_v63 = vadd.f32 %v8894_v29, %v6330_v3 }
0x1eef   : > { %v6482_v48 = vsel %vm897_vm4, %v6456_v22, 0 }
0x1ef2   : > { %v6335_v31 = vpop.f32.mrb[164].mxu1  ;;  %10625 = vmatpush3.bf16.xpose.msra.mxu1 %v6482_v48  ;;  %v6462_v48 = vpack.c.bf16 %v6426_v5, %v6426_v5 }
0x1ef3   : > { %v6336_v30 = vadd.f32 %v8894_v29, %v6335_v31  ;;  %v10590_v39 = vpop.f32.mrb[165].mxu1  ;;  %10656 = vmatprep.subr.bf16.mxu1 %v11415_v2  ;;  %v14850_v31 = vpack.c.bf16 %v13927_v28, %v13924_v13  ;;  %v6230_v13 = vadd.f32 %v13852_v37, %v13878_v25  ;;  %v14853_v25 = vpack.c.bf16 %v13937_v50, %v13934_v34 }
0x1ef4   : > { %v6338_v12 = vpop.f32.mrb[166].mxu1  ;;  %v6740_v4 = vsel %vm1172_vm5, %v6462_v48, 0 }
0x1ef5   : > { %v6457_v24 = vpack.c.bf16 %v6336_v30, %v6331_v63  ;;  %v10591_v18 = vpop.f32.mrb[167].mxu1  ;;  %v6339_v3 = vadd.f32 %v8894_v29, %v6338_v12  ;;  %v14851_v30 = vpack.c.bf16 %v13870_v41, %v13867_v62  ;;  %v6445_v62 = vadd.f32 %v13913_v51, %v13947_v52 }
0x1ef6   : > { %v14852_v41 = vpack.c.bf16 %v13888_v54, %v13885_v57  ;;  %v14855_v54 = vpack.c.bf16 %v13900_v21, %v13897_v61  ;;  %v6249_v51 = vadd.f32 %v13852_v37, %v13902_v47 }
0x1ef7   : > { %v6550_v42 = vsel %vm897_vm4, %v6457_v24, 0  ;;  %v6465_v12 = vpack.c.bf16 %v6445_v62, %v6445_v62  ;;  %v14854_v24 = vpack.c.bf16 %v13945_v19, %v13942_v58 }
0x1ef8   : > { %10639 = vmatpush3.bf16.xpose.msra.mxu0 %v6550_v42  ;;  %v6453_v34 = vpack.c.bf16 %v6249_v51, %v6249_v51 }
0x1ef9   : > { %10627 = vmatmul.mubr.msk.bf16.vlgmr.msra.gmra.mrb[172].mxu1 %vm897_vm4, %v14848_v14  ;;  %10640 = vmatprep.subr.bf16.mxu0 %v11415_v2  ;;  %v6808_v57 = vsel %vm1172_vm5, %v6465_v12, 0 }
0x1efa   : > { %v6343_v16 = vpop.f32.mrb[168].mxu1  ;;  %10657 = vmatpush3.bf16.msra.mxu1 %v14849_v46  ;;  %10630 = vmatprep.mubr.msk.bf16.mxu1 %vm11416_vm2, %v11415_v2 }
0x1efb   : > { %v6344_v22 = vadd.f32 %v8894_v29, %v6343_v16  ;;  %v10594_v0 = vpop.f32.mrb[169].mxu1  ;;  %10658 = vmatprep.subr.bf16.mxu1 %v11415_v2 }
0x1efc   : > { %v6346_v6 = vpop.f32.mrb[170].mxu1 }
0x1efd   : > { %v6458_v38 = vpack.c.bf16 %v6344_v22, %v6339_v3  ;;  %v10595_v44 = vpop.f32.mrb[171].mxu1  ;;  %v6347_v63 = vadd.f32 %v8894_v29, %v6346_v6  ;;  %v6450_v29 = vpack.c.bf16 %v6230_v13, %v6230_v13 }
0x1efe   : > { %10659 = vmatpush3.bf16.msra.mxu1 %v14850_v31 }
0x1eff   : > { %v6553_v8 = vsel %vm897_vm4, %v6458_v38, 0  ;;  %10660 = vmatprep.subr.bf16.mxu1 %v11415_v2  ;;  %v6459_v28 = vpack.c.bf16 %v6347_v63, %v6347_v63 }
0x1f00   : > { %10641 = vmatpush3.bf16.xpose.msra.mxu0 %v6553_v8 }
0x1f01   : > { %10631 = vmatmul.mubr.msk.bf16.gmra.mrb[176].mxu1 %vm897_vm4, %v14851_v30  ;;  %10642 = vmatprep.subr.bf16.mxu0 %v11415_v2  ;;  %v6556_v39 = vsel %vm897_vm4, %v6459_v28, 0 }
0x1f02   : > { %10661 = vmatpush3.bf16.msra.mxu1 %v6740_v4  ;;  %10634 = vmatprep.mubr.msk.bf16.mxu1 %vm11416_vm2, %v11415_v2 }
0x1f03   : > { %10692 = vmatprep.subr.bf16.mxu1 %v11415_v2 }
0x1f08   : > { %10643 = vmatpush3.bf16.xpose.msra.mxu0 %v6556_v39 }
0x1f09   : > { %10635 = vmatmul.mubr.msk.bf16.gmra.mrb[180].mxu1 %vm897_vm4, %v6450_v29  ;;  %10674 = vmatprep.subr.bf16.mxu0 %v11415_v2 }
0x1f0a   : > { %10662 = vmatprep.mubr.msk.bf16.mxu1 %vm11416_vm2, %v11415_v2 }
0x1f0f   : > { %10645 = vmatmul.mubr.msk.bf16.vlgmr.msra.gmra.mrb[196].mxu0 %vm897_vm4, %v14852_v41 }
0x1f10   : > { %10675 = vmatpush3.bf16.msra.mxu0 %v14853_v25  ;;  %10648 = vmatprep.mubr.msk.bf16.mxu0 %vm11416_vm2, %v11415_v2 }
0x1f11   : > { %10676 = vmatprep.subr.bf16.mxu0 %v11415_v2 }
0x1f14   : > { %10677 = vmatpush3.bf16.msra.mxu0 %v14854_v24 }
0x1f15   : > { %10678 = vmatprep.subr.bf16.mxu0 %v11415_v2 }
0x1f17   : > { %10649 = vmatmul.mubr.msk.bf16.gmra.mrb[200].mxu0 %vm897_vm4, %v14855_v54 }
0x1f18   : > { %10679 = vmatpush3.bf16.msra.mxu0 %v6808_v57  ;;  %10652 = vmatprep.mubr.msk.bf16.mxu0 %vm11416_vm2, %v11415_v2 }
0x1f19   : > { %10714 = vmatprep.subr.bf16.mxu0 %v11415_v2 }
0x1f1f   : > { %10653 = vmatmul.mubr.msk.bf16.gmra.mrb[204].mxu0 %vm897_vm4, %v6453_v34 }
0x1f20   : > { %10680 = vmatprep.mubr.msk.bf16.mxu0 %vm11416_vm2, %v11415_v2 }
0x1fcc   : > { %v6518_v50 = vpop.f32.mrb[172].mxu1 }
0x1fcd   : > { %v10628_v58 = vpop.f32.mrb[173].mxu1  ;;  %v6614_v61 = vsel %vm1046_vm6, %v6518_v50, -inf }
0x1fce   : > { %6615 = vmax.xlane.f32.xlu0 %v6614_v61  ;;  %v6521_v21 = vpop.f32.mrb[174].mxu1 }
0x1fcf   : > { %v10629_v19 = vpop.f32.mrb[175].mxu1  ;;  %v6617_v52 = vsel %vm1046_vm6, %v6521_v21, -inf }
0x1fd0   : > { %6618 = vmax.xlane.f32.xlu1 %v6617_v52 }
0x1fd4   : > { %v6526_v18 = vpop.f32.mrb[176].mxu1 }
0x1fd5   : > { %v10632_v37 = vpop.f32.mrb[177].mxu1  ;;  %v6620_v47 = vsel %vm1046_vm6, %v6526_v18, -inf }
0x1fd6   : > { %6621 = vmax.xlane.f32.xlu0 %v6620_v47  ;;  %v6529_v42 = vpop.f32.mrb[178].mxu1 }
0x1fd7   : > { %v10633_v5 = vpop.f32.mrb[179].mxu1  ;;  %v6623_v14 = vsel %vm1046_vm6, %v6529_v42, -inf }
0x1fd8   : > { %6624 = vmax.xlane.f32.xlu1 %v6623_v14 }
0x1fdc   : > { %v6534_v16 = vpop.f32.mrb[180].mxu1 }
0x1fdd   : > { %v10636_v46 = vpop.f32.mrb[181].mxu1  ;;  %v6626_v3 = vsel %vm1046_vm6, %v6534_v16, -inf }
0x1fde   : > { %6627 = vmax.xlane.f32.xlu0 %v6626_v3  ;;  %v6537_v22 = vpop.f32.mrb[182].mxu1 }
0x1fdf   : > { %v10637_v0 = vpop.f32.mrb[183].mxu1 }
0x1fe2   : > { %v6592_v6 = vpop.f32.mrb[196].mxu0 }
0x1fe3   : > { %v10646_v48 = vpop.f32.mrb[197].mxu0  ;;  %v6629_v38 = vsel %vm1046_vm6, %v6592_v6, -inf }
0x1fe4   : > { %6630 = vmax.xlane.f32.xlu1 %v6629_v38  ;;  %v6595_v44 = vpop.f32.mrb[198].mxu0 }
0x1fe5   : > { %v10647_v31 = vpop.f32.mrb[199].mxu0  ;;  %v6632_v63 = vsel %vm1046_vm6, %v6595_v44, -inf }
0x1fe6   : > { %6633 = vmax.xlane.f32.xlu0 %v6632_v63 }
0x1fea   : > { %v6600_v8 = vpop.f32.mrb[200].mxu0 }
0x1feb   : > { %v10650_v4 = vpop.f32.mrb[201].mxu0  ;;  %v6635_v30 = vsel %vm1046_vm6, %v6600_v8, -inf }
0x1fec   : > { %6636 = vmax.xlane.f32.xlu1 %v6635_v30  ;;  %v6603_v13 = vpop.f32.mrb[202].mxu0 }
0x1fed   : > { %v10651_v28 = vpop.f32.mrb[203].mxu0  ;;  %v6638_v29 = vsel %vm1046_vm6, %v6603_v13, -inf }
0x1fee   : > { %6639 = vmax.xlane.f32.xlu0 %v6638_v29 }
0x1ff2   : > { %v14066_v39 = vpop.f32.mrb[204].mxu0 }
0x1ff3   : > { %v10654_v62 = vpop.f32.mrb[205].mxu0  ;;  %v6641_v41 = vsel %vm1046_vm6, %v14066_v39, -inf }
0x1ff4   : > { %6642 = vmax.xlane.f32.xlu1 %v6641_v41  ;;  %v6611_v25 = vpop.f32.mrb[206].mxu0 }
0x1ff5   : > { %v10655_v12 = vpop.f32.mrb[207].mxu0 }
0x205b   : > { %v6616_v24 = vpop.xlane.xlu0 %6615 }
0x205c   : > { %v6644_v57 = vsub.f32 %v6518_v50, %v6616_v24 }
0x205d   : > { %v6619_v54 = vpop.xlane.xlu1 %6618 }
0x205e   : > { %v6654_v51 = vmul.f32 1.442695, %v6644_v57  ;;  %v6645_v34 = vsub.f32 %v6521_v21, %v6619_v54 }
0x2060   : > { %11287 = vpow2.f32 %v6654_v51  ;;  %v6656_v58 = vmul.f32 1.442695, %v6645_v34 }
0x2062   : > { %11289 = vpow2.f32 %v6656_v58 }
0x2063   : > { %v6622_v61 = vpop.xlane.xlu0 %6621 }
0x2064   : > { %v6646_v19 = vsub.f32 %v6526_v18, %v6622_v61 }
0x2065   : > { %v6625_v52 = vpop.xlane.xlu1 %6624 }
0x2066   : > { %v6658_v37 = vmul.f32 1.442695, %v6646_v19  ;;  %v6647_v47 = vsub.f32 %v6529_v42, %v6625_v52 }
0x2068   : > { %11291 = vpow2.f32 %v6658_v37  ;;  %v6660_v5 = vmul.f32 1.442695, %v6647_v47 }
0x206a   : > { %v14070_v14 = vpop.eup %11287  ;;  %11293 = vpow2.f32 %v6660_v5 }
0x206b   : > { %v6628_v46 = vpop.xlane.xlu0 %6627  ;;  %v6674_v50 = vsel %vm1046_vm6, %v14070_v14, 0.0 }
0x206c   : > { %v11290_v3 = vpop.eup %11289  ;;  %v6648_v22 = vsub.f32 %v6534_v16, %v6628_v46  ;;  %6675 = vadd.xlane.f32.xlu0 %v6674_v50 }
0x206d   : > { %v6677_v21 = vsel %vm1046_vm6, %v11290_v3, 0.0 }
0x206e   : > { %v6662_v0 = vmul.f32 1.442695, %v6648_v22  ;;  %6678 = vadd.xlane.f32.xlu1 %v6677_v21 }
0x2070   : > { %11295 = vpow2.f32 %v6662_v0 }
0x2071   : > { %v6631_v18 = vpop.xlane.xlu1 %6630 }
0x2072   : > { %v11292_v48 = vpop.eup %11291  ;;  %v6649_v42 = vsub.f32 %v6592_v6, %v6631_v18 }
0x2073   : > { %v6634_v38 = vpop.xlane.xlu0 %6633  ;;  %v6680_v31 = vsel %vm1046_vm6, %v11292_v48, 0.0 }
0x2074   : > { %v11294_v63 = vpop.eup %11293  ;;  %v6664_v4 = vmul.f32 1.442695, %v6649_v42  ;;  %v6650_v30 = vsub.f32 %v6595_v44, %v6634_v38  ;;  %6681 = vadd.xlane.f32.xlu0 %v6680_v31 }
0x2075   : > { %v6683_v28 = vsel %vm1046_vm6, %v11294_v63, 0.0 }
0x2076   : > { %11297 = vpow2.f32 %v6664_v4  ;;  %v6666_v16 = vmul.f32 1.442695, %v6650_v30  ;;  %6684 = vadd.xlane.f32.xlu1 %v6683_v28 }
0x2078   : > { %11299 = vpow2.f32 %v6666_v16 }
0x2079   : > { %v6637_v29 = vpop.xlane.xlu1 %6636 }
0x207a   : > { %v11296_v62 = vpop.eup %11295  ;;  %v6651_v41 = vsub.f32 %v6600_v8, %v6637_v29 }
0x207b   : > { %v6640_v25 = vpop.xlane.xlu0 %6639  ;;  %v6686_v12 = vsel %vm1046_vm6, %v11296_v62, 0.0 }
0x207c   : > { %v6668_v6 = vmul.f32 1.442695, %v6651_v41  ;;  %v6652_v24 = vsub.f32 %v6603_v13, %v6640_v25  ;;  %6687 = vadd.xlane.f32.xlu0 %v6686_v12 }
0x207e   : > { %11301 = vpow2.f32 %v6668_v6  ;;  %v6670_v57 = vmul.f32 1.442695, %v6652_v24 }
0x2080   : > { %v11298_v54 = vpop.eup %11297  ;;  %11303 = vpow2.f32 %v6670_v57 }
0x2081   : > { %v6643_v44 = vpop.xlane.xlu1 %6642  ;;  %v6689_v51 = vsel %vm1046_vm6, %v11298_v54, 0.0 }
0x2082   : > { %v11300_v34 = vpop.eup %11299  ;;  %v6653_v58 = vsub.f32 %v14066_v39, %v6643_v44  ;;  %6690 = vadd.xlane.f32.xlu1 %v6689_v51  ;;  %v10995_v51 = vld [vmem:[%s14808_s3 + $0xf0] sm:$0xff]  }
0x2083   : > { %v6692_v61 = vsel %vm1046_vm6, %v11300_v34, 0.0 }
0x2084   : > { %v6672_v8 = vmul.f32 1.442695, %v6653_v58  ;;  %6693 = vadd.xlane.f32.xlu0 %v6692_v61 }
0x2086   : > { %11305 = vpow2.f32 %v6672_v8  ;;  %v10996_v8 = vld [vmem:[%s14808_s3 + $0xf8] sm:$0xff]  }
0x2088   : > { %v11302_v19 = vpop.eup %11301 }
0x2089   : > { %v6695_v13 = vsel %vm1046_vm6, %v11302_v19, 0.0 }
0x208a   : > { %v11304_v52 = vpop.eup %11303  ;;  %6696 = vadd.xlane.f32.xlu1 %v6695_v13 }
0x208b   : > { %v6698_v37 = vsel %vm1046_vm6, %v11304_v52, 0.0 }
0x208c   : > { %6699 = vadd.xlane.f32.xlu0 %v6698_v37 }
0x2090   : > { %v14083_v47 = vpop.eup %11305 }
0x2091   : > { %v6701_v5 = vsel %vm1046_vm6, %v14083_v47, 0.0 }
0x2092   : > { %6702 = vadd.xlane.f32.xlu1 %v6701_v5 }
0x20f9   : > { %v6676_v39 = vpop.xlane.xlu0 %6675 }
0x20fa   : > { %11307 = vrcp.f32 %v6676_v39 }
0x20fb   : > { %v6679_v46 = vpop.xlane.xlu1 %6678 }
0x20fc   : > { %11309 = vrcp.f32 %v6679_v46 }
0x2101   : > { %v6682_v50 = vpop.xlane.xlu0 %6681 }
0x2102   : > { %11311 = vrcp.f32 %v6682_v50 }
0x2103   : > { %v6685_v22 = vpop.xlane.xlu1 %6684 }
0x2104   : > { %v11308_v21 = vpop.eup %11307  ;;  %11313 = vrcp.f32 %v6685_v22 }
0x2105   : > { %v6705_v18 = vmul.f32 %v11308_v21, %v14070_v14 }
0x2106   : > { %v11310_v0 = vpop.eup %11309 }
0x2107   : > { %v6707_v42 = vmul.f32 %v11310_v0, %v11290_v3 }
0x2109   : > { %v6724_v38 = vpack.c.bf16 %v6707_v42, %v6705_v18  ;;  %v6688_v31 = vpop.xlane.xlu0 %6687  ;;  %v10999_v18 = vld [vmem:[%s14808_s3 + $0x130] sm:$0xff]  }
0x210a   : > { %11315 = vrcp.f32 %v6688_v31  ;;  %v11000_v31 = vld [vmem:[%s14808_s3 + $0x138] sm:$0xff]  }
0x210b   : > { %10663 = vmatmul.mubr.msk.bf16.vlgmr.msra.gmra.mrb[184].mxu1 %vm1046_vm6, %v6724_v38 }
0x210c   : > { %v11312_v4 = vpop.eup %11311  ;;  %10666 = vmatprep.mubr.msk.bf16.mxu1 %vm11416_vm2, %v11415_v2 }
0x210d   : > { %v6709_v28 = vmul.f32 %v11312_v4, %v11292_v48 }
0x210e   : > { %v11314_v30 = vpop.eup %11313 }
0x210f   : > { %v6711_v16 = vmul.f32 %v11314_v30, %v11294_v63  ;;  %v6691_v29 = vpop.xlane.xlu1 %6690 }
0x2110   : > { %11317 = vrcp.f32 %v6691_v29 }
0x2111   : > { %v6725_v41 = vpack.c.bf16 %v6711_v16, %v6709_v28  ;;  %v6694_v25 = vpop.xlane.xlu0 %6693 }
0x2112   : > { %11319 = vrcp.f32 %v6694_v25 }
0x2113   : > { %10667 = vmatmul.mubr.msk.bf16.gmra.mrb[188].mxu1 %vm1046_vm6, %v6725_v41 }
0x2114   : > { %v11316_v14 = vpop.eup %11315  ;;  %10670 = vmatprep.mubr.msk.bf16.mxu1 %vm11416_vm2, %v11415_v2 }
0x2115   : > { %v6713_v3 = vmul.f32 %v11316_v14, %v11296_v62 }
0x2117   : > { %v6697_v12 = vpop.xlane.xlu1 %6696  ;;  %v6726_v6 = vpack.c.bf16 %v6713_v3, %v6713_v3 }
0x2118   : > { %11321 = vrcp.f32 %v6697_v12 }
0x2119   : > { %v6700_v24 = vpop.xlane.xlu0 %6699 }
0x211a   : > { %v11318_v57 = vpop.eup %11317  ;;  %11323 = vrcp.f32 %v6700_v24 }
0x211b   : > { %10671 = vmatmul.mubr.msk.bf16.gmra.mrb[192].mxu1 %vm1046_vm6, %v6726_v6  ;;  %v6715_v63 = vmul.f32 %v11318_v57, %v11298_v54 }
0x211c   : > { %v11320_v48 = vpop.eup %11319  ;;  %10694 = vmatprep.mubr.msk.bf16.mxu1 %vm11416_vm2, %v11415_v2 }
0x211d   : > { %v6717_v44 = vmul.f32 %v11320_v48, %v11300_v34 }
0x211f   : > { %v6727_v58 = vpack.c.bf16 %v6717_v44, %v6715_v63  ;;  %v6703_v62 = vpop.xlane.xlu1 %6702 }
0x2120   : > { %11325 = vrcp.f32 %v6703_v62 }
0x2121   : > { %10681 = vmatmul.mubr.msk.bf16.vlgmr.msra.gmra.mrb[208].mxu0 %vm1046_vm6, %v6727_v58 }
0x2122   : > { %v11322_v61 = vpop.eup %11321  ;;  %10684 = vmatprep.mubr.msk.bf16.mxu0 %vm11416_vm2, %v11415_v2  ;;  %10715 = vmatpush3.bf16.msra.mxu0 %v10995_v51 }
0x2123   : > { %10716 = vmatprep.subr.bf16.mxu0 %v11415_v2  ;;  %v6719_v34 = vmul.f32 %v11322_v61, %v11302_v19  ;;  %v10997_v19 = vld [vmem:[%s14808_s3 + $0x170] sm:$0xff]  }
0x2124   : > { %v11324_v54 = vpop.eup %11323 }
0x2125   : > { %v6721_v13 = vmul.f32 %v11324_v54, %v11304_v52  ;;  %v10998_v52 = vld [vmem:[%s14808_s3 + $0x178] sm:$0xff]  }
0x2126   : > { %10717 = vmatpush3.bf16.msra.mxu0 %v10996_v8 }
0x2127   : > { %v6728_v37 = vpack.c.bf16 %v6721_v13, %v6719_v34  ;;  %10762 = vmatprep.subr.bf16.mxu0 %v11415_v2 }
0x2129   : > { %10685 = vmatmul.mubr.msk.bf16.gmra.mrb[212].mxu0 %vm1046_vm6, %v6728_v37  ;;  %v14194_v37 = vld [vmem:[%s14809_s4 + $0xf] ss:$0 sm:$0xff] }
0x212a   : > { %v11326_v5 = vpop.eup %11325  ;;  %10688 = vmatprep.mubr.msk.bf16.mxu0 %vm11416_vm2, %v11415_v2 }
0x212b   : > { %v6723_v39 = vmul.f32 %v11326_v5, %v14083_v47  ;;  %v8927_v47 = vld [vmem:[%s14810_s5 + $0x18] sm:$0xf] }
0x212c   : > { %v6889_v50 = vsel %vm1172_vm5, %v8927_v47, 0 }
0x212d   : > { %v6729_v46 = vpack.c.bf16 %v6723_v39, %v6723_v39  ;;  %10693 = vmatpush3.bf16.msra.mxu1 %v6889_v50 }
0x212e   : > { %10738 = vmatprep.subr.bf16.mxu1 %v11415_v2 }
0x2131   : > { %10689 = vmatmul.mubr.msk.bf16.gmra.mrb[216].mxu0 %vm1046_vm6, %v6729_v46 }
0x2132   : > { %10718 = vmatprep.mubr.msk.bf16.mxu0 %vm11416_vm2, %v11415_v2 }
0x2139   : > { %10719 = vmatmul.mubr.msk.bf16.vlgmr.msra.gmra.mrb[220].mxu0 %vm594_vm3, %v13182_v59 }
0x213a   : > { %10722 = vmatprep.mubr.msk.bf16.mxu0 %vm11416_vm2, %v11415_v2  ;;  %10763 = vmatpush3.bf16.msra.mxu0 %v10997_v19 }
0x213b   : > { %10764 = vmatprep.subr.bf16.mxu0 %v11415_v2 }
0x213e   : > { %10765 = vmatpush3.bf16.msra.mxu0 %v10998_v52 }
0x213f   : > { %10804 = vmatprep.subr.bf16.mxu0 %v11415_v2 }
0x2141   : > { %10723 = vmatmul.mubr.msk.bf16.gmra.mrb[224].mxu0 %vm594_vm3, %v13211_v17 }
0x2142   : > { %10726 = vmatprep.mubr.msk.bf16.mxu0 %vm11416_vm2, %v11415_v2 }
0x2149   : > { %10727 = vmatmul.mubr.msk.bf16.gmra.mrb[228].mxu0 %vm594_vm3, %v13234_v36 }
0x214a   : > { %10730 = vmatprep.mubr.msk.bf16.mxu0 %vm11416_vm2, %v11415_v2 }
0x2151   : > { %10731 = vmatmul.mubr.msk.bf16.gmra.mrb[232].mxu0 %vm594_vm3, %v13256_v43 }
0x2152   : > { %10734 = vmatprep.mubr.msk.bf16.mxu0 %vm11416_vm2, %v11415_v2 }
0x2159   : > { %10735 = vmatmul.mubr.msk.bf16.gmra.mrb[236].mxu0 %vm594_vm3, %v13278_v27 }
0x215a   : > { %10766 = vmatprep.mubr.msk.bf16.mxu0 %vm11416_vm2, %v11415_v2 }
0x2161   : > { %10767 = vmatmul.mubr.msk.bf16.vlgmr.msra.gmra.mrb[240].mxu0 %vm594_vm3, %v13182_v59 }
0x2162   : > { %10770 = vmatprep.mubr.msk.bf16.mxu0 %vm11416_vm2, %v11415_v2 }
0x2169   : > { %10771 = vmatmul.mubr.msk.bf16.gmra.mrb[244].mxu0 %vm594_vm3, %v13211_v17 }
0x216a   : > { %10774 = vmatprep.mubr.msk.bf16.mxu0 %vm11416_vm2, %v11415_v2 }
0x2171   : > { %10775 = vmatmul.mubr.msk.bf16.gmra.mrb[248].mxu0 %vm594_vm3, %v13234_v36 }
0x2172   : > { %10778 = vmatprep.mubr.msk.bf16.mxu0 %vm11416_vm2, %v11415_v2 }
0x2179   : > { %10779 = vmatmul.mubr.msk.bf16.gmra.mrb[252].mxu0 %vm594_vm3, %v13256_v43 }
0x217a   : > { %10782 = vmatprep.mubr.msk.bf16.mxu0 %vm11416_vm2, %v11415_v2 }
0x2181   : > { %10783 = vmatmul.mubr.msk.bf16.gmra.mrb[0].mxu0 %vm594_vm3, %v13278_v27 }
0x2182   : > { %10810 = vmatprep.mubr.msk.bf16.mxu0 %vm11416_vm2, %v11415_v2 }
0x21de   : > { %v6776_v22 = vpop.f32.mrb[184].mxu1 }
0x21df   : > { %v10664_v21 = vpop.f32.mrb[185].mxu1 }
0x21e0   : > { %v6779_v0 = vpop.f32.mrb[186].mxu1 }
0x21e1   : > { %v6866_v42 = vpack.c.bf16 %v6779_v0, %v6776_v22  ;;  %v10665_v38 = vpop.f32.mrb[187].mxu1 }
0x21e3   : > { %10695 = vmatmul.mubr.msk.bf16.vlgmr.msra.gmra.mrb[196].mxu1 %vm897_vm4, %v6866_v42 }
0x21e4   : > { %10698 = vmatprep.mubr.msk.bf16.mxu1 %vm11416_vm2, %v11415_v2  ;;  %10739 = vmatpush3.bf16.msra.mxu1 %v10999_v18 }
0x21e5   : > { %10740 = vmatprep.subr.bf16.mxu1 %v11415_v2 }
0x21e6   : > { %v6784_v4 = vpop.f32.mrb[188].mxu1 }
0x21e7   : > { %v10668_v30 = vpop.f32.mrb[189].mxu1 }
0x21e8   : > { %v6787_v28 = vpop.f32.mrb[190].mxu1  ;;  %10741 = vmatpush3.bf16.msra.mxu1 %v11000_v31 }
0x21e9   : > { %v6867_v16 = vpack.c.bf16 %v6787_v28, %v6784_v4  ;;  %v10669_v29 = vpop.f32.mrb[191].mxu1  ;;  %10786 = vmatprep.subr.bf16.mxu1 %v11415_v2 }
0x21eb   : > { %10699 = vmatmul.mubr.msk.bf16.gmra.mrb[200].mxu1 %vm897_vm4, %v6867_v16 }
0x21ec   : > { %10702 = vmatprep.mubr.msk.bf16.mxu1 %vm11416_vm2, %v11415_v2 }
0x21ee   : > { %v6792_v41 = vpop.f32.mrb[192].mxu1 }
0x21ef   : > { %v10672_v25 = vpop.f32.mrb[193].mxu1 }
0x21f0   : > { %v6795_v14 = vpop.f32.mrb[194].mxu1 }
0x21f1   : > { %v10673_v3 = vpop.f32.mrb[195].mxu1 }
0x21f4   : > { %v6844_v12 = vpop.f32.mrb[208].mxu0 }
0x21f5   : > { %v6868_v6 = vpack.c.bf16 %v6844_v12, %v6792_v41  ;;  %v10682_v24 = vpop.f32.mrb[209].mxu0 }
0x21f6   : > { %v6847_v57 = vpop.f32.mrb[210].mxu0 }
0x21f7   : > { %v10683_v48 = vpop.f32.mrb[211].mxu0  ;;  %10703 = vmatmul.mubr.msk.bf16.gmra.mrb[204].mxu1 %vm897_vm4, %v6868_v6 }
0x21f8   : > { %10706 = vmatprep.mubr.msk.bf16.mxu1 %vm11416_vm2, %v11415_v2 }
0x21fc   : > { %v6852_v63 = vpop.f32.mrb[212].mxu0 }
0x21fd   : > { %v6869_v44 = vpack.c.bf16 %v6852_v63, %v6847_v57  ;;  %v10686_v51 = vpop.f32.mrb[213].mxu0 }
0x21fe   : > { %v6855_v58 = vpop.f32.mrb[214].mxu0 }
0x21ff   : > { %v10687_v62 = vpop.f32.mrb[215].mxu0  ;;  %10707 = vmatmul.mubr.msk.bf16.gmra.mrb[208].mxu1 %vm897_vm4, %v6869_v44 }
0x2200   : > { %10710 = vmatprep.mubr.msk.bf16.mxu1 %vm11416_vm2, %v11415_v2 }
0x2204   : > { %v6860_v61 = vpop.f32.mrb[216].mxu0 }
0x2205   : > { %v6870_v8 = vpack.c.bf16 %v6860_v61, %v6855_v58  ;;  %v10690_v54 = vpop.f32.mrb[217].mxu0 }
0x2206   : > { %v6863_v34 = vpop.f32.mrb[218].mxu0 }
0x2207   : > { %v10691_v13 = vpop.f32.mrb[219].mxu0  ;;  %10711 = vmatmul.mubr.msk.bf16.gmra.mrb[212].mxu1 %vm897_vm4, %v6870_v8 }
0x2208   : > { %10742 = vmatprep.mubr.msk.bf16.mxu1 %vm11416_vm2, %v11415_v2 }
0x220c   : > { %v7033_v5 = vpop.f32.mrb[220].mxu0 }
0x220d   : > { %v10720_v39 = vpop.f32.mrb[221].mxu0  ;;  %v14197_v19 = vadd.f32 %v14194_v37, %v7033_v5 }
0x220e   : > { %v7036_v46 = vpop.f32.mrb[222].mxu0 }
0x220f   : > { %v14200_v52 = vadd.f32 %v14194_v37, %v7036_v46  ;;  %v10721_v47 = vpop.f32.mrb[223].mxu0  ;;  %10743 = vmatmul.mubr.msk.bf16.vlgmr.msra.gmra.mrb[216].mxu1 %vm594_vm3, %v13182_v59 }
0x2210   : > { %10746 = vmatprep.mubr.msk.bf16.mxu1 %vm11416_vm2, %v11415_v2 }
0x2211   : > { %v7268_v50 = vpack.c.bf16 %v14200_v52, %v14197_v19 }
0x2214   : > { %v7041_v22 = vpop.f32.mrb[224].mxu0 }
0x2215   : > { %v10724_v21 = vpop.f32.mrb[225].mxu0  ;;  %v14209_v18 = vadd.f32 %v14194_v37, %v7041_v22 }
0x2216   : > { %v7044_v0 = vpop.f32.mrb[226].mxu0 }
0x2217   : > { %v14212_v42 = vadd.f32 %v14194_v37, %v7044_v0  ;;  %v10725_v38 = vpop.f32.mrb[227].mxu0  ;;  %10747 = vmatmul.mubr.msk.bf16.gmra.mrb[220].mxu1 %vm594_vm3, %v13211_v17 }
0x2218   : > { %10750 = vmatprep.mubr.msk.bf16.mxu1 %vm11416_vm2, %v11415_v2 }
0x2219   : > { %v7269_v59 = vpack.c.bf16 %v14212_v42, %v14209_v18 }
0x221c   : > { %v14220_v31 = vpop.f32.mrb[228].mxu0 }
0x221d   : > { %v10728_v4 = vpop.f32.mrb[229].mxu0 }
0x221e   : > { %v7052_v30 = vpop.f32.mrb[230].mxu0 }
0x221f   : > { %v10729_v28 = vpop.f32.mrb[231].mxu0  ;;  %10751 = vmatmul.mubr.msk.bf16.gmra.mrb[224].mxu1 %vm594_vm3, %v13234_v36  ;;  %v14227_v17 = vadd.f32 %v14194_v37, %v7052_v30 }
0x2220   : > { %10754 = vmatprep.mubr.msk.bf16.mxu1 %vm11416_vm2, %v11415_v2 }
0x2224   : > { %v7057_v16 = vpop.f32.mrb[232].mxu0 }
0x2225   : > { %v14230_v29 = vadd.f32 %v14194_v37, %v7057_v16  ;;  %v10732_v41 = vpop.f32.mrb[233].mxu0 }
0x2226   : > { %v7060_v25 = vpop.f32.mrb[234].mxu0 }
0x2227   : > { %v7271_v14 = vpack.c.bf16 %v14230_v29, %v14227_v17  ;;  %v10733_v3 = vpop.f32.mrb[235].mxu0  ;;  %10755 = vmatmul.mubr.msk.bf16.gmra.mrb[228].mxu1 %vm594_vm3, %v13256_v43  ;;  %v14239_v12 = vadd.f32 %v14194_v37, %v7060_v25  ;;  %v14255_v43 = vld [vmem:[%s14809_s4 + $0x17] ss:$0 sm:$0xff] }
0x2228   : > { %10758 = vmatprep.mubr.msk.bf16.mxu1 %vm11416_vm2, %v11415_v2 }
0x222c   : > { %v7065_v36 = vpop.f32.mrb[236].mxu0 }
0x222d   : > { %v14242_v6 = vadd.f32 %v14194_v37, %v7065_v36  ;;  %v10736_v24 = vpop.f32.mrb[237].mxu0 }
0x222e   : > { %v14244_v57 = vpop.f32.mrb[238].mxu0 }
0x222f   : > { %v10737_v63 = vpop.f32.mrb[239].mxu0  ;;  %10759 = vmatmul.mubr.msk.bf16.gmra.mrb[232].mxu1 %vm594_vm3, %v13278_v27  ;;  %v14858_v29 = vpack.c.bf16 %v14242_v6, %v14239_v12 }
0x2230   : > { %10792 = vmatprep.mubr.msk.bf16.mxu1 %vm11416_vm2, %v11415_v2 }
0x2234   : > { %v7229_v44 = vpop.f32.mrb[240].mxu0 }
0x2235   : > { %v10768_v51 = vpop.f32.mrb[241].mxu0  ;;  %v14258_v62 = vadd.f32 %v14255_v43, %v7229_v44 }
0x2236   : > { %v7232_v58 = vpop.f32.mrb[242].mxu0 }
0x2237   : > { %v14261_v61 = vadd.f32 %v14255_v43, %v7232_v58  ;;  %v10769_v8 = vpop.f32.mrb[243].mxu0 }
0x2239   : > { %v7280_v27 = vpack.c.bf16 %v14261_v61, %v14258_v62 }
0x223c   : > { %v7237_v54 = vpop.f32.mrb[244].mxu0 }
0x223d   : > { %v10772_v34 = vpop.f32.mrb[245].mxu0  ;;  %v14266_v5 = vadd.f32 %v14255_v43, %v7237_v54 }
0x223e   : > { %v7240_v13 = vpop.f32.mrb[246].mxu0 }
0x223f   : > { %v14269_v39 = vadd.f32 %v14255_v43, %v7240_v13  ;;  %v10773_v46 = vpop.f32.mrb[247].mxu0 }
0x2241   : > { %v7281_v47 = vpack.c.bf16 %v14269_v39, %v14266_v5 }
0x2244   : > { %v14273_v22 = vpop.f32.mrb[248].mxu0 }
0x2245   : > { %v10776_v21 = vpop.f32.mrb[249].mxu0 }
0x2246   : > { %v7248_v0 = vpop.f32.mrb[250].mxu0 }
0x2247   : > { %v10777_v38 = vpop.f32.mrb[251].mxu0  ;;  %v14276_v30 = vadd.f32 %v14255_v43, %v7248_v0 }
0x224c   : > { %v7253_v4 = vpop.f32.mrb[252].mxu0 }
0x224d   : > { %v14279_v28 = vadd.f32 %v14255_v43, %v7253_v4  ;;  %v10780_v16 = vpop.f32.mrb[253].mxu0 }
0x224e   : > { %v7256_v41 = vpop.f32.mrb[254].mxu0 }
0x224f   : > { %v10781_v3 = vpop.f32.mrb[255].mxu0  ;;  %v14284_v24 = vadd.f32 %v14255_v43, %v7256_v41  ;;  %v14856_v42 = vpack.c.bf16 %v14279_v28, %v14276_v30 }
0x2254   : > { %v7261_v36 = vpop.f32.mrb[0].mxu0 }
0x2255   : > { %v14287_v63 = vadd.f32 %v14255_v43, %v7261_v36  ;;  %v10784_v44 = vpop.f32.mrb[1].mxu0 }
0x2256   : > { %v14289_v51 = vpop.f32.mrb[2].mxu0 }
0x2257   : > { %v10785_v8 = vpop.f32.mrb[3].mxu0  ;;  %v7265_v18 = vadd.f32 %v14255_v43, %v14289_v51 }
0x22b6   : > { %v6925_v54 = vpop.f32.mrb[196].mxu1 }
0x22b7   : > { %v14294_v34 = vadd.f32 %v6925_v54, %v13956_v45  ;;  %v10696_v13 = vpop.f32.mrb[197].mxu1 }
0x22b8   : > { %v6928_v46 = vpop.f32.mrb[198].mxu1 }
0x22b9   : > { %v14297_v21 = vadd.f32 %v6928_v46, %v13958_v40  ;;  %v10697_v0 = vpop.f32.mrb[199].mxu1 }
0x22be   : > { %v6933_v38 = vpop.f32.mrb[200].mxu1 }
0x22bf   : > { %v14300_v4 = vadd.f32 %v6933_v38, %v13962_v23  ;;  %v10700_v16 = vpop.f32.mrb[201].mxu1 }
0x22c0   : > { %v6936_v41 = vpop.f32.mrb[202].mxu1 }
0x22c1   : > { %v14303_v3 = vadd.f32 %v6936_v41, %v13964_v55  ;;  %v10701_v36 = vpop.f32.mrb[203].mxu1 }
0x22ca   : > { %v6941_v44 = vpop.f32.mrb[204].mxu1 }
0x22cb   : > { %v14306_v45 = vadd.f32 %v6941_v44, %v13968_v56  ;;  %v10704_v8 = vpop.f32.mrb[205].mxu1 }
0x22cc   : > { %v6944_v54 = vpop.f32.mrb[206].mxu1 }
0x22cd   : > { %v14309_v40 = vadd.f32 %v6944_v54, %v13970_v9  ;;  %v10705_v13 = vpop.f32.mrb[207].mxu1 }
0x22d2   : > { %v6949_v46 = vpop.f32.mrb[208].mxu1 }
0x22d3   : > { %v14312_v23 = vadd.f32 %v6949_v46, %v13974_v26  ;;  %v10708_v0 = vpop.f32.mrb[209].mxu1  ;;  %v8951_v26 = vld [vmem:[%s14809_s4 + $0x13] ss:$0 sm:$0xff] }
0x22d4   : > { %v6952_v38 = vpop.f32.mrb[210].mxu1 }
0x22d5   : > { %v14315_v55 = vadd.f32 %v6952_v38, %v13976_v15  ;;  %v10709_v16 = vpop.f32.mrb[211].mxu1 }
0x22da   : > { %v6957_v41 = vpop.f32.mrb[212].mxu1 }
0x22db   : > { %v14318_v56 = vadd.f32 %v6957_v41, %v13980_v7  ;;  %v10712_v36 = vpop.f32.mrb[213].mxu1 }
0x22dc   : > { %v6960_v44 = vpop.f32.mrb[214].mxu1 }
0x22dd   : > { %v14321_v9 = vadd.f32 %v6960_v44, %v13982_v10  ;;  %v10713_v8 = vpop.f32.mrb[215].mxu1 }
0x22e2   : > { %v7131_v54 = vpop.f32.mrb[216].mxu1 }
0x22e3   : > { %v10744_v13 = vpop.f32.mrb[217].mxu1  ;;  %v7132_v15 = vadd.f32 %v8951_v26, %v7131_v54 }
0x22e4   : > { %v7134_v46 = vpop.f32.mrb[218].mxu1 }
0x22e5   : > { %v7135_v0 = vadd.f32 %v8951_v26, %v7134_v46  ;;  %v10745_v38 = vpop.f32.mrb[219].mxu1 }
0x22e7   : > { %v7274_v16 = vpack.c.bf16 %v7135_v0, %v7132_v15 }
0x22e9   : > { %v7296_v7 = vsel %vm897_vm4, %v7274_v16, 0 }
0x22ea   : > { %v7139_v41 = vpop.f32.mrb[220].mxu1  ;;  %10787 = vmatpush3.bf16.xpose.msra.mxu1 %v7296_v7 }
0x22eb   : > { %v10748_v36 = vpop.f32.mrb[221].mxu1  ;;  %10788 = vmatprep.subr.bf16.mxu1 %v11415_v2  ;;  %v7140_v44 = vadd.f32 %v8951_v26, %v7139_v41 }
0x22ec   : > { %v7142_v10 = vpop.f32.mrb[222].mxu1 }
0x22ed   : > { %v7143_v8 = vadd.f32 %v8951_v26, %v7142_v10  ;;  %v10749_v48 = vpop.f32.mrb[223].mxu1 }
0x22ef   : > { %v7275_v58 = vpack.c.bf16 %v7143_v8, %v7140_v44  ;;  %v7246_v8 = vadd.f32 %v14255_v43, %v14273_v22 }
0x22f1   : > { %v7299_v25 = vsel %vm897_vm4, %v7275_v58, 0 }
0x22f2   : > { %v7147_v13 = vpop.f32.mrb[224].mxu1  ;;  %10789 = vmatpush3.bf16.xpose.msra.mxu1 %v7299_v25 }
0x22f3   : > { %v7148_v54 = vadd.f32 %v8951_v26, %v7147_v13  ;;  %v10752_v46 = vpop.f32.mrb[225].mxu1  ;;  %10790 = vmatprep.subr.bf16.mxu1 %v11415_v2 }
0x22f4   : > { %v7150_v15 = vpop.f32.mrb[226].mxu1 }
0x22f5   : > { %v7276_v0 = vpack.c.bf16 %v7148_v54, %v7148_v54  ;;  %v10753_v38 = vpop.f32.mrb[227].mxu1  ;;  %v7151_v36 = vadd.f32 %v8951_v26, %v7150_v15 }
0x22f7   : > { %v7302_v16 = vsel %vm897_vm4, %v7276_v0, 0  ;;  %v7282_v0 = vpack.c.bf16 %v7246_v8, %v7246_v8 }
0x22f9   : > { %v7560_v61 = vsel %vm1172_vm5, %v7282_v0, 0 }
0x22fa   : > { %v7155_v7 = vpop.f32.mrb[228].mxu1  ;;  %10791 = vmatpush3.bf16.xpose.msra.mxu1 %v7302_v16 }
0x22fb   : > { %v7156_v41 = vadd.f32 %v8951_v26, %v7155_v7  ;;  %v10756_v10 = vpop.f32.mrb[229].mxu1  ;;  %10822 = vmatprep.subr.bf16.mxu1 %v11415_v2 }
0x22fc   : > { %v7158_v48 = vpop.f32.mrb[230].mxu1 }
0x22fd   : > { %v7277_v58 = vpack.c.bf16 %v7156_v41, %v7151_v36  ;;  %v10757_v44 = vpop.f32.mrb[231].mxu1  ;;  %v7159_v54 = vadd.f32 %v8951_v26, %v7158_v48 }
0x22ff   : > { %v7370_v25 = vsel %vm897_vm4, %v7277_v58, 0 }
0x2300   : > { %10805 = vmatpush3.bf16.xpose.msra.mxu0 %v7370_v25 }
0x2301   : > { %10793 = vmatmul.mubr.msk.bf16.vlgmr.msra.gmra.mrb[236].mxu1 %vm897_vm4, %v7268_v50  ;;  %10806 = vmatprep.subr.bf16.mxu0 %v11415_v2 }
0x2302   : > { %v7163_v13 = vpop.f32.mrb[232].mxu1  ;;  %10823 = vmatpush3.bf16.msra.mxu1 %v7280_v27  ;;  %10796 = vmatprep.mubr.msk.bf16.mxu1 %vm11416_vm2, %v11415_v2  ;;  %v7050_v27 = vadd.f32 %v14194_v37, %v14220_v31  ;;  %v14857_v31 = vpack.c.bf16 %v14287_v63, %v14284_v24 }
0x2303   : > { %v7164_v46 = vadd.f32 %v8951_v26, %v7163_v13  ;;  %v10760_v15 = vpop.f32.mrb[233].mxu1  ;;  %10824 = vmatprep.subr.bf16.mxu1 %v11415_v2 }
0x2304   : > { %v7166_v22 = vpop.f32.mrb[234].mxu1  ;;  %v7270_v39 = vpack.c.bf16 %v7050_v27, %v7050_v27 }
0x2305   : > { %v7278_v19 = vpack.c.bf16 %v7164_v46, %v7159_v54  ;;  %v10761_v52 = vpop.f32.mrb[235].mxu1  ;;  %v7167_v50 = vadd.f32 %v8951_v26, %v7166_v22 }
0x2306   : > { %10825 = vmatpush3.bf16.msra.mxu1 %v7281_v47 }
0x2307   : > { %v7373_v62 = vsel %vm897_vm4, %v7278_v19, 0  ;;  %10826 = vmatprep.subr.bf16.mxu1 %v11415_v2  ;;  %v7279_v5 = vpack.c.bf16 %v7167_v50, %v7167_v50 }
0x2308   : > { %10807 = vmatpush3.bf16.xpose.msra.mxu0 %v7373_v62 }
0x2309   : > { %10797 = vmatmul.mubr.msk.bf16.gmra.mrb[240].mxu1 %vm897_vm4, %v7269_v59  ;;  %10808 = vmatprep.subr.bf16.mxu0 %v11415_v2  ;;  %v7376_v47 = vsel %vm897_vm4, %v7279_v5, 0  ;;  %v7285_v59 = vpack.c.bf16 %v7265_v18, %v7265_v18 }
0x230a   : > { %10827 = vmatpush3.bf16.msra.mxu1 %v7560_v61  ;;  %10800 = vmatprep.mubr.msk.bf16.mxu1 %vm11416_vm2, %v11415_v2 }
0x230b   : > { %10858 = vmatprep.subr.bf16.mxu1 %v11415_v2  ;;  %v7628_v17 = vsel %vm1172_vm5, %v7285_v59, 0 }
0x2310   : > { %10809 = vmatpush3.bf16.xpose.msra.mxu0 %v7376_v47 }
0x2311   : > { %10801 = vmatmul.mubr.msk.bf16.gmra.mrb[244].mxu1 %vm897_vm4, %v7270_v39  ;;  %10840 = vmatprep.subr.bf16.mxu0 %v11415_v2 }
0x2312   : > { %10828 = vmatprep.mubr.msk.bf16.mxu1 %vm11416_vm2, %v11415_v2 }
0x2317   : > { %10811 = vmatmul.mubr.msk.bf16.vlgmr.msra.gmra.mrb[4].mxu0 %vm897_vm4, %v7271_v14  ;;  %v7069_v14 = vadd.f32 %v14194_v37, %v14244_v57 }
0x2318   : > { %10841 = vmatpush3.bf16.msra.mxu0 %v14856_v42  ;;  %10814 = vmatprep.mubr.msk.bf16.mxu0 %vm11416_vm2, %v11415_v2 }
0x2319   : > { %10842 = vmatprep.subr.bf16.mxu0 %v11415_v2  ;;  %v7273_v43 = vpack.c.bf16 %v7069_v14, %v7069_v14 }
0x231c   : > { %10843 = vmatpush3.bf16.msra.mxu0 %v14857_v31 }
0x231d   : > { %10844 = vmatprep.subr.bf16.mxu0 %v11415_v2 }
0x231f   : > { %10815 = vmatmul.mubr.msk.bf16.gmra.mrb[8].mxu0 %vm897_vm4, %v14858_v29 }
0x2320   : > { %10845 = vmatpush3.bf16.msra.mxu0 %v7628_v17  ;;  %10818 = vmatprep.mubr.msk.bf16.mxu0 %vm11416_vm2, %v11415_v2 }
0x2321   : > { %10880 = vmatprep.subr.bf16.mxu0 %v11415_v2 }
0x2327   : > { %10819 = vmatmul.mubr.msk.bf16.gmra.mrb[12].mxu0 %vm897_vm4, %v7273_v43 }
0x2328   : > { %10846 = vmatprep.mubr.msk.bf16.mxu0 %vm11416_vm2, %v11415_v2 }
0x23d4   : > { %v7338_v30 = vpop.f32.mrb[236].mxu1 }
0x23d5   : > { %v10794_v28 = vpop.f32.mrb[237].mxu1  ;;  %v7434_v12 = vsel %vm1046_vm6, %v7338_v30, -inf }
0x23d6   : > { %7435 = vmax.xlane.f32.xlu0 %v7434_v12  ;;  %v7341_v6 = vpop.f32.mrb[238].mxu1 }
0x23d7   : > { %v10795_v24 = vpop.f32.mrb[239].mxu1  ;;  %v7437_v63 = vsel %vm1046_vm6, %v7341_v6, -inf }
0x23d8   : > { %7438 = vmax.xlane.f32.xlu1 %v7437_v63 }
0x23dc   : > { %v7346_v51 = vpop.f32.mrb[240].mxu1 }
0x23dd   : > { %v10798_v37 = vpop.f32.mrb[241].mxu1  ;;  %v7440_v57 = vsel %vm1046_vm6, %v7346_v51, -inf }
0x23de   : > { %7441 = vmax.xlane.f32.xlu0 %v7440_v57  ;;  %v7349_v26 = vpop.f32.mrb[242].mxu1 }
0x23df   : > { %v10799_v38 = vpop.f32.mrb[243].mxu1  ;;  %v7443_v16 = vsel %vm1046_vm6, %v7349_v26, -inf }
0x23e0   : > { %7444 = vmax.xlane.f32.xlu1 %v7443_v16 }
0x23e4   : > { %v7354_v7 = vpop.f32.mrb[244].mxu1 }
0x23e5   : > { %v10802_v36 = vpop.f32.mrb[245].mxu1  ;;  %v7446_v41 = vsel %vm1046_vm6, %v7354_v7, -inf }
0x23e6   : > { %7447 = vmax.xlane.f32.xlu0 %v7446_v41  ;;  %v7357_v10 = vpop.f32.mrb[246].mxu1 }
0x23e7   : > { %v10803_v48 = vpop.f32.mrb[247].mxu1 }
0x23ea   : > { %v7412_v58 = vpop.f32.mrb[4].mxu0 }
0x23eb   : > { %v10812_v44 = vpop.f32.mrb[5].mxu0  ;;  %v7449_v25 = vsel %vm1046_vm6, %v7412_v58, -inf }
0x23ec   : > { %7450 = vmax.xlane.f32.xlu1 %v7449_v25  ;;  %v7415_v8 = vpop.f32.mrb[6].mxu0 }
0x23ed   : > { %v10813_v13 = vpop.f32.mrb[7].mxu0  ;;  %v7452_v54 = vsel %vm1046_vm6, %v7415_v8, -inf }
0x23ee   : > { %7453 = vmax.xlane.f32.xlu0 %v7452_v54 }
0x23f2   : > { %v7420_v46 = vpop.f32.mrb[8].mxu0 }
0x23f3   : > { %v10816_v15 = vpop.f32.mrb[9].mxu0  ;;  %v7455_v22 = vsel %vm1046_vm6, %v7420_v46, -inf }
0x23f4   : > { %7456 = vmax.xlane.f32.xlu1 %v7455_v22  ;;  %v7423_v0 = vpop.f32.mrb[10].mxu0 }
0x23f5   : > { %v10817_v19 = vpop.f32.mrb[11].mxu0  ;;  %v7458_v52 = vsel %vm1046_vm6, %v7423_v0, -inf }
0x23f6   : > { %7459 = vmax.xlane.f32.xlu0 %v7458_v52 }
0x23fa   : > { %v14405_v50 = vpop.f32.mrb[12].mxu0 }
0x23fb   : > { %v10820_v62 = vpop.f32.mrb[13].mxu0  ;;  %v7461_v61 = vsel %vm1046_vm6, %v14405_v50, -inf }
0x23fc   : > { %7462 = vmax.xlane.f32.xlu1 %v7461_v61  ;;  %v7431_v27 = vpop.f32.mrb[14].mxu0 }
0x23fd   : > { %v10821_v5 = vpop.f32.mrb[15].mxu0 }
0x2463   : > { %v7436_v39 = vpop.xlane.xlu0 %7435 }
0x2464   : > { %v7464_v47 = vsub.f32 %v7338_v30, %v7436_v39 }
0x2465   : > { %v7439_v18 = vpop.xlane.xlu1 %7438 }
0x2466   : > { %v7474_v42 = vmul.f32 1.442695, %v7464_v47  ;;  %v7465_v59 = vsub.f32 %v7341_v6, %v7439_v18 }
0x2468   : > { %11327 = vpow2.f32 %v7474_v42  ;;  %v7476_v31 = vmul.f32 1.442695, %v7465_v59 }
0x246a   : > { %11329 = vpow2.f32 %v7476_v31 }
0x246b   : > { %v7442_v17 = vpop.xlane.xlu0 %7441 }
0x246c   : > { %v7466_v29 = vsub.f32 %v7346_v51, %v7442_v17 }
0x246d   : > { %v7445_v14 = vpop.xlane.xlu1 %7444 }
0x246e   : > { %v7478_v43 = vmul.f32 1.442695, %v7466_v29  ;;  %v7467_v28 = vsub.f32 %v7349_v26, %v7445_v14 }
0x2470   : > { %11331 = vpow2.f32 %v7478_v43  ;;  %v7480_v12 = vmul.f32 1.442695, %v7467_v28 }
0x2472   : > { %v14409_v24 = vpop.eup %11327  ;;  %11333 = vpow2.f32 %v7480_v12 }
0x2473   : > { %v7448_v63 = vpop.xlane.xlu0 %7447  ;;  %v7494_v30 = vsel %vm1046_vm6, %v14409_v24, 0.0 }
0x2474   : > { %v11330_v37 = vpop.eup %11329  ;;  %v7468_v57 = vsub.f32 %v7354_v7, %v7448_v63  ;;  %7495 = vadd.xlane.f32.xlu0 %v7494_v30 }
0x2475   : > { %v7497_v6 = vsel %vm1046_vm6, %v11330_v37, 0.0 }
0x2476   : > { %v7482_v38 = vmul.f32 1.442695, %v7468_v57  ;;  %7498 = vadd.xlane.f32.xlu1 %v7497_v6 }
0x2478   : > { %11335 = vpow2.f32 %v7482_v38 }
0x2479   : > { %v7451_v51 = vpop.xlane.xlu1 %7450 }
0x247a   : > { %v11332_v16 = vpop.eup %11331  ;;  %v7469_v26 = vsub.f32 %v7412_v58, %v7451_v51 }
0x247b   : > { %v7454_v36 = vpop.xlane.xlu0 %7453  ;;  %v7500_v41 = vsel %vm1046_vm6, %v11332_v16, 0.0 }
0x247c   : > { %v11334_v10 = vpop.eup %11333  ;;  %v7484_v48 = vmul.f32 1.442695, %v7469_v26  ;;  %v7470_v44 = vsub.f32 %v7415_v8, %v7454_v36  ;;  %7501 = vadd.xlane.f32.xlu0 %v7500_v41 }
0x247d   : > { %v7503_v25 = vsel %vm1046_vm6, %v11334_v10, 0.0 }
0x247e   : > { %11337 = vpow2.f32 %v7484_v48  ;;  %v7486_v7 = vmul.f32 1.442695, %v7470_v44  ;;  %7504 = vadd.xlane.f32.xlu1 %v7503_v25 }
0x2480   : > { %11339 = vpow2.f32 %v7486_v7 }
0x2481   : > { %v7457_v13 = vpop.xlane.xlu1 %7456 }
0x2482   : > { %v11336_v54 = vpop.eup %11335  ;;  %v7471_v15 = vsub.f32 %v7420_v46, %v7457_v13 }
0x2483   : > { %v7460_v22 = vpop.xlane.xlu0 %7459  ;;  %v7506_v19 = vsel %vm1046_vm6, %v11336_v54, 0.0 }
0x2484   : > { %v7488_v58 = vmul.f32 1.442695, %v7471_v15  ;;  %v7472_v52 = vsub.f32 %v7423_v0, %v7460_v22  ;;  %7507 = vadd.xlane.f32.xlu0 %v7506_v19 }
0x2486   : > { %11341 = vpow2.f32 %v7488_v58  ;;  %v7490_v62 = vmul.f32 1.442695, %v7472_v52 }
0x2488   : > { %v11338_v61 = vpop.eup %11337  ;;  %11343 = vpow2.f32 %v7490_v62 }
0x2489   : > { %v7463_v8 = vpop.xlane.xlu1 %7462  ;;  %v7509_v27 = vsel %vm1046_vm6, %v11338_v61, 0.0 }
0x248a   : > { %v11340_v5 = vpop.eup %11339  ;;  %v7473_v39 = vsub.f32 %v14405_v50, %v7463_v8  ;;  %7510 = vadd.xlane.f32.xlu1 %v7509_v27 }
0x248b   : > { %v7512_v47 = vsel %vm1046_vm6, %v11340_v5, 0.0 }
0x248c   : > { %v7492_v46 = vmul.f32 1.442695, %v7473_v39  ;;  %7513 = vadd.xlane.f32.xlu0 %v7512_v47  ;;  %v8984_v47 = vld [vmem:[%s14810_s5 + $0x1c] sm:$0xf] }
0x248e   : > { %11345 = vpow2.f32 %v7492_v46  ;;  %v7709_v46 = vsel %vm1172_vm5, %v8984_v47, 0 }
0x2490   : > { %v11342_v18 = vpop.eup %11341 }
0x2491   : > { %v7515_v0 = vsel %vm1046_vm6, %v11342_v18, 0.0 }
0x2492   : > { %v11344_v42 = vpop.eup %11343  ;;  %7516 = vadd.xlane.f32.xlu1 %v7515_v0 }
0x2493   : > { %v7518_v59 = vsel %vm1046_vm6, %v11344_v42, 0.0 }
0x2494   : > { %7519 = vadd.xlane.f32.xlu0 %v7518_v59 }
0x2498   : > { %v11346_v31 = vpop.eup %11345 }
0x2499   : > { %v7521_v17 = vsel %vm1046_vm6, %v11346_v31, 0.0 }
0x249a   : > { %7522 = vadd.xlane.f32.xlu1 %v7521_v17 }
0x2501   : > { %v7496_v29 = vpop.xlane.xlu0 %7495 }
0x2502   : > { %11347 = vrcp.f32 %v7496_v29 }
0x2503   : > { %v7499_v50 = vpop.xlane.xlu1 %7498 }
0x2504   : > { %11349 = vrcp.f32 %v7499_v50 }
0x2509   : > { %v7502_v14 = vpop.xlane.xlu0 %7501 }
0x250a   : > { %11351 = vrcp.f32 %v7502_v14 }
0x250b   : > { %v7505_v43 = vpop.xlane.xlu1 %7504 }
0x250c   : > { %v11348_v28 = vpop.eup %11347  ;;  %11353 = vrcp.f32 %v7505_v43 }
0x250d   : > { %v7525_v63 = vmul.f32 %v11348_v28, %v14409_v24 }
0x250e   : > { %v11350_v12 = vpop.eup %11349 }
0x250f   : > { %v7527_v30 = vmul.f32 %v11350_v12, %v11330_v37 }
0x2511   : > { %v7544_v57 = vpack.c.bf16 %v7527_v30, %v7525_v63  ;;  %v7508_v6 = vpop.xlane.xlu0 %7507 }
0x2512   : > { %11355 = vrcp.f32 %v7508_v6 }
0x2513   : > { %10829 = vmatmul.mubr.msk.bf16.vlgmr.msra.gmra.mrb[248].mxu1 %vm1046_vm6, %v7544_v57 }
0x2514   : > { %v11352_v38 = vpop.eup %11351  ;;  %10832 = vmatprep.mubr.msk.bf16.mxu1 %vm11416_vm2, %v11415_v2  ;;  %10859 = vmatpush3.bf16.msra.mxu1 %v7709_v46 }
0x2515   : > { %v7529_v26 = vmul.f32 %v11352_v38, %v11332_v16  ;;  %10904 = vmatprep.subr.bf16.mxu1 %v11415_v2 }
0x2516   : > { %v11354_v51 = vpop.eup %11353 }
0x2517   : > { %v7531_v36 = vmul.f32 %v11354_v51, %v11334_v10  ;;  %v7511_v41 = vpop.xlane.xlu1 %7510 }
0x2518   : > { %11357 = vrcp.f32 %v7511_v41 }
0x2519   : > { %v7545_v48 = vpack.c.bf16 %v7531_v36, %v7529_v26  ;;  %v7514_v44 = vpop.xlane.xlu0 %7513 }
0x251a   : > { %11359 = vrcp.f32 %v7514_v44 }
0x251b   : > { %10833 = vmatmul.mubr.msk.bf16.gmra.mrb[252].mxu1 %vm1046_vm6, %v7545_v48 }
0x251c   : > { %v11356_v24 = vpop.eup %11355  ;;  %10836 = vmatprep.mubr.msk.bf16.mxu1 %vm11416_vm2, %v11415_v2 }
0x251d   : > { %v7533_v37 = vmul.f32 %v11356_v24, %v11336_v54 }
0x251f   : > { %v7517_v25 = vpop.xlane.xlu1 %7516  ;;  %v7546_v7 = vpack.c.bf16 %v7533_v37, %v7533_v37 }
0x2520   : > { %11361 = vrcp.f32 %v7517_v25 }
0x2521   : > { %v7520_v13 = vpop.xlane.xlu0 %7519 }
0x2522   : > { %v11358_v15 = vpop.eup %11357  ;;  %11363 = vrcp.f32 %v7520_v13 }
0x2523   : > { %10837 = vmatmul.mubr.msk.bf16.gmra.mrb[0].mxu1 %vm1046_vm6, %v7546_v7  ;;  %v7535_v10 = vmul.f32 %v11358_v15, %v11338_v61 }
0x2524   : > { %v11360_v16 = vpop.eup %11359  ;;  %10860 = vmatprep.mubr.msk.bf16.mxu1 %vm11416_vm2, %v11415_v2 }
0x2525   : > { %v7537_v22 = vmul.f32 %v11360_v16, %v11340_v5 }
0x2527   : > { %v7547_v19 = vpack.c.bf16 %v7537_v22, %v7535_v10  ;;  %v7523_v58 = vpop.xlane.xlu1 %7522 }
0x2528   : > { %11365 = vrcp.f32 %v7523_v58 }
0x2529   : > { %10847 = vmatmul.mubr.msk.bf16.vlgmr.msra.gmra.mrb[16].mxu0 %vm1046_vm6, %v7547_v19 }
0x252a   : > { %v11362_v54 = vpop.eup %11361  ;;  %10850 = vmatprep.mubr.msk.bf16.mxu0 %vm11416_vm2, %v11415_v2 }
0x252b   : > { %v7539_v62 = vmul.f32 %v11362_v54, %v11342_v18 }
0x252c   : > { %v11364_v52 = vpop.eup %11363 }
0x252d   : > { %v7541_v8 = vmul.f32 %v11364_v52, %v11344_v42 }
0x252f   : > { %v7548_v27 = vpack.c.bf16 %v7541_v8, %v7539_v62 }
0x2531   : > { %10851 = vmatmul.mubr.msk.bf16.gmra.mrb[20].mxu0 %vm1046_vm6, %v7548_v27 }
0x2532   : > { %v11366_v39 = vpop.eup %11365  ;;  %10854 = vmatprep.mubr.msk.bf16.mxu0 %vm11416_vm2, %v11415_v2 }
0x2533   : > { %v7543_v61 = vmul.f32 %v11366_v39, %v11346_v31 }
0x2535   : > { %v7549_v5 = vpack.c.bf16 %v7543_v61, %v7543_v61 }
0x2539   : > { %10855 = vmatmul.mubr.msk.bf16.gmra.mrb[24].mxu0 %vm1046_vm6, %v7549_v5 }
0x253a   : > { %10884 = vmatprep.mubr.msk.bf16.mxu0 %vm11416_vm2, %v11415_v2 }
0x25e6   : > { %v7596_v18 = vpop.f32.mrb[248].mxu1 }
0x25e7   : > { %v10830_v0 = vpop.f32.mrb[249].mxu1 }
0x25e8   : > { %v7599_v42 = vpop.f32.mrb[250].mxu1 }
0x25e9   : > { %v7686_v59 = vpack.c.bf16 %v7599_v42, %v7596_v18  ;;  %v10831_v31 = vpop.f32.mrb[251].mxu1 }
0x25eb   : > { %10861 = vmatmul.mubr.msk.bf16.vlgmr.msra.gmra.mrb[4].mxu1 %vm897_vm4, %v7686_v59 }
0x25ec   : > { %10864 = vmatprep.mubr.msk.bf16.mxu1 %vm11416_vm2, %v11415_v2 }
0x25ee   : > { %v7604_v17 = vpop.f32.mrb[252].mxu1 }
0x25ef   : > { %v10834_v29 = vpop.f32.mrb[253].mxu1 }
0x25f0   : > { %v7607_v50 = vpop.f32.mrb[254].mxu1 }
0x25f1   : > { %v7687_v14 = vpack.c.bf16 %v7607_v50, %v7604_v17  ;;  %v10835_v43 = vpop.f32.mrb[255].mxu1 }
0x25f3   : > { %10865 = vmatmul.mubr.msk.bf16.gmra.mrb[8].mxu1 %vm897_vm4, %v7687_v14 }
0x25f4   : > { %10868 = vmatprep.mubr.msk.bf16.mxu1 %vm11416_vm2, %v11415_v2 }
0x25f6   : > { %v7612_v28 = vpop.f32.mrb[0].mxu1 }
0x25f7   : > { %v10838_v12 = vpop.f32.mrb[1].mxu1 }
0x25f8   : > { %v7615_v63 = vpop.f32.mrb[2].mxu1 }
0x25f9   : > { %v10839_v30 = vpop.f32.mrb[3].mxu1 }
0x25fc   : > { %v7664_v57 = vpop.f32.mrb[16].mxu0 }
0x25fd   : > { %v7688_v6 = vpack.c.bf16 %v7664_v57, %v7612_v28  ;;  %v10848_v38 = vpop.f32.mrb[17].mxu0 }
0x25fe   : > { %v7667_v51 = vpop.f32.mrb[18].mxu0 }
0x25ff   : > { %v10849_v26 = vpop.f32.mrb[19].mxu0  ;;  %10869 = vmatmul.mubr.msk.bf16.gmra.mrb[12].mxu1 %vm897_vm4, %v7688_v6 }
0x2600   : > { %10872 = vmatprep.mubr.msk.bf16.mxu1 %vm11416_vm2, %v11415_v2 }
0x2604   : > { %v7672_v36 = vpop.f32.mrb[20].mxu0 }
0x2605   : > { %v7689_v41 = vpack.c.bf16 %v7672_v36, %v7667_v51  ;;  %v10852_v48 = vpop.f32.mrb[21].mxu0 }
0x2606   : > { %v7675_v44 = vpop.f32.mrb[22].mxu0 }
0x2607   : > { %v10853_v24 = vpop.f32.mrb[23].mxu0  ;;  %10873 = vmatmul.mubr.msk.bf16.gmra.mrb[16].mxu1 %vm897_vm4, %v7689_v41 }
0x2608   : > { %10876 = vmatprep.mubr.msk.bf16.mxu1 %vm11416_vm2, %v11415_v2 }
0x260c   : > { %v7680_v37 = vpop.f32.mrb[24].mxu0 }
0x260d   : > { %v7690_v25 = vpack.c.bf16 %v7680_v37, %v7675_v44  ;;  %v10856_v7 = vpop.f32.mrb[25].mxu0 }
0x260e   : > { %v7683_v13 = vpop.f32.mrb[26].mxu0 }
0x260f   : > { %v10857_v15 = vpop.f32.mrb[27].mxu0  ;;  %10877 = vmatmul.mubr.msk.bf16.gmra.mrb[20].mxu1 %vm897_vm4, %v7690_v25 }
0x2610   : > { %10912 = vmatprep.mubr.msk.bf16.mxu1 %vm11416_vm2, %v11415_v2 }
0x26be   : > { %v7745_v16 = vpop.f32.mrb[4].mxu1 }
0x26bf   : > { %v7784_v10 = vadd.f32 %v7745_v16, %v14294_v34  ;;  %v10862_v22 = vpop.f32.mrb[5].mxu1 }
0x26c0   : > { %v7748_v19 = vpop.f32.mrb[6].mxu1 }
0x26c1   : > { %v7794_v58 = vadd.f32 %v7784_v10, %v13175_v49  ;;  %v7785_v54 = vadd.f32 %v7748_v19, %v14297_v21  ;;  %v10863_v52 = vpop.f32.mrb[7].mxu1 }
0x26c3   : > { %v7795_v62 = vadd.f32 %v7785_v54, %v13178_v33  ;;  %v7808_v8 = vsel %vm594_vm3, %v7794_v58, 0.0 }
0x26c4   : > { %7809 = vadd.xlane.f32.xlu0 %v7808_v8 }
0x26c5   : > { %v7811_v27 = vsel %vm594_vm3, %v7795_v62, 0.0 }
0x26c6   : > { %7812 = vadd.xlane.f32.xlu1 %v7811_v27  ;;  %v7753_v39 = vpop.f32.mrb[8].mxu1 }
0x26c7   : > { %v7786_v61 = vadd.f32 %v7753_v39, %v14300_v4  ;;  %v10866_v5 = vpop.f32.mrb[9].mxu1 }
0x26c8   : > { %v7756_v34 = vpop.f32.mrb[10].mxu1 }
0x26c9   : > { %v7796_v47 = vadd.f32 %v7786_v61, %v13204_v20  ;;  %v7787_v49 = vadd.f32 %v7756_v34, %v14303_v3  ;;  %v10867_v46 = vpop.f32.mrb[11].mxu1 }
0x26cb   : > { %v7797_v21 = vadd.f32 %v7787_v49, %v13207_v60  ;;  %v7814_v33 = vsel %vm594_vm3, %v7796_v47, 0.0 }
0x26cc   : > { %7815 = vadd.xlane.f32.xlu0 %v7814_v33 }
0x26cd   : > { %v7817_v18 = vsel %vm594_vm3, %v7797_v21, 0.0 }
0x26ce   : > { %7818 = vadd.xlane.f32.xlu1 %v7817_v18 }
0x26d2   : > { %v7761_v0 = vpop.f32.mrb[12].mxu1 }
0x26d3   : > { %v7788_v42 = vadd.f32 %v7761_v0, %v14306_v45  ;;  %v10870_v59 = vpop.f32.mrb[13].mxu1 }
0x26d4   : > { %v7764_v4 = vpop.f32.mrb[14].mxu1 }
0x26d5   : > { %v7798_v31 = vadd.f32 %v7788_v42, %v13227_v53  ;;  %v7789_v20 = vadd.f32 %v7764_v4, %v14309_v40  ;;  %v10871_v17 = vpop.f32.mrb[15].mxu1 }
0x26d7   : > { %v7799_v3 = vadd.f32 %v7789_v20, %v13230_v35  ;;  %v7820_v60 = vsel %vm594_vm3, %v7798_v31, 0.0 }
0x26d8   : > { %7821 = vadd.xlane.f32.xlu0 %v7820_v60 }
0x26d9   : > { %v7823_v29 = vsel %vm594_vm3, %v7799_v3, 0.0 }
0x26da   : > { %7824 = vadd.xlane.f32.xlu1 %v7823_v29  ;;  %v7769_v50 = vpop.f32.mrb[16].mxu1 }
0x26db   : > { %v7790_v14 = vadd.f32 %v7769_v50, %v14312_v23  ;;  %v10874_v43 = vpop.f32.mrb[17].mxu1 }
0x26dc   : > { %v7772_v45 = vpop.f32.mrb[18].mxu1 }
0x26dd   : > { %v7800_v28 = vadd.f32 %v7790_v14, %v13249_v32  ;;  %v7791_v53 = vadd.f32 %v7772_v45, %v14315_v55  ;;  %v10875_v12 = vpop.f32.mrb[19].mxu1  ;;  %v14859_v55 = vld [vmem:[#allocation2_spill] sm:$0xff]  ;;  %v11001_v45 = vld [vmem:[%s14811_s6 + $0x10] sm:$0xff]  }
0x26de   : > { %10881 = vmatpush3.bf16.msra.mxu0 %v11001_v45 }
0x26df   : > { %v7801_v40 = vadd.f32 %v7791_v53, %v13252_v1  ;;  %v7826_v35 = vsel %vm594_vm3, %v7800_v28, 0.0  ;;  %10882 = vmatprep.subr.bf16.mxu0 %v11415_v2 }
0x26e0   : > { %7827 = vadd.xlane.f32.xlu0 %v7826_v35  ;;  %v11002_v35 = vld [vmem:[%s14811_s6 + $0x18] sm:$0xff]  }
0x26e1   : > { %v7829_v63 = vsel %vm594_vm3, %v7801_v40, 0.0 }
0x26e2   : > { %7830 = vadd.xlane.f32.xlu1 %v7829_v63  ;;  %v7777_v30 = vpop.f32.mrb[20].mxu1  ;;  %10883 = vmatpush3.bf16.msra.mxu0 %v11002_v35 }
0x26e3   : > { %v7792_v57 = vadd.f32 %v7777_v30, %v14318_v56  ;;  %v10878_v6 = vpop.f32.mrb[21].mxu1  ;;  %v11003_v30 = vld [vmem:[%s14813_s8 + $0x20] sm:$0xff]  }
0x26e4   : > { %v7780_v23 = vpop.f32.mrb[22].mxu1  ;;  %10905 = vmatpush3.bf16.msra.mxu1 %v11003_v30 }
0x26e5   : > { %v7802_v38 = vadd.f32 %v7792_v57, %v13271_v11  ;;  %v7793_v32 = vadd.f32 %v7780_v23, %v14321_v9  ;;  %v10879_v51 = vpop.f32.mrb[23].mxu1  ;;  %v11004_v57 = vld [vmem:[%s14813_s8 + $0x28] sm:$0xff]   ;;  %10906 = vmatprep.subr.bf16.mxu1 %v11415_v2 }
0x26e7   : > { %v7803_v26 = vadd.f32 %v7793_v32, %v14859_v55  ;;  %v7832_v1 = vsel %vm594_vm3, %v7802_v38, 0.0 }
0x26e8   : > { %7833 = vadd.xlane.f32.xlu0 %v7832_v1  ;;  %10907 = vmatpush3.bf16.msra.mxu1 %v11004_v57 }
0x26e9   : > { %v7835_v36 = vsel %vm594_vm3, %v7803_v26, 0.0  ;;  %10908 = vmatprep.subr.bf16.mxu1 %v11415_v2 }
0x26ea   : > { %7836 = vadd.xlane.f32.xlu1 %v7835_v36 }
0x2751   : > { %v7810_v41 = vpop.xlane.xlu0 %7809 }
0x2752   : > { %v7838_v48 = vmul.f32 0.03125, %v7810_v41 }
0x2753   : > { %v7813_v44 = vpop.xlane.xlu1 %7812 }
0x2754   : > { %v14492_v24 = vsub.f32 %v7794_v58, %v7838_v48  ;;  %v7839_v56 = vmul.f32 0.03125, %v7813_v44 }
0x2756   : > { %v14494_v37 = vsub.f32 %v7795_v62, %v7839_v56  ;;  %v7858_v11 = vmul.f32 %v14492_v24, %v14492_v24 }
0x2758   : > { %v7868_v9 = vsel %vm594_vm3, %v7858_v11, 0.0  ;;  %v7859_v25 = vmul.f32 %v14494_v37, %v14494_v37  ;;  %v14560_v11 = vld [vmem:[%s14814_s9 + $0x7] ss:$0 sm:$0xff] }
0x2759   : > { %v7816_v7 = vpop.xlane.xlu0 %7815  ;;  %7869 = vadd.xlane.f32.xlu0 %v7868_v9 }
0x275a   : > { %v7840_v13 = vmul.f32 0.03125, %v7816_v7  ;;  %v7871_v15 = vsel %vm594_vm3, %v7859_v25, 0.0 }
0x275b   : > { %v7819_v16 = vpop.xlane.xlu1 %7818  ;;  %7872 = vadd.xlane.f32.xlu1 %v7871_v15  ;;  %v14568_v15 = vld [vmem:[%s14814_s9 + $0x8] ss:$0 sm:$0xff] }
0x275c   : > { %v14502_v10 = vsub.f32 %v7796_v47, %v7840_v13  ;;  %v7841_v22 = vmul.f32 0.03125, %v7819_v16 }
0x275e   : > { %v14504_v19 = vsub.f32 %v7797_v21, %v7841_v22  ;;  %v7860_v58 = vmul.f32 %v14502_v10, %v14502_v10 }
0x2760   : > { %v7874_v54 = vsel %vm594_vm3, %v7860_v58, 0.0  ;;  %v7861_v52 = vmul.f32 %v14504_v19, %v14504_v19 }
0x2761   : > { %7875 = vadd.xlane.f32.xlu0 %v7874_v54 }
0x2762   : > { %v7877_v62 = vsel %vm594_vm3, %v7861_v52, 0.0 }
0x2763   : > { %7878 = vadd.xlane.f32.xlu1 %v7877_v62 }
0x2765   : > { %v7822_v8 = vpop.xlane.xlu0 %7821 }
0x2766   : > { %v7842_v27 = vmul.f32 0.03125, %v7822_v8 }
0x2767   : > { %v7825_v39 = vpop.xlane.xlu1 %7824 }
0x2768   : > { %v14512_v61 = vsub.f32 %v7798_v31, %v7842_v27  ;;  %v7843_v5 = vmul.f32 0.03125, %v7825_v39 }
0x276a   : > { %v14514_v34 = vsub.f32 %v7799_v3, %v7843_v5  ;;  %v7862_v47 = vmul.f32 %v14512_v61, %v14512_v61 }
0x276c   : > { %v7880_v49 = vsel %vm594_vm3, %v7862_v47, 0.0  ;;  %v7863_v46 = vmul.f32 %v14514_v34, %v14514_v34 }
0x276d   : > { %v7828_v21 = vpop.xlane.xlu0 %7827  ;;  %7881 = vadd.xlane.f32.xlu0 %v7880_v49 }
0x276e   : > { %v7844_v33 = vmul.f32 0.03125, %v7828_v21  ;;  %v7883_v18 = vsel %vm594_vm3, %v7863_v46, 0.0 }
0x276f   : > { %v7831_v0 = vpop.xlane.xlu1 %7830  ;;  %7884 = vadd.xlane.f32.xlu1 %v7883_v18 }
0x2770   : > { %v14522_v42 = vsub.f32 %v7800_v28, %v7844_v33  ;;  %v7845_v59 = vmul.f32 0.03125, %v7831_v0 }
0x2772   : > { %v14524_v4 = vsub.f32 %v7801_v40, %v7845_v59  ;;  %v7864_v31 = vmul.f32 %v14522_v42, %v14522_v42 }
0x2774   : > { %v7886_v20 = vsel %vm594_vm3, %v7864_v31, 0.0  ;;  %v7865_v17 = vmul.f32 %v14524_v4, %v14524_v4 }
0x2775   : > { %7887 = vadd.xlane.f32.xlu0 %v7886_v20  ;;  %v7834_v3 = vpop.xlane.xlu0 %7833 }
0x2776   : > { %v7846_v60 = vmul.f32 0.03125, %v7834_v3  ;;  %v7889_v29 = vsel %vm594_vm3, %v7865_v17, 0.0 }
0x2777   : > { %7890 = vadd.xlane.f32.xlu1 %v7889_v29  ;;  %v7837_v50 = vpop.xlane.xlu1 %7836 }
0x2778   : > { %v14532_v14 = vsub.f32 %v7802_v38, %v7846_v60  ;;  %v7847_v43 = vmul.f32 0.03125, %v7837_v50 }
0x277a   : > { %v14537_v28 = vsub.f32 %v7803_v26, %v7847_v43  ;;  %v7866_v53 = vmul.f32 %v14532_v14, %v14532_v14 }
0x277c   : > { %v7892_v12 = vsel %vm594_vm3, %v7866_v53, 0.0  ;;  %v7867_v40 = vmul.f32 %v14537_v28, %v14537_v28 }
0x277d   : > { %7893 = vadd.xlane.f32.xlu0 %v7892_v12 }
0x277e   : > { %v7895_v63 = vsel %vm594_vm3, %v7867_v40, 0.0 }
0x277f   : > { %7896 = vadd.xlane.f32.xlu1 %v7895_v63 }
0x27e6   : > { %v7870_v6 = vpop.xlane.xlu0 %7869 }
0x27e7   : > { %v7898_v23 = vmul.f32 0.03125, %v7870_v6 }
0x27e8   : > { %v7873_v38 = vpop.xlane.xlu1 %7872 }
0x27e9   : > { %v7908_v32 = vadd.f32 1e-05, %v7898_v23  ;;  %v7899_v51 = vmul.f32 0.03125, %v7873_v38 }
0x27eb   : > { %11367 = vrsqrt.f32 %v7908_v32  ;;  %v7909_v55 = vadd.f32 1e-05, %v7899_v51 }
0x27ed   : > { %11369 = vrsqrt.f32 %v7909_v55 }
0x27ee   : > { %v7876_v26 = vpop.xlane.xlu0 %7875 }
0x27ef   : > { %v7900_v1 = vmul.f32 0.03125, %v7876_v26 }
0x27f0   : > { %v7879_v36 = vpop.xlane.xlu1 %7878 }
0x27f1   : > { %v7910_v41 = vadd.f32 1e-05, %v7900_v1  ;;  %v7901_v48 = vmul.f32 0.03125, %v7879_v36 }
0x27f3   : > { %11371 = vrsqrt.f32 %v7910_v41  ;;  %v7911_v44 = vadd.f32 1e-05, %v7901_v48 }
0x27f5   : > { %v11368_v56 = vpop.eup %11367  ;;  %11373 = vrsqrt.f32 %v7911_v44 }
0x27f6   : > { %v7928_v9 = vmul.f32 %v11368_v56, %v14492_v24 }
0x27f7   : > { %v11370_v25 = vpop.eup %11369 }
0x27f8   : > { %v7944_v7 = vmul.f32 %v14560_v11, %v7928_v9  ;;  %v7929_v13 = vmul.f32 %v11370_v25, %v14494_v37 }
0x27fa   : > { %v7945_v16 = vmul.f32 %v14560_v11, %v7929_v13  ;;  %v7882_v22 = vpop.xlane.xlu0 %7881  ;;  %v14572_v54 = vadd.f32 %v14568_v15, %v7944_v7  ;;  %v8999_v7 = vld [vmem:[%s14812_s7 + $0x1] ss:$0 sm:$0xff] }
0x27fb   : > { %v7902_v58 = vmul.f32 0.03125, %v7882_v22 }
0x27fc   : > { %v14575_v52 = vadd.f32 %v14568_v15, %v7945_v16  ;;  %v7885_v24 = vpop.xlane.xlu1 %7884 }
0x27fd   : > { %v11372_v62 = vpop.eup %11371  ;;  %v7912_v8 = vadd.f32 1e-05, %v7902_v58  ;;  %v7903_v27 = vmul.f32 0.03125, %v7885_v24 }
0x27fe   : > { %v7970_v37 = vpack.c.bf16 %v14575_v52, %v14572_v54  ;;  %v7930_v39 = vmul.f32 %v11372_v62, %v14502_v10 }
0x27ff   : > { %v11374_v5 = vpop.eup %11373  ;;  %11375 = vrsqrt.f32 %v7912_v8  ;;  %v7913_v47 = vadd.f32 1e-05, %v7903_v27 }
0x2800   : > { %v7946_v49 = vmul.f32 %v14560_v11, %v7930_v39  ;;  %v7931_v46 = vmul.f32 %v11374_v5, %v14504_v19  ;;  %10885 = vmatmul.mubr.msk.bf16.vlgmr.msra.gmra.mrb[28].mxu0 %vm594_vm3, %v7970_v37 }
0x2801   : > { %11377 = vrsqrt.f32 %v7913_v47  ;;  %10888 = vmatprep.mubr.msk.bf16.mxu0 %vm11416_vm2, %v11415_v2 }
0x2802   : > { %v7947_v21 = vmul.f32 %v14560_v11, %v7931_v46  ;;  %v7888_v33 = vpop.xlane.xlu0 %7887  ;;  %v14587_v0 = vadd.f32 %v14568_v15, %v7946_v49 }
0x2803   : > { %v7904_v18 = vmul.f32 0.03125, %v7888_v33 }
0x2804   : > { %v14590_v10 = vadd.f32 %v14568_v15, %v7947_v21  ;;  %v7891_v59 = vpop.xlane.xlu1 %7890 }
0x2805   : > { %v7914_v31 = vadd.f32 1e-05, %v7904_v18  ;;  %v7905_v20 = vmul.f32 0.03125, %v7891_v59 }
0x2806   : > { %v7971_v19 = vpack.c.bf16 %v14590_v10, %v14587_v0 }
0x2807   : > { %11379 = vrsqrt.f32 %v7914_v31  ;;  %v7915_v17 = vadd.f32 1e-05, %v7905_v20 }
0x2808   : > { %10889 = vmatmul.mubr.msk.bf16.gmra.mrb[32].mxu0 %vm594_vm3, %v7971_v19 }
0x2809   : > { %v11376_v3 = vpop.eup %11375  ;;  %11381 = vrsqrt.f32 %v7915_v17  ;;  %10892 = vmatprep.mubr.msk.bf16.mxu0 %vm11416_vm2, %v11415_v2 }
0x280a   : > { %v7932_v60 = vmul.f32 %v11376_v3, %v14512_v61  ;;  %v7894_v29 = vpop.xlane.xlu0 %7893 }
0x280b   : > { %v11378_v50 = vpop.eup %11377  ;;  %v7906_v43 = vmul.f32 0.03125, %v7894_v29 }
0x280c   : > { %v7948_v45 = vmul.f32 %v14560_v11, %v7932_v60  ;;  %v7933_v53 = vmul.f32 %v11378_v50, %v14514_v34  ;;  %v7897_v12 = vpop.xlane.xlu1 %7896 }
0x280d   : > { %v7916_v40 = vadd.f32 1e-05, %v7906_v43  ;;  %v7907_v35 = vmul.f32 0.03125, %v7897_v12 }
0x280e   : > { %v7949_v63 = vmul.f32 %v14560_v11, %v7933_v53  ;;  %v14602_v57 = vadd.f32 %v14568_v15, %v7948_v45 }
0x280f   : > { %11383 = vrsqrt.f32 %v7916_v40  ;;  %v7917_v30 = vadd.f32 1e-05, %v7907_v35 }
0x2810   : > { %v14605_v6 = vadd.f32 %v14568_v15, %v7949_v63 }
0x2811   : > { %v11380_v61 = vpop.eup %11379  ;;  %11385 = vrsqrt.f32 %v7917_v30 }
0x2812   : > { %v7972_v23 = vpack.c.bf16 %v14605_v6, %v14602_v57  ;;  %v7934_v34 = vmul.f32 %v11380_v61, %v14522_v42 }
0x2813   : > { %v11382_v38 = vpop.eup %11381 }
0x2814   : > { %v7950_v32 = vmul.f32 %v14560_v11, %v7934_v34  ;;  %v7935_v51 = vmul.f32 %v11382_v38, %v14524_v4  ;;  %10893 = vmatmul.mubr.msk.bf16.gmra.mrb[36].mxu0 %vm594_vm3, %v7972_v23 }
0x2815   : > { %10896 = vmatprep.mubr.msk.bf16.mxu0 %vm11416_vm2, %v11415_v2 }
0x2816   : > { %v7951_v55 = vmul.f32 %v14560_v11, %v7935_v51  ;;  %v14617_v26 = vadd.f32 %v14568_v15, %v7950_v32 }
0x2818   : > { %v14620_v1 = vadd.f32 %v14568_v15, %v7951_v55 }
0x2819   : > { %v11384_v36 = vpop.eup %11383 }
0x281a   : > { %v7973_v42 = vpack.c.bf16 %v14620_v1, %v14617_v26  ;;  %v7936_v41 = vmul.f32 %v11384_v36, %v14532_v14 }
0x281b   : > { %v11386_v4 = vpop.eup %11385 }
0x281c   : > { %v7952_v48 = vmul.f32 %v14560_v11, %v7936_v41  ;;  %v7937_v44 = vmul.f32 %v11386_v4, %v14537_v28  ;;  %10897 = vmatmul.mubr.msk.bf16.gmra.mrb[40].mxu0 %vm594_vm3, %v7973_v42  ;;  %v11005_v28 = vld [vmem:[%s14813_s8 + $0x30] sm:$0xff]   ;;  %v9016_v4 = vld [vmem:[%s14814_s9 + $0x9] ss:$0 sm:$0xff] }
0x281d   : > { %10900 = vmatprep.mubr.msk.bf16.mxu0 %vm11416_vm2, %v11415_v2  ;;  %10909 = vmatpush3.bf16.msra.mxu1 %v11005_v28 }
0x281e   : > { %v7953_v56 = vmul.f32 %v14560_v11, %v7937_v44  ;;  %v14632_v9 = vadd.f32 %v14568_v15, %v7952_v48  ;;  %10910 = vmatprep.subr.bf16.mxu1 %v11415_v2  ;;  %v11006_v11 = vld [vmem:[%s14813_s8 + $0x38] sm:$0xff]  }
0x2820   : > { %v14635_v25 = vadd.f32 %v14568_v15, %v7953_v56 }
0x2821   : > { %10911 = vmatpush3.bf16.msra.mxu1 %v11006_v11 }
0x2822   : > { %v7974_v14 = vpack.c.bf16 %v14635_v25, %v14632_v9 }
0x2824   : > { %10901 = vmatmul.mubr.msk.bf16.gmra.mrb[44].mxu0 %vm594_vm3, %v7974_v14 }
0x28d3   : > { %v8049_v13 = vpop.f32.mrb[28].mxu0 }
0x28d4   : > { %v8050_v15 = vadd.f32 %v8999_v7, %v8049_v13  ;;  %v10886_v16 = vpop.f32.mrb[29].mxu0 }
0x28d5   : > { %v8052_v22 = vpop.f32.mrb[30].mxu0 }
0x28d6   : > { %v8053_v58 = vadd.f32 %v8999_v7, %v8052_v22  ;;  %v10887_v24 = vpop.f32.mrb[31].mxu0  ;;  %v8088_v62 = vmax.f32 %v8050_v15, 0.0 }
0x28d8   : > { %v8089_v8 = vmax.f32 %v8053_v58, 0.0 }
0x28da   : > { %v8098_v27 = vpack.c.bf16 %v8089_v8, %v8088_v62 }
0x28db   : > { %v8057_v37 = vpop.f32.mrb[32].mxu0 }
0x28dc   : > { %v8058_v39 = vadd.f32 %v8999_v7, %v8057_v37  ;;  %v10890_v5 = vpop.f32.mrb[33].mxu0  ;;  %10913 = vmatmul.mubr.msk.bf16.vlgmr.msra.gmra.mrb[24].mxu1 %vm4221_vm7, %v8098_v27 }
0x28dd   : > { %v8060_v47 = vpop.f32.mrb[34].mxu0  ;;  %10916 = vmatprep.mubr.msk.bf16.mxu1 %vm11416_vm2, %v11415_v2 }
0x28de   : > { %v8061_v49 = vadd.f32 %v8999_v7, %v8060_v47  ;;  %v10891_v46 = vpop.f32.mrb[35].mxu0  ;;  %v8090_v21 = vmax.f32 %v8058_v39, 0.0 }
0x28e0   : > { %v8091_v33 = vmax.f32 %v8061_v49, 0.0 }
0x28e2   : > { %v8099_v18 = vpack.c.bf16 %v8091_v33, %v8090_v21 }
0x28e4   : > { %10917 = vmatmul.mubr.msk.bf16.gmra.mrb[28].mxu1 %vm4221_vm7, %v8099_v18 }
0x28e5   : > { %10920 = vmatprep.mubr.msk.bf16.mxu1 %vm11416_vm2, %v11415_v2 }
0x28e7   : > { %v8065_v59 = vpop.f32.mrb[36].mxu0 }
0x28e8   : > { %v8066_v31 = vadd.f32 %v8999_v7, %v8065_v59  ;;  %v10894_v20 = vpop.f32.mrb[37].mxu0 }
0x28e9   : > { %v8068_v19 = vpop.f32.mrb[38].mxu0 }
0x28ea   : > { %v8069_v17 = vadd.f32 %v8999_v7, %v8068_v19  ;;  %v10895_v3 = vpop.f32.mrb[39].mxu0  ;;  %v8092_v60 = vmax.f32 %v8066_v31, 0.0 }
0x28ec   : > { %v8093_v29 = vmax.f32 %v8069_v17, 0.0 }
0x28ee   : > { %v8100_v50 = vpack.c.bf16 %v8093_v29, %v8092_v60 }
0x28ef   : > { %v8073_v43 = vpop.f32.mrb[40].mxu0 }
0x28f0   : > { %v8074_v45 = vadd.f32 %v8999_v7, %v8073_v43  ;;  %v10898_v53 = vpop.f32.mrb[41].mxu0  ;;  %10921 = vmatmul.mubr.msk.bf16.gmra.mrb[32].mxu1 %vm4221_vm7, %v8100_v50 }
0x28f1   : > { %v8076_v12 = vpop.f32.mrb[42].mxu0  ;;  %10924 = vmatprep.mubr.msk.bf16.mxu1 %vm11416_vm2, %v11415_v2 }
0x28f2   : > { %v8077_v40 = vadd.f32 %v8999_v7, %v8076_v12  ;;  %v10899_v35 = vpop.f32.mrb[43].mxu0  ;;  %v8094_v63 = vmax.f32 %v8074_v45, 0.0 }
0x28f4   : > { %v8095_v30 = vmax.f32 %v8077_v40, 0.0 }
0x28f6   : > { %v8101_v61 = vpack.c.bf16 %v8095_v30, %v8094_v63 }
0x28f7   : > { %v8081_v23 = vpop.f32.mrb[44].mxu0 }
0x28f8   : > { %v8082_v34 = vadd.f32 %v8999_v7, %v8081_v23  ;;  %v10902_v38 = vpop.f32.mrb[45].mxu0  ;;  %10925 = vmatmul.mubr.msk.bf16.gmra.mrb[36].mxu1 %vm4221_vm7, %v8101_v61 }
0x28f9   : > { %v8084_v32 = vpop.f32.mrb[46].mxu0  ;;  %10928 = vmatprep.mubr.msk.bf16.mxu1 %vm11416_vm2, %v11415_v2 }
0x28fa   : > { %v8085_v51 = vadd.f32 %v8999_v7, %v8084_v32  ;;  %v10903_v55 = vpop.f32.mrb[47].mxu0  ;;  %v8096_v36 = vmax.f32 %v8082_v34, 0.0 }
0x28fc   : > { %v8097_v42 = vmax.f32 %v8085_v51, 0.0 }
0x28fe   : > { %v8102_v41 = vpack.c.bf16 %v8097_v42, %v8096_v36 }
0x2900   : > { %10929 = vmatmul.mubr.msk.bf16.gmra.mrb[40].mxu1 %vm4221_vm7, %v8102_v41 }
0x29af   : > { %v8193_v48 = vpop.f32.mrb[24].mxu1 }
0x29b0   : > { %v8194_v44 = vadd.f32 %v9016_v4, %v8193_v48  ;;  %v10914_v56 = vpop.f32.mrb[25].mxu1 }
0x29b1   : > { %v8196_v14 = vpop.f32.mrb[26].mxu1 }
0x29b2   : > { %v8232_v28 = vadd.f32 %v8194_v44, %v14572_v54  ;;  %v8197_v11 = vadd.f32 %v9016_v4, %v8196_v14  ;;  %v10915_v13 = vpop.f32.mrb[27].mxu1 }
0x29b4   : > { %v8233_v2 = vadd.f32 %v8197_v11, %v14575_v52  ;;  %v8246_v7 = vsel %vm594_vm3, %v8232_v28, 0.0 }
0x29b5   : > { %8247 = vadd.xlane.f32.xlu0 %v8246_v7 }
0x29b6   : > { %v8249_v15 = vsel %vm594_vm3, %v8233_v2, 0.0 }
0x29b7   : > { %8250 = vadd.xlane.f32.xlu1 %v8249_v15  ;;  %v8201_v16 = vpop.f32.mrb[28].mxu1 }
0x29b8   : > { %v8202_v22 = vadd.f32 %v9016_v4, %v8201_v16  ;;  %v10918_v58 = vpop.f32.mrb[29].mxu1 }
0x29b9   : > { %v8204_v24 = vpop.f32.mrb[30].mxu1 }
0x29ba   : > { %v8234_v62 = vadd.f32 %v8202_v22, %v14587_v0  ;;  %v8205_v8 = vadd.f32 %v9016_v4, %v8204_v24  ;;  %v10919_v27 = vpop.f32.mrb[31].mxu1 }
0x29bc   : > { %v8235_v54 = vadd.f32 %v8205_v8, %v14590_v10  ;;  %v8252_v37 = vsel %vm594_vm3, %v8234_v62, 0.0 }
0x29bd   : > { %8253 = vadd.xlane.f32.xlu0 %v8252_v37 }
0x29be   : > { %v8255_v52 = vsel %vm594_vm3, %v8235_v54, 0.0 }
0x29bf   : > { %8256 = vadd.xlane.f32.xlu1 %v8255_v52 }
0x29c3   : > { %v8209_v39 = vpop.f32.mrb[32].mxu1 }
0x29c4   : > { %v8210_v5 = vadd.f32 %v9016_v4, %v8209_v39  ;;  %v10922_v47 = vpop.f32.mrb[33].mxu1 }
0x29c5   : > { %v8212_v49 = vpop.f32.mrb[34].mxu1 }
0x29c6   : > { %v8236_v46 = vadd.f32 %v8210_v5, %v14602_v57  ;;  %v8213_v21 = vadd.f32 %v9016_v4, %v8212_v49  ;;  %v10923_v33 = vpop.f32.mrb[35].mxu1 }
0x29c8   : > { %v8237_v0 = vadd.f32 %v8213_v21, %v14605_v6  ;;  %v8258_v18 = vsel %vm594_vm3, %v8236_v46, 0.0 }
0x29c9   : > { %8259 = vadd.xlane.f32.xlu0 %v8258_v18 }
0x29ca   : > { %v8261_v10 = vsel %vm594_vm3, %v8237_v0, 0.0 }
0x29cb   : > { %8262 = vadd.xlane.f32.xlu1 %v8261_v10  ;;  %v8217_v59 = vpop.f32.mrb[36].mxu1 }
0x29cc   : > { %v8218_v31 = vadd.f32 %v9016_v4, %v8217_v59  ;;  %v10926_v20 = vpop.f32.mrb[37].mxu1 }
0x29cd   : > { %v8220_v19 = vpop.f32.mrb[38].mxu1 }
0x29ce   : > { %v8238_v17 = vadd.f32 %v8218_v31, %v14617_v26  ;;  %v8221_v3 = vadd.f32 %v9016_v4, %v8220_v19  ;;  %v10927_v60 = vpop.f32.mrb[39].mxu1 }
0x29d0   : > { %v8239_v57 = vadd.f32 %v8221_v3, %v14620_v1  ;;  %v8264_v29 = vsel %vm594_vm3, %v8238_v17, 0.0 }
0x29d1   : > { %8265 = vadd.xlane.f32.xlu0 %v8264_v29 }
0x29d2   : > { %v8267_v6 = vsel %vm594_vm3, %v8239_v57, 0.0 }
0x29d3   : > { %8268 = vadd.xlane.f32.xlu1 %v8267_v6  ;;  %v8225_v50 = vpop.f32.mrb[40].mxu1 }
0x29d4   : > { %v8226_v43 = vadd.f32 %v9016_v4, %v8225_v50  ;;  %v10930_v45 = vpop.f32.mrb[41].mxu1 }
0x29d5   : > { %v8228_v53 = vpop.f32.mrb[42].mxu1 }
0x29d6   : > { %v8240_v12 = vadd.f32 %v8226_v43, %v14632_v9  ;;  %v8229_v40 = vadd.f32 %v9016_v4, %v8228_v53  ;;  %v10931_v35 = vpop.f32.mrb[43].mxu1 }
0x29d8   : > { %v8241_v26 = vadd.f32 %v8229_v40, %v14635_v25  ;;  %v8270_v63 = vsel %vm594_vm3, %v8240_v12, 0.0 }
0x29d9   : > { %8271 = vadd.xlane.f32.xlu0 %v8270_v63 }
0x29da   : > { %v8273_v1 = vsel %vm594_vm3, %v8241_v26, 0.0 }
0x29db   : > { %8274 = vadd.xlane.f32.xlu1 %v8273_v1  ;;  %v14739_v1 = vld [vmem:[%s14814_s9 + $0xa] ss:$0 sm:$0xff] }
0x2a42   : > { %v8248_v30 = vpop.xlane.xlu0 %8247 }
0x2a43   : > { %v8276_v61 = vmul.f32 0.03125, %v8248_v30 }
0x2a44   : > { %v8251_v23 = vpop.xlane.xlu1 %8250 }
0x2a45   : > { %v14686_v34 = vsub.f32 %v8232_v28, %v8276_v61  ;;  %v8277_v38 = vmul.f32 0.03125, %v8251_v23  ;;  %v14745_v23 = vld [vmem:[%s14814_s9 + $0xb] ss:$0 sm:$0xff] }
0x2a47   : > { %v14688_v32 = vsub.f32 %v8233_v2, %v8277_v38  ;;  %v8296_v9 = vmul.f32 %v14686_v34, %v14686_v34 }
0x2a49   : > { %v8306_v51 = vsel %vm594_vm3, %v8296_v9, 0.0  ;;  %v8297_v25 = vmul.f32 %v14688_v32, %v14688_v32 }
0x2a4a   : > { %v8254_v55 = vpop.xlane.xlu0 %8253  ;;  %8307 = vadd.xlane.f32.xlu0 %v8306_v51 }
0x2a4b   : > { %v8278_v36 = vmul.f32 0.03125, %v8254_v55  ;;  %v8309_v42 = vsel %vm594_vm3, %v8297_v25, 0.0 }
0x2a4c   : > { %v8257_v41 = vpop.xlane.xlu1 %8256  ;;  %8310 = vadd.xlane.f32.xlu1 %v8309_v42 }
0x2a4d   : > { %v14696_v4 = vsub.f32 %v8234_v62, %v8278_v36  ;;  %v8279_v48 = vmul.f32 0.03125, %v8257_v41 }
0x2a4f   : > { %v14698_v44 = vsub.f32 %v8235_v54, %v8279_v48  ;;  %v8298_v56 = vmul.f32 %v14696_v4, %v14696_v4 }
0x2a51   : > { %v8312_v14 = vsel %vm594_vm3, %v8298_v56, 0.0  ;;  %v8299_v28 = vmul.f32 %v14698_v44, %v14698_v44 }
0x2a52   : > { %8313 = vadd.xlane.f32.xlu0 %v8312_v14 }
0x2a53   : > { %v8315_v11 = vsel %vm594_vm3, %v8299_v28, 0.0 }
0x2a54   : > { %8316 = vadd.xlane.f32.xlu1 %v8315_v11 }
0x2a56   : > { %v8260_v13 = vpop.xlane.xlu0 %8259 }
0x2a57   : > { %v8280_v2 = vmul.f32 0.03125, %v8260_v13 }
0x2a58   : > { %v8263_v7 = vpop.xlane.xlu1 %8262 }
0x2a59   : > { %v14706_v15 = vsub.f32 %v8236_v46, %v8280_v2  ;;  %v8281_v16 = vmul.f32 0.03125, %v8263_v7 }
0x2a5b   : > { %v14708_v22 = vsub.f32 %v8237_v0, %v8281_v16  ;;  %v8300_v58 = vmul.f32 %v14706_v15, %v14706_v15 }
0x2a5d   : > { %v8318_v24 = vsel %vm594_vm3, %v8300_v58, 0.0  ;;  %v8301_v62 = vmul.f32 %v14708_v22, %v14708_v22 }
0x2a5e   : > { %v8266_v8 = vpop.xlane.xlu0 %8265  ;;  %8319 = vadd.xlane.f32.xlu0 %v8318_v24 }
0x2a5f   : > { %v8282_v27 = vmul.f32 0.03125, %v8266_v8  ;;  %v8321_v54 = vsel %vm594_vm3, %v8301_v62, 0.0 }
0x2a60   : > { %v8269_v37 = vpop.xlane.xlu1 %8268  ;;  %8322 = vadd.xlane.f32.xlu1 %v8321_v54 }
0x2a61   : > { %v14716_v52 = vsub.f32 %v8238_v17, %v8282_v27  ;;  %v8283_v39 = vmul.f32 0.03125, %v8269_v37 }
0x2a63   : > { %v14718_v5 = vsub.f32 %v8239_v57, %v8283_v39  ;;  %v8302_v47 = vmul.f32 %v14716_v52, %v14716_v52 }
0x2a65   : > { %v8324_v49 = vsel %vm594_vm3, %v8302_v47, 0.0  ;;  %v8303_v46 = vmul.f32 %v14718_v5, %v14718_v5 }
0x2a66   : > { %8325 = vadd.xlane.f32.xlu0 %v8324_v49  ;;  %v8272_v21 = vpop.xlane.xlu0 %8271 }
0x2a67   : > { %v8284_v33 = vmul.f32 0.03125, %v8272_v21  ;;  %v8327_v0 = vsel %vm594_vm3, %v8303_v46, 0.0 }
0x2a68   : > { %8328 = vadd.xlane.f32.xlu1 %v8327_v0  ;;  %v8275_v18 = vpop.xlane.xlu1 %8274 }
0x2a69   : > { %v14726_v10 = vsub.f32 %v8240_v12, %v8284_v33  ;;  %v8285_v59 = vmul.f32 0.03125, %v8275_v18 }
0x2a6b   : > { %v14728_v31 = vsub.f32 %v8241_v26, %v8285_v59  ;;  %v8304_v20 = vmul.f32 %v14726_v10, %v14726_v10 }
0x2a6d   : > { %v8330_v19 = vsel %vm594_vm3, %v8304_v20, 0.0  ;;  %v8305_v17 = vmul.f32 %v14728_v31, %v14728_v31 }
0x2a6e   : > { %8331 = vadd.xlane.f32.xlu0 %v8330_v19 }
0x2a6f   : > { %v8333_v3 = vsel %vm594_vm3, %v8305_v17, 0.0 }
0x2a70   : > { %8334 = vadd.xlane.f32.xlu1 %v8333_v3 }
0x2ad7   : > { %v8308_v60 = vpop.xlane.xlu0 %8307 }
0x2ad8   : > { %v8336_v57 = vmul.f32 0.03125, %v8308_v60 }
0x2ad9   : > { %v8311_v29 = vpop.xlane.xlu1 %8310 }
0x2ada   : > { %v8346_v6 = vadd.f32 1e-05, %v8336_v57  ;;  %v8337_v50 = vmul.f32 0.03125, %v8311_v29 }
0x2adc   : > { %11387 = vrsqrt.f32 %v8346_v6  ;;  %v8347_v43 = vadd.f32 1e-05, %v8337_v50 }
0x2ade   : > { %11389 = vrsqrt.f32 %v8347_v43 }
0x2adf   : > { %v8314_v45 = vpop.xlane.xlu0 %8313 }
0x2ae0   : > { %v8338_v53 = vmul.f32 0.03125, %v8314_v45 }
0x2ae1   : > { %v8317_v12 = vpop.xlane.xlu1 %8316 }
0x2ae2   : > { %v8348_v40 = vadd.f32 1e-05, %v8338_v53  ;;  %v8339_v35 = vmul.f32 0.03125, %v8317_v12 }
0x2ae4   : > { %11391 = vrsqrt.f32 %v8348_v40  ;;  %v8349_v26 = vadd.f32 1e-05, %v8339_v35 }
0x2ae6   : > { %v11388_v63 = vpop.eup %11387  ;;  %11393 = vrsqrt.f32 %v8349_v26 }
0x2ae7   : > { %v8366_v30 = vmul.f32 %v11388_v63, %v14686_v34 }
0x2ae8   : > { %v11390_v61 = vpop.eup %11389 }
0x2ae9   : > { %v8382_v38 = vmul.f32 %v14739_v1, %v8366_v30  ;;  %v8367_v9 = vmul.f32 %v11390_v61, %v14688_v32 }
0x2aeb   : > { %v8398_v51 = vadd.f32 %v14745_v23, %v8382_v38  ;;  %v8383_v34 = vmul.f32 %v14739_v1, %v8367_v9  ;;  %v8320_v25 = vpop.xlane.xlu0 %8319 }
0x2aec   : > { %v8340_v55 = vmul.f32 0.03125, %v8320_v25 }
0x2aed   : > { %8408 = vst.msk [vmem:[%s14753_s23] sm:$0xff] %vm594_vm3, %v8398_v51  ;;  %v8399_v36 = vadd.f32 %v14745_v23, %v8383_v34  ;;  %v8323_v42 = vpop.xlane.xlu1 %8322 }
0x2aee   : > { %v11392_v32 = vpop.eup %11391  ;;  %v8350_v41 = vadd.f32 1e-05, %v8340_v55  ;;  %v8341_v48 = vmul.f32 0.03125, %v8323_v42 }
0x2aef   : > { %8409 = vst.msk [vmem:[%s14753_s23 + $0x8] sm:$0xff] %vm594_vm3, %v8399_v36  ;;  %v8368_v56 = vmul.f32 %v11392_v32, %v14696_v4 }
0x2af0   : > { %v11394_v14 = vpop.eup %11393  ;;  %11395 = vrsqrt.f32 %v8350_v41  ;;  %v8351_v28 = vadd.f32 1e-05, %v8341_v48 }
0x2af1   : > { %v8384_v11 = vmul.f32 %v14739_v1, %v8368_v56  ;;  %v8369_v13 = vmul.f32 %v11394_v14, %v14698_v44 }
0x2af2   : > { %11397 = vrsqrt.f32 %v8351_v28 }
0x2af3   : > { %v8400_v2 = vadd.f32 %v14745_v23, %v8384_v11  ;;  %v8385_v7 = vmul.f32 %v14739_v1, %v8369_v13  ;;  %v8326_v16 = vpop.xlane.xlu0 %8325 }
0x2af4   : > { %v8342_v58 = vmul.f32 0.03125, %v8326_v16 }
0x2af5   : > { %8410 = vst.msk [vmem:[%s14753_s23 + $0x10] sm:$0xff] %vm594_vm3, %v8400_v2  ;;  %v8401_v24 = vadd.f32 %v14745_v23, %v8385_v7  ;;  %v8329_v4 = vpop.xlane.xlu1 %8328 }
0x2af6   : > { %v8352_v62 = vadd.f32 1e-05, %v8342_v58  ;;  %v8343_v8 = vmul.f32 0.03125, %v8329_v4 }
0x2af7   : > { %8411 = vst.msk [vmem:[%s14753_s23 + $0x18] sm:$0xff] %vm594_vm3, %v8401_v24 }
0x2af8   : > { %11399 = vrsqrt.f32 %v8352_v62  ;;  %v8353_v27 = vadd.f32 1e-05, %v8343_v8 }
0x2afa   : > { %v11396_v44 = vpop.eup %11395  ;;  %11401 = vrsqrt.f32 %v8353_v27 }
0x2afb   : > { %v8370_v54 = vmul.f32 %v11396_v44, %v14706_v15  ;;  %v8332_v37 = vpop.xlane.xlu0 %8331 }
0x2afc   : > { %v11398_v39 = vpop.eup %11397  ;;  %v8344_v47 = vmul.f32 0.03125, %v8332_v37 }
0x2afd   : > { %v8386_v49 = vmul.f32 %v14739_v1, %v8370_v54  ;;  %v8371_v46 = vmul.f32 %v11398_v39, %v14708_v22  ;;  %v8335_v21 = vpop.xlane.xlu1 %8334 }
0x2afe   : > { %v8354_v33 = vadd.f32 1e-05, %v8344_v47  ;;  %v8345_v0 = vmul.f32 0.03125, %v8335_v21 }
0x2aff   : > { %v8402_v18 = vadd.f32 %v14745_v23, %v8386_v49  ;;  %v8387_v59 = vmul.f32 %v14739_v1, %v8371_v46 }
0x2b00   : > { %11403 = vrsqrt.f32 %v8354_v33  ;;  %v8355_v20 = vadd.f32 1e-05, %v8345_v0 }
0x2b01   : > { %8412 = vst.msk [vmem:[%s14753_s23 + $0x20] sm:$0xff] %vm594_vm3, %v8402_v18  ;;  %v8403_v15 = vadd.f32 %v14745_v23, %v8387_v59 }
0x2b02   : > { %v11400_v19 = vpop.eup %11399  ;;  %11405 = vrsqrt.f32 %v8355_v20 }
0x2b03   : > { %8413 = vst.msk [vmem:[%s14753_s23 + $0x28] sm:$0xff] %vm594_vm3, %v8403_v15  ;;  %v8372_v22 = vmul.f32 %v11400_v19, %v14716_v52 }
0x2b04   : > { %v11402_v17 = vpop.eup %11401 }
0x2b05   : > { %v8388_v3 = vmul.f32 %v14739_v1, %v8372_v22  ;;  %v8373_v60 = vmul.f32 %v11402_v17, %v14718_v5 }
0x2b07   : > { %v8404_v57 = vadd.f32 %v14745_v23, %v8388_v3  ;;  %v8389_v29 = vmul.f32 %v14739_v1, %v8373_v60 }
0x2b09   : > { %8414 = vst.msk [vmem:[%s14753_s23 + $0x30] sm:$0xff] %vm594_vm3, %v8404_v57  ;;  %v8405_v6 = vadd.f32 %v14745_v23, %v8389_v29 }
0x2b0a   : > { %v11404_v50 = vpop.eup %11403 }
0x2b0b   : > { %8415 = vst.msk [vmem:[%s14753_s23 + $0x38] sm:$0xff] %vm594_vm3, %v8405_v6  ;;  %v8374_v52 = vmul.f32 %v11404_v50, %v14726_v10 }
0x2b0c   : > { %v11406_v43 = vpop.eup %11405 }
0x2b0d   : > { %v8390_v45 = vmul.f32 %v14739_v1, %v8374_v52  ;;  %v8375_v53 = vmul.f32 %v11406_v43, %v14728_v31 }
0x2b0f   : > { %v8406_v5 = vadd.f32 %v14745_v23, %v8390_v45  ;;  %v8391_v12 = vmul.f32 %v14739_v1, %v8375_v53 }
0x2b11   : > { %8416 = vst.msk [vmem:[%s14753_s23 + $0x40] sm:$0xff] %vm594_vm3, %v8406_v5  ;;  %v8407_v40 = vadd.f32 %v14745_v23, %v8391_v12 }
0x2b13   : > { %8417 = vst.msk [vmem:[%s14753_s23 + $0x48] sm:$0xff] %vm594_vm3, %v8407_v40 }
0x2b14 PF: > { %s20_s13 = sadd.s32 1, %s11413_s13  }
0x2b15   : > { %p17_p4 = scmp.ge.s32.totalorder %s20_s13, 4  }
0x2b17   :  { %19 = sbr.rel (!%p17_p4) target bundleno = 1 (0x1), region = 160 }

</bundles_post_ra>
